<compile_context>
chip_gen: v7x
topology: tpu7x:2x2x1
jax: 0.10.0
libtpu: 0.0.40
codegen_flags: <defaults>
</compile_context>

<pallas_src>
import functools

import jax
import jax.numpy as jnp
from jax.experimental import pallas as pl
from jax.experimental.pallas import tpu as pltpu

NUM_CLASSES = 14
IN_DIM = 768
HIDDEN_DIM = 64
SUB_DIM = 64
CH = NUM_CLASSES * HIDDEN_DIM      # 896 = fc0 output width
CS = NUM_CLASSES * SUB_DIM         # 896 = flattened sub_rep width
NCP = 128                          # num_classes padded to one 128-lane tile
LEAKY_SLOPE = 0.01                 # nn.LeakyReLU() default
NORM_EPS = 1e-12                   # F.normalize default eps

DEFAULT_TILE_B = 512               # v7x: 256-512; v5e/v6e: sweep up to 1024+


def _autoencoder_kernel(x_ref, w0_ref, b0_ref, w1b_ref, b1_ref,
                        mr_ref, mb_ref, w2_ref, b2_ref, sub_ref, recon_ref):
    cd = w0_ref.dtype                                   # MXU compute dtype (bf16 / f32)

    # fc0 + LeakyReLU (f32 accumulate, f32 elementwise).
    y = jnp.dot(x_ref[...], w0_ref[...],
                preferred_element_type=jnp.float32) + b0_ref[...]     # (tb, 896)
    y = jnp.where(y > 0, y, LEAKY_SLOPE * y)

    # fc1 applied per class via a block-diagonal (896, 896) weight:
    # stays lane-dense, no (tb,896) -> (tb*14,64) relayout.
    s = jnp.dot(y.astype(cd), w1b_ref[...],
                preferred_element_type=jnp.float32) + b1_ref[...]     # (tb, 896)

    # Per-class L2 normalize (F.normalize(dim=-1)) without reshape:
    # thin reduce matmul (896 -> NCP) then thin broadcast matmul (NCP -> 896).
    sumsq = jnp.dot((s * s).astype(cd), mr_ref[...],
                    preferred_element_type=jnp.float32)               # (tb, NCP)
    inv_small = jax.lax.rsqrt(jnp.maximum(sumsq, NORM_EPS * NORM_EPS))
    inv = jnp.dot(inv_small.astype(cd), mb_ref[...],
                  preferred_element_type=jnp.float32)                 # (tb, 896)
    s_n = s * inv                                        # == s / max(||s||, eps)
    sub_ref[...] = s_n                                   # lane-dense (tb, 896) store

    # fc2 on the flattened sub_rep.
    recon_ref[...] = jnp.dot(s_n.astype(cd), w2_ref[...],
                             preferred_element_type=jnp.float32) + b2_ref[...]


def prepare_kernel_params(params, compute_dtype=jnp.bfloat16):
    """One-time (per model) weight prep: block-diag fc1, tiled fc1 bias,
    reduce/broadcast class masks, and compute-dtype casts. Hoisted out of the
    per-call jitted forward so it is not re-executed on every inference call."""
    cd = jnp.dtype(compute_dtype)
    eye_c = jnp.eye(NUM_CLASSES, dtype=jnp.float32)
    w1_blk = jnp.kron(eye_c, params["w1"]).astype(cd)                # (896, 896)
    b1_tiled = jnp.tile(params["b1"], (1, NUM_CLASSES)).astype(jnp.float32)

    class_of_lane = jnp.arange(CS) // SUB_DIM                         # 0..13 per lane
    mask_reduce = (class_of_lane[:, None]
                   == jnp.arange(NCP)[None, :]).astype(jnp.float32)   # (896, 128)
    mask_bcast = mask_reduce.T                                        # (128, 896)

    return {
        "w0": params["w0"].astype(cd),
        "b0": params["b0"].astype(jnp.float32),
        "w1_blk": w1_blk,
        "b1": b1_tiled,
        "mr": mask_reduce.astype(cd),
        "mb": mask_bcast.astype(cd),
        "w2": params["w2"].astype(cd),
        "b2": params["b2"].astype(jnp.float32),
    }


def _pick_tile_b(B, tile_b):
    """Batch tile: multiple of 8 (or == B for tiny B), capped at ceil(B/2)
    rounded up to 8 so the 1-D grid has >= 2 steps whenever possible and
    dimension_semantics=("parallel",) shards across v7x's two TensorCores."""
    if B <= 8:
        return B
    half_up = ((-(-B // 2)) + 7) // 8 * 8
    return max(8, min(tile_b, half_up))


@functools.partial(jax.jit, static_argnames=("tile_b",))
def auto_encoder_forward(x, kparams, tile_b=DEFAULT_TILE_B):
    """Returns (sub_rep [B, num_classes, sub_dim], recon [B, in_dim])."""
    B = x.shape[0]
    cd = kparams["w0"].dtype
    tb = _pick_tile_b(B, tile_b)
    grid = (pl.cdiv(B, tb),)

    x_c = x.astype(cd)
    cd_bytes = jnp.dtype(cd).itemsize

    def resident(shape):   # weight stays in VMEM across all grid steps
        return pl.BlockSpec(shape, lambda i: (0, 0))

    flops = 2 * B * (IN_DIM * CH + CH * CS + CS * NCP + NCP * CS + CS * IN_DIM)
    weight_elems = IN_DIM * CH + CH * CS + CS * NCP + NCP * CS + CS * IN_DIM
    bytes_acc = (B * IN_DIM * cd_bytes                  # x
                 + B * (CS + IN_DIM) * 4                # outputs (f32)
                 + weight_elems * cd_bytes)             # resident weights

    sub_flat, recon = pl.pallas_call(
        _autoencoder_kernel,
        out_shape=(
            jax.ShapeDtypeStruct((B, CS), jnp.float32),
            jax.ShapeDtypeStruct((B, IN_DIM), jnp.float32),
        ),
        grid=grid,
        in_specs=[
            pl.BlockSpec((tb, IN_DIM), lambda i: (i, 0)),   # x (batch-tiled)
            resident((IN_DIM, CH)),                          # w0
            resident((1, CH)),                               # b0
            resident((CH, CS)),                              # w1 block-diagonal
            resident((1, CS)),                               # b1 tiled
            resident((CS, NCP)),                             # class reduce mask
            resident((NCP, CS)),                             # class broadcast mask
            resident((CS, IN_DIM)),                          # w2
            resident((1, IN_DIM)),                           # b2
        ],
        out_specs=(
            pl.BlockSpec((tb, CS), lambda i: (i, 0)),        # sub_rep (lane-dense)
            pl.BlockSpec((tb, IN_DIM), lambda i: (i, 0)),    # recon
        ),
        compiler_params=pltpu.CompilerParams(
            dimension_semantics=("parallel",),               # megacore split on v7x
            vmem_limit_bytes=48 << 20,                       # headroom on v7x 64MiB VMEM
        ),
        cost_estimate=pl.CostEstimate(
            flops=flops, transcendentals=B * NCP, bytes_accessed=bytes_acc),
    )(x_c, kparams["w0"], kparams["b0"], kparams["w1_blk"], kparams["b1"],
      kparams["mr"], kparams["mb"], kparams["w2"], kparams["b2"])

    return sub_flat.reshape(B, NUM_CLASSES, SUB_DIM), recon


def init_params(key):
    """Deterministic init matching PyTorch Linear shapes (stored as (in, out))."""
    k0, k1, k2, k3, k4, k5 = jax.random.split(key, 6)

    def uniform(k, shape, fan_in):
        bound = 1.0 / jnp.sqrt(float(fan_in))
        return jax.random.uniform(k, shape, jnp.float32, -bound, bound)

    return {
        "w0": uniform(k0, (IN_DIM, CH), IN_DIM),
        "b0": uniform(k1, (1, CH), IN_DIM),
        "w1": uniform(k2, (HIDDEN_DIM, SUB_DIM), HIDDEN_DIM),
        "b1": uniform(k3, (1, SUB_DIM), HIDDEN_DIM),
        "w2": uniform(k4, (CS, IN_DIM), CS),
        "b2": uniform(k5, (1, IN_DIM), CS),
    }


def _reference_forward(x, p):
    y = x @ p["w0"] + p["b0"]
    y = jnp.where(y > 0, y, LEAKY_SLOPE * y)
    y = y.reshape(x.shape[0], NUM_CLASSES, HIDDEN_DIM)
    s = y @ p["w1"] + p["b1"][0]
    s = s / jnp.maximum(jnp.linalg.norm(s, axis=-1, keepdims=True), NORM_EPS)
    recon = s.reshape(x.shape[0], -1) @ p["w2"] + p["b2"]
    return s, recon


# TODO(synk): train_forward's running count/mean buffer updates and the
# SupConLoss / MSELoss heads are training-only and not part of forward(); they
# are not implemented in this kernel.

if __name__ == "__main__":
    key = jax.random.PRNGKey(0)
    kx, kp = jax.random.split(key)
    params = init_params(kp)

    # One-time weight prep (hoisted out of the jitted forward).
    kparams_f32 = prepare_kernel_params(params, jnp.float32)    # exact path
    kparams_bf16 = prepare_kernel_params(params, jnp.bfloat16)  # default fast path

    # Case 1: small batch, f32 compute (matches PyTorch numerics), single tile.
    B = 4
    x = jax.random.normal(kx, (B, IN_DIM), jnp.float32)
    sub_ref, recon_ref = _reference_forward(x, params)

    sub_f32, rec_f32 = auto_encoder_forward(x, kparams_f32)
    jax.block_until_ready((sub_f32, rec_f32))
    assert sub_f32.shape == (B, NUM_CLASSES, SUB_DIM)
    assert rec_f32.shape == (B, IN_DIM)
    assert jnp.allclose(sub_f32, sub_ref, atol=1e-5, rtol=1e-5)
    assert jnp.allclose(rec_f32, recon_ref, atol=1e-4, rtol=1e-4)

    # Case 2: default bf16 MXU path (f32 accumulate) — looser tolerance.
    sub_bf, rec_bf = auto_encoder_forward(x, kparams_bf16)
    jax.block_until_ready((sub_bf, rec_bf))
    assert jnp.allclose(sub_bf, sub_ref, atol=2e-2, rtol=2e-2)
    assert jnp.allclose(rec_bf, recon_ref, atol=5e-2, rtol=5e-2)

    # Case 3: exercise the batch grid / pipelining and the >=2-step guarantee
    # (B=32 -> tile_b capped to 16 -> 2 grid steps), f32 for tight check.
    B2 = 32
    x2 = jax.random.normal(jax.random.PRNGKey(1), (B2, IN_DIM), jnp.float32)
    sub2, rec2 = auto_encoder_forward(x2, kparams_f32)
    jax.block_until_ready((sub2, rec2))
    sub2_ref, rec2_ref = _reference_forward(x2, params)
    assert jnp.allclose(sub2, sub2_ref, atol=1e-5, rtol=1e-5)
    assert jnp.allclose(rec2, rec2_ref, atol=1e-4, rtol=1e-4)

    # Case 4: same batch on the bf16 fast path with an explicit small tile.
    sub3, rec3 = auto_encoder_forward(x2, kparams_bf16, tile_b=8)
    jax.block_until_ready((sub3, rec3))
    assert jnp.allclose(sub3, sub2_ref, atol=2e-2, rtol=2e-2)
    assert jnp.allclose(rec3, rec2_ref, atol=5e-2, rtol=5e-2)

    print("KERNEL_OK")
</pallas_src>

<mosaic_0001>
module attributes {stable_mosaic.version = 11 : i64} {
  func.func @_autoencoder_kernel(%arg0: i32, %arg1: memref<4x768xf32, #tpu.memory_space<vmem>>, %arg2: memref<768x896xf32, #tpu.memory_space<vmem>>, %arg3: memref<1x896xf32, #tpu.memory_space<vmem>>, %arg4: memref<896x896xf32, #tpu.memory_space<vmem>>, %arg5: memref<1x896xf32, #tpu.memory_space<vmem>>, %arg6: memref<896x128xf32, #tpu.memory_space<vmem>>, %arg7: memref<128x896xf32, #tpu.memory_space<vmem>>, %arg8: memref<896x768xf32, #tpu.memory_space<vmem>>, %arg9: memref<1x768xf32, #tpu.memory_space<vmem>>, %arg10: memref<4x896xf32, #tpu.memory_space<vmem>>, %arg11: memref<4x768xf32, #tpu.memory_space<vmem>>) attributes {dimension_semantics = [#tpu.dimension_semantics<parallel>], iteration_bounds = array<i64: 1>, scalar_prefetch = 0 : i64, scratch_operands = 0 : i64, tpu.core_type = #tpu.core_type<tc>, window_params = [{transform_indices = @transform_0, window_bounds = array<i64: 4, 768>}, {pipeline_mode = #tpu.pipeline_mode<synchronous>, transform_indices = @transform_1, window_bounds = array<i64: 768, 896>}, {pipeline_mode = #tpu.pipeline_mode<synchronous>, transform_indices = @transform_2, window_bounds = array<i64: 1, 896>}, {pipeline_mode = #tpu.pipeline_mode<synchronous>, transform_indices = @transform_3, window_bounds = array<i64: 896, 896>}, {pipeline_mode = #tpu.pipeline_mode<synchronous>, transform_indices = @transform_4, window_bounds = array<i64: 1, 896>}, {pipeline_mode = #tpu.pipeline_mode<synchronous>, transform_indices = @transform_5, window_bounds = array<i64: 896, 128>}, {pipeline_mode = #tpu.pipeline_mode<synchronous>, transform_indices = @transform_6, window_bounds = array<i64: 128, 896>}, {pipeline_mode = #tpu.pipeline_mode<synchronous>, transform_indices = @transform_7, window_bounds = array<i64: 896, 768>}, {pipeline_mode = #tpu.pipeline_mode<synchronous>, transform_indices = @transform_8, window_bounds = array<i64: 1, 768>}, {transform_indices = @transform_9, window_bounds = array<i64: 4, 896>}, {transform_indices = @transform_10, window_bounds = array<i64: 4, 768>}]} {
    %c0 = arith.constant 0 : index
    %c0_0 = arith.constant 0 : index
    %0 = vector.load %arg1[%c0, %c0_0] : memref<4x768xf32, #tpu.memory_space<vmem>>, vector<4x768xf32>
    %c0_1 = arith.constant 0 : index
    %c0_2 = arith.constant 0 : index
    %1 = vector.load %arg2[%c0_1, %c0_2] : memref<768x896xf32, #tpu.memory_space<vmem>>, vector<768x896xf32>
    %cst = arith.constant dense<0.000000e+00> : vector<4x896xf32>
    %2 = tpu.matmul %0, %1, %cst {dimension_numbers = #tpu.dot_dimension_numbers<[1], [0], [0], [1], [0, 0, 1, 1], [], []>} : vector<4x768xf32>, vector<768x896xf32>, vector<4x896xf32> -> vector<4x896xf32>
    %c0_3 = arith.constant 0 : index
    %c0_4 = arith.constant 0 : index
    %3 = vector.load %arg3[%c0_3, %c0_4] : memref<1x896xf32, #tpu.memory_space<vmem>>, vector<1x896xf32>
    %4 = vector.broadcast %3 : vector<1x896xf32> to vector<4x896xf32>
    %5 = arith.addf %2, %4 : vector<4x896xf32>
    %cst_5 = arith.constant 0.000000e+00 : f32
    %6 = vector.broadcast %cst_5 : f32 to vector<4x896xf32>
    %7 = arith.cmpf ogt, %5, %6 : vector<4x896xf32>
    %cst_6 = arith.constant 0.00999999977 : f32
    %8 = vector.broadcast %cst_6 : f32 to vector<4x896xf32>
    %9 = arith.mulf %8, %5 : vector<4x896xf32>
    %10 = arith.select %7, %5, %9 : vector<4x896xi1>, vector<4x896xf32>
    %c0_7 = arith.constant 0 : index
    %c0_8 = arith.constant 0 : index
    %11 = vector.load %arg4[%c0_7, %c0_8] : memref<896x896xf32, #tpu.memory_space<vmem>>, vector<896x896xf32>
    %cst_9 = arith.constant dense<0.000000e+00> : vector<4x896xf32>
    %12 = tpu.matmul %10, %11, %cst_9 {dimension_numbers = #tpu.dot_dimension_numbers<[1], [0], [0], [1], [0, 0, 1, 1], [], []>} : vector<4x896xf32>, vector<896x896xf32>, vector<4x896xf32> -> vector<4x896xf32>
    %c0_10 = arith.constant 0 : index
    %c0_11 = arith.constant 0 : index
    %13 = vector.load %arg5[%c0_10, %c0_11] : memref<1x896xf32, #tpu.memory_space<vmem>>, vector<1x896xf32>
    %14 = vector.broadcast %13 : vector<1x896xf32> to vector<4x896xf32>
    %15 = arith.addf %12, %14 : vector<4x896xf32>
    %16 = arith.mulf %15, %15 : vector<4x896xf32>
    %c0_12 = arith.constant 0 : index
    %c0_13 = arith.constant 0 : index
    %17 = vector.load %arg6[%c0_12, %c0_13] : memref<896x128xf32, #tpu.memory_space<vmem>>, vector<896x128xf32>
    %cst_14 = arith.constant dense<0.000000e+00> : vector<4x128xf32>
    %18 = tpu.matmul %16, %17, %cst_14 {dimension_numbers = #tpu.dot_dimension_numbers<[1], [0], [0], [1], [0, 0, 1, 1], [], []>} : vector<4x896xf32>, vector<896x128xf32>, vector<4x128xf32> -> vector<4x128xf32>
    %cst_15 = arith.constant 1.000000e-24 : f32
    %19 = vector.broadcast %cst_15 : f32 to vector<4x128xf32>
    %20 = arith.maximumf %18, %19 : vector<4x128xf32>
    %21 = math.rsqrt %20 : vector<4x128xf32>
    %c0_16 = arith.constant 0 : index
    %c0_17 = arith.constant 0 : index
    %22 = vector.load %arg7[%c0_16, %c0_17] : memref<128x896xf32, #tpu.memory_space<vmem>>, vector<128x896xf32>
    %cst_18 = arith.constant dense<0.000000e+00> : vector<4x896xf32>
    %23 = tpu.matmul %21, %22, %cst_18 {dimension_numbers = #tpu.dot_dimension_numbers<[1], [0], [0], [1], [0, 0, 1, 1], [], []>} : vector<4x128xf32>, vector<128x896xf32>, vector<4x896xf32> -> vector<4x896xf32>
    %24 = arith.mulf %15, %23 : vector<4x896xf32>
    %c0_19 = arith.constant 0 : index
    %c0_20 = arith.constant 0 : index
    %25 = vector.load %arg10[%c0_19, %c0_20] : memref<4x896xf32, #tpu.memory_space<vmem>>, vector<4x896xf32>
    tpu.vector_store %arg10[%c0_19, %c0_20], %24 {strides = array<i32>} : memref<4x896xf32, #tpu.memory_space<vmem>>, vector<4x896xf32>,
    %c0_21 = arith.constant 0 : index
    %c0_22 = arith.constant 0 : index
    %26 = vector.load %arg8[%c0_21, %c0_22] : memref<896x768xf32, #tpu.memory_space<vmem>>, vector<896x768xf32>
    %cst_23 = arith.constant dense<0.000000e+00> : vector<4x768xf32>
    %27 = tpu.matmul %24, %26, %cst_23 {dimension_numbers = #tpu.dot_dimension_numbers<[1], [0], [0], [1], [0, 0, 1, 1], [], []>} : vector<4x896xf32>, vector<896x768xf32>, vector<4x768xf32> -> vector<4x768xf32>
    %c0_24 = arith.constant 0 : index
    %c0_25 = arith.constant 0 : index
    %28 = vector.load %arg9[%c0_24, %c0_25] : memref<1x768xf32, #tpu.memory_space<vmem>>, vector<1x768xf32>
    %29 = vector.broadcast %28 : vector<1x768xf32> to vector<4x768xf32>
    %30 = arith.addf %27, %29 : vector<4x768xf32>
    %c0_26 = arith.constant 0 : index
    %c0_27 = arith.constant 0 : index
    %31 = vector.load %arg11[%c0_26, %c0_27] : memref<4x768xf32, #tpu.memory_space<vmem>>, vector<4x768xf32>
    tpu.vector_store %arg11[%c0_26, %c0_27], %30 {strides = array<i32>} : memref<4x768xf32, #tpu.memory_space<vmem>>, vector<4x768xf32>,
    return
  }
  func.func @transform_0(%arg0: i32) -> (i32, i32) {
    %c0_i32 = arith.constant 0 : i32
    %c0_i32_0 = arith.constant 0 : i32
    return %arg0, %c0_i32 : i32, i32
  }
  func.func @transform_1(%arg0: i32) -> (i32, i32) {
    %c0_i32 = arith.constant 0 : i32
    %c0_i32_0 = arith.constant 0 : i32
    %c0_i32_1 = arith.constant 0 : i32
    return %c0_i32, %c0_i32_0 : i32, i32
  }
  func.func @transform_2(%arg0: i32) -> (i32, i32) {
    %c0_i32 = arith.constant 0 : i32
    %c0_i32_0 = arith.constant 0 : i32
    %c0_i32_1 = arith.constant 0 : i32
    return %c0_i32, %c0_i32_0 : i32, i32
  }
  func.func @transform_3(%arg0: i32) -> (i32, i32) {
    %c0_i32 = arith.constant 0 : i32
    %c0_i32_0 = arith.constant 0 : i32
    %c0_i32_1 = arith.constant 0 : i32
    return %c0_i32, %c0_i32_0 : i32, i32
  }
  func.func @transform_4(%arg0: i32) -> (i32, i32) {
    %c0_i32 = arith.constant 0 : i32
    %c0_i32_0 = arith.constant 0 : i32
    %c0_i32_1 = arith.constant 0 : i32
    return %c0_i32, %c0_i32_0 : i32, i32
  }
  func.func @transform_5(%arg0: i32) -> (i32, i32) {
    %c0_i32 = arith.constant 0 : i32
    %c0_i32_0 = arith.constant 0 : i32
    %c0_i32_1 = arith.constant 0 : i32
    return %c0_i32, %c0_i32_0 : i32, i32
  }
  func.func @transform_6(%arg0: i32) -> (i32, i32) {
    %c0_i32 = arith.constant 0 : i32
    %c0_i32_0 = arith.constant 0 : i32
    %c0_i32_1 = arith.constant 0 : i32
    return %c0_i32, %c0_i32_0 : i32, i32
  }
  func.func @transform_7(%arg0: i32) -> (i32, i32) {
    %c0_i32 = arith.constant 0 : i32
    %c0_i32_0 = arith.constant 0 : i32
    %c0_i32_1 = arith.constant 0 : i32
    return %c0_i32, %c0_i32_0 : i32, i32
  }
  func.func @transform_8(%arg0: i32) -> (i32, i32) {
    %c0_i32 = arith.constant 0 : i32
    %c0_i32_0 = arith.constant 0 : i32
    %c0_i32_1 = arith.constant 0 : i32
    return %c0_i32, %c0_i32_0 : i32, i32
  }
  func.func @transform_9(%arg0: i32) -> (i32, i32) {
    %c0_i32 = arith.constant 0 : i32
    %c0_i32_0 = arith.constant 0 : i32
    return %arg0, %c0_i32 : i32, i32
  }
  func.func @transform_10(%arg0: i32) -> (i32, i32) {
    %c0_i32 = arith.constant 0 : i32
    %c0_i32_0 = arith.constant 0 : i32
    return %arg0, %c0_i32 : i32, i32
  }
}

</mosaic_0001>

<bundles_post_ra>
// kernel: auto_encoder_forward.1
= control target key start
LH: loop header
LB: loop body
LE: loop exit
PB: predicated region body
PF: predicated region fallthrough
CT: control target
= control target key end

     0   :  { %16 = vsyncpa [#allocation3], 0  ;;  %s9795_s0 = inlined_call_operand.hbm [shape: f32[4,768], index: 0, kind: input, shape index: {}]   ;;  %s9796_s1 = inlined_call_operand.hbm [shape: f32[768,896], index: 1, kind: input, shape index: {}]   ;;  %s9797_s2 = inlined_call_operand.hbm [shape: f32[1,896], index: 2, kind: input, shape index: {}]   ;;  %s9798_s3 = inlined_call_operand.hbm [shape: f32[896,896], index: 3, kind: input, shape index: {}]   ;;  %s9799_s4 = inlined_call_operand.hbm [shape: f32[1,896], index: 4, kind: input, shape index: {}]   ;;  %s9800_s5 = inlined_call_operand.hbm [shape: f32[896,128], index: 5, kind: input, shape index: {}]   ;;  %s9801_s6 = inlined_call_operand.hbm [shape: f32[128,896], index: 6, kind: input, shape index: {}]   ;;  %s9802_s7 = inlined_call_operand.hbm [shape: f32[896,768], index: 7, kind: input, shape index: {}]   ;;  %s9803_s8 = inlined_call_operand.hbm [shape: f32[1,768], index: 8, kind: input, shape index: {}]   ;;  %s9804_s9 = inlined_call_operand.vmem [shape: f32[4,896], index: 9, kind: output, shape index: {0}]   ;;  %s9805_s10 = inlined_call_operand.hbm [shape: f32[4,768], index: 10, kind: output, shape index: {1}]  }
   0x1   :  { %17 = vsyncpa [#allocation6], 0 }
   0x2   :  { %18 = vsyncpa [#allocation9], 0 }
   0x3   :  { %19 = vsyncpa [#allocation12], 0 }
   0x4   :  { %20 = vsyncpa [#allocation15], 0 }
   0x5   :  { %21 = vsyncpa [#allocation4], 0  ;;  %s9281_s13 = smov [#allocation5]   ;;  %s9049_s17 = scalar_lea.hbm %s9796_s1, 86016 }
   0x6   :  { %s37_s14 = sshll.u32 %s9281_s13, 4  ;;  %p9050_p0 = scmp.ne.s32.totalorder %s9796_s1, %s9049_s17  ;;  %s38_s14 = int_to_ptr.vmem [resolvable:$true] %s37_s14 }
   0x7   :  { %p9053_p1 = scmp.lt.u32.totalorder %s9049_s17, %s9796_s1 }
   0x9   :  { %p9055_p2 = pnand %p9053_p1, %p9050_p0 }
   0xb   :  { %9058 = shalt.err (!%p9055_p2)
}
   0xc   :  { %s9059_s22 = scalar_lea.vmem %s38_s14, 86016  ;;  %p9064_p4 = scmp.lt.s32.totalorder %s38_s14, %s38_s14 }
   0xd   :  { %p9060_p3 = scmp.ne.s32.totalorder %s38_s14, %s9059_s22  ;;  %p9065_p5 = scmp.lt.s32.totalorder %s9059_s22, %s9059_s22 }
   0xf   :  { %p9066_p6 = por %p9065_p5, %p9064_p4 }
  0x11   :  { %p9067_p7 = pnand %p9066_p6, %p9060_p3 }
  0x13   :  { %9070 = shalt.err (!%p9067_p7)
}
  0x14   :  { %s9282_s23 = smov 896   ;;  %s9283_s24 = smov 56  }
  0x15   :  { %43 = dma.hbm_to_vmem [thread:$0]  %s9796_s1, 86016, %s38_s14, [#allocation6], %s9282_s23, %s9282_s23, %s9283_s24  }
  0x16   :  { %s9284_s27 = smov [#allocation8]   ;;  %s9285_s29 = smov [#allocation11]  }
  0x17   :  { %s59_s28 = sshll.u32 %s9284_s27, 4  ;;  %s81_s30 = sshll.u32 %s9285_s29, 4  ;;  %s60_s28 = int_to_ptr.vmem [resolvable:$true] %s59_s28  ;;  %s82_s30 = int_to_ptr.vmem [resolvable:$true] %s81_s30 }
  0x18   :  { %s9071_s13 = scalar_lea.hbm %s9798_s3, 100352 }
  0x19   :  { %p9072_p8 = scmp.ne.s32.totalorder %s9798_s3, %s9071_s13  ;;  %p9075_p9 = scmp.lt.u32.totalorder %s9071_s13, %s9798_s3 }
  0x1b   :  { %p9077_p10 = pnand %p9075_p9, %p9072_p8 }
  0x1d   :  { %9080 = shalt.err (!%p9077_p10)
}
  0x1e   :  { %s9081_s1 = scalar_lea.vmem %s60_s28, 100352  ;;  %p9086_p12 = scmp.lt.s32.totalorder %s60_s28, %s60_s28 }
  0x1f   :  { %p9082_p11 = scmp.ne.s32.totalorder %s60_s28, %s9081_s1  ;;  %p9087_p13 = scmp.lt.s32.totalorder %s9081_s1, %s9081_s1 }
  0x21   :  { %p9088_p0 = por %p9087_p13, %p9086_p12 }
  0x23   :  { %p9089_p1 = pnand %p9088_p0, %p9082_p11 }
  0x25   :  { %9092 = shalt.err (!%p9089_p1)
}
  0x26   :  { %65 = dma.hbm_to_vmem [thread:$0]  %s9798_s3, 100352, %s60_s28, [#allocation9], %s9282_s23, %s9282_s23, %s9283_s24  }
  0x27   :  { %s9093_s22 = scalar_lea.hbm %s9800_s5, 14336 }
  0x28   :  { %p9094_p2 = scmp.ne.s32.totalorder %s9800_s5, %s9093_s22  ;;  %p9097_p3 = scmp.lt.u32.totalorder %s9093_s22, %s9800_s5 }
  0x2a   :  { %p9099_p4 = pnand %p9097_p3, %p9094_p2 }
  0x2c   :  { %9102 = shalt.err (!%p9099_p4)
}
  0x2d   :  { %s9103_s11 = scalar_lea.vmem %s82_s30, 14336  ;;  %p9108_p6 = scmp.lt.s32.totalorder %s82_s30, %s82_s30 }
  0x2e   :  { %p9104_p5 = scmp.ne.s32.totalorder %s82_s30, %s9103_s11  ;;  %p9109_p7 = scmp.lt.s32.totalorder %s9103_s11, %s9103_s11 }
  0x30   :  { %p9110_p8 = por %p9109_p7, %p9108_p6 }
  0x32   :  { %p9111_p9 = pnand %p9110_p8, %p9104_p5 }
  0x34   :  { %9114 = shalt.err (!%p9111_p9)
}
  0x35   :  { %s9286_s3 = smov 128   ;;  %s9287_s28 = smov 8  }
  0x36   :  { %87 = dma.hbm_to_vmem [thread:$0]  %s9800_s5, 14336, %s82_s30, [#allocation12], %s9286_s3, %s9286_s3, %s9287_s28  }
  0x37   :  { %s9288_s15 = smov [#allocation14]   ;;  %s9115_s1 = scalar_lea.hbm %s9802_s7, 86016 }
  0x38   :  { %s105_s16 = sshll.u32 %s9288_s15, 4  ;;  %p9116_p10 = scmp.ne.s32.totalorder %s9802_s7, %s9115_s1  ;;  %s106_s16 = int_to_ptr.vmem [resolvable:$true] %s105_s16 }
  0x39   :  { %p9119_p11 = scmp.lt.u32.totalorder %s9115_s1, %s9802_s7 }
  0x3b   :  { %p9121_p12 = pnand %p9119_p11, %p9116_p10 }
  0x3d   :  { %9124 = shalt.err (!%p9121_p12)
}
  0x3e   :  { %s9125_s22 = scalar_lea.vmem %s106_s16, 86016  ;;  %p9130_p0 = scmp.lt.s32.totalorder %s106_s16, %s106_s16 }
  0x3f   :  { %p9126_p13 = scmp.ne.s32.totalorder %s106_s16, %s9125_s22  ;;  %p9131_p1 = scmp.lt.s32.totalorder %s9125_s22, %s9125_s22 }
  0x41   :  { %p9132_p2 = por %p9131_p1, %p9130_p0 }
  0x43   :  { %p9133_p3 = pnand %p9132_p2, %p9126_p13 }
  0x45   :  { %9136 = shalt.err (!%p9133_p3)
}
  0x46   :  { %s9289_s5 = smov 768   ;;  %s9290_s30 = smov 48  }
  0x47   :  { %111 = dma.hbm_to_vmem [thread:$0]  %s9802_s7, 86016, %s106_s16, [#allocation15], %s9289_s5, %s9289_s5, %s9290_s30  }
  0x48   :  { %s9291_s27 = smov [#allocation2]   ;;  %s9292_s11 = smov [#allocation7]  }
  0x49   :  { %s28_s29 = sshll.u32 %s9291_s27, 4  ;;  %s50_s3 = sshll.u32 %s9292_s11, 4  ;;  %s29_s29 = int_to_ptr.vmem [resolvable:$true] %s28_s29  ;;  %s51_s3 = int_to_ptr.vmem [resolvable:$true] %s50_s3 }
  0x4a   :  { %s9137_s13 = scalar_lea.hbm %s9795_s0, 384 }
  0x4b   :  { %p9138_p4 = scmp.ne.s32.totalorder %s9795_s0, %s9137_s13  ;;  %p9141_p5 = scmp.lt.u32.totalorder %s9137_s13, %s9795_s0 }
  0x4d   :  { %p9143_p6 = pnand %p9141_p5, %p9138_p4 }
  0x4f   :  { %9146 = shalt.err (!%p9143_p6)
}
  0x50   :  { %s9147_s7 = scalar_lea.vmem %s29_s29, 384  ;;  %p9152_p8 = scmp.lt.s32.totalorder %s29_s29, %s29_s29 }
  0x51   :  { %p9148_p7 = scmp.ne.s32.totalorder %s29_s29, %s9147_s7  ;;  %p9153_p9 = scmp.lt.s32.totalorder %s9147_s7, %s9147_s7 }
  0x53   :  { %p9154_p10 = por %p9153_p9, %p9152_p8 }
  0x55   :  { %p9155_p11 = pnand %p9154_p10, %p9148_p7 }
  0x57   :  { %9158 = shalt.err (!%p9155_p11)
}
  0x58   :  { %31 = dma.hbm_to_vmem [thread:$0]  %s9795_s0, 384, %s29_s29, [#allocation3]  }
  0x59   :  { %s9159_s21 = scalar_lea.hbm %s9797_s2, 112 }
  0x5a   :  { %p9160_p12 = scmp.ne.s32.totalorder %s9797_s2, %s9159_s21  ;;  %p9163_p13 = scmp.lt.u32.totalorder %s9159_s21, %s9797_s2 }
  0x5c   :  { %p9165_p0 = pnand %p9163_p13, %p9160_p12 }
  0x5e   :  { %9168 = shalt.err (!%p9165_p0)
}
  0x5f   :  { %s9169_s26 = scalar_lea.vmem %s51_s3, 112  ;;  %s9173_s27 = scalar_lea.vmem %s51_s3, 128 }
  0x60   :  { %p9170_p1 = scmp.ne.s32.totalorder %s51_s3, %s9169_s26  ;;  %p9174_p2 = scmp.lt.s32.totalorder %s51_s3, %s51_s3 }
  0x61   :  { %p9175_p3 = scmp.lt.s32.totalorder %s9173_s27, %s9169_s26 }
  0x63   :  { %p9176_p4 = por %p9175_p3, %p9174_p2 }
  0x65   :  { %p9177_p5 = pnand %p9176_p4, %p9170_p1 }
  0x67   :  { %9180 = shalt.err (!%p9177_p5)
}
  0x68   :  { %53 = dma.hbm_to_vmem [thread:$0]  %s9797_s2, 112, %s51_s3, [#allocation6]  }
  0x69   :  { %s9293_s11 = smov [#allocation10]   ;;  %s9294_s12 = smov [#allocation13]  }
  0x6a   :  { %s72_s28 = sshll.u32 %s9293_s11, 4  ;;  %s93_s13 = sshll.u32 %s9294_s12, 4  ;;  %s73_s28 = int_to_ptr.vmem [resolvable:$true] %s72_s28  ;;  %s9433_s13 = int_to_ptr.vmem [resolvable:$true] %s93_s13 }
  0x6b   :  { %s9181_s18 = scalar_lea.hbm %s9799_s4, 112 }
  0x6c   :  { %p9182_p6 = scmp.ne.s32.totalorder %s9799_s4, %s9181_s18  ;;  %p9185_p7 = scmp.lt.u32.totalorder %s9181_s18, %s9799_s4 }
  0x6e   :  { %p9187_p8 = pnand %p9185_p7, %p9182_p6 }
  0x70   :  { %9190 = shalt.err (!%p9187_p8)
}
  0x71   :  { %s9191_s2 = scalar_lea.vmem %s73_s28, 112  ;;  %s9195_s3 = scalar_lea.vmem %s73_s28, 128 }
  0x72   :  { %p9192_p9 = scmp.ne.s32.totalorder %s73_s28, %s9191_s2  ;;  %p9196_p10 = scmp.lt.s32.totalorder %s73_s28, %s73_s28 }
  0x73   :  { %p9197_p11 = scmp.lt.s32.totalorder %s9195_s3, %s9191_s2 }
  0x75   :  { %p9198_p12 = por %p9197_p11, %p9196_p10 }
  0x77   :  { %p9199_p13 = pnand %p9198_p12, %p9192_p9 }
  0x79   :  { %9202 = shalt.err (!%p9199_p13)
}
  0x7a   :  { %75 = dma.hbm_to_vmem [thread:$0]  %s9799_s4, 112, %s73_s28, [#allocation9]  }
  0x7b   :  { %s9203_s5 = scalar_lea.hbm %s9801_s6, 14336 }
  0x7c   :  { %p9204_p0 = scmp.ne.s32.totalorder %s9801_s6, %s9203_s5  ;;  %p9207_p1 = scmp.lt.u32.totalorder %s9203_s5, %s9801_s6 }
  0x7e   :  { %p9209_p2 = pnand %p9207_p1, %p9204_p0 }
  0x80   :  { %9212 = shalt.err (!%p9209_p2)
}
  0x81   :  { %s9213_s0 = scalar_lea.vmem %s9433_s13, 14336  ;;  %p9218_p4 = scmp.lt.s32.totalorder %s9433_s13, %s9433_s13 }
  0x82   :  { %p9214_p3 = scmp.ne.s32.totalorder %s9433_s13, %s9213_s0  ;;  %p9219_p5 = scmp.lt.s32.totalorder %s9213_s0, %s9213_s0 }
  0x84   :  { %p9220_p6 = por %p9219_p5, %p9218_p4 }
  0x86   :  { %p9221_p7 = pnand %p9220_p6, %p9214_p3 }
  0x88   :  { %9224 = shalt.err (!%p9221_p7)
}
  0x89   :  { %99 = dma.hbm_to_vmem [thread:$0]  %s9801_s6, 14336, %s9433_s13, [#allocation12], %s9282_s23, %s9282_s23, %s9283_s24  }
  0x8a   :  { %s9295_s11 = smov [#allocation16]   ;;  %s9225_s17 = scalar_lea.hbm %s9803_s8, 96 }
  0x8b   :  { %s118_s28 = sshll.u32 %s9295_s11, 4  ;;  %p9226_p8 = scmp.ne.s32.totalorder %s9803_s8, %s9225_s17  ;;  %s119_s28 = int_to_ptr.vmem [resolvable:$true] %s118_s28 }
  0x8c   :  { %p9229_p9 = scmp.lt.u32.totalorder %s9225_s17, %s9803_s8 }
  0x8e   :  { %p9231_p10 = pnand %p9229_p9, %p9226_p8 }
  0x90   :  { %9234 = shalt.err (!%p9231_p10)
}
  0x91   :  { %s9235_s14 = scalar_lea.vmem %s119_s28, 96  ;;  %p9240_p12 = scmp.lt.s32.totalorder %s119_s28, %s119_s28 }
  0x92   :  { %p9236_p11 = scmp.ne.s32.totalorder %s119_s28, %s9235_s14  ;;  %p9241_p13 = scmp.lt.s32.totalorder %s9235_s14, %s9235_s14 }
  0x94   :  { %p9242_p0 = por %p9241_p13, %p9240_p12 }
  0x96   :  { %p9243_p1 = pnand %p9242_p0, %p9236_p11 }
  0x98   :  { %9246 = shalt.err (!%p9243_p1)
}
  0x99   :  { %121 = dma.hbm_to_vmem [thread:$0]  %s9803_s8, 96, %s119_s28, [#allocation15]  }
  0x9a   :  { %9269 = dma.done.wait [#allocation3], 384  }
  0x9b   :  { %9270 = vsyncadd [#allocation3], 4294966912 }
  0x9c   :  { %9271 = dma.done.wait [#allocation6], 86128  }
  0x9d   :  { %9272 = vsyncadd [#allocation6], 4294881168 }
  0x9e   :  { %9273 = dma.done.wait [#allocation9], 100464  }
  0x9f   :  { %9274 = vsyncadd [#allocation9], 4294866832 }
  0xa0   :  { %9275 = dma.done.wait [#allocation12], 28672  }
  0xa1   :  { %9276 = vsyncadd [#allocation12], 4294938624 }
  0xa2   :  { %9277 = dma.done.wait [#allocation15], 86112  }
  0xa3   :  { %9278 = vsyncadd [#allocation15], 4294881184  ;;  %v153_v0 = vld [vmem:[#allocation5 + $0x8] sm:$0xff]  ;;  %v160_v1 = vld [vmem:[#allocation5 + $0x40] sm:$0xff]  ;;  %vm9298_vm7 = vmmov 0  }
  0xa4   :  { %v152_v2 = vld [vmem:[#allocation5] sm:$0xff]  ;;  %v6577_v3 = vpack.c.bf16 %v160_v1, %v153_v0  ;;  %v159_v4 = vld [vmem:[#allocation5 + $0x38] sm:$0xff]  ;;  %v174_v6 = vld [vmem:[#allocation5 + $0xb0] sm:$0xff] }
  0xa5   :  { %v167_v5 = vld [vmem:[#allocation5 + $0x78] sm:$0xff]  ;;  %v6579_v7 = vpack.c.bf16 %v159_v4, %v152_v2  ;;  %v601_v9 = vld [vmem:[#allocation5 + $0xe08] sm:$0xff]  ;;  %v608_v10 = vld [vmem:[#allocation5 + $0xe40] sm:$0xff] }
  0xa6   :  { %v6581_v8 = vpack.c.bf16 %v174_v6, %v167_v5  ;;  %v166_v11 = vld [vmem:[#allocation5 + $0x70] sm:$0xff]  ;;  %6578 = vmatprep.subr.bf16.mxu1 %v6577_v3  ;;  %v6705_v12 = vpack.c.bf16 %v608_v10, %v601_v9  ;;  %v173_v13 = vld [vmem:[#allocation5 + $0xa8] sm:$0xff]  ;;  %v600_v14 = vld [vmem:[#allocation5 + $0xe00] sm:$0xff] }
  0xa7   :  { %v607_v15 = vld [vmem:[#allocation5 + $0xe38] sm:$0xff]  ;;  %6580 = vmatpush1.bf16.msra.mxu1 %v6579_v7  ;;  %v6583_v16 = vpack.c.bf16 %v173_v13, %v166_v11  ;;  %v181_v18 = vld [vmem:[#allocation5 + $0xe8] sm:$0xff]  ;;  %v188_v19 = vld [vmem:[#allocation5 + $0x120] sm:$0xff] }
  0xa8   :  { %v6707_v17 = vpack.c.bf16 %v607_v15, %v600_v14  ;;  %v615_v20 = vld [vmem:[#allocation5 + $0xe78] sm:$0xff]  ;;  %6582 = vmatprep.subr.bf16.mxu1 %v6581_v8  ;;  %6706 = vmatprep.subr.bf16.mxu0 %v6705_v12  ;;  %v6585_v21 = vpack.c.bf16 %v188_v19, %v181_v18  ;;  %v622_v22 = vld [vmem:[#allocation5 + $0xeb0] sm:$0xff]  ;;  %v180_v23 = vld [vmem:[#allocation5 + $0xe0] sm:$0xff] }
  0xa9   :  { %v187_v24 = vld [vmem:[#allocation5 + $0x118] sm:$0xff]  ;;  %v6709_v25 = vpack.c.bf16 %v622_v22, %v615_v20  ;;  %v614_v26 = vld [vmem:[#allocation5 + $0xe70] sm:$0xff]  ;;  %v621_v27 = vld [vmem:[#allocation5 + $0xea8] sm:$0xff] }
  0xaa   :  { %6708 = vmatpush1.bf16.msra.mxu0 %v6707_v17  ;;  %v195_v28 = vld [vmem:[#allocation5 + $0x158] sm:$0xff]  ;;  %v6711_v29 = vpack.c.bf16 %v621_v27, %v614_v26  ;;  %v202_v30 = vld [vmem:[#allocation5 + $0x190] sm:$0xff]  ;;  %v629_v31 = vld [vmem:[#allocation5 + $0xee8] sm:$0xff]  ;;  %v6587_v33 = vpack.c.bf16 %v187_v24, %v180_v23 }
  0xab   :  { %v636_v32 = vld [vmem:[#allocation5 + $0xf20] sm:$0xff]  ;;  %6584 = vmatpush1.bf16.msra.mxu1 %v6583_v16  ;;  %6710 = vmatprep.subr.bf16.mxu0 %v6709_v25  ;;  %v194_v35 = vld [vmem:[#allocation5 + $0x150] sm:$0xff]  ;;  %v6589_v37 = vpack.c.bf16 %v202_v30, %v195_v28  ;;  %v201_v38 = vld [vmem:[#allocation5 + $0x188] sm:$0xff] }
  0xac   :  { %v6713_v34 = vpack.c.bf16 %v636_v32, %v629_v31  ;;  %v628_v36 = vld [vmem:[#allocation5 + $0xee0] sm:$0xff]  ;;  %6586 = vmatprep.subr.bf16.mxu1 %v6585_v21  ;;  %v635_v39 = vld [vmem:[#allocation5 + $0xf18] sm:$0xff]  ;;  %v209_v40 = vld [vmem:[#allocation5 + $0x1c8] sm:$0xff]  ;;  %v6591_v48 = vpack.c.bf16 %v201_v38, %v194_v35 }
  0xad   :  { %v6715_v41 = vpack.c.bf16 %v635_v39, %v628_v36  ;;  %v216_v42 = vld [vmem:[#allocation5 + $0x200] sm:$0xff]  ;;  %v643_v43 = vld [vmem:[#allocation5 + $0xf58] sm:$0xff]  ;;  %v650_v44 = vld [vmem:[#allocation5 + $0xf90] sm:$0xff] }
  0xae   :  { %6712 = vmatpush1.bf16.msra.mxu0 %v6711_v29  ;;  %v6717_v45 = vpack.c.bf16 %v650_v44, %v643_v43  ;;  %v642_v46 = vld [vmem:[#allocation5 + $0xf50] sm:$0xff]  ;;  %v649_v47 = vld [vmem:[#allocation5 + $0xf88] sm:$0xff]  ;;  %v6593_v50 = vpack.c.bf16 %v216_v42, %v209_v40  ;;  %v208_v51 = vld [vmem:[#allocation5 + $0x1c0] sm:$0xff] }
  0xaf   :  { %6714 = vmatprep.subr.bf16.mxu0 %v6713_v34  ;;  %6588 = vmatpush1.bf16.msra.mxu1 %v6587_v33  ;;  %v657_v49 = vld [vmem:[#allocation5 + $0xfc8] sm:$0xff]  ;;  %v215_v52 = vld [vmem:[#allocation5 + $0x1f8] sm:$0xff]  ;;  %v664_v53 = vld [vmem:[#allocation5 + $0x1000] sm:$0xff]  ;;  %v6719_v54 = vpack.c.bf16 %v649_v47, %v642_v46 }
  0xb0   :  { %6590 = vmatprep.subr.bf16.mxu1 %v6589_v37  ;;  %v223_v55 = vld [vmem:[#allocation5 + $0x238] sm:$0xff]  ;;  %v230_v56 = vld [vmem:[#allocation5 + $0x270] sm:$0xff]  ;;  %v6721_v57 = vpack.c.bf16 %v664_v53, %v657_v49  ;;  %v656_v58 = vld [vmem:[#allocation5 + $0xfc0] sm:$0xff]  ;;  %v6595_v60 = vpack.c.bf16 %v215_v52, %v208_v51 }
  0xb1   :  { %v663_v59 = vld [vmem:[#allocation5 + $0xff8] sm:$0xff]  ;;  %v678_v62 = vld [vmem:[#allocation5 + $0x1070] sm:$0xff]  ;;  %v6597_v63 = vpack.c.bf16 %v230_v56, %v223_v55  ;;  %v229_v1 = vld [vmem:[#allocation5 + $0x268] sm:$0xff] }
  0xb2   :  { %6716 = vmatpush1.bf16.msra.mxu0 %v6715_v41  ;;  %v671_v61 = vld [vmem:[#allocation5 + $0x1038] sm:$0xff]  ;;  %v222_v0 = vld [vmem:[#allocation5 + $0x230] sm:$0xff]  ;;  %v6723_v2 = vpack.c.bf16 %v663_v59, %v656_v58  ;;  %v237_v3 = vld [vmem:[#allocation5 + $0x2a8] sm:$0xff] }
  0xb3   :  { %6718 = vmatprep.subr.bf16.mxu0 %v6717_v45  ;;  %6592 = vmatpush1.bf16.msra.mxu1 %v6591_v48  ;;  %v244_v4 = vld [vmem:[#allocation5 + $0x2e0] sm:$0xff]  ;;  %v6725_v5 = vpack.c.bf16 %v678_v62, %v671_v61  ;;  %v670_v6 = vld [vmem:[#allocation5 + $0x1030] sm:$0xff]  ;;  %v677_v7 = vld [vmem:[#allocation5 + $0x1068] sm:$0xff]  ;;  %v6599_v8 = vpack.c.bf16 %v229_v1, %v222_v0 }
  0xb4   :  { %6594 = vmatprep.subr.bf16.mxu1 %v6593_v50  ;;  %v685_v9 = vld [vmem:[#allocation5 + $0x10a8] sm:$0xff]  ;;  %v692_v10 = vld [vmem:[#allocation5 + $0x10e0] sm:$0xff]  ;;  %v6601_v11 = vpack.c.bf16 %v244_v4, %v237_v3  ;;  %v243_v13 = vld [vmem:[#allocation5 + $0x2d8] sm:$0xff]  ;;  %v6727_v14 = vpack.c.bf16 %v677_v7, %v670_v6 }
  0xb5   :  { %v236_v12 = vld [vmem:[#allocation5 + $0x2a0] sm:$0xff]  ;;  %v251_v15 = vld [vmem:[#allocation5 + $0x318] sm:$0xff]  ;;  %v258_v16 = vld [vmem:[#allocation5 + $0x350] sm:$0xff]  ;;  %v6729_v17 = vpack.c.bf16 %v692_v10, %v685_v9 }
  0xb6   :  { %6720 = vmatpush1.bf16.msra.mxu0 %v6719_v54  ;;  %v684_v18 = vld [vmem:[#allocation5 + $0x10a0] sm:$0xff]  ;;  %v691_v19 = vld [vmem:[#allocation5 + $0x10d8] sm:$0xff]  ;;  %v6603_v20 = vpack.c.bf16 %v243_v13, %v236_v12  ;;  %v706_v22 = vld [vmem:[#allocation5 + $0x1150] sm:$0xff]  ;;  %v6605_v23 = vpack.c.bf16 %v258_v16, %v251_v15 }
  0xb7   :  { %6722 = vmatprep.subr.bf16.mxu0 %v6721_v57  ;;  %6596 = vmatpush1.bf16.msra.mxu1 %v6595_v60  ;;  %v699_v21 = vld [vmem:[#allocation5 + $0x1118] sm:$0xff]  ;;  %v250_v24 = vld [vmem:[#allocation5 + $0x310] sm:$0xff]  ;;  %v257_v25 = vld [vmem:[#allocation5 + $0x348] sm:$0xff]  ;;  %v6731_v26 = vpack.c.bf16 %v691_v19, %v684_v18 }
  0xb8   :  { %6598 = vmatprep.subr.bf16.mxu1 %v6597_v63  ;;  %v265_v27 = vld [vmem:[#allocation5 + $0x388] sm:$0xff]  ;;  %v272_v28 = vld [vmem:[#allocation5 + $0x3c0] sm:$0xff]  ;;  %v6733_v29 = vpack.c.bf16 %v706_v22, %v699_v21  ;;  %v698_v30 = vld [vmem:[#allocation5 + $0x1110] sm:$0xff]  ;;  %v6607_v32 = vpack.c.bf16 %v257_v25, %v250_v24 }
  0xb9   :  { %v705_v31 = vld [vmem:[#allocation5 + $0x1148] sm:$0xff]  ;;  %v720_v34 = vld [vmem:[#allocation5 + $0x11c0] sm:$0xff]  ;;  %v6609_v35 = vpack.c.bf16 %v272_v28, %v265_v27  ;;  %v271_v37 = vld [vmem:[#allocation5 + $0x3b8] sm:$0xff] }
  0xba   :  { %6724 = vmatpush1.bf16.msra.mxu0 %v6723_v2  ;;  %v713_v33 = vld [vmem:[#allocation5 + $0x1188] sm:$0xff]  ;;  %v264_v36 = vld [vmem:[#allocation5 + $0x380] sm:$0xff]  ;;  %v6735_v38 = vpack.c.bf16 %v705_v31, %v698_v30  ;;  %v279_v39 = vld [vmem:[#allocation5 + $0x3f8] sm:$0xff] }
  0xbb   :  { %6726 = vmatprep.subr.bf16.mxu0 %v6725_v5  ;;  %6600 = vmatpush1.bf16.msra.mxu1 %v6599_v8  ;;  %v286_v40 = vld [vmem:[#allocation5 + $0x430] sm:$0xff]  ;;  %v6737_v41 = vpack.c.bf16 %v720_v34, %v713_v33  ;;  %v712_v42 = vld [vmem:[#allocation5 + $0x1180] sm:$0xff]  ;;  %v719_v43 = vld [vmem:[#allocation5 + $0x11b8] sm:$0xff]  ;;  %v6611_v44 = vpack.c.bf16 %v271_v37, %v264_v36 }
  0xbc   :  { %6602 = vmatprep.subr.bf16.mxu1 %v6601_v11  ;;  %v727_v45 = vld [vmem:[#allocation5 + $0x11f8] sm:$0xff]  ;;  %v734_v46 = vld [vmem:[#allocation5 + $0x1230] sm:$0xff]  ;;  %v6613_v47 = vpack.c.bf16 %v286_v40, %v279_v39  ;;  %v285_v49 = vld [vmem:[#allocation5 + $0x428] sm:$0xff]  ;;  %v6739_v50 = vpack.c.bf16 %v719_v43, %v712_v42 }
  0xbd   :  { %v278_v48 = vld [vmem:[#allocation5 + $0x3f0] sm:$0xff]  ;;  %v293_v51 = vld [vmem:[#allocation5 + $0x468] sm:$0xff]  ;;  %v300_v52 = vld [vmem:[#allocation5 + $0x4a0] sm:$0xff]  ;;  %v6741_v53 = vpack.c.bf16 %v734_v46, %v727_v45 }
  0xbe   :  { %6728 = vmatpush1.bf16.msra.mxu0 %v6727_v14  ;;  %v726_v54 = vld [vmem:[#allocation5 + $0x11f0] sm:$0xff]  ;;  %v733_v55 = vld [vmem:[#allocation5 + $0x1228] sm:$0xff]  ;;  %v6615_v56 = vpack.c.bf16 %v285_v49, %v278_v48  ;;  %v748_v58 = vld [vmem:[#allocation5 + $0x12a0] sm:$0xff]  ;;  %v6617_v59 = vpack.c.bf16 %v300_v52, %v293_v51 }
  0xbf   :  { %6730 = vmatprep.subr.bf16.mxu0 %v6729_v17  ;;  %6604 = vmatpush1.bf16.msra.mxu1 %v6603_v20  ;;  %v741_v57 = vld [vmem:[#allocation5 + $0x1268] sm:$0xff]  ;;  %v292_v60 = vld [vmem:[#allocation5 + $0x460] sm:$0xff]  ;;  %v299_v61 = vld [vmem:[#allocation5 + $0x498] sm:$0xff]  ;;  %v6743_v62 = vpack.c.bf16 %v733_v55, %v726_v54 }
  0xc0   :  { %6606 = vmatprep.subr.bf16.mxu1 %v6605_v23  ;;  %v307_v63 = vld [vmem:[#allocation5 + $0x4d8] sm:$0xff]  ;;  %v314_v0 = vld [vmem:[#allocation5 + $0x510] sm:$0xff]  ;;  %v6745_v1 = vpack.c.bf16 %v748_v58, %v741_v57  ;;  %v740_v2 = vld [vmem:[#allocation5 + $0x1260] sm:$0xff]  ;;  %v6619_v4 = vpack.c.bf16 %v299_v61, %v292_v60 }
  0xc1   :  { %v747_v3 = vld [vmem:[#allocation5 + $0x1298] sm:$0xff]  ;;  %v762_v6 = vld [vmem:[#allocation5 + $0x1310] sm:$0xff]  ;;  %v6621_v7 = vpack.c.bf16 %v314_v0, %v307_v63  ;;  %v313_v9 = vld [vmem:[#allocation5 + $0x508] sm:$0xff] }
  0xc2   :  { %6732 = vmatpush1.bf16.msra.mxu0 %v6731_v26  ;;  %v755_v5 = vld [vmem:[#allocation5 + $0x12d8] sm:$0xff]  ;;  %v306_v8 = vld [vmem:[#allocation5 + $0x4d0] sm:$0xff]  ;;  %v9479_v10 = vld [vmem:[#allocation2] sm:$0xff]  ;;  %v6747_v11 = vpack.c.bf16 %v747_v3, %v740_v2 }
  0xc3   :  { %6734 = vmatprep.subr.bf16.mxu0 %v6733_v29  ;;  %6608 = vmatpush1.bf16.msra.mxu1 %v6607_v32  ;;  %v321_v12 = vld [vmem:[#allocation5 + $0x548] sm:$0xff]  ;;  %v328_v13 = vld [vmem:[#allocation5 + $0x580] sm:$0xff]  ;;  %v9483_v14 = vcombine.high %v9479_v10, %v9479_v10  ;;  %v6749_v15 = vpack.c.bf16 %v762_v6, %v755_v5  ;;  %v754_v16 = vld [vmem:[#allocation5 + $0x12d0] sm:$0xff]  ;;  %v6623_v18 = vpack.c.bf16 %v313_v9, %v306_v8 }
  0xc4   :  { %6610 = vmatprep.subr.bf16.mxu1 %v6609_v35  ;;  %v761_v17 = vld [vmem:[#allocation5 + $0x1308] sm:$0xff]  ;;  %v776_v20 = vld [vmem:[#allocation5 + $0x1380] sm:$0xff]  ;;  %v6625_v21 = vpack.c.bf16 %v328_v13, %v321_v12  ;;  %v327_v23 = vld [vmem:[#allocation5 + $0x578] sm:$0xff] }
  0xc5   :  { %v769_v19 = vld [vmem:[#allocation5 + $0x1348] sm:$0xff]  ;;  %934 = vmatprep.mubr.f32.mxu1 %v9483_v14  ;;  %v320_v22 = vld [vmem:[#allocation5 + $0x540] sm:$0xff]  ;;  %v9486_v24 = vld [vmem:[#allocation2 + $0x10] sm:$0xff]  ;;  %v6751_v25 = vpack.c.bf16 %v761_v17, %v754_v16 }
  0xc6   :  { %6736 = vmatpush1.bf16.msra.mxu0 %v6735_v38  ;;  %v335_v26 = vld [vmem:[#allocation5 + $0x5b8] sm:$0xff]  ;;  %v342_v27 = vld [vmem:[#allocation5 + $0x5f0] sm:$0xff]  ;;  %v9490_v28 = vcombine.high %v9486_v24, %v9486_v24  ;;  %v6753_v29 = vpack.c.bf16 %v776_v20, %v769_v19  ;;  %v768_v30 = vld [vmem:[#allocation5 + $0x1340] sm:$0xff]  ;;  %v6627_v32 = vpack.c.bf16 %v327_v23, %v320_v22 }
  0xc7   :  { %6738 = vmatprep.subr.bf16.mxu0 %v6737_v41  ;;  %6612 = vmatpush1.bf16.msra.mxu1 %v6611_v44  ;;  %v775_v31 = vld [vmem:[#allocation5 + $0x1378] sm:$0xff]  ;;  %v790_v34 = vld [vmem:[#allocation5 + $0x13f0] sm:$0xff]  ;;  %v6629_v35 = vpack.c.bf16 %v342_v27, %v335_v26  ;;  %v341_v37 = vld [vmem:[#allocation5 + $0x5e8] sm:$0xff] }
  0xc8   :  { %6614 = vmatprep.subr.bf16.mxu1 %v6613_v47  ;;  %v783_v33 = vld [vmem:[#allocation5 + $0x13b8] sm:$0xff]  ;;  %1076 = vmatprep.mubr.f32.mxu0 %v9490_v28  ;;  %v334_v36 = vld [vmem:[#allocation5 + $0x5b0] sm:$0xff]  ;;  %v6755_v38 = vpack.c.bf16 %v775_v31, %v768_v30  ;;  %v349_v39 = vld [vmem:[#allocation5 + $0x628] sm:$0xff] }
  0xc9   :  { %v356_v40 = vld [vmem:[#allocation5 + $0x660] sm:$0xff]  ;;  %v6757_v41 = vpack.c.bf16 %v790_v34, %v783_v33  ;;  %v782_v42 = vld [vmem:[#allocation5 + $0x13b0] sm:$0xff]  ;;  %v789_v43 = vld [vmem:[#allocation5 + $0x13e8] sm:$0xff]  ;;  %v6631_v44 = vpack.c.bf16 %v341_v37, %v334_v36 }
  0xca   :  { %6740 = vmatpush1.bf16.msra.mxu0 %v6739_v50  ;;  %v797_v45 = vld [vmem:[#allocation5 + $0x1428] sm:$0xff]  ;;  %v804_v46 = vld [vmem:[#allocation5 + $0x1460] sm:$0xff]  ;;  %v6633_v47 = vpack.c.bf16 %v356_v40, %v349_v39  ;;  %v355_v49 = vld [vmem:[#allocation5 + $0x658] sm:$0xff]  ;;  %v6759_v50 = vpack.c.bf16 %v789_v43, %v782_v42 }
  0xcb   :  { %6742 = vmatprep.subr.bf16.mxu0 %v6741_v53  ;;  %6616 = vmatpush1.bf16.msra.mxu1 %v6615_v56  ;;  %v348_v48 = vld [vmem:[#allocation5 + $0x620] sm:$0xff]  ;;  %v363_v51 = vld [vmem:[#allocation5 + $0x698] sm:$0xff]  ;;  %v370_v52 = vld [vmem:[#allocation5 + $0x6d0] sm:$0xff]  ;;  %v6761_v53 = vpack.c.bf16 %v804_v46, %v797_v45 }
  0xcc   :  { %6618 = vmatprep.subr.bf16.mxu1 %v6617_v59  ;;  %v796_v54 = vld [vmem:[#allocation5 + $0x1420] sm:$0xff]  ;;  %v803_v55 = vld [vmem:[#allocation5 + $0x1458] sm:$0xff]  ;;  %v6635_v56 = vpack.c.bf16 %v355_v49, %v348_v48  ;;  %v818_v58 = vld [vmem:[#allocation5 + $0x14d0] sm:$0xff]  ;;  %v6637_v59 = vpack.c.bf16 %v370_v52, %v363_v51 }
  0xcd   :  { %v811_v57 = vld [vmem:[#allocation5 + $0x1498] sm:$0xff]  ;;  %v362_v60 = vld [vmem:[#allocation5 + $0x690] sm:$0xff]  ;;  %v369_v61 = vld [vmem:[#allocation5 + $0x6c8] sm:$0xff] }
  0xce   :  { %6744 = vmatpush1.bf16.msra.mxu0 %v6743_v62  ;;  %v6763_v62 = vpack.c.bf16 %v803_v55, %v796_v54  ;;  %v377_v63 = vld [vmem:[#allocation5 + $0x708] sm:$0xff]  ;;  %v384_v0 = vld [vmem:[#allocation5 + $0x740] sm:$0xff]  ;;  %v810_v2 = vld [vmem:[#allocation5 + $0x1490] sm:$0xff] }
  0xcf   :  { %6746 = vmatprep.subr.bf16.mxu0 %v6745_v1  ;;  %6620 = vmatpush1.bf16.msra.mxu1 %v6619_v4  ;;  %v6765_v1 = vpack.c.bf16 %v818_v58, %v811_v57  ;;  %v817_v3 = vld [vmem:[#allocation5 + $0x14c8] sm:$0xff]  ;;  %v6639_v4 = vpack.c.bf16 %v369_v61, %v362_v60  ;;  %v164_v6 = vld [vmem:[#allocation5 + $0x60] sm:$0xff]  ;;  %v383_v9 = vld [vmem:[#allocation5 + $0x738] sm:$0xff] }
  0xd0   :  { %6622 = vmatprep.subr.bf16.mxu1 %v6621_v7  ;;  %v157_v5 = vld [vmem:[#allocation5 + $0x28] sm:$0xff]  ;;  %v6641_v7 = vpack.c.bf16 %v384_v0, %v377_v63  ;;  %v376_v8 = vld [vmem:[#allocation5 + $0x700] sm:$0xff]  ;;  %v391_v12 = vld [vmem:[#allocation5 + $0x778] sm:$0xff] }
  0xd1   :  { %v398_v13 = vld [vmem:[#allocation5 + $0x7b0] sm:$0xff]  ;;  %v156_v16 = vld [vmem:[#allocation5 + $0x20] sm:$0xff]  ;;  %v163_v17 = vld [vmem:[#allocation5 + $0x58] sm:$0xff] }
  0xd2   :  { %6748 = vmatpush1.bf16.msra.mxu0 %v6747_v11  ;;  %v6767_v11 = vpack.c.bf16 %v817_v3, %v810_v2  ;;  %v171_v19 = vld [vmem:[#allocation5 + $0x98] sm:$0xff]  ;;  %v178_v20 = vld [vmem:[#allocation5 + $0xd0] sm:$0xff]  ;;  %v397_v23 = vld [vmem:[#allocation5 + $0x7a8] sm:$0xff] }
  0xd3   :  { %6750 = vmatprep.subr.bf16.mxu0 %v6749_v15  ;;  %6624 = vmatpush1.bf16.msra.mxu1 %v6623_v18  ;;  %v6961_v15 = vpack.c.bf16 %v164_v6, %v157_v5  ;;  %v6643_v18 = vpack.c.bf16 %v383_v9, %v376_v8  ;;  %v390_v22 = vld [vmem:[#allocation5 + $0x770] sm:$0xff]  ;;  %v405_v26 = vld [vmem:[#allocation5 + $0x7e8] sm:$0xff]  ;;  %v412_v27 = vld [vmem:[#allocation5 + $0x820] sm:$0xff] }
  0xd4   :  { %6626 = vmatprep.subr.bf16.mxu1 %v6625_v21  ;;  %v6645_v21 = vpack.c.bf16 %v398_v13, %v391_v12  ;;  %v170_v30 = vld [vmem:[#allocation5 + $0x90] sm:$0xff]  ;;  %v177_v31 = vld [vmem:[#allocation5 + $0xc8] sm:$0xff]  ;;  %v192_v34 = vld [vmem:[#allocation5 + $0x140] sm:$0xff] }
  0xd5   :  { %v185_v33 = vld [vmem:[#allocation5 + $0x108] sm:$0xff]  ;;  %v404_v36 = vld [vmem:[#allocation5 + $0x7e0] sm:$0xff]  ;;  %v411_v37 = vld [vmem:[#allocation5 + $0x818] sm:$0xff] }
  0xd6   :  { %6752 = vmatpush1.bf16.msra.mxu0 %v6751_v25  ;;  %v6963_v25 = vpack.c.bf16 %v163_v17, %v156_v16  ;;  %v419_v39 = vld [vmem:[#allocation5 + $0x858] sm:$0xff]  ;;  %v426_v40 = vld [vmem:[#allocation5 + $0x890] sm:$0xff]  ;;  %v184_v42 = vld [vmem:[#allocation5 + $0x100] sm:$0xff] }
  0xd7   :  { %6754 = vmatprep.subr.bf16.mxu0 %v6753_v29  ;;  %6628 = vmatpush1.bf16.msra.mxu1 %v6627_v32  ;;  %v6965_v29 = vpack.c.bf16 %v178_v20, %v171_v19  ;;  %v6647_v32 = vpack.c.bf16 %v397_v23, %v390_v22  ;;  %v191_v43 = vld [vmem:[#allocation5 + $0x138] sm:$0xff]  ;;  %v206_v46 = vld [vmem:[#allocation5 + $0x1b0] sm:$0xff]  ;;  %v425_v48 = vld [vmem:[#allocation5 + $0x888] sm:$0xff] }
  0xd8   :  { %6630 = vmatprep.subr.bf16.mxu1 %v6629_v35  ;;  %v6649_v35 = vpack.c.bf16 %v412_v27, %v405_v26  ;;  %v199_v45 = vld [vmem:[#allocation5 + $0x178] sm:$0xff]  ;;  %v6971_v49 = vpack.c.bf16 %v191_v43, %v184_v42  ;;  %v440_v51 = vld [vmem:[#allocation5 + $0x900] sm:$0xff]  ;;  %v205_v54 = vld [vmem:[#allocation5 + $0x1a8] sm:$0xff] }
  0xd9   :  { %v6973_v52 = vpack.c.bf16 %v206_v46, %v199_v45  ;;  %v220_v57 = vld [vmem:[#allocation5 + $0x220] sm:$0xff]  ;;  %v439_v60 = vld [vmem:[#allocation5 + $0x8f8] sm:$0xff]  ;;  %v454_v63 = vld [vmem:[#allocation5 + $0x970] sm:$0xff] }
  0xda   :  { %6756 = vmatpush1.bf16.msra.mxu0 %v6755_v38  ;;  %v6967_v38 = vpack.c.bf16 %v177_v31, %v170_v30  ;;  %v219_v2 = vld [vmem:[#allocation5 + $0x218] sm:$0xff]  ;;  %v234_v5 = vld [vmem:[#allocation5 + $0x290] sm:$0xff]  ;;  %v453_v8 = vld [vmem:[#allocation5 + $0x968] sm:$0xff] }
  0xdb   :  { %6758 = vmatprep.subr.bf16.mxu0 %v6757_v41  ;;  %6632 = vmatpush1.bf16.msra.mxu1 %v6631_v44  ;;  %v6969_v41 = vpack.c.bf16 %v192_v34, %v185_v33  ;;  %v6651_v44 = vpack.c.bf16 %v411_v37, %v404_v36  ;;  %v468_v12 = vld [vmem:[#allocation5 + $0x9e0] sm:$0xff]  ;;  %v233_v16 = vld [vmem:[#allocation5 + $0x288] sm:$0xff]  ;;  %v9496_v20 = vld [vmem:[#allocation2 + $0x8] sm:$0xff] }
  0xdc   :  { %6634 = vmatprep.subr.bf16.mxu1 %v6633_v47  ;;  %v6653_v47 = vpack.c.bf16 %v426_v40, %v419_v39  ;;  %v248_v19 = vld [vmem:[#allocation5 + $0x300] sm:$0xff]  ;;  %v467_v23 = vld [vmem:[#allocation5 + $0x9d8] sm:$0xff]  ;;  %v474_v37 = vld [vmem:[#allocation5 + $0xa10] sm:$0xff] }
  0xdd   :  { %v460_v22 = vld [vmem:[#allocation5 + $0x9a0] sm:$0xff]  ;;  %v475_v27 = vld [vmem:[#allocation5 + $0xa18] sm:$0xff]  ;;  %v489_v40 = vld [vmem:[#allocation5 + $0xa88] sm:$0xff] }
  0xde   :  { %6760 = vmatpush1.bf16.msra.mxu0 %v6759_v50  ;;  %v433_v50 = vld [vmem:[#allocation5 + $0x8c8] sm:$0xff]  ;;  %v240_v31 = vld [vmem:[#allocation5 + $0x2c0] sm:$0xff]  ;;  %v6667_v33 = vpack.c.bf16 %v467_v23, %v460_v22  ;;  %v255_v34 = vld [vmem:[#allocation5 + $0x338] sm:$0xff] }
  0xdf   :  { %6762 = vmatprep.subr.bf16.mxu0 %v6761_v53  ;;  %6636 = vmatpush1.bf16.msra.mxu1 %v6635_v56  ;;  %v198_v53 = vld [vmem:[#allocation5 + $0x170] sm:$0xff]  ;;  %v213_v56 = vld [vmem:[#allocation5 + $0x1e8] sm:$0xff]  ;;  %v6657_v58 = vpack.c.bf16 %v440_v51, %v433_v50  ;;  %v503_v51 = vld [vmem:[#allocation5 + $0xaf8] sm:$0xff] }
  0xe0   :  { %6638 = vmatprep.subr.bf16.mxu1 %v6637_v59  ;;  %v432_v59 = vld [vmem:[#allocation5 + $0x8c0] sm:$0xff]  ;;  %v6975_v61 = vpack.c.bf16 %v205_v54, %v198_v53  ;;  %v6977_v0 = vpack.c.bf16 %v220_v57, %v213_v56  ;;  %v254_v43 = vld [vmem:[#allocation5 + $0x330] sm:$0xff]  ;;  %v269_v46 = vld [vmem:[#allocation5 + $0x3a8] sm:$0xff] }
  0xe1   :  { %v6659_v3 = vpack.c.bf16 %v439_v60, %v432_v59  ;;  %v268_v54 = vld [vmem:[#allocation5 + $0x3a0] sm:$0xff]  ;;  %v283_v57 = vld [vmem:[#allocation5 + $0x418] sm:$0xff]  ;;  %v502_v60 = vld [vmem:[#allocation5 + $0xaf0] sm:$0xff] }
  0xe2   :  { %6764 = vmatpush1.bf16.msra.mxu0 %v6763_v62  ;;  %v447_v62 = vld [vmem:[#allocation5 + $0x938] sm:$0xff]  ;;  %v530_v23 = vld [vmem:[#allocation5 + $0xbd0] sm:$0xff] }
  0xe3   :  { %6766 = vmatprep.subr.bf16.mxu0 %v6765_v1  ;;  %6640 = vmatpush1.bf16.msra.mxu1 %v6639_v4  ;;  %v212_v1 = vld [vmem:[#allocation5 + $0x1e0] sm:$0xff]  ;;  %v227_v4 = vld [vmem:[#allocation5 + $0x258] sm:$0xff]  ;;  %v6661_v6 = vpack.c.bf16 %v454_v63, %v447_v62  ;;  %v517_v63 = vld [vmem:[#allocation5 + $0xb68] sm:$0xff] }
  0xe4   :  { %6642 = vmatprep.subr.bf16.mxu1 %v6641_v7  ;;  %v446_v7 = vld [vmem:[#allocation5 + $0x930] sm:$0xff]  ;;  %v6979_v9 = vpack.c.bf16 %v219_v2, %v212_v1  ;;  %v6981_v13 = vpack.c.bf16 %v234_v5, %v227_v4  ;;  %v297_v5 = vld [vmem:[#allocation5 + $0x488] sm:$0xff] }
  0xe5   :  { %v6663_v17 = vpack.c.bf16 %v453_v8, %v446_v7  ;;  %v282_v2 = vld [vmem:[#allocation5 + $0x410] sm:$0xff]  ;;  %v516_v8 = vld [vmem:[#allocation5 + $0xb60] sm:$0xff] }
  0xe6   :  { %6768 = vmatpush1.bf16.msra.mxu0 %v6767_v11  ;;  %935 = vmatmul.mubr.f32.vlgmr.msra.gmra.mrb[0].mxu1 %v9479_v10  ;;  %v461_v11 = vld [vmem:[#allocation5 + $0x9a8] sm:$0xff] }
  0xe7   :  { %6962 = vmatprep.subr.bf16.mxu0 %v6961_v15  ;;  %6644 = vmatpush1.bf16.msra.mxu1 %v6643_v18  ;;  %v226_v15 = vld [vmem:[#allocation5 + $0x250] sm:$0xff]  ;;  %v241_v18 = vld [vmem:[#allocation5 + $0x2c8] sm:$0xff] }
  0xe8   :  { %6646 = vmatprep.subr.bf16.mxu1 %v6645_v21  ;;  %v6665_v21 = vpack.c.bf16 %v468_v12, %v461_v11  ;;  %v6983_v26 = vpack.c.bf16 %v233_v16, %v226_v15  ;;  %v6985_v30 = vpack.c.bf16 %v248_v19, %v241_v18  ;;  %v531_v12 = vld [vmem:[#allocation5 + $0xbd8] sm:$0xff]  ;;  %v296_v16 = vld [vmem:[#allocation5 + $0x480] sm:$0xff] }
  0xe9   :  { %1077 = vmatmul.mubr.f32.vlgmr.msra.gmra.mrb[0].mxu0 %v9486_v24  ;;  %v418_v24 = vld [vmem:[#allocation5 + $0x850] sm:$0xff]  ;;  %v311_v19 = vld [vmem:[#allocation5 + $0x4f8] sm:$0xff] }
  0xea   :  { %6964 = vmatpush1.bf16.msra.mxu0 %v6963_v25  ;;  %1360 = vmatprep.mubr.f32.mxu0 %v9483_v14  ;;  %v6655_v55 = vpack.c.bf16 %v425_v48, %v418_v24  ;;  %v9500_v25 = vcombine.high %v9496_v20, %v9496_v20  ;;  %v488_v48 = vld [vmem:[#allocation5 + $0xa80] sm:$0xff] }
  0xeb   :  { %6966 = vmatprep.subr.bf16.mxu0 %v6965_v29  ;;  %6648 = vmatpush1.bf16.msra.mxu1 %v6647_v32  ;;  %v482_v29 = vld [vmem:[#allocation5 + $0xa50] sm:$0xff]  ;;  %v247_v32 = vld [vmem:[#allocation5 + $0x2f8] sm:$0xff] }
  0xec   :  { %6650 = vmatprep.subr.bf16.mxu1 %v6649_v35  ;;  %1005 = vmatprep.mubr.f32.mxu1 %v9500_v25  ;;  %v262_v35 = vld [vmem:[#allocation5 + $0x370] sm:$0xff]  ;;  %v6669_v36 = vpack.c.bf16 %v482_v29, %v475_v27  ;;  %v6987_v39 = vpack.c.bf16 %v247_v32, %v240_v31  ;;  %v545_v29 = vld [vmem:[#allocation5 + $0xc48] sm:$0xff] }
  0xed   :  { %v6989_v42 = vpack.c.bf16 %v262_v35, %v255_v34  ;;  %v310_v32 = vld [vmem:[#allocation5 + $0x4f0] sm:$0xff]  ;;  %v325_v35 = vld [vmem:[#allocation5 + $0x568] sm:$0xff] }
  0xee   :  { %6968 = vmatpush1.bf16.msra.mxu0 %v6967_v38  ;;  %v481_v38 = vld [vmem:[#allocation5 + $0xa48] sm:$0xff] }
  0xef   :  { %6970 = vmatprep.subr.bf16.mxu0 %v6969_v41  ;;  %6652 = vmatpush1.bf16.msra.mxu1 %v6651_v44  ;;  %v496_v41 = vld [vmem:[#allocation5 + $0xac0] sm:$0xff]  ;;  %v261_v44 = vld [vmem:[#allocation5 + $0x368] sm:$0xff]  ;;  %v6671_v45 = vpack.c.bf16 %v481_v38, %v474_v37 }
  0xf0   :  { %6654 = vmatprep.subr.bf16.mxu1 %v6653_v47  ;;  %v276_v47 = vld [vmem:[#allocation5 + $0x3e0] sm:$0xff]  ;;  %v6673_v24 = vpack.c.bf16 %v496_v41, %v489_v40  ;;  %v6991_v50 = vpack.c.bf16 %v261_v44, %v254_v43  ;;  %v559_v41 = vld [vmem:[#allocation5 + $0xcb8] sm:$0xff] }
  0xf1   :  { %v6993_v53 = vpack.c.bf16 %v276_v47, %v269_v46  ;;  %v544_v38 = vld [vmem:[#allocation5 + $0xc40] sm:$0xff]  ;;  %v339_v47 = vld [vmem:[#allocation5 + $0x5d8] sm:$0xff] }
  0xf2   :  { %6972 = vmatpush1.bf16.msra.mxu0 %v6971_v49  ;;  %v495_v49 = vld [vmem:[#allocation5 + $0xab8] sm:$0xff]  ;;  %v324_v44 = vld [vmem:[#allocation5 + $0x560] sm:$0xff] }
  0xf3   :  { %6974 = vmatprep.subr.bf16.mxu0 %v6973_v52  ;;  %6656 = vmatpush1.bf16.msra.mxu1 %v6655_v55  ;;  %v510_v52 = vld [vmem:[#allocation5 + $0xb30] sm:$0xff]  ;;  %v275_v55 = vld [vmem:[#allocation5 + $0x3d8] sm:$0xff]  ;;  %v6675_v56 = vpack.c.bf16 %v495_v49, %v488_v48 }
  0xf4   :  { %6658 = vmatprep.subr.bf16.mxu1 %v6657_v58  ;;  %v290_v58 = vld [vmem:[#allocation5 + $0x450] sm:$0xff]  ;;  %v6677_v59 = vpack.c.bf16 %v510_v52, %v503_v51  ;;  %v6995_v62 = vpack.c.bf16 %v275_v55, %v268_v54  ;;  %v573_v52 = vld [vmem:[#allocation5 + $0xd28] sm:$0xff] }
  0xf5   :  { %v6997_v1 = vpack.c.bf16 %v290_v58, %v283_v57  ;;  %v558_v49 = vld [vmem:[#allocation5 + $0xcb0] sm:$0xff]  ;;  %v353_v58 = vld [vmem:[#allocation5 + $0x648] sm:$0xff] }
  0xf6   :  { %6976 = vmatpush1.bf16.msra.mxu0 %v6975_v61  ;;  %v509_v61 = vld [vmem:[#allocation5 + $0xb28] sm:$0xff]  ;;  %v338_v55 = vld [vmem:[#allocation5 + $0x5d0] sm:$0xff] }
  0xf7   :  { %6978 = vmatprep.subr.bf16.mxu0 %v6977_v0  ;;  %6660 = vmatpush1.bf16.msra.mxu1 %v6659_v3  ;;  %v524_v0 = vld [vmem:[#allocation5 + $0xba0] sm:$0xff]  ;;  %v289_v3 = vld [vmem:[#allocation5 + $0x448] sm:$0xff]  ;;  %v6679_v4 = vpack.c.bf16 %v509_v61, %v502_v60 }
  0xf8   :  { %6662 = vmatprep.subr.bf16.mxu1 %v6661_v6  ;;  %v304_v6 = vld [vmem:[#allocation5 + $0x4c0] sm:$0xff]  ;;  %v6681_v7 = vpack.c.bf16 %v524_v0, %v517_v63  ;;  %v6999_v11 = vpack.c.bf16 %v289_v3, %v282_v2  ;;  %v587_v0 = vld [vmem:[#allocation5 + $0xd98] sm:$0xff] }
  0xf9   :  { %v7001_v15 = vpack.c.bf16 %v304_v6, %v297_v5  ;;  %v572_v61 = vld [vmem:[#allocation5 + $0xd20] sm:$0xff]  ;;  %v367_v6 = vld [vmem:[#allocation5 + $0x6b8] sm:$0xff] }
  0xfa   :  { %6980 = vmatpush1.bf16.msra.mxu0 %v6979_v9  ;;  %v523_v9 = vld [vmem:[#allocation5 + $0xb98] sm:$0xff]  ;;  %v352_v3 = vld [vmem:[#allocation5 + $0x640] sm:$0xff] }
  0xfb   :  { %6982 = vmatprep.subr.bf16.mxu0 %v6981_v13  ;;  %6664 = vmatpush1.bf16.msra.mxu1 %v6663_v17  ;;  %v538_v13 = vld [vmem:[#allocation5 + $0xc10] sm:$0xff]  ;;  %v303_v17 = vld [vmem:[#allocation5 + $0x4b8] sm:$0xff]  ;;  %v6683_v18 = vpack.c.bf16 %v523_v9, %v516_v8 }
  0xfc   :  { %6666 = vmatprep.subr.bf16.mxu1 %v6665_v21  ;;  %v318_v21 = vld [vmem:[#allocation5 + $0x530] sm:$0xff]  ;;  %v6685_v22 = vpack.c.bf16 %v538_v13, %v531_v12  ;;  %v7003_v27 = vpack.c.bf16 %v303_v17, %v296_v16  ;;  %v155_v13 = vld [vmem:[#allocation5 + $0x18] sm:$0xff] }
  0xfd   :  { %v7005_v31 = vpack.c.bf16 %v318_v21, %v311_v19  ;;  %v586_v9 = vld [vmem:[#allocation5 + $0xd90] sm:$0xff]  ;;  %v381_v21 = vld [vmem:[#allocation5 + $0x728] sm:$0xff] }
  0xfe   :  { %6984 = vmatpush1.bf16.msra.mxu0 %v6983_v26  ;;  %v537_v26 = vld [vmem:[#allocation5 + $0xc08] sm:$0xff]  ;;  %v366_v17 = vld [vmem:[#allocation5 + $0x6b0] sm:$0xff] }
  0xff   :  { %6986 = vmatprep.subr.bf16.mxu0 %v6985_v30  ;;  %6668 = vmatpush1.bf16.msra.mxu1 %v6667_v33  ;;  %v552_v30 = vld [vmem:[#allocation5 + $0xc80] sm:$0xff]  ;;  %v317_v33 = vld [vmem:[#allocation5 + $0x528] sm:$0xff]  ;;  %v6687_v34 = vpack.c.bf16 %v537_v26, %v530_v23  ;;  %v154_v26 = vld [vmem:[#allocation5 + $0x10] sm:$0xff] }
 0x100   :  { %6670 = vmatprep.subr.bf16.mxu1 %v6669_v36  ;;  %v332_v36 = vld [vmem:[#allocation5 + $0x5a0] sm:$0xff]  ;;  %v6689_v37 = vpack.c.bf16 %v552_v30, %v545_v29  ;;  %v7007_v40 = vpack.c.bf16 %v317_v33, %v310_v32  ;;  %v169_v30 = vld [vmem:[#allocation5 + $0x88] sm:$0xff] }
 0x101   :  { %v7009_v43 = vpack.c.bf16 %v332_v36, %v325_v35  ;;  %v380_v33 = vld [vmem:[#allocation5 + $0x720] sm:$0xff]  ;;  %v395_v36 = vld [vmem:[#allocation5 + $0x798] sm:$0xff] }
 0x102   :  { %6988 = vmatpush1.bf16.msra.mxu0 %v6987_v39  ;;  %v551_v39 = vld [vmem:[#allocation5 + $0xc78] sm:$0xff] }
 0x103   :  { %6990 = vmatprep.subr.bf16.mxu0 %v6989_v42  ;;  %6672 = vmatpush1.bf16.msra.mxu1 %v6671_v45  ;;  %v566_v42 = vld [vmem:[#allocation5 + $0xcf0] sm:$0xff]  ;;  %v331_v45 = vld [vmem:[#allocation5 + $0x598] sm:$0xff]  ;;  %v6691_v46 = vpack.c.bf16 %v551_v39, %v544_v38  ;;  %v168_v39 = vld [vmem:[#allocation5 + $0x80] sm:$0xff] }
 0x104   :  { %6674 = vmatprep.subr.bf16.mxu1 %v6673_v24  ;;  %v346_v24 = vld [vmem:[#allocation5 + $0x610] sm:$0xff]  ;;  %v6693_v48 = vpack.c.bf16 %v566_v42, %v559_v41  ;;  %v7011_v51 = vpack.c.bf16 %v331_v45, %v324_v44  ;;  %v183_v42 = vld [vmem:[#allocation5 + $0xf8] sm:$0xff] }
 0x105   :  { %v7013_v54 = vpack.c.bf16 %v346_v24, %v339_v47  ;;  %v394_v45 = vld [vmem:[#allocation5 + $0x790] sm:$0xff]  ;;  %v409_v24 = vld [vmem:[#allocation5 + $0x808] sm:$0xff] }
 0x106   :  { %6992 = vmatpush1.bf16.msra.mxu0 %v6991_v50  ;;  %v565_v50 = vld [vmem:[#allocation5 + $0xce8] sm:$0xff] }
 0x107   :  { %6994 = vmatprep.subr.bf16.mxu0 %v6993_v53  ;;  %6676 = vmatpush1.bf16.msra.mxu1 %v6675_v56  ;;  %v580_v53 = vld [vmem:[#allocation5 + $0xd60] sm:$0xff]  ;;  %v345_v56 = vld [vmem:[#allocation5 + $0x608] sm:$0xff]  ;;  %v6695_v57 = vpack.c.bf16 %v565_v50, %v558_v49  ;;  %v182_v50 = vld [vmem:[#allocation5 + $0xf0] sm:$0xff] }
 0x108   :  { %6678 = vmatprep.subr.bf16.mxu1 %v6677_v59  ;;  %v360_v59 = vld [vmem:[#allocation5 + $0x680] sm:$0xff]  ;;  %v6697_v60 = vpack.c.bf16 %v580_v53, %v573_v52  ;;  %v7015_v63 = vpack.c.bf16 %v345_v56, %v338_v55  ;;  %v197_v53 = vld [vmem:[#allocation5 + $0x168] sm:$0xff] }
 0x109   :  { %v7017_v2 = vpack.c.bf16 %v360_v59, %v353_v58  ;;  %v408_v56 = vld [vmem:[#allocation5 + $0x800] sm:$0xff]  ;;  %v423_v59 = vld [vmem:[#allocation5 + $0x878] sm:$0xff] }
 0x10a   :  { %6996 = vmatpush1.bf16.msra.mxu0 %v6995_v62  ;;  %v579_v62 = vld [vmem:[#allocation5 + $0xd58] sm:$0xff] }
 0x10b   :  { %6998 = vmatprep.subr.bf16.mxu0 %v6997_v1  ;;  %6680 = vmatpush1.bf16.msra.mxu1 %v6679_v4  ;;  %v594_v1 = vld [vmem:[#allocation5 + $0xdd0] sm:$0xff]  ;;  %v359_v4 = vld [vmem:[#allocation5 + $0x678] sm:$0xff]  ;;  %v6699_v5 = vpack.c.bf16 %v579_v62, %v572_v61 }
 0x10c   :  { %6682 = vmatprep.subr.bf16.mxu1 %v6681_v7  ;;  %v374_v7 = vld [vmem:[#allocation5 + $0x6f0] sm:$0xff]  ;;  %v6701_v8 = vpack.c.bf16 %v594_v1, %v587_v0  ;;  %v7019_v12 = vpack.c.bf16 %v359_v4, %v352_v3  ;;  %v203_v62 = vld [vmem:[#allocation5 + $0x198] sm:$0xff]  ;;  %v429_v4 = vld [vmem:[#allocation5 + $0x8a8] sm:$0xff] }
 0x10d   :  { %v7021_v16 = vpack.c.bf16 %v374_v7, %v367_v6  ;;  %v211_v0 = vld [vmem:[#allocation5 + $0x1d8] sm:$0xff]  ;;  %v218_v1 = vld [vmem:[#allocation5 + $0x210] sm:$0xff]  ;;  %v437_v6 = vld [vmem:[#allocation5 + $0x8e8] sm:$0xff] }
 0x10e   :  { %7000 = vmatpush1.bf16.msra.mxu0 %v6999_v11  ;;  %v593_v11 = vld [vmem:[#allocation5 + $0xdc8] sm:$0xff]  ;;  %v422_v3 = vld [vmem:[#allocation5 + $0x870] sm:$0xff]  ;;  %v444_v7 = vld [vmem:[#allocation5 + $0x920] sm:$0xff] }
 0x10f   :  { %7002 = vmatprep.subr.bf16.mxu0 %v7001_v15  ;;  %6684 = vmatpush1.bf16.msra.mxu1 %v6683_v18  ;;  %v162_v15 = vld [vmem:[#allocation5 + $0x50] sm:$0xff]  ;;  %v373_v18 = vld [vmem:[#allocation5 + $0x6e8] sm:$0xff]  ;;  %v6703_v19 = vpack.c.bf16 %v593_v11, %v586_v9 }
 0x110   :  { %6686 = vmatprep.subr.bf16.mxu1 %v6685_v22  ;;  %v388_v22 = vld [vmem:[#allocation5 + $0x760] sm:$0xff]  ;;  %v6769_v23 = vpack.c.bf16 %v162_v15, %v155_v13  ;;  %v7023_v29 = vpack.c.bf16 %v373_v18, %v366_v17  ;;  %v210_v9 = vld [vmem:[#allocation5 + $0x1d0] sm:$0xff]  ;;  %v217_v11 = vld [vmem:[#allocation5 + $0x208] sm:$0xff] }
 0x111   :  { %v7025_v32 = vpack.c.bf16 %v388_v22, %v381_v21  ;;  %v225_v13 = vld [vmem:[#allocation5 + $0x248] sm:$0xff]  ;;  %v232_v15 = vld [vmem:[#allocation5 + $0x280] sm:$0xff]  ;;  %v443_v18 = vld [vmem:[#allocation5 + $0x918] sm:$0xff] }
 0x112   :  { %7004 = vmatpush1.bf16.msra.mxu0 %v7003_v27  ;;  %v161_v27 = vld [vmem:[#allocation5 + $0x48] sm:$0xff]  ;;  %v436_v17 = vld [vmem:[#allocation5 + $0x8e0] sm:$0xff]  ;;  %v451_v21 = vld [vmem:[#allocation5 + $0x958] sm:$0xff] }
 0x113   :  { %7006 = vmatprep.subr.bf16.mxu0 %v7005_v31  ;;  %6688 = vmatpush1.bf16.msra.mxu1 %v6687_v34  ;;  %v176_v31 = vld [vmem:[#allocation5 + $0xc0] sm:$0xff]  ;;  %v387_v34 = vld [vmem:[#allocation5 + $0x758] sm:$0xff]  ;;  %v6771_v35 = vpack.c.bf16 %v161_v27, %v154_v26  ;;  %v458_v22 = vld [vmem:[#allocation5 + $0x990] sm:$0xff] }
 0x114   :  { %6690 = vmatprep.subr.bf16.mxu1 %v6689_v37  ;;  %v402_v37 = vld [vmem:[#allocation5 + $0x7d0] sm:$0xff]  ;;  %v6773_v38 = vpack.c.bf16 %v176_v31, %v169_v30  ;;  %v7027_v41 = vpack.c.bf16 %v387_v34, %v380_v33  ;;  %v224_v26 = vld [vmem:[#allocation5 + $0x240] sm:$0xff]  ;;  %v231_v27 = vld [vmem:[#allocation5 + $0x278] sm:$0xff] }
 0x115   :  { %v7029_v44 = vpack.c.bf16 %v402_v37, %v395_v36  ;;  %v239_v30 = vld [vmem:[#allocation5 + $0x2b8] sm:$0xff]  ;;  %v246_v31 = vld [vmem:[#allocation5 + $0x2f0] sm:$0xff]  ;;  %v457_v34 = vld [vmem:[#allocation5 + $0x988] sm:$0xff] }
 0x116   :  { %7008 = vmatpush1.bf16.msra.mxu0 %v7007_v40  ;;  %v175_v40 = vld [vmem:[#allocation5 + $0xb8] sm:$0xff]  ;;  %v450_v33 = vld [vmem:[#allocation5 + $0x950] sm:$0xff]  ;;  %v465_v36 = vld [vmem:[#allocation5 + $0x9c8] sm:$0xff] }
 0x117   :  { %7010 = vmatprep.subr.bf16.mxu0 %v7009_v43  ;;  %6692 = vmatpush1.bf16.msra.mxu1 %v6691_v46  ;;  %v190_v43 = vld [vmem:[#allocation5 + $0x130] sm:$0xff]  ;;  %v401_v46 = vld [vmem:[#allocation5 + $0x7c8] sm:$0xff]  ;;  %v6775_v47 = vpack.c.bf16 %v175_v40, %v168_v39  ;;  %v472_v37 = vld [vmem:[#allocation5 + $0xa00] sm:$0xff] }
 0x118   :  { %6694 = vmatprep.subr.bf16.mxu1 %v6693_v48  ;;  %v416_v48 = vld [vmem:[#allocation5 + $0x840] sm:$0xff]  ;;  %v6777_v49 = vpack.c.bf16 %v190_v43, %v183_v42  ;;  %v7031_v52 = vpack.c.bf16 %v401_v46, %v394_v45  ;;  %v238_v39 = vld [vmem:[#allocation5 + $0x2b0] sm:$0xff]  ;;  %v245_v40 = vld [vmem:[#allocation5 + $0x2e8] sm:$0xff] }
 0x119   :  { %v7033_v55 = vpack.c.bf16 %v416_v48, %v409_v24  ;;  %v253_v42 = vld [vmem:[#allocation5 + $0x328] sm:$0xff]  ;;  %v260_v43 = vld [vmem:[#allocation5 + $0x360] sm:$0xff]  ;;  %v471_v46 = vld [vmem:[#allocation5 + $0x9f8] sm:$0xff] }
 0x11a   :  { %7012 = vmatpush1.bf16.msra.mxu0 %v7011_v51  ;;  %v189_v51 = vld [vmem:[#allocation5 + $0x128] sm:$0xff]  ;;  %v464_v45 = vld [vmem:[#allocation5 + $0x9c0] sm:$0xff]  ;;  %v479_v24 = vld [vmem:[#allocation5 + $0xa38] sm:$0xff] }
 0x11b   :  { %7014 = vmatprep.subr.bf16.mxu0 %v7013_v54  ;;  %6696 = vmatpush1.bf16.msra.mxu1 %v6695_v57  ;;  %v204_v54 = vld [vmem:[#allocation5 + $0x1a0] sm:$0xff]  ;;  %v415_v57 = vld [vmem:[#allocation5 + $0x838] sm:$0xff]  ;;  %v6779_v58 = vpack.c.bf16 %v189_v51, %v182_v50  ;;  %v486_v48 = vld [vmem:[#allocation5 + $0xa70] sm:$0xff] }
 0x11c   :  { %6698 = vmatprep.subr.bf16.mxu1 %v6697_v60  ;;  %v430_v60 = vld [vmem:[#allocation5 + $0x8b0] sm:$0xff]  ;;  %v6781_v61 = vpack.c.bf16 %v204_v54, %v197_v53  ;;  %v252_v50 = vld [vmem:[#allocation5 + $0x320] sm:$0xff]  ;;  %v259_v51 = vld [vmem:[#allocation5 + $0x358] sm:$0xff] }
 0x11d   :  { %v267_v53 = vld [vmem:[#allocation5 + $0x398] sm:$0xff]  ;;  %v274_v54 = vld [vmem:[#allocation5 + $0x3d0] sm:$0xff] }
 0x11e   :  { %7016 = vmatpush1.bf16.msra.mxu0 %v7015_v63  ;;  %v7035_v63 = vpack.c.bf16 %v415_v57, %v408_v56  ;;  %v478_v56 = vld [vmem:[#allocation5 + $0xa30] sm:$0xff]  ;;  %v485_v57 = vld [vmem:[#allocation5 + $0xa68] sm:$0xff] }
 0x11f   :  { %7018 = vmatprep.subr.bf16.mxu0 %v7017_v2  ;;  %6700 = vmatpush1.bf16.msra.mxu1 %v6699_v5  ;;  %v7037_v2 = vpack.c.bf16 %v430_v60, %v423_v59  ;;  %v493_v59 = vld [vmem:[#allocation5 + $0xaa8] sm:$0xff]  ;;  %v500_v60 = vld [vmem:[#allocation5 + $0xae0] sm:$0xff] }
 0x120   :  { %6702 = vmatprep.subr.bf16.mxu1 %v6701_v8  ;;  %v6785_v8 = vpack.c.bf16 %v218_v1, %v211_v0  ;;  %v281_v0 = vld [vmem:[#allocation5 + $0x408] sm:$0xff]  ;;  %v288_v1 = vld [vmem:[#allocation5 + $0x440] sm:$0xff] }
 0x122   :  { %7020 = vmatpush1.bf16.msra.mxu0 %v7019_v12  ;;  %v7039_v12 = vpack.c.bf16 %v429_v4, %v422_v3  ;;  %v492_v3 = vld [vmem:[#allocation5 + $0xaa0] sm:$0xff]  ;;  %v499_v4 = vld [vmem:[#allocation5 + $0xad8] sm:$0xff] }
 0x123   :  { %7022 = vmatprep.subr.bf16.mxu0 %v7021_v16  ;;  %6704 = vmatpush1.bf16.msra.mxu1 %v6703_v19  ;;  %v7041_v16 = vpack.c.bf16 %v444_v7, %v437_v6  ;;  %v6787_v19 = vpack.c.bf16 %v217_v11, %v210_v9  ;;  %v507_v6 = vld [vmem:[#allocation5 + $0xb18] sm:$0xff]  ;;  %v514_v7 = vld [vmem:[#allocation5 + $0xb50] sm:$0xff]  ;;  %v280_v9 = vld [vmem:[#allocation5 + $0x400] sm:$0xff] }
 0x124   :  { %6770 = vmatprep.subr.bf16.mxu1 %v6769_v23  ;;  %v6789_v23 = vpack.c.bf16 %v232_v15, %v225_v13  ;;  %v287_v11 = vld [vmem:[#allocation5 + $0x438] sm:$0xff]  ;;  %v302_v15 = vld [vmem:[#allocation5 + $0x4b0] sm:$0xff] }
 0x125   :  { %v295_v13 = vld [vmem:[#allocation5 + $0x478] sm:$0xff] }
 0x126   :  { %7024 = vmatpush1.bf16.msra.mxu0 %v7023_v29  ;;  %1006 = vmatmul.mubr.f32.vlgmr.msra.gmra.mrb[0].mxu1 %v9496_v20  ;;  %v7043_v29 = vpack.c.bf16 %v443_v18, %v436_v17  ;;  %v506_v17 = vld [vmem:[#allocation5 + $0xb10] sm:$0xff]  ;;  %v513_v18 = vld [vmem:[#allocation5 + $0xb48] sm:$0xff] }
 0x127   :  { %7026 = vmatprep.subr.bf16.mxu0 %v7025_v32  ;;  %6772 = vmatpush1.bf16.msra.mxu1 %v6771_v35  ;;  %v7045_v32 = vpack.c.bf16 %v458_v22, %v451_v21  ;;  %v6791_v35 = vpack.c.bf16 %v231_v27, %v224_v26  ;;  %v521_v21 = vld [vmem:[#allocation5 + $0xb88] sm:$0xff]  ;;  %v528_v22 = vld [vmem:[#allocation5 + $0xbc0] sm:$0xff]  ;;  %v294_v26 = vld [vmem:[#allocation5 + $0x470] sm:$0xff] }
 0x128   :  { %1147 = vmatprep.mubr.f32.mxu1 %v9483_v14  ;;  %6774 = vmatprep.subr.bf16.mxu1 %v6773_v38  ;;  %v6793_v38 = vpack.c.bf16 %v246_v31, %v239_v30  ;;  %v301_v27 = vld [vmem:[#allocation5 + $0x4a8] sm:$0xff]  ;;  %v316_v31 = vld [vmem:[#allocation5 + $0x520] sm:$0xff] }
 0x129   :  { %1361 = vmatmul.mubr.f32.vlgmr.msra.gmra.mrb[2].mxu0 %v9479_v10  ;;  %v196_v10 = vld [vmem:[#allocation5 + $0x160] sm:$0xff]  ;;  %v309_v30 = vld [vmem:[#allocation5 + $0x4e8] sm:$0xff] }
 0x12a   :  { %7028 = vmatpush1.bf16.msra.mxu0 %v7027_v41  ;;  %1431 = vmatprep.mubr.f32.mxu0 %v9500_v25  ;;  %v6783_v5 = vpack.c.bf16 %v203_v62, %v196_v10  ;;  %v7047_v41 = vpack.c.bf16 %v457_v34, %v450_v33  ;;  %v266_v10 = vld [vmem:[#allocation5 + $0x390] sm:$0xff]  ;;  %v273_v62 = vld [vmem:[#allocation5 + $0x3c8] sm:$0xff]  ;;  %v520_v33 = vld [vmem:[#allocation5 + $0xb80] sm:$0xff] }
 0x12b   :  { %7030 = vmatprep.subr.bf16.mxu0 %v7029_v44  ;;  %6776 = vmatpush1.bf16.msra.mxu1 %v6775_v47  ;;  %v7049_v44 = vpack.c.bf16 %v472_v37, %v465_v36  ;;  %v6795_v47 = vpack.c.bf16 %v245_v40, %v238_v39  ;;  %v527_v34 = vld [vmem:[#allocation5 + $0xbb8] sm:$0xff]  ;;  %v542_v37 = vld [vmem:[#allocation5 + $0xc30] sm:$0xff]  ;;  %v308_v39 = vld [vmem:[#allocation5 + $0x4e0] sm:$0xff] }
 0x12c   :  { %6778 = vmatprep.subr.bf16.mxu1 %v6777_v49  ;;  %v6797_v49 = vpack.c.bf16 %v260_v43, %v253_v42  ;;  %v535_v36 = vld [vmem:[#allocation5 + $0xbf8] sm:$0xff]  ;;  %v330_v43 = vld [vmem:[#allocation5 + $0x590] sm:$0xff] }
 0x12d   :  { %v315_v40 = vld [vmem:[#allocation5 + $0x518] sm:$0xff] }
 0x12e   :  { %7032 = vmatpush1.bf16.msra.mxu0 %v7031_v52  ;;  %v7051_v52 = vpack.c.bf16 %v471_v46, %v464_v45  ;;  %v323_v42 = vld [vmem:[#allocation5 + $0x558] sm:$0xff]  ;;  %v534_v45 = vld [vmem:[#allocation5 + $0xbf0] sm:$0xff]  ;;  %v541_v46 = vld [vmem:[#allocation5 + $0xc28] sm:$0xff] }
 0x12f   :  { %7034 = vmatprep.subr.bf16.mxu0 %v7033_v55  ;;  %6780 = vmatpush1.bf16.msra.mxu1 %v6779_v58  ;;  %v7053_v55 = vpack.c.bf16 %v486_v48, %v479_v24  ;;  %v6799_v58 = vpack.c.bf16 %v259_v51, %v252_v50  ;;  %v549_v24 = vld [vmem:[#allocation5 + $0xc68] sm:$0xff]  ;;  %v556_v48 = vld [vmem:[#allocation5 + $0xca0] sm:$0xff]  ;;  %v322_v50 = vld [vmem:[#allocation5 + $0x550] sm:$0xff] }
 0x130   :  { %6782 = vmatprep.subr.bf16.mxu1 %v6781_v61  ;;  %v6801_v61 = vpack.c.bf16 %v274_v54, %v267_v53  ;;  %v329_v51 = vld [vmem:[#allocation5 + $0x588] sm:$0xff]  ;;  %v344_v54 = vld [vmem:[#allocation5 + $0x600] sm:$0xff] }
 0x131   :  { %v337_v53 = vld [vmem:[#allocation5 + $0x5c8] sm:$0xff] }
 0x132   :  { %7036 = vmatpush1.bf16.msra.mxu0 %v7035_v63  ;;  %v7055_v63 = vpack.c.bf16 %v485_v57, %v478_v56  ;;  %v548_v56 = vld [vmem:[#allocation5 + $0xc60] sm:$0xff]  ;;  %v555_v57 = vld [vmem:[#allocation5 + $0xc98] sm:$0xff] }
 0x133   :  { %7038 = vmatprep.subr.bf16.mxu0 %v7037_v2  ;;  %6784 = vmatpush1.bf16.msra.mxu1 %v6783_v5  ;;  %v7057_v2 = vpack.c.bf16 %v500_v60, %v493_v59  ;;  %v6803_v5 = vpack.c.bf16 %v273_v62, %v266_v10  ;;  %v563_v59 = vld [vmem:[#allocation5 + $0xcd8] sm:$0xff]  ;;  %v570_v60 = vld [vmem:[#allocation5 + $0xd10] sm:$0xff]  ;;  %v336_v10 = vld [vmem:[#allocation5 + $0x5c0] sm:$0xff] }
 0x134   :  { %6786 = vmatprep.subr.bf16.mxu1 %v6785_v8  ;;  %v6805_v8 = vpack.c.bf16 %v288_v1, %v281_v0  ;;  %v343_v62 = vld [vmem:[#allocation5 + $0x5f8] sm:$0xff]  ;;  %v358_v1 = vld [vmem:[#allocation5 + $0x670] sm:$0xff] }
 0x135   :  { %v351_v0 = vld [vmem:[#allocation5 + $0x638] sm:$0xff] }
 0x136   :  { %7040 = vmatpush1.bf16.msra.mxu0 %v7039_v12  ;;  %v7059_v12 = vpack.c.bf16 %v499_v4, %v492_v3  ;;  %v562_v3 = vld [vmem:[#allocation5 + $0xcd0] sm:$0xff]  ;;  %v569_v4 = vld [vmem:[#allocation5 + $0xd08] sm:$0xff] }
 0x137   :  { %7042 = vmatprep.subr.bf16.mxu0 %v7041_v16  ;;  %6788 = vmatpush1.bf16.msra.mxu1 %v6787_v19  ;;  %v7061_v16 = vpack.c.bf16 %v514_v7, %v507_v6  ;;  %v6807_v19 = vpack.c.bf16 %v287_v11, %v280_v9  ;;  %v577_v6 = vld [vmem:[#allocation5 + $0xd48] sm:$0xff]  ;;  %v584_v7 = vld [vmem:[#allocation5 + $0xd80] sm:$0xff]  ;;  %v350_v9 = vld [vmem:[#allocation5 + $0x630] sm:$0xff] }
 0x138   :  { %6790 = vmatprep.subr.bf16.mxu1 %v6789_v23  ;;  %v6809_v23 = vpack.c.bf16 %v302_v15, %v295_v13  ;;  %v357_v11 = vld [vmem:[#allocation5 + $0x668] sm:$0xff]  ;;  %v372_v15 = vld [vmem:[#allocation5 + $0x6e0] sm:$0xff] }
 0x139   :  { %v365_v13 = vld [vmem:[#allocation5 + $0x6a8] sm:$0xff] }
 0x13a   :  { %7044 = vmatpush1.bf16.msra.mxu0 %v7043_v29  ;;  %v7063_v29 = vpack.c.bf16 %v513_v18, %v506_v17  ;;  %v576_v17 = vld [vmem:[#allocation5 + $0xd40] sm:$0xff]  ;;  %v583_v18 = vld [vmem:[#allocation5 + $0xd78] sm:$0xff] }
 0x13b   :  { %7046 = vmatprep.subr.bf16.mxu0 %v7045_v32  ;;  %6792 = vmatpush1.bf16.msra.mxu1 %v6791_v35  ;;  %v7065_v32 = vpack.c.bf16 %v528_v22, %v521_v21  ;;  %v6811_v35 = vpack.c.bf16 %v301_v27, %v294_v26  ;;  %v591_v21 = vld [vmem:[#allocation5 + $0xdb8] sm:$0xff]  ;;  %v598_v22 = vld [vmem:[#allocation5 + $0xdf0] sm:$0xff]  ;;  %v364_v26 = vld [vmem:[#allocation5 + $0x6a0] sm:$0xff] }
 0x13c   :  { %6794 = vmatprep.subr.bf16.mxu1 %v6793_v38  ;;  %v6813_v38 = vpack.c.bf16 %v316_v31, %v309_v30  ;;  %v371_v27 = vld [vmem:[#allocation5 + $0x6d8] sm:$0xff]  ;;  %v386_v31 = vld [vmem:[#allocation5 + $0x750] sm:$0xff] }
 0x13d   :  { %v379_v30 = vld [vmem:[#allocation5 + $0x718] sm:$0xff] }
 0x13e   :  { %7048 = vmatpush1.bf16.msra.mxu0 %v7047_v41  ;;  %v7067_v41 = vpack.c.bf16 %v527_v34, %v520_v33  ;;  %v590_v33 = vld [vmem:[#allocation5 + $0xdb0] sm:$0xff]  ;;  %v597_v34 = vld [vmem:[#allocation5 + $0xde8] sm:$0xff] }
 0x13f   :  { %7050 = vmatprep.subr.bf16.mxu0 %v7049_v44  ;;  %6796 = vmatpush1.bf16.msra.mxu1 %v6795_v47  ;;  %v7069_v44 = vpack.c.bf16 %v542_v37, %v535_v36  ;;  %v6815_v47 = vpack.c.bf16 %v315_v40, %v308_v39  ;;  %v605_v36 = vld [vmem:[#allocation5 + $0xe28] sm:$0xff]  ;;  %v612_v37 = vld [vmem:[#allocation5 + $0xe60] sm:$0xff]  ;;  %v378_v39 = vld [vmem:[#allocation5 + $0x710] sm:$0xff] }
 0x140   :  { %6798 = vmatprep.subr.bf16.mxu1 %v6797_v49  ;;  %v6817_v49 = vpack.c.bf16 %v330_v43, %v323_v42  ;;  %v385_v40 = vld [vmem:[#allocation5 + $0x748] sm:$0xff]  ;;  %v400_v43 = vld [vmem:[#allocation5 + $0x7c0] sm:$0xff] }
 0x141   :  { %v393_v42 = vld [vmem:[#allocation5 + $0x788] sm:$0xff] }
 0x142   :  { %7052 = vmatpush1.bf16.msra.mxu0 %v7051_v52  ;;  %v7071_v52 = vpack.c.bf16 %v541_v46, %v534_v45  ;;  %v604_v45 = vld [vmem:[#allocation5 + $0xe20] sm:$0xff]  ;;  %v611_v46 = vld [vmem:[#allocation5 + $0xe58] sm:$0xff] }
 0x143   :  { %7054 = vmatprep.subr.bf16.mxu0 %v7053_v55  ;;  %6800 = vmatpush1.bf16.msra.mxu1 %v6799_v58  ;;  %v7073_v55 = vpack.c.bf16 %v556_v48, %v549_v24  ;;  %v6819_v58 = vpack.c.bf16 %v329_v51, %v322_v50  ;;  %v619_v24 = vld [vmem:[#allocation5 + $0xe98] sm:$0xff]  ;;  %v626_v48 = vld [vmem:[#allocation5 + $0xed0] sm:$0xff]  ;;  %v392_v50 = vld [vmem:[#allocation5 + $0x780] sm:$0xff] }
 0x144   :  { %6802 = vmatprep.subr.bf16.mxu1 %v6801_v61  ;;  %v6821_v61 = vpack.c.bf16 %v344_v54, %v337_v53  ;;  %v399_v51 = vld [vmem:[#allocation5 + $0x7b8] sm:$0xff]  ;;  %v414_v54 = vld [vmem:[#allocation5 + $0x830] sm:$0xff] }
 0x145   :  { %v407_v53 = vld [vmem:[#allocation5 + $0x7f8] sm:$0xff] }
 0x146   :  { %7056 = vmatpush1.bf16.msra.mxu0 %v7055_v63  ;;  %v7075_v63 = vpack.c.bf16 %v555_v57, %v548_v56  ;;  %v7093_v56 = vpack.c.bf16 %v626_v48, %v619_v24  ;;  %v618_v57 = vld [vmem:[#allocation5 + $0xe90] sm:$0xff]  ;;  %v689_v24 = vld [vmem:[#allocation5 + $0x10c8] sm:$0xff]  ;;  %v696_v48 = vld [vmem:[#allocation5 + $0x1100] sm:$0xff] }
 0x147   :  { %7058 = vmatprep.subr.bf16.mxu0 %v7057_v2  ;;  %6804 = vmatpush1.bf16.msra.mxu1 %v6803_v5  ;;  %v7077_v2 = vpack.c.bf16 %v570_v60, %v563_v59  ;;  %v6823_v5 = vpack.c.bf16 %v343_v62, %v336_v10  ;;  %v6839_v59 = vpack.c.bf16 %v399_v51, %v392_v50  ;;  %v633_v60 = vld [vmem:[#allocation5 + $0xf08] sm:$0xff]  ;;  %v406_v62 = vld [vmem:[#allocation5 + $0x7f0] sm:$0xff] }
 0x148   :  { %6806 = vmatprep.subr.bf16.mxu1 %v6805_v8  ;;  %v6825_v8 = vpack.c.bf16 %v358_v1, %v351_v0  ;;  %v6841_v10 = vpack.c.bf16 %v414_v54, %v407_v53  ;;  %v421_v1 = vld [vmem:[#allocation5 + $0x868] sm:$0xff]  ;;  %v462_v50 = vld [vmem:[#allocation5 + $0x9b0] sm:$0xff]  ;;  %v484_v54 = vld [vmem:[#allocation5 + $0xa60] sm:$0xff] }
 0x149   :  { %v469_v51 = vld [vmem:[#allocation5 + $0x9e8] sm:$0xff] }
 0x14a   :  { %7060 = vmatpush1.bf16.msra.mxu0 %v7059_v12  ;;  %v7079_v12 = vpack.c.bf16 %v569_v4, %v562_v3  ;;  %v632_v4 = vld [vmem:[#allocation5 + $0xf00] sm:$0xff]  ;;  %v477_v53 = vld [vmem:[#allocation5 + $0xa28] sm:$0xff] }
 0x14b   :  { %7062 = vmatprep.subr.bf16.mxu0 %v7061_v16  ;;  %6808 = vmatpush1.bf16.msra.mxu1 %v6807_v19  ;;  %v7081_v16 = vpack.c.bf16 %v584_v7, %v577_v6  ;;  %v6827_v19 = vpack.c.bf16 %v357_v11, %v350_v9  ;;  %v647_v7 = vld [vmem:[#allocation5 + $0xf78] sm:$0xff] }
 0x14c   :  { %6810 = vmatprep.subr.bf16.mxu1 %v6809_v23  ;;  %v6829_v23 = vpack.c.bf16 %v372_v15, %v365_v13  ;;  %v427_v11 = vld [vmem:[#allocation5 + $0x898] sm:$0xff]  ;;  %v442_v15 = vld [vmem:[#allocation5 + $0x910] sm:$0xff] }
 0x14d   :  { %v435_v13 = vld [vmem:[#allocation5 + $0x8d8] sm:$0xff] }
 0x14e   :  { %7064 = vmatpush1.bf16.msra.mxu0 %v7063_v29  ;;  %v7083_v29 = vpack.c.bf16 %v583_v18, %v576_v17  ;;  %v646_v17 = vld [vmem:[#allocation5 + $0xf70] sm:$0xff]  ;;  %v653_v18 = vld [vmem:[#allocation5 + $0xfa8] sm:$0xff] }
 0x14f   :  { %7066 = vmatprep.subr.bf16.mxu0 %v7065_v32  ;;  %6812 = vmatpush1.bf16.msra.mxu1 %v6811_v35  ;;  %v7085_v32 = vpack.c.bf16 %v598_v22, %v591_v21  ;;  %v6831_v35 = vpack.c.bf16 %v371_v27, %v364_v26  ;;  %v661_v21 = vld [vmem:[#allocation5 + $0xfe8] sm:$0xff]  ;;  %v668_v22 = vld [vmem:[#allocation5 + $0x1020] sm:$0xff]  ;;  %v434_v26 = vld [vmem:[#allocation5 + $0x8d0] sm:$0xff] }
 0x150   :  { %6814 = vmatprep.subr.bf16.mxu1 %v6813_v38  ;;  %v6833_v38 = vpack.c.bf16 %v386_v31, %v379_v30  ;;  %v441_v27 = vld [vmem:[#allocation5 + $0x908] sm:$0xff]  ;;  %v456_v31 = vld [vmem:[#allocation5 + $0x980] sm:$0xff] }
 0x151   :  { %v449_v30 = vld [vmem:[#allocation5 + $0x948] sm:$0xff] }
 0x152   :  { %7068 = vmatpush1.bf16.msra.mxu0 %v7067_v41  ;;  %v7087_v41 = vpack.c.bf16 %v597_v34, %v590_v33  ;;  %v660_v33 = vld [vmem:[#allocation5 + $0xfe0] sm:$0xff]  ;;  %v667_v34 = vld [vmem:[#allocation5 + $0x1018] sm:$0xff] }
 0x153   :  { %7070 = vmatprep.subr.bf16.mxu0 %v7069_v44  ;;  %6816 = vmatpush1.bf16.msra.mxu1 %v6815_v47  ;;  %v7089_v44 = vpack.c.bf16 %v612_v37, %v605_v36  ;;  %v6835_v47 = vpack.c.bf16 %v385_v40, %v378_v39  ;;  %v675_v36 = vld [vmem:[#allocation5 + $0x1058] sm:$0xff]  ;;  %v682_v37 = vld [vmem:[#allocation5 + $0x1090] sm:$0xff]  ;;  %v448_v39 = vld [vmem:[#allocation5 + $0x940] sm:$0xff] }
 0x154   :  { %6818 = vmatprep.subr.bf16.mxu1 %v6817_v49  ;;  %v6837_v49 = vpack.c.bf16 %v400_v43, %v393_v42  ;;  %v455_v40 = vld [vmem:[#allocation5 + $0x978] sm:$0xff]  ;;  %v470_v43 = vld [vmem:[#allocation5 + $0x9f0] sm:$0xff] }
 0x155   :  { %v463_v42 = vld [vmem:[#allocation5 + $0x9b8] sm:$0xff] }
 0x156   :  { %7072 = vmatpush1.bf16.msra.mxu0 %v7071_v52  ;;  %v7091_v52 = vpack.c.bf16 %v611_v46, %v604_v45  ;;  %v674_v45 = vld [vmem:[#allocation5 + $0x1050] sm:$0xff]  ;;  %v681_v46 = vld [vmem:[#allocation5 + $0x1088] sm:$0xff] }
 0x157   :  { %7074 = vmatprep.subr.bf16.mxu0 %v7073_v55  ;;  %6820 = vmatpush1.bf16.msra.mxu1 %v6819_v58  ;;  %v9043_v55 = vld [vmem:[#allocation2] sm:$0xff] }
 0x158   :  { %6822 = vmatprep.subr.bf16.mxu1 %v6821_v61  ;;  %v625_v58 = vld [vmem:[#allocation5 + $0xec8] sm:$0xff]  ;;  %v640_v61 = vld [vmem:[#allocation5 + $0xf40] sm:$0xff] }
 0x159   :  { %v7095_v0 = vpack.c.bf16 %v625_v58, %v618_v57  ;;  %v7097_v3 = vpack.c.bf16 %v640_v61, %v633_v60  ;;  %v695_v57 = vld [vmem:[#allocation5 + $0x10f8] sm:$0xff]  ;;  %v6859_v58 = vpack.c.bf16 %v469_v51, %v462_v50  ;;  %v710_v60 = vld [vmem:[#allocation5 + $0x1170] sm:$0xff]  ;;  %v6861_v61 = vpack.c.bf16 %v484_v54, %v477_v53 }
 0x15a   :  { %7076 = vmatpush1.bf16.msra.mxu0 %v7075_v63  ;;  %v413_v63 = vld [vmem:[#allocation5 + $0x828] sm:$0xff]  ;;  %v539_v50 = vld [vmem:[#allocation5 + $0xc18] sm:$0xff]  ;;  %v554_v53 = vld [vmem:[#allocation5 + $0xc90] sm:$0xff] }
 0x15b   :  { %7078 = vmatprep.subr.bf16.mxu0 %v7077_v2  ;;  %6824 = vmatpush1.bf16.msra.mxu1 %v6823_v5  ;;  %v428_v2 = vld [vmem:[#allocation5 + $0x8a0] sm:$0xff]  ;;  %v639_v5 = vld [vmem:[#allocation5 + $0xf38] sm:$0xff]  ;;  %v6843_v6 = vpack.c.bf16 %v413_v63, %v406_v62 }
 0x15c   :  { %6826 = vmatprep.subr.bf16.mxu1 %v6825_v8  ;;  %v654_v8 = vld [vmem:[#allocation5 + $0xfb0] sm:$0xff]  ;;  %v6845_v9 = vpack.c.bf16 %v428_v2, %v421_v1  ;;  %v483_v62 = vld [vmem:[#allocation5 + $0xa58] sm:$0xff] }
 0x15d   :  { %v498_v1 = vld [vmem:[#allocation5 + $0xad0] sm:$0xff] }
 0x15e   :  { %7080 = vmatpush1.bf16.msra.mxu0 %v7079_v12  ;;  %v7099_v12 = vpack.c.bf16 %v639_v5, %v632_v4  ;;  %v709_v4 = vld [vmem:[#allocation5 + $0x1168] sm:$0xff] }
 0x15f   :  { %7082 = vmatprep.subr.bf16.mxu0 %v7081_v16  ;;  %6828 = vmatpush1.bf16.msra.mxu1 %v6827_v19  ;;  %v7101_v16 = vpack.c.bf16 %v654_v8, %v647_v7  ;;  %v724_v7 = vld [vmem:[#allocation5 + $0x11e0] sm:$0xff] }
 0x160   :  { %6830 = vmatprep.subr.bf16.mxu1 %v6829_v23  ;;  %v6849_v23 = vpack.c.bf16 %v442_v15, %v435_v13  ;;  %v512_v13 = vld [vmem:[#allocation5 + $0xb40] sm:$0xff] }
 0x162   :  { %7084 = vmatpush1.bf16.msra.mxu0 %v7083_v29  ;;  %v7103_v29 = vpack.c.bf16 %v653_v18, %v646_v17  ;;  %v723_v17 = vld [vmem:[#allocation5 + $0x11d8] sm:$0xff] }
 0x163   :  { %7086 = vmatprep.subr.bf16.mxu0 %v7085_v32  ;;  %6832 = vmatpush1.bf16.msra.mxu1 %v6831_v35  ;;  %v7105_v32 = vpack.c.bf16 %v668_v22, %v661_v21  ;;  %v6851_v35 = vpack.c.bf16 %v441_v27, %v434_v26  ;;  %v738_v21 = vld [vmem:[#allocation5 + $0x1250] sm:$0xff]  ;;  %v511_v26 = vld [vmem:[#allocation5 + $0xb38] sm:$0xff] }
 0x164   :  { %6834 = vmatprep.subr.bf16.mxu1 %v6833_v38  ;;  %v6853_v38 = vpack.c.bf16 %v456_v31, %v449_v30  ;;  %v526_v30 = vld [vmem:[#allocation5 + $0xbb0] sm:$0xff] }
 0x166   :  { %7088 = vmatpush1.bf16.msra.mxu0 %v7087_v41  ;;  %1148 = vmatmul.mubr.f32.vlgmr.msra.gmra.mrb[2].mxu1 %v9043_v55  ;;  %v7107_v41 = vpack.c.bf16 %v667_v34, %v660_v33  ;;  %v7113_v55 = vpack.c.bf16 %v696_v48, %v689_v24  ;;  %v737_v33 = vld [vmem:[#allocation5 + $0x1248] sm:$0xff]  ;;  %v766_v24 = vld [vmem:[#allocation5 + $0x1330] sm:$0xff] }
 0x167   :  { %7090 = vmatprep.subr.bf16.mxu0 %v7089_v44  ;;  %6836 = vmatpush1.bf16.msra.mxu1 %v6835_v47  ;;  %v7109_v44 = vpack.c.bf16 %v682_v37, %v675_v36  ;;  %v6855_v47 = vpack.c.bf16 %v455_v40, %v448_v39  ;;  %v752_v36 = vld [vmem:[#allocation5 + $0x12c0] sm:$0xff]  ;;  %v525_v39 = vld [vmem:[#allocation5 + $0xba8] sm:$0xff] }
 0x168   :  { %1218 = vmatprep.mubr.f32.mxu1 %v9500_v25  ;;  %6838 = vmatprep.subr.bf16.mxu1 %v6837_v49  ;;  %v6857_v49 = vpack.c.bf16 %v470_v43, %v463_v42  ;;  %v540_v42 = vld [vmem:[#allocation5 + $0xc20] sm:$0xff] }
 0x169   :  { %1432 = vmatmul.mubr.f32.vlgmr.msra.gmra.mrb[2].mxu0 %v9496_v20  ;;  %v420_v20 = vld [vmem:[#allocation5 + $0x860] sm:$0xff] }
 0x16a   :  { %7092 = vmatpush1.bf16.msra.mxu0 %v7091_v52  ;;  %1502 = vmatprep.mubr.f32.mxu0 %v9490_v28  ;;  %v6847_v19 = vpack.c.bf16 %v427_v11, %v420_v20  ;;  %v7111_v52 = vpack.c.bf16 %v681_v46, %v674_v45  ;;  %v497_v20 = vld [vmem:[#allocation5 + $0xac8] sm:$0xff]  ;;  %v751_v45 = vld [vmem:[#allocation5 + $0x12b8] sm:$0xff] }
 0x16b   :  { %7094 = vmatprep.subr.bf16.mxu0 %v7093_v56  ;;  %6840 = vmatpush1.bf16.msra.mxu1 %v6839_v59  ;;  %v688_v56 = vld [vmem:[#allocation5 + $0x10c0] sm:$0xff]  ;;  %v703_v59 = vld [vmem:[#allocation5 + $0x1138] sm:$0xff] }
 0x16c   :  { %6842 = vmatprep.subr.bf16.mxu1 %v6841_v10  ;;  %v476_v10 = vld [vmem:[#allocation5 + $0xa20] sm:$0xff]  ;;  %v7115_v63 = vpack.c.bf16 %v695_v57, %v688_v56  ;;  %v7117_v2 = vpack.c.bf16 %v710_v60, %v703_v59  ;;  %v765_v56 = vld [vmem:[#allocation5 + $0x1328] sm:$0xff] }
 0x16d   :  { %v6863_v5 = vpack.c.bf16 %v483_v62, %v476_v10  ;;  %v780_v59 = vld [vmem:[#allocation5 + $0x13a0] sm:$0xff]  ;;  %v553_v10 = vld [vmem:[#allocation5 + $0xc88] sm:$0xff] }
 0x16e   :  { %7096 = vmatpush1.bf16.msra.mxu0 %v7095_v0  ;;  %v491_v0 = vld [vmem:[#allocation5 + $0xa98] sm:$0xff] }
 0x16f   :  { %7098 = vmatprep.subr.bf16.mxu0 %v7097_v3  ;;  %6844 = vmatpush1.bf16.msra.mxu1 %v6843_v6  ;;  %v702_v3 = vld [vmem:[#allocation5 + $0x1130] sm:$0xff]  ;;  %v717_v6 = vld [vmem:[#allocation5 + $0x11a8] sm:$0xff]  ;;  %v6865_v8 = vpack.c.bf16 %v498_v1, %v491_v0  ;;  %v568_v0 = vld [vmem:[#allocation5 + $0xd00] sm:$0xff] }
 0x170   :  { %6846 = vmatprep.subr.bf16.mxu1 %v6845_v9  ;;  %v490_v9 = vld [vmem:[#allocation5 + $0xa90] sm:$0xff]  ;;  %v7119_v11 = vpack.c.bf16 %v709_v4, %v702_v3  ;;  %v7121_v15 = vpack.c.bf16 %v724_v7, %v717_v6  ;;  %v779_v3 = vld [vmem:[#allocation5 + $0x1398] sm:$0xff] }
 0x171   :  { %v6867_v18 = vpack.c.bf16 %v497_v20, %v490_v9  ;;  %v794_v6 = vld [vmem:[#allocation5 + $0x1410] sm:$0xff]  ;;  %v567_v9 = vld [vmem:[#allocation5 + $0xcf8] sm:$0xff] }
 0x172   :  { %7100 = vmatpush1.bf16.msra.mxu0 %v7099_v12  ;;  %v505_v12 = vld [vmem:[#allocation5 + $0xb08] sm:$0xff] }
 0x173   :  { %7102 = vmatprep.subr.bf16.mxu0 %v7101_v16  ;;  %6848 = vmatpush1.bf16.msra.mxu1 %v6847_v19  ;;  %v716_v16 = vld [vmem:[#allocation5 + $0x11a0] sm:$0xff]  ;;  %v731_v19 = vld [vmem:[#allocation5 + $0x1218] sm:$0xff]  ;;  %v6869_v22 = vpack.c.bf16 %v512_v13, %v505_v12  ;;  %v582_v12 = vld [vmem:[#allocation5 + $0xd70] sm:$0xff] }
 0x174   :  { %6850 = vmatprep.subr.bf16.mxu1 %v6849_v23  ;;  %v504_v23 = vld [vmem:[#allocation5 + $0xb00] sm:$0xff]  ;;  %v7123_v27 = vpack.c.bf16 %v723_v17, %v716_v16  ;;  %v7125_v31 = vpack.c.bf16 %v738_v21, %v731_v19  ;;  %v793_v16 = vld [vmem:[#allocation5 + $0x1408] sm:$0xff] }
 0x175   :  { %v6871_v34 = vpack.c.bf16 %v511_v26, %v504_v23  ;;  %v808_v19 = vld [vmem:[#allocation5 + $0x1480] sm:$0xff]  ;;  %v581_v23 = vld [vmem:[#allocation5 + $0xd68] sm:$0xff] }
 0x176   :  { %7104 = vmatpush1.bf16.msra.mxu0 %v7103_v29  ;;  %v519_v29 = vld [vmem:[#allocation5 + $0xb78] sm:$0xff] }
 0x177   :  { %7106 = vmatprep.subr.bf16.mxu0 %v7105_v32  ;;  %6852 = vmatpush1.bf16.msra.mxu1 %v6851_v35  ;;  %v730_v32 = vld [vmem:[#allocation5 + $0x1210] sm:$0xff]  ;;  %v745_v35 = vld [vmem:[#allocation5 + $0x1288] sm:$0xff]  ;;  %v6873_v37 = vpack.c.bf16 %v526_v30, %v519_v29  ;;  %v596_v29 = vld [vmem:[#allocation5 + $0xde0] sm:$0xff] }
 0x178   :  { %6854 = vmatprep.subr.bf16.mxu1 %v6853_v38  ;;  %v518_v38 = vld [vmem:[#allocation5 + $0xb70] sm:$0xff]  ;;  %v7127_v40 = vpack.c.bf16 %v737_v33, %v730_v32  ;;  %v7129_v43 = vpack.c.bf16 %v752_v36, %v745_v35  ;;  %v807_v32 = vld [vmem:[#allocation5 + $0x1478] sm:$0xff] }
 0x179   :  { %v6875_v46 = vpack.c.bf16 %v525_v39, %v518_v38  ;;  %v822_v35 = vld [vmem:[#allocation5 + $0x14f0] sm:$0xff]  ;;  %v595_v38 = vld [vmem:[#allocation5 + $0xdd8] sm:$0xff] }
 0x17a   :  { %7108 = vmatpush1.bf16.msra.mxu0 %v7107_v41  ;;  %v533_v41 = vld [vmem:[#allocation5 + $0xbe8] sm:$0xff] }
 0x17b   :  { %7110 = vmatprep.subr.bf16.mxu0 %v7109_v44  ;;  %6856 = vmatpush1.bf16.msra.mxu1 %v6855_v47  ;;  %v744_v44 = vld [vmem:[#allocation5 + $0x1280] sm:$0xff]  ;;  %v759_v47 = vld [vmem:[#allocation5 + $0x12f8] sm:$0xff]  ;;  %v6877_v48 = vpack.c.bf16 %v540_v42, %v533_v41  ;;  %v610_v41 = vld [vmem:[#allocation5 + $0xe50] sm:$0xff] }
 0x17c   :  { %6858 = vmatprep.subr.bf16.mxu1 %v6857_v49  ;;  %v532_v49 = vld [vmem:[#allocation5 + $0xbe0] sm:$0xff]  ;;  %v7131_v51 = vpack.c.bf16 %v751_v45, %v744_v44  ;;  %v7133_v54 = vpack.c.bf16 %v766_v24, %v759_v47  ;;  %v821_v44 = vld [vmem:[#allocation5 + $0x14e8] sm:$0xff]  ;;  %v1750_v47 = vld [vmem:[#allocation8 + $0x50] sm:$0xff] }
 0x17d   :  { %v6879_v57 = vpack.c.bf16 %v539_v50, %v532_v49  ;;  %v609_v49 = vld [vmem:[#allocation5 + $0xe48] sm:$0xff] }
 0x17e   :  { %7112 = vmatpush1.bf16.msra.mxu0 %v7111_v52  ;;  %v547_v52 = vld [vmem:[#allocation5 + $0xc58] sm:$0xff] }
 0x17f   :  { %7114 = vmatprep.subr.bf16.mxu0 %v7113_v55  ;;  %6860 = vmatpush1.bf16.msra.mxu1 %v6859_v58  ;;  %v758_v55 = vld [vmem:[#allocation5 + $0x12f0] sm:$0xff]  ;;  %v773_v58 = vld [vmem:[#allocation5 + $0x1368] sm:$0xff]  ;;  %v6881_v60 = vpack.c.bf16 %v554_v53, %v547_v52  ;;  %v624_v52 = vld [vmem:[#allocation5 + $0xec0] sm:$0xff] }
 0x180   :  { %6862 = vmatprep.subr.bf16.mxu1 %v6861_v61  ;;  %v546_v61 = vld [vmem:[#allocation5 + $0xc50] sm:$0xff]  ;;  %v7135_v62 = vpack.c.bf16 %v765_v56, %v758_v55  ;;  %v7137_v1 = vpack.c.bf16 %v780_v59, %v773_v58  ;;  %v1764_v58 = vld [vmem:[#allocation8 + $0xc0] sm:$0xff] }
 0x181   :  { %v6883_v4 = vpack.c.bf16 %v553_v10, %v546_v61  ;;  %v1749_v55 = vld [vmem:[#allocation8 + $0x48] sm:$0xff]  ;;  %v623_v61 = vld [vmem:[#allocation5 + $0xeb8] sm:$0xff] }
 0x182   :  { %7116 = vmatpush1.bf16.msra.mxu0 %v7115_v63  ;;  %v561_v63 = vld [vmem:[#allocation5 + $0xcc8] sm:$0xff]  ;;  %v631_v10 = vld [vmem:[#allocation5 + $0xef8] sm:$0xff] }
 0x183   :  { %7118 = vmatprep.subr.bf16.mxu0 %v7117_v2  ;;  %6864 = vmatpush1.bf16.msra.mxu1 %v6863_v5  ;;  %v772_v2 = vld [vmem:[#allocation5 + $0x1360] sm:$0xff]  ;;  %v787_v5 = vld [vmem:[#allocation5 + $0x13d8] sm:$0xff]  ;;  %v6885_v7 = vpack.c.bf16 %v568_v0, %v561_v63  ;;  %v9510_v0 = vld [vmem:[#allocation2 + $0x8] sm:$0xff] }
 0x184   :  { %6866 = vmatprep.subr.bf16.mxu1 %v6865_v8  ;;  %v560_v8 = vld [vmem:[#allocation5 + $0xcc0] sm:$0xff]  ;;  %v7139_v20 = vpack.c.bf16 %v779_v3, %v772_v2  ;;  %v7141_v13 = vpack.c.bf16 %v794_v6, %v787_v5  ;;  %v1756_v2 = vld [vmem:[#allocation8 + $0x80] sm:$0xff]  ;;  %v1778_v6 = vld [vmem:[#allocation8 + $0x130] sm:$0xff] }
 0x185   :  { %v6887_v17 = vpack.c.bf16 %v567_v9, %v560_v8  ;;  %v1763_v3 = vld [vmem:[#allocation8 + $0xb8] sm:$0xff]  ;;  %v630_v9 = vld [vmem:[#allocation5 + $0xef0] sm:$0xff] }
 0x186   :  { %7120 = vmatpush1.bf16.msra.mxu0 %v7119_v11  ;;  %v575_v11 = vld [vmem:[#allocation5 + $0xd38] sm:$0xff]  ;;  %v1771_v5 = vld [vmem:[#allocation8 + $0xf8] sm:$0xff] }
 0x187   :  { %7122 = vmatprep.subr.bf16.mxu0 %v7121_v15  ;;  %6868 = vmatpush1.bf16.msra.mxu1 %v6867_v18  ;;  %v786_v15 = vld [vmem:[#allocation5 + $0x13d0] sm:$0xff]  ;;  %v801_v18 = vld [vmem:[#allocation5 + $0x1448] sm:$0xff]  ;;  %v6889_v21 = vpack.c.bf16 %v582_v12, %v575_v11  ;;  %v652_v12 = vld [vmem:[#allocation5 + $0xfa0] sm:$0xff] }
 0x188   :  { %6870 = vmatprep.subr.bf16.mxu1 %v6869_v22  ;;  %v574_v22 = vld [vmem:[#allocation5 + $0xd30] sm:$0xff]  ;;  %v7143_v26 = vpack.c.bf16 %v793_v16, %v786_v15  ;;  %v7145_v30 = vpack.c.bf16 %v808_v19, %v801_v18  ;;  %v645_v11 = vld [vmem:[#allocation5 + $0xf68] sm:$0xff]  ;;  %v7481_v15 = vpack.c.bf16 %v1778_v6, %v1771_v5  ;;  %v1770_v16 = vld [vmem:[#allocation8 + $0xf0] sm:$0xff] }
 0x189   :  { %v6891_v33 = vpack.c.bf16 %v581_v23, %v574_v22  ;;  %v1785_v19 = vld [vmem:[#allocation8 + $0x168] sm:$0xff]  ;;  %v6909_v22 = vpack.c.bf16 %v652_v12, %v645_v11  ;;  %v644_v23 = vld [vmem:[#allocation5 + $0xf60] sm:$0xff]  ;;  %v707_v12 = vld [vmem:[#allocation5 + $0x1158] sm:$0xff] }
 0x18a   :  { %7124 = vmatpush1.bf16.msra.mxu0 %v7123_v27  ;;  %v589_v27 = vld [vmem:[#allocation5 + $0xda8] sm:$0xff]  ;;  %v1841_v6 = vld [vmem:[#allocation8 + $0x328] sm:$0xff]  ;;  %v700_v11 = vld [vmem:[#allocation5 + $0x1120] sm:$0xff] }
 0x18b   :  { %7126 = vmatprep.subr.bf16.mxu0 %v7125_v31  ;;  %6872 = vmatpush1.bf16.msra.mxu1 %v6871_v34  ;;  %v800_v31 = vld [vmem:[#allocation5 + $0x1440] sm:$0xff]  ;;  %v815_v34 = vld [vmem:[#allocation5 + $0x14b8] sm:$0xff]  ;;  %v6893_v36 = vpack.c.bf16 %v596_v29, %v589_v27  ;;  %v666_v29 = vld [vmem:[#allocation5 + $0x1010] sm:$0xff] }
 0x18c   :  { %6874 = vmatprep.subr.bf16.mxu1 %v6873_v37  ;;  %v588_v37 = vld [vmem:[#allocation5 + $0xda0] sm:$0xff]  ;;  %v7147_v39 = vpack.c.bf16 %v807_v32, %v800_v31  ;;  %v7149_v42 = vpack.c.bf16 %v822_v35, %v815_v34  ;;  %v659_v27 = vld [vmem:[#allocation5 + $0xfd8] sm:$0xff]  ;;  %v1784_v32 = vld [vmem:[#allocation8 + $0x160] sm:$0xff] }
 0x18d   :  { %v6895_v45 = vpack.c.bf16 %v595_v38, %v588_v37  ;;  %v1799_v35 = vld [vmem:[#allocation8 + $0x1d8] sm:$0xff]  ;;  %v6913_v37 = vpack.c.bf16 %v666_v29, %v659_v27  ;;  %v658_v38 = vld [vmem:[#allocation5 + $0xfd0] sm:$0xff] }
 0x18e   :  { %7128 = vmatpush1.bf16.msra.mxu0 %v7127_v40  ;;  %v603_v40 = vld [vmem:[#allocation5 + $0xe18] sm:$0xff]  ;;  %v714_v29 = vld [vmem:[#allocation5 + $0x1190] sm:$0xff] }
 0x18f   :  { %7130 = vmatprep.subr.bf16.mxu0 %v7129_v43  ;;  %6876 = vmatpush1.bf16.msra.mxu1 %v6875_v46  ;;  %v814_v43 = vld [vmem:[#allocation5 + $0x14b0] sm:$0xff]  ;;  %v1743_v46 = vld [vmem:[#allocation8 + $0x18] sm:$0xff]  ;;  %v6897_v24 = vpack.c.bf16 %v610_v41, %v603_v40  ;;  %v673_v40 = vld [vmem:[#allocation5 + $0x1048] sm:$0xff] }
 0x190   :  { %6878 = vmatprep.subr.bf16.mxu1 %v6877_v48  ;;  %v602_v48 = vld [vmem:[#allocation5 + $0xe10] sm:$0xff]  ;;  %v7151_v50 = vpack.c.bf16 %v821_v44, %v814_v43  ;;  %v7473_v53 = vpack.c.bf16 %v1750_v47, %v1743_v46  ;;  %v680_v41 = vld [vmem:[#allocation5 + $0x1080] sm:$0xff]  ;;  %v1798_v44 = vld [vmem:[#allocation8 + $0x1d0] sm:$0xff] }
 0x191   :  { %v6899_v56 = vpack.c.bf16 %v609_v49, %v602_v48  ;;  %v1813_v47 = vld [vmem:[#allocation8 + $0x248] sm:$0xff]  ;;  %v6917_v48 = vpack.c.bf16 %v680_v41, %v673_v40  ;;  %v672_v49 = vld [vmem:[#allocation5 + $0x1040] sm:$0xff] }
 0x192   :  { %7132 = vmatpush1.bf16.msra.mxu0 %v7131_v51  ;;  %v617_v51 = vld [vmem:[#allocation5 + $0xe88] sm:$0xff]  ;;  %v728_v41 = vld [vmem:[#allocation5 + $0x1200] sm:$0xff] }
 0x193   :  { %7134 = vmatprep.subr.bf16.mxu0 %v7133_v54  ;;  %6880 = vmatpush1.bf16.msra.mxu1 %v6879_v57  ;;  %v1742_v54 = vld [vmem:[#allocation8 + $0x10] sm:$0xff]  ;;  %v1757_v57 = vld [vmem:[#allocation8 + $0x88] sm:$0xff]  ;;  %v6901_v59 = vpack.c.bf16 %v624_v52, %v617_v51 }
 0x194   :  { %6882 = vmatprep.subr.bf16.mxu1 %v6881_v60  ;;  %v616_v60 = vld [vmem:[#allocation5 + $0xe80] sm:$0xff]  ;;  %v7475_v63 = vpack.c.bf16 %v1749_v55, %v1742_v54  ;;  %v687_v51 = vld [vmem:[#allocation5 + $0x10b8] sm:$0xff]  ;;  %v694_v52 = vld [vmem:[#allocation5 + $0x10f0] sm:$0xff] }
 0x195   :  { %v1812_v55 = vld [vmem:[#allocation8 + $0x240] sm:$0xff] }
 0x196   :  { %7136 = vmatpush1.bf16.msra.mxu0 %v7135_v62  ;;  %v638_v62 = vld [vmem:[#allocation5 + $0xf30] sm:$0xff] }
 0x197   :  { %7138 = vmatprep.subr.bf16.mxu0 %v7137_v1  ;;  %6884 = vmatpush1.bf16.msra.mxu1 %v6883_v4  ;;  %v7477_v1 = vpack.c.bf16 %v1764_v58, %v1757_v57  ;;  %v6903_v4 = vpack.c.bf16 %v623_v61, %v616_v60  ;;  %v6905_v8 = vpack.c.bf16 %v638_v62, %v631_v10  ;;  %v1827_v58 = vld [vmem:[#allocation8 + $0x2b8] sm:$0xff]  ;;  %v686_v61 = vld [vmem:[#allocation5 + $0x10b0] sm:$0xff]  ;;  %v693_v10 = vld [vmem:[#allocation5 + $0x10e8] sm:$0xff] }
 0x198   :  { %6886 = vmatprep.subr.bf16.mxu1 %v6885_v7  ;;  %v9514_v7 = vld [vmem:[#allocation2 + $0x10] sm:$0xff]  ;;  %v6921_v60 = vpack.c.bf16 %v694_v52, %v687_v51  ;;  %v701_v62 = vld [vmem:[#allocation5 + $0x1128] sm:$0xff]  ;;  %v6923_v5 = vpack.c.bf16 %v693_v10, %v686_v61  ;;  %v742_v52 = vld [vmem:[#allocation5 + $0x1270] sm:$0xff] }
 0x199   :  { %v1897_v61 = vld [vmem:[#allocation8 + $0x4e8] sm:$0xff]  ;;  %v1904_v10 = vld [vmem:[#allocation8 + $0x520] sm:$0xff] }
 0x19a   :  { %7140 = vmatpush1.bf16.msra.mxu0 %v7139_v20  ;;  %v637_v20 = vld [vmem:[#allocation5 + $0xf28] sm:$0xff] }
 0x19b   :  { %7142 = vmatprep.subr.bf16.mxu0 %v7141_v13  ;;  %6888 = vmatpush1.bf16.msra.mxu1 %v6887_v17  ;;  %v7479_v13 = vpack.c.bf16 %v1763_v3, %v1756_v2  ;;  %v1777_v17 = vld [vmem:[#allocation8 + $0x128] sm:$0xff]  ;;  %v6907_v18 = vpack.c.bf16 %v637_v20, %v630_v9  ;;  %v1826_v3 = vld [vmem:[#allocation8 + $0x2b0] sm:$0xff] }
 0x19c   :  { %6890 = vmatprep.subr.bf16.mxu1 %v6889_v21  ;;  %v1792_v21 = vld [vmem:[#allocation8 + $0x1a0] sm:$0xff] }
 0x19d   :  { %v7485_v31 = vpack.c.bf16 %v1792_v21, %v1785_v19  ;;  %v1840_v19 = vld [vmem:[#allocation8 + $0x320] sm:$0xff]  ;;  %v1847_v21 = vld [vmem:[#allocation8 + $0x358] sm:$0xff] }
 0x19e   :  { %7144 = vmatpush1.bf16.msra.mxu0 %v7143_v26  ;;  %v651_v26 = vld [vmem:[#allocation5 + $0xf98] sm:$0xff] }
 0x19f   :  { %7146 = vmatprep.subr.bf16.mxu0 %v7145_v30  ;;  %6892 = vmatpush1.bf16.msra.mxu1 %v6891_v33  ;;  %v7483_v30 = vpack.c.bf16 %v1777_v17, %v1770_v16  ;;  %v1791_v33 = vld [vmem:[#allocation8 + $0x198] sm:$0xff]  ;;  %v6911_v34 = vpack.c.bf16 %v651_v26, %v644_v23  ;;  %v722_v16 = vld [vmem:[#allocation5 + $0x11d0] sm:$0xff]  ;;  %v1862_v26 = vld [vmem:[#allocation8 + $0x3d0] sm:$0xff] }
 0x1a0   :  { %6894 = vmatprep.subr.bf16.mxu1 %v6893_v36  ;;  %v1806_v36 = vld [vmem:[#allocation8 + $0x210] sm:$0xff]  ;;  %v1855_v23 = vld [vmem:[#allocation8 + $0x398] sm:$0xff] }
 0x1a1   :  { %v7489_v43 = vpack.c.bf16 %v1806_v36, %v1799_v35  ;;  %v1854_v35 = vld [vmem:[#allocation8 + $0x390] sm:$0xff]  ;;  %v1861_v36 = vld [vmem:[#allocation8 + $0x3c8] sm:$0xff] }
 0x1a2   :  { %7148 = vmatpush1.bf16.msra.mxu0 %v7147_v39  ;;  %v665_v39 = vld [vmem:[#allocation5 + $0x1008] sm:$0xff] }
 0x1a3   :  { %7150 = vmatprep.subr.bf16.mxu0 %v7149_v42  ;;  %6896 = vmatpush1.bf16.msra.mxu1 %v6895_v45  ;;  %v7487_v42 = vpack.c.bf16 %v1791_v33, %v1784_v32  ;;  %v1805_v45 = vld [vmem:[#allocation8 + $0x208] sm:$0xff]  ;;  %v6915_v46 = vpack.c.bf16 %v665_v39, %v658_v38  ;;  %v736_v32 = vld [vmem:[#allocation5 + $0x1240] sm:$0xff]  ;;  %v7503_v33 = vpack.c.bf16 %v1847_v21, %v1840_v19  ;;  %v1876_v39 = vld [vmem:[#allocation8 + $0x440] sm:$0xff] }
 0x1a4   :  { %6898 = vmatprep.subr.bf16.mxu1 %v6897_v24  ;;  %v1820_v24 = vld [vmem:[#allocation8 + $0x280] sm:$0xff]  ;;  %v1869_v38 = vld [vmem:[#allocation8 + $0x408] sm:$0xff]  ;;  %v792_v19 = vld [vmem:[#allocation5 + $0x1400] sm:$0xff] }
 0x1a5   :  { %v7493_v54 = vpack.c.bf16 %v1820_v24, %v1813_v47  ;;  %v1868_v47 = vld [vmem:[#allocation8 + $0x400] sm:$0xff]  ;;  %v1875_v24 = vld [vmem:[#allocation8 + $0x438] sm:$0xff] }
 0x1a6   :  { %7152 = vmatpush1.bf16.msra.mxu0 %v7151_v50  ;;  %1219 = vmatmul.mubr.f32.vlgmr.msra.gmra.mrb[2].mxu1 %v9510_v0  ;;  %v679_v50 = vld [vmem:[#allocation5 + $0x1078] sm:$0xff] }
 0x1a7   :  { %7474 = vmatprep.subr.bf16.mxu0 %v7473_v53  ;;  %6900 = vmatpush1.bf16.msra.mxu1 %v6899_v56  ;;  %v7491_v53 = vpack.c.bf16 %v1805_v45, %v1798_v44  ;;  %v1819_v56 = vld [vmem:[#allocation8 + $0x278] sm:$0xff]  ;;  %v6919_v57 = vpack.c.bf16 %v679_v50, %v672_v49  ;;  %v750_v44 = vld [vmem:[#allocation5 + $0x12b0] sm:$0xff]  ;;  %v7507_v45 = vpack.c.bf16 %v1861_v36, %v1854_v35  ;;  %v1890_v50 = vld [vmem:[#allocation8 + $0x4b0] sm:$0xff] }
 0x1a8   :  { %1289 = vmatprep.mubr.f32.mxu1 %v9490_v28  ;;  %6902 = vmatprep.subr.bf16.mxu1 %v6901_v59  ;;  %v1834_v59 = vld [vmem:[#allocation8 + $0x2f0] sm:$0xff]  ;;  %v1883_v49 = vld [vmem:[#allocation8 + $0x478] sm:$0xff]  ;;  %v806_v35 = vld [vmem:[#allocation5 + $0x1470] sm:$0xff] }
 0x1a9   :  { %1503 = vmatmul.mubr.f32.vlgmr.msra.gmra.mrb[2].mxu0 %v9514_v7  ;;  %v7497_v2 = vpack.c.bf16 %v1834_v59, %v1827_v58  ;;  %v1882_v58 = vld [vmem:[#allocation8 + $0x470] sm:$0xff]  ;;  %v1889_v59 = vld [vmem:[#allocation8 + $0x4a8] sm:$0xff] }
 0x1aa   :  { %7476 = vmatpush1.bf16.msra.mxu0 %v7475_v63  ;;  %v708_v63 = vld [vmem:[#allocation5 + $0x1160] sm:$0xff] }
 0x1ab   :  { %7478 = vmatprep.subr.bf16.mxu0 %v7477_v1  ;;  %6904 = vmatpush1.bf16.msra.mxu1 %v6903_v4  ;;  %v7495_v1 = vpack.c.bf16 %v1819_v56, %v1812_v55  ;;  %v1833_v4 = vld [vmem:[#allocation8 + $0x2e8] sm:$0xff]  ;;  %v6925_v20 = vpack.c.bf16 %v708_v63, %v701_v62  ;;  %v764_v55 = vld [vmem:[#allocation5 + $0x1320] sm:$0xff]  ;;  %v7511_v56 = vpack.c.bf16 %v1875_v24, %v1868_v47 }
 0x1ac   :  { %6906 = vmatprep.subr.bf16.mxu1 %v6905_v8  ;;  %v1848_v8 = vld [vmem:[#allocation8 + $0x360] sm:$0xff]  ;;  %v7499_v17 = vpack.c.bf16 %v1833_v4, %v1826_v3  ;;  %v756_v63 = vld [vmem:[#allocation5 + $0x12e0] sm:$0xff]  ;;  %v778_v3 = vld [vmem:[#allocation5 + $0x1390] sm:$0xff]  ;;  %v7515_v4 = vpack.c.bf16 %v1889_v59, %v1882_v58 }
 0x1ad   :  { %v820_v47 = vld [vmem:[#allocation5 + $0x14e0] sm:$0xff]  ;;  %v277_v58 = vld [vmem:[#allocation5 + $0x3e8] sm:$0xff] }
 0x1ae   :  { %7480 = vmatpush1.bf16.msra.mxu0 %v7479_v13 }
 0x1af   :  { %7482 = vmatprep.subr.bf16.mxu0 %v7481_v15  ;;  %6908 = vmatpush1.bf16.msra.mxu1 %v6907_v18  ;;  %v715_v15 = vld [vmem:[#allocation5 + $0x1198] sm:$0xff]  ;;  %v7501_v18 = vpack.c.bf16 %v1848_v8, %v1841_v6  ;;  %v1896_v6 = vld [vmem:[#allocation8 + $0x4e0] sm:$0xff]  ;;  %v1903_v8 = vld [vmem:[#allocation8 + $0x518] sm:$0xff] }
 0x1b0   :  { %6910 = vmatprep.subr.bf16.mxu1 %v6909_v22  ;;  %v6927_v22 = vpack.c.bf16 %v707_v12, %v700_v11  ;;  %v6929_v27 = vpack.c.bf16 %v722_v16, %v715_v15  ;;  %v1911_v11 = vld [vmem:[#allocation8 + $0x558] sm:$0xff]  ;;  %v1918_v12 = vld [vmem:[#allocation8 + $0x590] sm:$0xff]  ;;  %v770_v16 = vld [vmem:[#allocation5 + $0x1350] sm:$0xff]  ;;  %v7519_v21 = vpack.c.bf16 %v1903_v8, %v1896_v6 }
 0x1b2   :  { %7484 = vmatpush1.bf16.msra.mxu0 %v7483_v30  ;;  %v721_v30 = vld [vmem:[#allocation5 + $0x11c8] sm:$0xff] }
 0x1b3   :  { %7486 = vmatprep.subr.bf16.mxu0 %v7485_v31  ;;  %6912 = vmatpush1.bf16.msra.mxu1 %v6911_v34  ;;  %v729_v31 = vld [vmem:[#allocation5 + $0x1208] sm:$0xff]  ;;  %v7505_v34 = vpack.c.bf16 %v1862_v26, %v1855_v23  ;;  %v1910_v23 = vld [vmem:[#allocation8 + $0x550] sm:$0xff]  ;;  %v1917_v26 = vld [vmem:[#allocation8 + $0x588] sm:$0xff] }
 0x1b4   :  { %6914 = vmatprep.subr.bf16.mxu1 %v6913_v37  ;;  %v6931_v37 = vpack.c.bf16 %v721_v30, %v714_v29  ;;  %v6933_v40 = vpack.c.bf16 %v736_v32, %v729_v31  ;;  %v1925_v29 = vld [vmem:[#allocation8 + $0x5c8] sm:$0xff]  ;;  %v1932_v30 = vld [vmem:[#allocation8 + $0x600] sm:$0xff]  ;;  %v784_v32 = vld [vmem:[#allocation5 + $0x13c0] sm:$0xff]  ;;  %v7523_v36 = vpack.c.bf16 %v1917_v26, %v1910_v23  ;;  %v826_v23 = vlaneseq }
 0x1b6   :  { %7488 = vmatpush1.bf16.msra.mxu0 %v7487_v42  ;;  %v735_v42 = vld [vmem:[#allocation5 + $0x1238] sm:$0xff] }
 0x1b7   :  { %7490 = vmatprep.subr.bf16.mxu0 %v7489_v43  ;;  %6916 = vmatpush1.bf16.msra.mxu1 %v6915_v46  ;;  %v743_v43 = vld [vmem:[#allocation5 + $0x1278] sm:$0xff]  ;;  %v7509_v46 = vpack.c.bf16 %v1876_v39, %v1869_v38  ;;  %v1924_v38 = vld [vmem:[#allocation8 + $0x5c0] sm:$0xff]  ;;  %v1931_v39 = vld [vmem:[#allocation8 + $0x5f8] sm:$0xff] }
 0x1b8   :  { %6918 = vmatprep.subr.bf16.mxu1 %v6917_v48  ;;  %v6935_v48 = vpack.c.bf16 %v735_v42, %v728_v41  ;;  %v6937_v51 = vpack.c.bf16 %v750_v44, %v743_v43  ;;  %v1939_v41 = vld [vmem:[#allocation8 + $0x638] sm:$0xff]  ;;  %v1946_v42 = vld [vmem:[#allocation8 + $0x670] sm:$0xff]  ;;  %v798_v44 = vld [vmem:[#allocation5 + $0x1430] sm:$0xff]  ;;  %v7527_v24 = vpack.c.bf16 %v1931_v39, %v1924_v38 }
 0x1ba   :  { %7492 = vmatpush1.bf16.msra.mxu0 %v7491_v53  ;;  %v749_v53 = vld [vmem:[#allocation5 + $0x12a8] sm:$0xff] }
 0x1bb   :  { %7494 = vmatprep.subr.bf16.mxu0 %v7493_v54  ;;  %6920 = vmatpush1.bf16.msra.mxu1 %v6919_v57  ;;  %v757_v54 = vld [vmem:[#allocation5 + $0x12e8] sm:$0xff]  ;;  %v7513_v57 = vpack.c.bf16 %v1890_v50, %v1883_v49  ;;  %v1938_v49 = vld [vmem:[#allocation8 + $0x630] sm:$0xff]  ;;  %v1945_v50 = vld [vmem:[#allocation8 + $0x668] sm:$0xff] }
 0x1bc   :  { %v9517_v9 = vpop.f32.mrb[0].mxu0  ;;  %6922 = vmatprep.subr.bf16.mxu1 %v6921_v60  ;;  %v6939_v60 = vpack.c.bf16 %v749_v53, %v742_v52  ;;  %v6941_v62 = vpack.c.bf16 %v764_v55, %v757_v54  ;;  %v1953_v52 = vld [vmem:[#allocation8 + $0x6a8] sm:$0xff]  ;;  %v1960_v53 = vld [vmem:[#allocation8 + $0x6e0] sm:$0xff]  ;;  %v812_v55 = vld [vmem:[#allocation5 + $0x14a0] sm:$0xff]  ;;  %v7531_v59 = vpack.c.bf16 %v1945_v50, %v1938_v49 }
 0x1bd   :  { %v9519_v13 = vpop.f32.mrb[1].mxu0  ;;  %v242_v50 = vld [vmem:[#allocation5 + $0x2d0] sm:$0xff] }
 0x1be   :  { %7496 = vmatpush1.bf16.msra.mxu0 %v7495_v1  ;;  %v763_v1 = vld [vmem:[#allocation5 + $0x1318] sm:$0xff] }
 0x1bf   :  { %7498 = vmatprep.subr.bf16.mxu0 %v7497_v2  ;;  %6924 = vmatpush1.bf16.msra.mxu1 %v6923_v5  ;;  %v771_v2 = vld [vmem:[#allocation5 + $0x1358] sm:$0xff]  ;;  %v7517_v5 = vpack.c.bf16 %v1904_v10, %v1897_v61  ;;  %v1952_v61 = vld [vmem:[#allocation8 + $0x6a0] sm:$0xff]  ;;  %v1959_v10 = vld [vmem:[#allocation8 + $0x6d8] sm:$0xff] }
 0x1c0   :  { %6926 = vmatprep.subr.bf16.mxu1 %v6925_v20  ;;  %v6943_v20 = vpack.c.bf16 %v763_v1, %v756_v63  ;;  %v6945_v15 = vpack.c.bf16 %v778_v3, %v771_v2  ;;  %v158_v1 = vld [vmem:[#allocation5 + $0x30] sm:$0xff]  ;;  %v165_v2 = vld [vmem:[#allocation5 + $0x68] sm:$0xff]  ;;  %v284_v3 = vld [vmem:[#allocation5 + $0x420] sm:$0xff] }
 0x1c1   :  { %v7155_v6 = vpack.c.bf16 %v165_v2, %v158_v1  ;;  %v501_v1 = vld [vmem:[#allocation5 + $0xae8] sm:$0xff]  ;;  %v1967_v2 = vld [vmem:[#allocation8 + $0x718] sm:$0xff] }
 0x1c2   :  { %7500 = vmatpush1.bf16.msra.mxu0 %v7499_v17  ;;  %v777_v17 = vld [vmem:[#allocation5 + $0x1388] sm:$0xff] }
 0x1c3   :  { %7502 = vmatprep.subr.bf16.mxu0 %v7501_v18  ;;  %6928 = vmatpush1.bf16.msra.mxu1 %v6927_v22  ;;  %v785_v18 = vld [vmem:[#allocation5 + $0x13c8] sm:$0xff]  ;;  %v7521_v22 = vpack.c.bf16 %v1918_v12, %v1911_v11  ;;  %v179_v11 = vld [vmem:[#allocation5 + $0xd8] sm:$0xff]  ;;  %v298_v12 = vld [vmem:[#allocation5 + $0x490] sm:$0xff] }
 0x1c4   :  { %6930 = vmatprep.subr.bf16.mxu1 %v6929_v27  ;;  %v6947_v27 = vpack.c.bf16 %v777_v17, %v770_v16  ;;  %v6949_v31 = vpack.c.bf16 %v792_v19, %v785_v18  ;;  %v186_v18 = vld [vmem:[#allocation5 + $0x110] sm:$0xff]  ;;  %v193_v19 = vld [vmem:[#allocation5 + $0x148] sm:$0xff] }
 0x1c5   :  { %v7163_v26 = vpack.c.bf16 %v193_v19, %v186_v18  ;;  %v515_v18 = vld [vmem:[#allocation5 + $0xb58] sm:$0xff]  ;;  %v1981_v19 = vld [vmem:[#allocation8 + $0x788] sm:$0xff] }
 0x1c6   :  { %7504 = vmatpush1.bf16.msra.mxu0 %v7503_v33  ;;  %v791_v33 = vld [vmem:[#allocation5 + $0x13f8] sm:$0xff] }
 0x1c7   :  { %7506 = vmatprep.subr.bf16.mxu0 %v7505_v34  ;;  %6932 = vmatpush1.bf16.msra.mxu1 %v6931_v37  ;;  %v799_v34 = vld [vmem:[#allocation5 + $0x1438] sm:$0xff]  ;;  %v7525_v37 = vpack.c.bf16 %v1932_v30, %v1925_v29  ;;  %v200_v29 = vld [vmem:[#allocation5 + $0x180] sm:$0xff] }
 0x1c8   :  { %6934 = vmatprep.subr.bf16.mxu1 %v6933_v40  ;;  %v6951_v40 = vpack.c.bf16 %v791_v33, %v784_v32  ;;  %v6953_v43 = vpack.c.bf16 %v806_v35, %v799_v34  ;;  %v207_v30 = vld [vmem:[#allocation5 + $0x1b8] sm:$0xff]  ;;  %v333_v32 = vld [vmem:[#allocation5 + $0x5a8] sm:$0xff]  ;;  %v214_v34 = vld [vmem:[#allocation5 + $0x1f0] sm:$0xff] }
 0x1c9   :  { %v7167_v33 = vpack.c.bf16 %v207_v30, %v200_v29  ;;  %v221_v35 = vld [vmem:[#allocation5 + $0x228] sm:$0xff] }
 0x1ca   :  { %7508 = vmatpush1.bf16.msra.mxu0 %v7507_v45  ;;  %v805_v45 = vld [vmem:[#allocation5 + $0x1468] sm:$0xff]  ;;  %v7171_v39 = vpack.c.bf16 %v221_v35, %v214_v34  ;;  %v1995_v35 = vld [vmem:[#allocation8 + $0x7f8] sm:$0xff] }
 0x1cb   :  { %7510 = vmatprep.subr.bf16.mxu0 %v7509_v46  ;;  %6936 = vmatpush1.bf16.msra.mxu1 %v6935_v48  ;;  %v813_v46 = vld [vmem:[#allocation5 + $0x14a8] sm:$0xff]  ;;  %v7529_v48 = vpack.c.bf16 %v1946_v42, %v1939_v41 }
 0x1cc   :  { %6938 = vmatprep.subr.bf16.mxu1 %v6937_v51  ;;  %v6955_v51 = vpack.c.bf16 %v805_v45, %v798_v44  ;;  %v6957_v54 = vpack.c.bf16 %v820_v47, %v813_v46  ;;  %v235_v44 = vld [vmem:[#allocation5 + $0x298] sm:$0xff]  ;;  %v354_v45 = vld [vmem:[#allocation5 + $0x650] sm:$0xff]  ;;  %v361_v46 = vld [vmem:[#allocation5 + $0x688] sm:$0xff] }
 0x1cd   :  { %v7177_v49 = vpack.c.bf16 %v361_v46, %v354_v45  ;;  %v529_v34 = vld [vmem:[#allocation5 + $0xbc8] sm:$0xff]  ;;  %v410_v45 = vld [vmem:[#allocation5 + $0x810] sm:$0xff] }
 0x1ce   :  { %7512 = vmatpush1.bf16.msra.mxu0 %v7511_v56  ;;  %v819_v56 = vld [vmem:[#allocation5 + $0x14d8] sm:$0xff]  ;;  %v417_v46 = vld [vmem:[#allocation5 + $0x848] sm:$0xff] }
 0x1cf   :  { %7514 = vmatprep.subr.bf16.mxu0 %v7513_v57  ;;  %6940 = vmatpush1.bf16.msra.mxu1 %v6939_v60  ;;  %v270_v57 = vld [vmem:[#allocation5 + $0x3b0] sm:$0xff]  ;;  %v7533_v60 = vpack.c.bf16 %v1960_v53, %v1953_v52  ;;  %v368_v53 = vld [vmem:[#allocation5 + $0x6c0] sm:$0xff] }
 0x1d0   :  { %6942 = vmatprep.subr.bf16.mxu1 %v6941_v62  ;;  %v6959_v62 = vpack.c.bf16 %v819_v56, %v812_v55  ;;  %v7153_v63 = vpack.c.bf16 %v277_v58, %v270_v57 }
 0x1d2   :  { %7516 = vmatpush1.bf16.msra.mxu0 %v7515_v4  ;;  %v291_v4 = vld [vmem:[#allocation5 + $0x458] sm:$0xff] }
 0x1d3   :  { %7518 = vmatprep.subr.bf16.mxu0 %v7517_v5  ;;  %6944 = vmatpush1.bf16.msra.mxu1 %v6943_v20  ;;  %v7535_v5 = vpack.c.bf16 %v1959_v10, %v1952_v61  ;;  %v7157_v8 = vpack.c.bf16 %v291_v4, %v284_v3  ;;  %v172_v20 = vld [vmem:[#allocation5 + $0xa0] sm:$0xff]  ;;  %v263_v10 = vld [vmem:[#allocation5 + $0x378] sm:$0xff] }
 0x1d4   :  { %6946 = vmatprep.subr.bf16.mxu1 %v6945_v15  ;;  %v305_v15 = vld [vmem:[#allocation5 + $0x4c8] sm:$0xff]  ;;  %v7159_v16 = vpack.c.bf16 %v179_v11, %v172_v20  ;;  %v256_v61 = vld [vmem:[#allocation5 + $0x340] sm:$0xff]  ;;  %v1974_v3 = vld [vmem:[#allocation8 + $0x750] sm:$0xff] }
 0x1d5   :  { %v7161_v17 = vpack.c.bf16 %v305_v15, %v298_v12  ;;  %v7183_v11 = vpack.c.bf16 %v263_v10, %v256_v61  ;;  %v382_v12 = vld [vmem:[#allocation5 + $0x730] sm:$0xff]  ;;  %v389_v15 = vld [vmem:[#allocation5 + $0x768] sm:$0xff]  ;;  %v2030_v61 = vld [vmem:[#allocation8 + $0x910] sm:$0xff] }
 0x1d6   :  { %7520 = vmatpush1.bf16.msra.mxu0 %v7519_v21  ;;  %v312_v21 = vld [vmem:[#allocation5 + $0x500] sm:$0xff]  ;;  %v7187_v29 = vpack.c.bf16 %v389_v15, %v382_v12  ;;  %v2036_v12 = vld [vmem:[#allocation8 + $0x940] sm:$0xff] }
 0x1d7   :  { %7522 = vmatprep.subr.bf16.mxu0 %v7521_v22  ;;  %6948 = vmatpush1.bf16.msra.mxu1 %v6947_v27  ;;  %v319_v22 = vld [vmem:[#allocation5 + $0x538] sm:$0xff]  ;;  %v2043_v15 = vld [vmem:[#allocation8 + $0x978] sm:$0xff] }
 0x1d8   :  { %6950 = vmatprep.subr.bf16.mxu1 %v6949_v31  ;;  %v7165_v27 = vpack.c.bf16 %v319_v22, %v312_v21  ;;  %v326_v31 = vld [vmem:[#allocation5 + $0x570] sm:$0xff]  ;;  %v1988_v21 = vld [vmem:[#allocation8 + $0x7c0] sm:$0xff] }
 0x1da   :  { %7524 = vmatpush1.bf16.msra.mxu0 %v7523_v36  ;;  %v340_v36 = vld [vmem:[#allocation5 + $0x5e0] sm:$0xff] }
 0x1db   :  { %7526 = vmatprep.subr.bf16.mxu0 %v7525_v37  ;;  %6952 = vmatpush1.bf16.msra.mxu1 %v6951_v40  ;;  %v347_v37 = vld [vmem:[#allocation5 + $0x618] sm:$0xff]  ;;  %v824_v40 = vld [vmem:[#allocation7] sm:$0xff] }
 0x1dc   :  { %6954 = vmatprep.subr.bf16.mxu1 %v6953_v43  ;;  %v7173_v42 = vpack.c.bf16 %v347_v37, %v340_v36  ;;  %v228_v43 = vld [vmem:[#allocation5 + $0x260] sm:$0xff]  ;;  %v2002_v36 = vld [vmem:[#allocation8 + $0x830] sm:$0xff]  ;;  %v9046_v37 = vld [vmem:[#allocation2] sm:$0xff] }
 0x1de   :  { %7528 = vmatpush1.bf16.msra.mxu0 %v7527_v24 }
 0x1df   :  { %7530 = vmatprep.subr.bf16.mxu0 %v7529_v48  ;;  %6956 = vmatpush1.bf16.msra.mxu1 %v6955_v51  ;;  %v7175_v48 = vpack.c.bf16 %v235_v44, %v228_v43  ;;  %v249_v51 = vld [vmem:[#allocation5 + $0x308] sm:$0xff] }
 0x1e0   :  { %6958 = vmatprep.subr.bf16.mxu1 %v6957_v54  ;;  %v375_v54 = vld [vmem:[#allocation5 + $0x6f8] sm:$0xff]  ;;  %v7179_v58 = vpack.c.bf16 %v249_v51, %v242_v50  ;;  %v2016_v50 = vld [vmem:[#allocation8 + $0x8a0] sm:$0xff] }
 0x1e2   :  { %7532 = vmatpush1.bf16.msra.mxu0 %v7531_v59 }
 0x1e3   :  { %7534 = vmatprep.subr.bf16.mxu0 %v7533_v60  ;;  %6960 = vmatpush1.bf16.msra.mxu1 %v6959_v62  ;;  %v7181_v60 = vpack.c.bf16 %v375_v54, %v368_v53  ;;  %v494_v62 = vld [vmem:[#allocation5 + $0xab0] sm:$0xff]  ;;  %v2015_v53 = vld [vmem:[#allocation8 + $0x898] sm:$0xff]  ;;  %v7195_v54 = vpack.c.bf16 %v417_v46, %v410_v45 }
 0x1e4   :  { %7154 = vmatprep.subr.bf16.mxu1 %v7153_v63  ;;  %v2071_v45 = vld [vmem:[#allocation8 + $0xa58] sm:$0xff] }
 0x1e6   :  { %7536 = vmatpush1.bf16.msra.mxu0 %v7535_v5  ;;  %1290 = vmatmul.mubr.f32.vlgmr.msra.gmra.mrb[2].mxu1 %v9514_v7  ;;  %v9523_v7 = vshrl.u32 %v826_v23, 7  ;;  %v7537_v5 = vpack.c.bf16 %v1974_v3, %v1967_v2  ;;  %v7541_v23 = vpack.c.bf16 %v1988_v21, %v1981_v19  ;;  %v438_v3 = vld [vmem:[#allocation5 + $0x8f0] sm:$0xff]  ;;  %v459_v19 = vld [vmem:[#allocation5 + $0x998] sm:$0xff] }
 0x1e7   :  { %7156 = vmatpush3.bf16.msra.mxu1 %v7155_v6  ;;  %1573 = vmatprep.mubr.f32.mxu1 %v9483_v14  ;;  %v7169_v14 = vpack.c.bf16 %v333_v32, %v326_v31  ;;  %v1966_v6 = vld [vmem:[#allocation8 + $0x710] sm:$0xff]  ;;  %v396_v31 = vld [vmem:[#allocation5 + $0x7a0] sm:$0xff]  ;;  %v578_v21 = vld [vmem:[#allocation5 + $0xd50] sm:$0xff] }
 0x1e8   :  { %7158 = vmatprep.subr.bf16.mxu1 %v7157_v8  ;;  %v9526_v38 = vsub.s32 0, %v9523_v7  ;;  %v9529_v41 = vsub.s32 1, %v9523_v7  ;;  %v1973_v8 = vld [vmem:[#allocation8 + $0x748] sm:$0xff]  ;;  %7538 = vmatprep.subr.bf16.mxu0 %v7537_v5  ;;  %v403_v32 = vld [vmem:[#allocation5 + $0x7d8] sm:$0xff]  ;;  %v564_v5 = vld [vmem:[#allocation5 + $0xce0] sm:$0xff] }
 0x1e9   :  { %v7191_v43 = vpack.c.bf16 %v403_v32, %v396_v31  ;;  %v2050_v31 = vld [vmem:[#allocation8 + $0x9b0] sm:$0xff]  ;;  %v2057_v32 = vld [vmem:[#allocation8 + $0x9e8] sm:$0xff] }
 0x1ea   :  { %v829_v47 = vrot.slane %v824_v40, %v9526_v38  ;;  %v833_v24 = vrot.slane %v824_v40, %v9529_v41  ;;  %v1994_v40 = vld [vmem:[#allocation8 + $0x7f0] sm:$0xff] }
 0x1eb   :  { %7160 = vmatpush3.bf16.msra.mxu1 %v7159_v16  ;;  %v508_v16 = vld [vmem:[#allocation5 + $0xb20] sm:$0xff] }
 0x1ec   :  { %7162 = vmatprep.subr.bf16.mxu1 %v7161_v17  ;;  %v7539_v17 = vpack.c.bf16 %v1973_v8, %v1966_v6  ;;  %v7189_v30 = vpack.c.bf16 %v515_v18, %v508_v16  ;;  %v571_v8 = vld [vmem:[#allocation5 + $0xd18] sm:$0xff]  ;;  %v452_v18 = vld [vmem:[#allocation5 + $0x960] sm:$0xff] }
 0x1ef   :  { %7164 = vmatpush3.bf16.msra.mxu1 %v7163_v26  ;;  %v1980_v26 = vld [vmem:[#allocation8 + $0x780] sm:$0xff] }
 0x1f0   :  { %7166 = vmatprep.subr.bf16.mxu1 %v7165_v27  ;;  %v1987_v27 = vld [vmem:[#allocation8 + $0x7b8] sm:$0xff] }
 0x1f3   :  { %7168 = vmatpush3.bf16.msra.mxu1 %v7167_v33  ;;  %v522_v33 = vld [vmem:[#allocation5 + $0xb90] sm:$0xff] }
 0x1f4   :  { %7170 = vmatprep.subr.bf16.mxu1 %v7169_v14  ;;  %v7543_v14 = vpack.c.bf16 %v1987_v27, %v1980_v26  ;;  %v7193_v44 = vpack.c.bf16 %v529_v34, %v522_v33  ;;  %v585_v26 = vld [vmem:[#allocation5 + $0xd88] sm:$0xff]  ;;  %v2051_v27 = vld [vmem:[#allocation8 + $0x9b8] sm:$0xff]  ;;  %v7207_v33 = vpack.c.bf16 %v459_v19, %v452_v18  ;;  %v466_v34 = vld [vmem:[#allocation5 + $0x9d0] sm:$0xff] }
 0x1f5   :  { %v2113_v18 = vld [vmem:[#allocation8 + $0xba8] sm:$0xff] }
 0x1f7   :  { %7172 = vmatpush3.bf16.msra.mxu1 %v7171_v39  ;;  %v7545_v39 = vpack.c.bf16 %v2002_v36, %v1995_v35  ;;  %v473_v35 = vld [vmem:[#allocation5 + $0xa08] sm:$0xff]  ;;  %v592_v36 = vld [vmem:[#allocation5 + $0xdc0] sm:$0xff] }
 0x1f8   :  { %7174 = vmatprep.subr.bf16.mxu1 %v7173_v42  ;;  %v2001_v42 = vld [vmem:[#allocation8 + $0x828] sm:$0xff]  ;;  %v7211_v46 = vpack.c.bf16 %v473_v35, %v466_v34 }
 0x1f9   :  { %v1007_v52 = vpop.f32.mrb[0].mxu1 }
 0x1fa   :  { %v8953_v55 = vadd.f32 %v1007_v52, %v829_v47  ;;  %v1009_v56 = vpop.f32.mrb[1].mxu1  ;;  %v536_v47 = vld [vmem:[#allocation5 + $0xc00] sm:$0xff]  ;;  %v2008_v52 = vld [vmem:[#allocation8 + $0x860] sm:$0xff] }
 0x1fb   :  { %v8955_v57 = vadd.f32 %v1009_v56, %v833_v24  ;;  %7176 = vmatpush3.bf16.msra.mxu1 %v7175_v48  ;;  %v7547_v24 = vpack.c.bf16 %v2001_v42, %v1994_v40  ;;  %v543_v48 = vld [vmem:[#allocation5 + $0xc38] sm:$0xff]  ;;  %v424_v56 = vld [vmem:[#allocation5 + $0x880] sm:$0xff]  ;;  %v2065_v40 = vld [vmem:[#allocation8 + $0xa28] sm:$0xff] }
 0x1fc   :  { %v8954_v59 = vadd.f32 %v8953_v55, %v9517_v9  ;;  %7178 = vmatprep.subr.bf16.mxu1 %v7177_v49  ;;  %v7185_v9 = vpack.c.bf16 %v501_v1, %v494_v62  ;;  %v2009_v49 = vld [vmem:[#allocation8 + $0x868] sm:$0xff]  ;;  %v7197_v55 = vpack.c.bf16 %v543_v48, %v536_v47  ;;  %v2022_v62 = vld [vmem:[#allocation8 + $0x8d0] sm:$0xff]  ;;  %v2072_v42 = vld [vmem:[#allocation8 + $0xa60] sm:$0xff] }
 0x1fd   :  { %v8956_v63 = vadd.f32 %v8955_v57, %v9519_v13  ;;  %v7549_v51 = vpack.c.bf16 %v2016_v50, %v2009_v49  ;;  %v550_v57 = vld [vmem:[#allocation5 + $0xc70] sm:$0xff]  ;;  %v487_v48 = vld [vmem:[#allocation5 + $0xa78] sm:$0xff] }
 0x1fe   :  { %v1726_v4 = vmul.f32 0.01, %v8954_v59  ;;  %vm1719_vm0 = vcmp.gt.f32.partialorder %v8954_v59, 0.0  ;;  %v718_v49 = vld [vmem:[#allocation5 + $0x11b0] sm:$0xff] }
 0x1ff   :  { %vm1720_vm1 = vcmp.gt.f32.partialorder %v8956_v63, 0.0  ;;  %v1727_v20 = vmul.f32 0.01, %v8956_v63  ;;  %7180 = vmatpush3.bf16.msra.mxu1 %v7179_v58  ;;  %v7551_v58 = vpack.c.bf16 %v2015_v53, %v2008_v52  ;;  %v2079_v52 = vld [vmem:[#allocation8 + $0xa98] sm:$0xff]  ;;  %v2086_v53 = vld [vmem:[#allocation8 + $0xad0] sm:$0xff] }
 0x200   :  { %7182 = vmatprep.subr.bf16.mxu1 %v7181_v60  ;;  %v9539_v22 = vsel %vm1719_vm0, %v8954_v59, %v1726_v4  ;;  %v557_v59 = vld [vmem:[#allocation5 + $0xca8] sm:$0xff]  ;;  %v2023_v60 = vld [vmem:[#allocation8 + $0x8d8] sm:$0xff] }
 0x201   :  { %v9535_v13 = vsel %vm1720_vm1, %v8956_v63, %v1727_v20  ;;  %v7553_v10 = vpack.c.bf16 %v2030_v61, %v2023_v60  ;;  %v2029_v63 = vld [vmem:[#allocation8 + $0x908] sm:$0xff]  ;;  %v7201_v2 = vpack.c.bf16 %v557_v59, %v550_v57  ;;  %v445_v4 = vld [vmem:[#allocation5 + $0x928] sm:$0xff]  ;;  %v732_v60 = vld [vmem:[#allocation5 + $0x1220] sm:$0xff] }
 0x202   :  { %2909 = vmatprep.mubr.f32.mxu0 %v9535_v13  ;;  %v7555_v6 = vpack.c.bf16 %v2029_v63, %v2022_v62  ;;  %v2037_v20 = vld [vmem:[#allocation8 + $0x948] sm:$0xff]  ;;  %v7203_v16 = vpack.c.bf16 %v445_v4, %v438_v3  ;;  %v613_v59 = vld [vmem:[#allocation5 + $0xe68] sm:$0xff]  ;;  %v2099_v3 = vld [vmem:[#allocation8 + $0xb38] sm:$0xff] }
 0x203   :  { %7184 = vmatpush3.bf16.msra.mxu1 %v7183_v11  ;;  %2910 = vmatmul.mubr.f32.vlgmr.msra.gmra.mrb[4].mxu0 %v9539_v22  ;;  %v2044_v11 = vld [vmem:[#allocation8 + $0x980] sm:$0xff]  ;;  %v2093_v62 = vld [vmem:[#allocation8 + $0xb08] sm:$0xff] }
 0x204   :  { %7186 = vmatprep.subr.bf16.mxu1 %v7185_v9  ;;  %7540 = vmatpush1.bf16.msra.mxu0 %v7539_v17  ;;  %v7557_v9 = vpack.c.bf16 %v2044_v11, %v2037_v20  ;;  %v7205_v17 = vpack.c.bf16 %v571_v8, %v564_v5  ;;  %v2100_v63 = vld [vmem:[#allocation8 + $0xb40] sm:$0xff]  ;;  %v627_v8 = vld [vmem:[#allocation5 + $0xed8] sm:$0xff]  ;;  %v746_v20 = vld [vmem:[#allocation5 + $0x1290] sm:$0xff] }
 0x205   :  { %7542 = vmatprep.subr.bf16.mxu0 %v7541_v23  ;;  %v7559_v23 = vpack.c.bf16 %v2043_v15, %v2036_v12  ;;  %v2107_v12 = vld [vmem:[#allocation8 + $0xb78] sm:$0xff]  ;;  %v2114_v15 = vld [vmem:[#allocation8 + $0xbb0] sm:$0xff] }
 0x206   :  { %1574 = vmatmul.mubr.f32.vlgmr.msra.gmra.mrb[4].mxu1 %v9046_v37  ;;  %v7563_v37 = vpack.c.bf16 %v2057_v32, %v2050_v31  ;;  %v2121_v31 = vld [vmem:[#allocation8 + $0xbe8] sm:$0xff]  ;;  %v2128_v32 = vld [vmem:[#allocation8 + $0xc20] sm:$0xff] }
 0x207   :  { %7188 = vmatpush3.bf16.msra.mxu1 %v7187_v29  ;;  %1643 = vmatprep.mubr.f32.mxu1 %v9500_v25  ;;  %v431_v25 = vld [vmem:[#allocation5 + $0x8b8] sm:$0xff] }
 0x208   :  { %7190 = vmatprep.subr.bf16.mxu1 %v7189_v30  ;;  %7544 = vmatpush1.bf16.msra.mxu0 %v7543_v14  ;;  %v7199_v1 = vpack.c.bf16 %v431_v25, %v424_v56  ;;  %v2058_v29 = vld [vmem:[#allocation8 + $0x9f0] sm:$0xff]  ;;  %v7209_v14 = vpack.c.bf16 %v585_v26, %v578_v21  ;;  %v2085_v56 = vld [vmem:[#allocation8 + $0xac8] sm:$0xff]  ;;  %v641_v26 = vld [vmem:[#allocation5 + $0xf48] sm:$0xff] }
 0x209   :  { %7546 = vmatprep.subr.bf16.mxu0 %v7545_v39  ;;  %v7561_v30 = vpack.c.bf16 %v2058_v29, %v2051_v27  ;;  %v599_v39 = vld [vmem:[#allocation5 + $0xdf8] sm:$0xff]  ;;  %v760_v27 = vld [vmem:[#allocation5 + $0x1300] sm:$0xff] }
 0x20a   :  { %v7213_v47 = vpack.c.bf16 %v599_v39, %v592_v36  ;;  %v648_v36 = vld [vmem:[#allocation5 + $0xf80] sm:$0xff] }
 0x20b   :  { %7192 = vmatpush3.bf16.msra.mxu1 %v7191_v43  ;;  %v7565_v43 = vpack.c.bf16 %v2072_v42, %v2065_v40  ;;  %v781_v40 = vld [vmem:[#allocation5 + $0x13a8] sm:$0xff]  ;;  %v2135_v42 = vld [vmem:[#allocation8 + $0xc58] sm:$0xff] }
 0x20c   :  { %7194 = vmatprep.subr.bf16.mxu1 %v7193_v44  ;;  %7548 = vmatpush1.bf16.msra.mxu0 %v7547_v24  ;;  %v2064_v44 = vld [vmem:[#allocation8 + $0xa20] sm:$0xff]  ;;  %v480_v24 = vld [vmem:[#allocation5 + $0xa40] sm:$0xff] }
 0x20d   :  { %7550 = vmatprep.subr.bf16.mxu0 %v7549_v51  ;;  %v7567_v50 = vpack.c.bf16 %v2071_v45, %v2064_v44  ;;  %v725_v51 = vld [vmem:[#allocation5 + $0x11e8] sm:$0xff]  ;;  %v7215_v25 = vpack.c.bf16 %v487_v48, %v480_v24  ;;  %v2134_v45 = vld [vmem:[#allocation8 + $0xc50] sm:$0xff]  ;;  %v662_v48 = vld [vmem:[#allocation5 + $0xff0] sm:$0xff] }
 0x20e   :  { %v7217_v57 = vpack.c.bf16 %v725_v51, %v718_v49  ;;  %v669_v49 = vld [vmem:[#allocation5 + $0x1028] sm:$0xff] }
 0x20f   :  { %7196 = vmatpush3.bf16.msra.mxu1 %v7195_v54  ;;  %v7569_v54 = vpack.c.bf16 %v2086_v53, %v2079_v52  ;;  %v795_v52 = vld [vmem:[#allocation5 + $0x1418] sm:$0xff]  ;;  %v2149_v53 = vld [vmem:[#allocation8 + $0xcc8] sm:$0xff] }
 0x210   :  { %7198 = vmatprep.subr.bf16.mxu1 %v7197_v55  ;;  %7552 = vmatpush1.bf16.msra.mxu0 %v7551_v58  ;;  %v2078_v55 = vld [vmem:[#allocation8 + $0xa90] sm:$0xff]  ;;  %v606_v58 = vld [vmem:[#allocation5 + $0xe30] sm:$0xff] }
 0x211   :  { %7554 = vmatprep.subr.bf16.mxu0 %v7553_v10  ;;  %v7571_v61 = vpack.c.bf16 %v2085_v56, %v2078_v55  ;;  %v739_v10 = vld [vmem:[#allocation5 + $0x1258] sm:$0xff]  ;;  %v7219_v4 = vpack.c.bf16 %v613_v59, %v606_v58  ;;  %v2148_v56 = vld [vmem:[#allocation8 + $0xcc0] sm:$0xff]  ;;  %v676_v59 = vld [vmem:[#allocation5 + $0x1060] sm:$0xff] }
 0x212   :  { %v7221_v5 = vpack.c.bf16 %v739_v10, %v732_v60  ;;  %v683_v60 = vld [vmem:[#allocation5 + $0x1098] sm:$0xff] }
 0x213   :  { %7200 = vmatpush3.bf16.msra.mxu1 %v7199_v1  ;;  %v7573_v1 = vpack.c.bf16 %v2100_v63, %v2093_v62  ;;  %v809_v62 = vld [vmem:[#allocation5 + $0x1488] sm:$0xff]  ;;  %v2163_v63 = vld [vmem:[#allocation8 + $0xd38] sm:$0xff] }
 0x214   :  { %7202 = vmatprep.subr.bf16.mxu1 %v7201_v2  ;;  %7556 = vmatpush1.bf16.msra.mxu0 %v7555_v6  ;;  %v2092_v2 = vld [vmem:[#allocation8 + $0xb00] sm:$0xff]  ;;  %v620_v6 = vld [vmem:[#allocation5 + $0xea0] sm:$0xff] }
 0x215   :  { %7558 = vmatprep.subr.bf16.mxu0 %v7557_v9  ;;  %v7575_v11 = vpack.c.bf16 %v2099_v3, %v2092_v2  ;;  %v753_v9 = vld [vmem:[#allocation5 + $0x12c8] sm:$0xff]  ;;  %v7223_v19 = vpack.c.bf16 %v627_v8, %v620_v6  ;;  %v2162_v3 = vld [vmem:[#allocation8 + $0xd30] sm:$0xff]  ;;  %v690_v8 = vld [vmem:[#allocation5 + $0x10d0] sm:$0xff] }
 0x216   :  { %v7225_v21 = vpack.c.bf16 %v753_v9, %v746_v20  ;;  %v697_v20 = vld [vmem:[#allocation5 + $0x1108] sm:$0xff] }
 0x217   :  { %7204 = vmatpush3.bf16.msra.mxu1 %v7203_v16  ;;  %v7577_v16 = vpack.c.bf16 %v2114_v15, %v2107_v12  ;;  %v823_v12 = vld [vmem:[#allocation5 + $0x14f8] sm:$0xff]  ;;  %v2177_v15 = vld [vmem:[#allocation8 + $0xda8] sm:$0xff] }
 0x218   :  { %7206 = vmatprep.subr.bf16.mxu1 %v7205_v17  ;;  %7560 = vmatpush1.bf16.msra.mxu0 %v7559_v23  ;;  %v2106_v17 = vld [vmem:[#allocation8 + $0xb70] sm:$0xff]  ;;  %v634_v23 = vld [vmem:[#allocation5 + $0xf10] sm:$0xff] }
 0x219   :  { %7562 = vmatprep.subr.bf16.mxu0 %v7561_v30  ;;  %v7579_v29 = vpack.c.bf16 %v2113_v18, %v2106_v17  ;;  %v767_v30 = vld [vmem:[#allocation5 + $0x1338] sm:$0xff]  ;;  %v7227_v34 = vpack.c.bf16 %v641_v26, %v634_v23  ;;  %v2176_v18 = vld [vmem:[#allocation8 + $0xda0] sm:$0xff]  ;;  %v704_v26 = vld [vmem:[#allocation5 + $0x1140] sm:$0xff] }
 0x21a   :  { %v7229_v35 = vpack.c.bf16 %v767_v30, %v760_v27  ;;  %v711_v27 = vld [vmem:[#allocation5 + $0x1178] sm:$0xff] }
 0x21b   :  { %7208 = vmatpush3.bf16.msra.mxu1 %v7207_v33  ;;  %v7581_v33 = vpack.c.bf16 %v2128_v32, %v2121_v31  ;;  %v1748_v31 = vld [vmem:[#allocation8 + $0x40] sm:$0xff]  ;;  %v2191_v32 = vld [vmem:[#allocation8 + $0xe18] sm:$0xff] }
 0x21c   :  { %7210 = vmatprep.subr.bf16.mxu1 %v7209_v14  ;;  %7564 = vmatpush1.bf16.msra.mxu0 %v7563_v37  ;;  %v2127_v14 = vld [vmem:[#allocation8 + $0xc18] sm:$0xff]  ;;  %v774_v37 = vld [vmem:[#allocation5 + $0x1370] sm:$0xff] }
 0x21d   :  { %7566 = vmatprep.subr.bf16.mxu0 %v7565_v43  ;;  %v2142_v43 = vld [vmem:[#allocation8 + $0xc90] sm:$0xff]  ;;  %v7233_v24 = vpack.c.bf16 %v781_v40, %v774_v37 }
 0x21e   :  { %v7585_v44 = vpack.c.bf16 %v2142_v43, %v2135_v42  ;;  %v1762_v37 = vld [vmem:[#allocation8 + $0xb0] sm:$0xff]  ;;  %v1761_v43 = vld [vmem:[#allocation8 + $0xa8] sm:$0xff] }
 0x21f   :  { %7212 = vmatpush3.bf16.msra.mxu1 %v7211_v46  ;;  %v2141_v46 = vld [vmem:[#allocation8 + $0xc88] sm:$0xff]  ;;  %v1754_v42 = vld [vmem:[#allocation8 + $0x70] sm:$0xff] }
 0x220   :  { %7214 = vmatprep.subr.bf16.mxu1 %v7213_v47  ;;  %7568 = vmatpush1.bf16.msra.mxu0 %v7567_v50  ;;  %v788_v50 = vld [vmem:[#allocation5 + $0x13e0] sm:$0xff]  ;;  %v7587_v51 = vpack.c.bf16 %v2141_v46, %v2134_v45  ;;  %v1776_v45 = vld [vmem:[#allocation8 + $0x120] sm:$0xff]  ;;  %v9047_v46 = vld [vmem:[#allocation2 + $0x10] sm:$0xff] }
 0x221   :  { %7570 = vmatprep.subr.bf16.mxu0 %v7569_v54  ;;  %v2156_v54 = vld [vmem:[#allocation8 + $0xd00] sm:$0xff]  ;;  %v7237_v58 = vpack.c.bf16 %v795_v52, %v788_v50  ;;  %v1783_v50 = vld [vmem:[#allocation8 + $0x158] sm:$0xff] }
 0x222   :  { %v7589_v55 = vpack.c.bf16 %v2156_v54, %v2149_v53  ;;  %v1782_v54 = vld [vmem:[#allocation8 + $0x150] sm:$0xff] }
 0x223   :  { %7216 = vmatpush3.bf16.msra.mxu1 %v7215_v25  ;;  %v2155_v25 = vld [vmem:[#allocation8 + $0xcf8] sm:$0xff] }
 0x224   :  { %7218 = vmatprep.subr.bf16.mxu1 %v7217_v57  ;;  %7572 = vmatpush1.bf16.msra.mxu0 %v7571_v61  ;;  %v7235_v57 = vpack.c.bf16 %v669_v49, %v662_v48  ;;  %v802_v61 = vld [vmem:[#allocation5 + $0x1450] sm:$0xff]  ;;  %v7591_v10 = vpack.c.bf16 %v2155_v25, %v2148_v56  ;;  %v1768_v48 = vld [vmem:[#allocation8 + $0xe0] sm:$0xff]  ;;  %v1775_v49 = vld [vmem:[#allocation8 + $0x118] sm:$0xff] }
 0x225   :  { %7574 = vmatprep.subr.bf16.mxu0 %v7573_v1  ;;  %v2170_v1 = vld [vmem:[#allocation8 + $0xd70] sm:$0xff]  ;;  %v7241_v6 = vpack.c.bf16 %v809_v62, %v802_v61  ;;  %v7259_v52 = vpack.c.bf16 %v1775_v49, %v1768_v48  ;;  %v1797_v56 = vld [vmem:[#allocation8 + $0x1c8] sm:$0xff]  ;;  %v1804_v25 = vld [vmem:[#allocation8 + $0x200] sm:$0xff] }
 0x226   :  { %1644 = vmatmul.mubr.f32.vlgmr.msra.gmra.mrb[6].mxu1 %v9510_v0  ;;  %v2120_v0 = vld [vmem:[#allocation8 + $0xbe0] sm:$0xff]  ;;  %v7593_v2 = vpack.c.bf16 %v2170_v1, %v2163_v63  ;;  %v1811_v61 = vld [vmem:[#allocation8 + $0x238] sm:$0xff]  ;;  %v1810_v1 = vld [vmem:[#allocation8 + $0x230] sm:$0xff] }
 0x227   :  { %7220 = vmatpush3.bf16.msra.mxu1 %v7219_v4  ;;  %1713 = vmatprep.mubr.f32.mxu1 %v9490_v28  ;;  %v655_v28 = vld [vmem:[#allocation5 + $0xfb8] sm:$0xff]  ;;  %v7583_v39 = vpack.c.bf16 %v2127_v14, %v2120_v0  ;;  %v2169_v4 = vld [vmem:[#allocation8 + $0xd68] sm:$0xff]  ;;  %v7247_v14 = vpack.c.bf16 %v711_v27, %v704_v26  ;;  %v1852_v26 = vld [vmem:[#allocation8 + $0x380] sm:$0xff] }
 0x228   :  { %7222 = vmatprep.subr.bf16.mxu1 %v7221_v5  ;;  %7576 = vmatpush1.bf16.msra.mxu0 %v7575_v11  ;;  %v7231_v47 = vpack.c.bf16 %v655_v28, %v648_v36  ;;  %v7239_v5 = vpack.c.bf16 %v683_v60, %v676_v59  ;;  %v816_v11 = vld [vmem:[#allocation5 + $0x14c0] sm:$0xff]  ;;  %v7595_v9 = vpack.c.bf16 %v2169_v4, %v2162_v3  ;;  %v1796_v59 = vld [vmem:[#allocation8 + $0x1c0] sm:$0xff]  ;;  %v1825_v3 = vld [vmem:[#allocation8 + $0x2a8] sm:$0xff] }
 0x229   :  { %7578 = vmatprep.subr.bf16.mxu0 %v7577_v16  ;;  %v2184_v16 = vld [vmem:[#allocation8 + $0xde0] sm:$0xff]  ;;  %v7245_v23 = vpack.c.bf16 %v823_v12, %v816_v11  ;;  %v1747_v36 = vld [vmem:[#allocation8 + $0x38] sm:$0xff] }
 0x22a   :  { %v7597_v17 = vpack.c.bf16 %v2184_v16, %v2177_v15  ;;  %v1755_v28 = vld [vmem:[#allocation8 + $0x78] sm:$0xff]  ;;  %v1832_v4 = vld [vmem:[#allocation8 + $0x2e0] sm:$0xff]  ;;  %v1838_v16 = vld [vmem:[#allocation8 + $0x310] sm:$0xff] }
 0x22b   :  { %7224 = vmatpush3.bf16.msra.mxu1 %v7223_v19  ;;  %v2183_v19 = vld [vmem:[#allocation8 + $0xdd8] sm:$0xff]  ;;  %v7253_v40 = vpack.c.bf16 %v1762_v37, %v1755_v28  ;;  %v1880_v28 = vld [vmem:[#allocation8 + $0x460] sm:$0xff] }
 0x22c   :  { %7226 = vmatprep.subr.bf16.mxu1 %v7225_v21  ;;  %7580 = vmatpush1.bf16.msra.mxu0 %v7579_v29  ;;  %v7243_v21 = vpack.c.bf16 %v697_v20, %v690_v8  ;;  %v1741_v29 = vld [vmem:[#allocation8 + $0x8] sm:$0xff]  ;;  %v7599_v30 = vpack.c.bf16 %v2183_v19, %v2176_v18  ;;  %v1803_v60 = vld [vmem:[#allocation8 + $0x1f8] sm:$0xff]  ;;  %v1824_v8 = vld [vmem:[#allocation8 + $0x2a0] sm:$0xff] }
 0x22d   :  { %7582 = vmatprep.subr.bf16.mxu0 %v7581_v33  ;;  %v2198_v33 = vld [vmem:[#allocation8 + $0xe50] sm:$0xff]  ;;  %v7267_v62 = vpack.c.bf16 %v1803_v60, %v1796_v59  ;;  %v1831_v20 = vld [vmem:[#allocation8 + $0x2d8] sm:$0xff]  ;;  %v1853_v18 = vld [vmem:[#allocation8 + $0x388] sm:$0xff] }
 0x22e   :  { %v7601_v0 = vpack.c.bf16 %v2198_v33, %v2191_v32  ;;  %v1839_v11 = vld [vmem:[#allocation8 + $0x318] sm:$0xff]  ;;  %v7275_v12 = vpack.c.bf16 %v1831_v20, %v1824_v8  ;;  %v1860_v19 = vld [vmem:[#allocation8 + $0x3c0] sm:$0xff]  ;;  %v1866_v33 = vld [vmem:[#allocation8 + $0x3f0] sm:$0xff] }
 0x22f   :  { %7228 = vmatpush3.bf16.msra.mxu1 %v7227_v34  ;;  %v7249_v34 = vpack.c.bf16 %v1748_v31, %v1741_v29  ;;  %v1859_v27 = vld [vmem:[#allocation8 + $0x3b8] sm:$0xff]  ;;  %v1908_v49 = vld [vmem:[#allocation8 + $0x540] sm:$0xff] }
 0x230   :  { %7230 = vmatprep.subr.bf16.mxu1 %v7229_v35  ;;  %7584 = vmatpush1.bf16.msra.mxu0 %v7583_v39  ;;  %v1740_v35 = vld [vmem:[#allocation8] sm:$0xff]  ;;  %v1867_v29 = vld [vmem:[#allocation8 + $0x3f8] sm:$0xff]  ;;  %v7283_v31 = vpack.c.bf16 %v1859_v27, %v1852_v26 }
 0x231   :  { %7586 = vmatprep.subr.bf16.mxu0 %v7585_v44  ;;  %v7251_v39 = vpack.c.bf16 %v1747_v36, %v1740_v35  ;;  %v1769_v44 = vld [vmem:[#allocation8 + $0xe8] sm:$0xff]  ;;  %v1887_v37 = vld [vmem:[#allocation8 + $0x498] sm:$0xff]  ;;  %v1936_v60 = vld [vmem:[#allocation8 + $0x620] sm:$0xff] }
 0x232   :  { %v1972_v8 = vld [vmem:[#allocation8 + $0x740] sm:$0xff] }
 0x233   :  { %7232 = vmatpush3.bf16.msra.mxu1 %v7231_v47  ;;  %v7255_v47 = vpack.c.bf16 %v1761_v43, %v1754_v42  ;;  %v7291_v42 = vpack.c.bf16 %v1887_v37, %v1880_v28  ;;  %v2000_v26 = vld [vmem:[#allocation8 + $0x820] sm:$0xff] }
 0x234   :  { %7234 = vmatprep.subr.bf16.mxu1 %v7233_v24  ;;  %7588 = vmatpush1.bf16.msra.mxu0 %v7587_v51  ;;  %v7257_v24 = vpack.c.bf16 %v1776_v45, %v1769_v44  ;;  %v1790_v51 = vld [vmem:[#allocation8 + $0x190] sm:$0xff]  ;;  %v1901_v45 = vld [vmem:[#allocation8 + $0x508] sm:$0xff]  ;;  %v2028_v28 = vld [vmem:[#allocation8 + $0x900] sm:$0xff] }
 0x235   :  { %7590 = vmatprep.subr.bf16.mxu0 %v7589_v55  ;;  %v7261_v53 = vpack.c.bf16 %v1790_v51, %v1783_v50  ;;  %v1789_v55 = vld [vmem:[#allocation8 + $0x188] sm:$0xff]  ;;  %v1894_v44 = vld [vmem:[#allocation8 + $0x4d0] sm:$0xff]  ;;  %v1915_v50 = vld [vmem:[#allocation8 + $0x578] sm:$0xff] }
 0x236   :  { %v1923_v51 = vld [vmem:[#allocation8 + $0x5b8] sm:$0xff] }
 0x237   :  { %7236 = vmatpush3.bf16.msra.mxu1 %v7235_v57  ;;  %v7263_v57 = vpack.c.bf16 %v1789_v55, %v1782_v54  ;;  %v1922_v55 = vld [vmem:[#allocation8 + $0x5b0] sm:$0xff] }
 0x238   :  { %7238 = vmatprep.subr.bf16.mxu1 %v7237_v58  ;;  %7592 = vmatpush1.bf16.msra.mxu0 %v7591_v10  ;;  %v7265_v58 = vpack.c.bf16 %v1804_v25, %v1797_v56  ;;  %v1818_v10 = vld [vmem:[#allocation8 + $0x270] sm:$0xff]  ;;  %v1929_v56 = vld [vmem:[#allocation8 + $0x5e8] sm:$0xff] }
 0x239   :  { %7594 = vmatprep.subr.bf16.mxu0 %v7593_v2  ;;  %v7269_v63 = vpack.c.bf16 %v1818_v10, %v1811_v61  ;;  %v1817_v2 = vld [vmem:[#allocation8 + $0x268] sm:$0xff]  ;;  %v1943_v61 = vld [vmem:[#allocation8 + $0x658] sm:$0xff] }
 0x23a   :  { %v1937_v25 = vld [vmem:[#allocation8 + $0x628] sm:$0xff]  ;;  %v1951_v10 = vld [vmem:[#allocation8 + $0x698] sm:$0xff] }
 0x23b   :  { %7240 = vmatpush3.bf16.msra.mxu1 %v7239_v5  ;;  %v7271_v5 = vpack.c.bf16 %v1817_v2, %v1810_v1  ;;  %v7307_v1 = vpack.c.bf16 %v1943_v61, %v1936_v60  ;;  %v2084_v60 = vld [vmem:[#allocation8 + $0xac0] sm:$0xff] }
 0x23c   :  { %7242 = vmatprep.subr.bf16.mxu1 %v7241_v6  ;;  %7596 = vmatpush1.bf16.msra.mxu0 %v7595_v9  ;;  %v7273_v6 = vpack.c.bf16 %v1832_v4, %v1825_v3  ;;  %v1846_v9 = vld [vmem:[#allocation8 + $0x350] sm:$0xff] }
 0x23d   :  { %7598 = vmatprep.subr.bf16.mxu0 %v7597_v17  ;;  %v7277_v15 = vpack.c.bf16 %v1846_v9, %v1839_v11  ;;  %v1845_v17 = vld [vmem:[#allocation8 + $0x348] sm:$0xff]  ;;  %v1950_v4 = vld [vmem:[#allocation8 + $0x690] sm:$0xff]  ;;  %v1964_v9 = vld [vmem:[#allocation8 + $0x700] sm:$0xff] }
 0x23f   :  { %7244 = vmatpush3.bf16.msra.mxu1 %v7243_v21  ;;  %v7279_v21 = vpack.c.bf16 %v1845_v17, %v1838_v16  ;;  %v1986_v16 = vld [vmem:[#allocation8 + $0x7b0] sm:$0xff] }
 0x240   :  { %7246 = vmatprep.subr.bf16.mxu1 %v7245_v23  ;;  %7600 = vmatpush1.bf16.msra.mxu0 %v7599_v30  ;;  %v7281_v23 = vpack.c.bf16 %v1860_v19, %v1853_v18  ;;  %v1874_v30 = vld [vmem:[#allocation8 + $0x430] sm:$0xff] }
 0x241   :  { %7602 = vmatprep.subr.bf16.mxu0 %v7601_v0  ;;  %v7285_v32 = vpack.c.bf16 %v1874_v30, %v1867_v29  ;;  %v1873_v0 = vld [vmem:[#allocation8 + $0x428] sm:$0xff]  ;;  %v1978_v19 = vld [vmem:[#allocation8 + $0x770] sm:$0xff]  ;;  %v1992_v30 = vld [vmem:[#allocation8 + $0x7e0] sm:$0xff] }
 0x242   :  { %v7287_v35 = vpack.c.bf16 %v1873_v0, %v1866_v33  ;;  %v2014_v33 = vld [vmem:[#allocation8 + $0x890] sm:$0xff] }
 0x243   :  { %7248 = vmatpush3.bf16.msra.mxu1 %v7247_v14  ;;  %v1881_v14 = vld [vmem:[#allocation8 + $0x468] sm:$0xff] }
 0x244   :  { %7250 = vmatprep.subr.bf16.mxu1 %v7249_v34  ;;  %v1888_v34 = vld [vmem:[#allocation8 + $0x4a0] sm:$0xff] }
 0x245   :  { %v7289_v36 = vpack.c.bf16 %v1888_v34, %v1881_v14  ;;  %v2006_v34 = vld [vmem:[#allocation8 + $0x850] sm:$0xff] }
 0x246   :  { %1714 = vmatmul.mubr.f32.vlgmr.msra.gmra.mrb[8].mxu1 %v9047_v46  ;;  %v1909_v46 = vld [vmem:[#allocation8 + $0x548] sm:$0xff] }
 0x247   :  { %7252 = vmatpush1.bf16.msra.mxu1 %v7251_v39  ;;  %2625 = vmatprep.mubr.f32.mxu1 %v9535_v13  ;;  %v1895_v39 = vld [vmem:[#allocation8 + $0x4d8] sm:$0xff] }
 0x248   :  { %7254 = vmatprep.subr.bf16.mxu1 %v7253_v40  ;;  %v1902_v40 = vld [vmem:[#allocation8 + $0x510] sm:$0xff] }
 0x249   :  { %v7293_v43 = vpack.c.bf16 %v1902_v40, %v1895_v39  ;;  %v2020_v40 = vld [vmem:[#allocation8 + $0x8c0] sm:$0xff] }
 0x24b   :  { %7256 = vmatpush1.bf16.msra.mxu1 %v7255_v47  ;;  %v1916_v47 = vld [vmem:[#allocation8 + $0x580] sm:$0xff] }
 0x24c   :  { %7258 = vmatprep.subr.bf16.mxu1 %v7257_v24  ;;  %v7295_v24 = vpack.c.bf16 %v1901_v45, %v1894_v44  ;;  %v7297_v48 = vpack.c.bf16 %v1916_v47, %v1909_v46  ;;  %v2042_v44 = vld [vmem:[#allocation8 + $0x970] sm:$0xff] }
 0x24d   :  { %v2034_v47 = vld [vmem:[#allocation8 + $0x930] sm:$0xff] }
 0x24f   :  { %7260 = vmatpush1.bf16.msra.mxu1 %v7259_v52  ;;  %v1930_v52 = vld [vmem:[#allocation8 + $0x5f0] sm:$0xff] }
 0x250   :  { %7262 = vmatprep.subr.bf16.mxu1 %v7261_v53  ;;  %v7299_v53 = vpack.c.bf16 %v1915_v50, %v1908_v49  ;;  %v7301_v54 = vpack.c.bf16 %v1930_v52, %v1923_v51  ;;  %v2056_v49 = vld [vmem:[#allocation8 + $0x9e0] sm:$0xff] }
 0x251   :  { %v2048_v52 = vld [vmem:[#allocation8 + $0x9a0] sm:$0xff] }
 0x253   :  { %7264 = vmatpush1.bf16.msra.mxu1 %v7263_v57  ;;  %v1944_v57 = vld [vmem:[#allocation8 + $0x660] sm:$0xff] }
 0x254   :  { %7266 = vmatprep.subr.bf16.mxu1 %v7265_v58  ;;  %v7303_v58 = vpack.c.bf16 %v1929_v56, %v1922_v55  ;;  %v7305_v59 = vpack.c.bf16 %v1944_v57, %v1937_v25  ;;  %v2070_v55 = vld [vmem:[#allocation8 + $0xa50] sm:$0xff] }
 0x255   :  { %v2062_v57 = vld [vmem:[#allocation8 + $0xa10] sm:$0xff] }
 0x257   :  { %7268 = vmatpush1.bf16.msra.mxu1 %v7267_v62  ;;  %v1958_v62 = vld [vmem:[#allocation8 + $0x6d0] sm:$0xff] }
 0x258   :  { %7270 = vmatprep.subr.bf16.mxu1 %v7269_v63  ;;  %v7309_v3 = vpack.c.bf16 %v1958_v62, %v1951_v10  ;;  %v2076_v62 = vld [vmem:[#allocation8 + $0xa80] sm:$0xff] }
 0x25b   :  { %7272 = vmatpush1.bf16.msra.mxu1 %v7271_v5  ;;  %v1957_v5 = vld [vmem:[#allocation8 + $0x6c8] sm:$0xff] }
 0x25c   :  { %7274 = vmatprep.subr.bf16.mxu1 %v7273_v6  ;;  %v1965_v6 = vld [vmem:[#allocation8 + $0x708] sm:$0xff]  ;;  %v7311_v20 = vpack.c.bf16 %v1957_v5, %v1950_v4  ;;  %v2098_v4 = vld [vmem:[#allocation8 + $0xb30] sm:$0xff] }
 0x25d   :  { %v7313_v11 = vpack.c.bf16 %v1972_v8, %v1965_v6  ;;  %v2090_v8 = vld [vmem:[#allocation8 + $0xaf0] sm:$0xff] }
 0x25f   :  { %7276 = vmatpush1.bf16.msra.mxu1 %v7275_v12  ;;  %v1971_v12 = vld [vmem:[#allocation8 + $0x738] sm:$0xff] }
 0x260   :  { %7278 = vmatprep.subr.bf16.mxu1 %v7277_v15  ;;  %v1979_v15 = vld [vmem:[#allocation8 + $0x778] sm:$0xff]  ;;  %v7315_v17 = vpack.c.bf16 %v1971_v12, %v1964_v9  ;;  %v2112_v9 = vld [vmem:[#allocation8 + $0xba0] sm:$0xff] }
 0x261   :  { %v7317_v18 = vpack.c.bf16 %v1986_v16, %v1979_v15  ;;  %v2104_v16 = vld [vmem:[#allocation8 + $0xb60] sm:$0xff] }
 0x263   :  { %7280 = vmatpush1.bf16.msra.mxu1 %v7279_v21  ;;  %v1985_v21 = vld [vmem:[#allocation8 + $0x7a8] sm:$0xff] }
 0x264   :  { %7282 = vmatprep.subr.bf16.mxu1 %v7281_v23  ;;  %v1993_v23 = vld [vmem:[#allocation8 + $0x7e8] sm:$0xff]  ;;  %v7319_v27 = vpack.c.bf16 %v1985_v21, %v1978_v19  ;;  %v2126_v19 = vld [vmem:[#allocation8 + $0xc10] sm:$0xff] }
 0x265   :  { %v7321_v29 = vpack.c.bf16 %v2000_v26, %v1993_v23  ;;  %v2118_v26 = vld [vmem:[#allocation8 + $0xbd0] sm:$0xff] }
 0x267   :  { %7284 = vmatpush1.bf16.msra.mxu1 %v7283_v31  ;;  %v1999_v31 = vld [vmem:[#allocation8 + $0x818] sm:$0xff] }
 0x268   :  { %7286 = vmatprep.subr.bf16.mxu1 %v7285_v32  ;;  %v2007_v32 = vld [vmem:[#allocation8 + $0x858] sm:$0xff]  ;;  %v7323_v0 = vpack.c.bf16 %v1999_v31, %v1992_v30  ;;  %v2140_v30 = vld [vmem:[#allocation8 + $0xc80] sm:$0xff] }
 0x269   :  { %v7325_v14 = vpack.c.bf16 %v2014_v33, %v2007_v32  ;;  %v2132_v33 = vld [vmem:[#allocation8 + $0xc40] sm:$0xff] }
 0x26b   :  { %7288 = vmatpush1.bf16.msra.mxu1 %v7287_v35  ;;  %v2013_v35 = vld [vmem:[#allocation8 + $0x888] sm:$0xff] }
 0x26c   :  { %7290 = vmatprep.subr.bf16.mxu1 %v7289_v36  ;;  %v2021_v36 = vld [vmem:[#allocation8 + $0x8c8] sm:$0xff]  ;;  %v7327_v37 = vpack.c.bf16 %v2013_v35, %v2006_v34  ;;  %v2147_v34 = vld [vmem:[#allocation8 + $0xcb8] sm:$0xff]  ;;  %v2154_v35 = vld [vmem:[#allocation8 + $0xcf0] sm:$0xff] }
 0x26d   :  { %v7329_v39 = vpack.c.bf16 %v2028_v28, %v2021_v36  ;;  %v9555_v36 = vsub.s32 2, %v9523_v7 }
 0x26f   :  { %7292 = vmatpush1.bf16.msra.mxu1 %v7291_v42  ;;  %v2027_v42 = vld [vmem:[#allocation8 + $0x8f8] sm:$0xff] }
 0x270   :  { %7294 = vmatprep.subr.bf16.mxu1 %v7293_v43  ;;  %v2035_v43 = vld [vmem:[#allocation8 + $0x938] sm:$0xff]  ;;  %v7331_v45 = vpack.c.bf16 %v2027_v42, %v2020_v40  ;;  %v2146_v40 = vld [vmem:[#allocation8 + $0xcb0] sm:$0xff]  ;;  %v2153_v42 = vld [vmem:[#allocation8 + $0xce8] sm:$0xff] }
 0x271   :  { %v7333_v46 = vpack.c.bf16 %v2042_v44, %v2035_v43  ;;  %v9560_v43 = vld [vmem:[#allocation7] sm:$0xff] }
 0x273   :  { %7296 = vmatpush1.bf16.msra.mxu1 %v7295_v24  ;;  %v2041_v24 = vld [vmem:[#allocation8 + $0x968] sm:$0xff] }
 0x274   :  { %7298 = vmatprep.subr.bf16.mxu1 %v7297_v48  ;;  %v2049_v48 = vld [vmem:[#allocation8 + $0x9a8] sm:$0xff]  ;;  %v7335_v50 = vpack.c.bf16 %v2041_v24, %v2034_v47  ;;  %v837_v47 = vrot.slane %v9560_v43, %v9555_v36 }
 0x275   :  { %v7337_v51 = vpack.c.bf16 %v2056_v49, %v2049_v48  ;;  %v7367_v48 = vpack.c.bf16 %v2153_v42, %v2146_v40  ;;  %v2233_v40 = vld [vmem:[#allocation8 + $0xf68] sm:$0xff]  ;;  %v2240_v42 = vld [vmem:[#allocation8 + $0xfa0] sm:$0xff] }
 0x277   :  { %7300 = vmatpush1.bf16.msra.mxu1 %v7299_v53  ;;  %v2055_v53 = vld [vmem:[#allocation8 + $0x9d8] sm:$0xff] }
 0x278   :  { %7302 = vmatprep.subr.bf16.mxu1 %v7301_v54  ;;  %v2063_v54 = vld [vmem:[#allocation8 + $0xa18] sm:$0xff]  ;;  %v7339_v56 = vpack.c.bf16 %v2055_v53, %v2048_v52 }
 0x279   :  { %v7341_v25 = vpack.c.bf16 %v2070_v55, %v2063_v54  ;;  %v2175_v54 = vld [vmem:[#allocation8 + $0xd98] sm:$0xff]  ;;  %v2182_v55 = vld [vmem:[#allocation8 + $0xdd0] sm:$0xff] }
 0x27b   :  { %7304 = vmatpush1.bf16.msra.mxu1 %v7303_v58  ;;  %v2069_v58 = vld [vmem:[#allocation8 + $0xa48] sm:$0xff] }
 0x27c   :  { %v9546_v63 = vpop.f32.mrb[2].mxu0  ;;  %7306 = vmatprep.subr.bf16.mxu1 %v7305_v59  ;;  %v2077_v59 = vld [vmem:[#allocation8 + $0xa88] sm:$0xff]  ;;  %v7343_v61 = vpack.c.bf16 %v2069_v58, %v2062_v57  ;;  %v2190_v57 = vld [vmem:[#allocation8 + $0xe10] sm:$0xff] }
 0x27d   :  { %v9548_v2 = vpop.f32.mrb[3].mxu0  ;;  %v7345_v10 = vpack.c.bf16 %v2084_v60, %v2077_v59  ;;  %v2197_v58 = vld [vmem:[#allocation8 + $0xe48] sm:$0xff] }
 0x27f   :  { %7308 = vmatpush1.bf16.msra.mxu1 %v7307_v1  ;;  %v2083_v1 = vld [vmem:[#allocation8 + $0xab8] sm:$0xff] }
 0x280   :  { %7310 = vmatprep.subr.bf16.mxu1 %v7309_v3  ;;  %v2091_v3 = vld [vmem:[#allocation8 + $0xaf8] sm:$0xff]  ;;  %v7347_v5 = vpack.c.bf16 %v2083_v1, %v2076_v62  ;;  %v2205_v62 = vld [vmem:[#allocation8 + $0xe88] sm:$0xff] }
 0x281   :  { %v7349_v6 = vpack.c.bf16 %v2098_v4, %v2091_v3  ;;  %v7373_v3 = vpack.c.bf16 %v2182_v55, %v2175_v54  ;;  %v2212_v4 = vld [vmem:[#allocation8 + $0xec0] sm:$0xff]  ;;  %v2254_v54 = vld [vmem:[#allocation8 + $0x1010] sm:$0xff]  ;;  %v2231_v55 = vld [vmem:[#allocation8 + $0xf58] sm:$0xff] }
 0x283   :  { %7312 = vmatpush1.bf16.msra.mxu1 %v7311_v20  ;;  %v2097_v20 = vld [vmem:[#allocation8 + $0xb28] sm:$0xff] }
 0x284   :  { %7314 = vmatprep.subr.bf16.mxu1 %v7313_v11  ;;  %v2105_v11 = vld [vmem:[#allocation8 + $0xb68] sm:$0xff]  ;;  %v7351_v12 = vpack.c.bf16 %v2097_v20, %v2090_v8  ;;  %v7603_v20 = vpack.c.bf16 %v2197_v58, %v2190_v57 }
 0x285   :  { %v7353_v15 = vpack.c.bf16 %v2112_v9, %v2105_v11 }
 0x286   :  { %2626 = vmatmul.mubr.f32.vlgmr.msra.gmra.mrb[10].mxu1 %v9539_v22 }
 0x287   :  { %7316 = vmatpush1.bf16.msra.mxu1 %v7315_v17  ;;  %v2111_v17 = vld [vmem:[#allocation8 + $0xb98] sm:$0xff] }
 0x288   :  { %7318 = vmatprep.subr.bf16.mxu1 %v7317_v18  ;;  %v2119_v18 = vld [vmem:[#allocation8 + $0xbd8] sm:$0xff]  ;;  %v7355_v21 = vpack.c.bf16 %v2111_v17, %v2104_v16 }
 0x289   :  { %v7357_v23 = vpack.c.bf16 %v2126_v19, %v2119_v18  ;;  %v2211_v16 = vld [vmem:[#allocation8 + $0xeb8] sm:$0xff]  ;;  %v2188_v19 = vld [vmem:[#allocation8 + $0xe00] sm:$0xff] }
 0x28b   :  { %7320 = vmatpush1.bf16.msra.mxu1 %v7319_v27  ;;  %v2125_v27 = vld [vmem:[#allocation8 + $0xc08] sm:$0xff] }
 0x28c   :  { %7322 = vmatprep.subr.bf16.mxu1 %v7321_v29  ;;  %v2133_v29 = vld [vmem:[#allocation8 + $0xc48] sm:$0xff]  ;;  %v7359_v31 = vpack.c.bf16 %v2125_v27, %v2118_v26  ;;  %v2226_v27 = vld [vmem:[#allocation8 + $0xf30] sm:$0xff] }
 0x28d   :  { %v7361_v32 = vpack.c.bf16 %v2140_v30, %v2133_v29  ;;  %v2203_v29 = vld [vmem:[#allocation8 + $0xe78] sm:$0xff]  ;;  %v2210_v30 = vld [vmem:[#allocation8 + $0xeb0] sm:$0xff] }
 0x28f   :  { %7324 = vmatpush1.bf16.msra.mxu1 %v7323_v0  ;;  %v2139_v0 = vld [vmem:[#allocation8 + $0xc78] sm:$0xff] }
 0x290   :  { %7326 = vmatprep.subr.bf16.mxu1 %v7325_v14  ;;  %v9552_v14 = vsub.s32 5, %v9523_v7  ;;  %v7363_v28 = vpack.c.bf16 %v2139_v0, %v2132_v33  ;;  %v2218_v33 = vld [vmem:[#allocation8 + $0xef0] sm:$0xff]  ;;  %v2225_v0 = vld [vmem:[#allocation8 + $0xf28] sm:$0xff] }
 0x292   :  { %v849_v44 = vrot.slane %v9560_v43, %v9552_v14 }
 0x293   :  { %7328 = vmatpush1.bf16.msra.mxu1 %v7327_v37  ;;  %v9558_v37 = vsub.s32 3, %v9523_v7 }
 0x294   :  { %7330 = vmatprep.subr.bf16.mxu1 %v7329_v39  ;;  %v7365_v39 = vpack.c.bf16 %v2154_v35, %v2147_v34  ;;  %v8960_v52 = vadd.f32 %v9548_v2, %v849_v44  ;;  %v2202_v34 = vld [vmem:[#allocation8 + $0xe70] sm:$0xff]  ;;  %v2217_v44 = vld [vmem:[#allocation8 + $0xee8] sm:$0xff] }
 0x295   :  { %v841_v24 = vrot.slane %v9560_v43, %v9558_v37 }
 0x296   :  { %v1731_v2 = vmul.f32 0.01, %v8960_v52  ;;  %vm1724_vm4 = vcmp.gt.f32.partialorder %v8960_v52, 0.0 }
 0x297   :  { %7332 = vmatpush1.bf16.msra.mxu1 %v7331_v45  ;;  %v2161_v45 = vld [vmem:[#allocation8 + $0xd28] sm:$0xff] }
 0x298   :  { %7334 = vmatprep.subr.bf16.mxu1 %v7333_v46  ;;  %v2168_v46 = vld [vmem:[#allocation8 + $0xd60] sm:$0xff]  ;;  %v9577_v26 = vsel %vm1724_vm4, %v8960_v52, %v1731_v2  ;;  %v2223_v52 = vld [vmem:[#allocation8 + $0xf18] sm:$0xff] }
 0x299   :  { %v7369_v49 = vpack.c.bf16 %v2168_v46, %v2161_v45  ;;  %v2224_v45 = vld [vmem:[#allocation8 + $0xf20] sm:$0xff]  ;;  %v7611_v46 = vpack.c.bf16 %v2225_v0, %v2218_v33  ;;  %v2258_v33 = vld [vmem:[#allocation8 + $0x1030] sm:$0xff] }
 0x29b   :  { %7336 = vmatpush1.bf16.msra.mxu1 %v7335_v50  ;;  %v2160_v50 = vld [vmem:[#allocation8 + $0xd20] sm:$0xff] }
 0x29c   :  { %7338 = vmatprep.subr.bf16.mxu1 %v7337_v51  ;;  %v2167_v51 = vld [vmem:[#allocation8 + $0xd58] sm:$0xff] }
 0x29d   :  { %v7371_v60 = vpack.c.bf16 %v2167_v51, %v2160_v50  ;;  %v2216_v50 = vld [vmem:[#allocation8 + $0xee0] sm:$0xff]  ;;  %v7385_v51 = vpack.c.bf16 %v2224_v45, %v2217_v44 }
 0x29e   :  { %v7387_v57 = vpack.c.bf16 %v2223_v52, %v2216_v50  ;;  %v2303_v50 = vld [vmem:[#allocation8 + $0x1198] sm:$0xff] }
 0x29f   :  { %7340 = vmatpush1.bf16.msra.mxu1 %v7339_v56 }
 0x2a0   :  { %7342 = vmatprep.subr.bf16.mxu1 %v7341_v25 }
 0x2a3   :  { %7344 = vmatpush1.bf16.msra.mxu1 %v7343_v61  ;;  %v2174_v61 = vld [vmem:[#allocation8 + $0xd90] sm:$0xff] }
 0x2a4   :  { %7346 = vmatprep.subr.bf16.mxu1 %v7345_v10  ;;  %v2181_v10 = vld [vmem:[#allocation8 + $0xdc8] sm:$0xff] }
 0x2a5   :  { %v7375_v9 = vpack.c.bf16 %v2181_v10, %v2174_v61  ;;  %v2230_v61 = vld [vmem:[#allocation8 + $0xf50] sm:$0xff] }
 0x2a7   :  { %7348 = vmatpush1.bf16.msra.mxu1 %v7347_v5  ;;  %v2189_v5 = vld [vmem:[#allocation8 + $0xe08] sm:$0xff] }
 0x2a8   :  { %7350 = vmatprep.subr.bf16.mxu1 %v7349_v6  ;;  %v2196_v6 = vld [vmem:[#allocation8 + $0xe40] sm:$0xff] }
 0x2a9   :  { %v7377_v18 = vpack.c.bf16 %v2196_v6, %v2189_v5  ;;  %v2252_v5 = vld [vmem:[#allocation8 + $0x1000] sm:$0xff] }
 0x2ab   :  { %7352 = vmatpush1.bf16.msra.mxu1 %v7351_v12  ;;  %v7605_v12 = vpack.c.bf16 %v2212_v4, %v2205_v62  ;;  %v2237_v62 = vld [vmem:[#allocation8 + $0xf88] sm:$0xff] }
 0x2ac   :  { %7354 = vmatprep.subr.bf16.mxu1 %v7353_v15  ;;  %v2204_v15 = vld [vmem:[#allocation8 + $0xe80] sm:$0xff]  ;;  %v2245_v4 = vld [vmem:[#allocation8 + $0xfc8] sm:$0xff]  ;;  %v7391_v2 = vpack.c.bf16 %v2237_v62, %v2230_v61  ;;  %v2286_v61 = vld [vmem:[#allocation8 + $0x1110] sm:$0xff] }
 0x2ad   :  { %v2293_v62 = vld [vmem:[#allocation8 + $0x1148] sm:$0xff] }
 0x2af   :  { %7356 = vmatpush1.bf16.msra.mxu1 %v7355_v21  ;;  %v2195_v21 = vld [vmem:[#allocation8 + $0xe38] sm:$0xff] }
 0x2b0   :  { %7358 = vmatprep.subr.bf16.mxu1 %v7357_v23  ;;  %v2219_v23 = vld [vmem:[#allocation8 + $0xef8] sm:$0xff] }
 0x2b1   :  { %v7609_v35 = vpack.c.bf16 %v2226_v27, %v2219_v23  ;;  %v2266_v23 = vld [vmem:[#allocation8 + $0x1070] sm:$0xff] }
 0x2b3   :  { %7360 = vmatpush1.bf16.msra.mxu1 %v7359_v31  ;;  %v7607_v31 = vpack.c.bf16 %v2211_v16, %v2204_v15  ;;  %v7393_v15 = vpack.c.bf16 %v2252_v5, %v2245_v4  ;;  %v2251_v16 = vld [vmem:[#allocation8 + $0xff8] sm:$0xff]  ;;  %v2301_v4 = vld [vmem:[#allocation8 + $0x1188] sm:$0xff]  ;;  %v2308_v5 = vld [vmem:[#allocation8 + $0x11c0] sm:$0xff] }
 0x2b4   :  { %7362 = vmatprep.subr.bf16.mxu1 %v7361_v32  ;;  %v7379_v32 = vpack.c.bf16 %v2195_v21, %v2188_v19  ;;  %v2282_v19 = vld [vmem:[#allocation8 + $0x10f0] sm:$0xff]  ;;  %v2259_v21 = vld [vmem:[#allocation8 + $0x1038] sm:$0xff] }
 0x2b5   :  { %v7397_v0 = vpack.c.bf16 %v2266_v23, %v2259_v21  ;;  %v2315_v21 = vld [vmem:[#allocation8 + $0x11f8] sm:$0xff]  ;;  %v2322_v23 = vld [vmem:[#allocation8 + $0x1230] sm:$0xff] }
 0x2b7   :  { %7364 = vmatpush1.bf16.msra.mxu1 %v7363_v28  ;;  %v7381_v28 = vpack.c.bf16 %v2210_v30, %v2203_v29 }
 0x2b8   :  { %7366 = vmatprep.subr.bf16.mxu1 %v7365_v39  ;;  %v2209_v39 = vld [vmem:[#allocation8 + $0xea8] sm:$0xff] }
 0x2b9   :  { %v1291_v53 = vpop.f32.mrb[2].mxu1 }
 0x2ba   :  { %v8957_v56 = vadd.f32 %v1291_v53, %v837_v47  ;;  %v1293_v25 = vpop.f32.mrb[3].mxu1  ;;  %v7383_v47 = vpack.c.bf16 %v2209_v39, %v2202_v34  ;;  %v2247_v53 = vld [vmem:[#allocation8 + $0xfd8] sm:$0xff]  ;;  %v2265_v34 = vld [vmem:[#allocation8 + $0x1068] sm:$0xff] }
 0x2bb   :  { %v8958_v59 = vadd.f32 %v1293_v25, %v841_v24  ;;  %7368 = vmatpush1.bf16.msra.mxu1 %v7367_v48  ;;  %v7613_v24 = vpack.c.bf16 %v2240_v42, %v2233_v40  ;;  %v2232_v48 = vld [vmem:[#allocation8 + $0xf60] sm:$0xff]  ;;  %v7617_v58 = vpack.c.bf16 %v2254_v54, %v2247_v53  ;;  %v2273_v39 = vld [vmem:[#allocation8 + $0x10a8] sm:$0xff]  ;;  %v7399_v44 = vpack.c.bf16 %v2265_v34, %v2258_v33  ;;  %v2287_v53 = vld [vmem:[#allocation8 + $0x1118] sm:$0xff] }
 0x2bc   :  { %v1728_v1 = vmul.f32 0.01, %v8957_v56  ;;  %7370 = vmatprep.subr.bf16.mxu1 %v7369_v49  ;;  %vm1721_vm2 = vcmp.gt.f32.partialorder %v8957_v56, 0.0  ;;  %v2239_v49 = vld [vmem:[#allocation8 + $0xf98] sm:$0xff]  ;;  %v2280_v40 = vld [vmem:[#allocation8 + $0x10e0] sm:$0xff]  ;;  %v2294_v54 = vld [vmem:[#allocation8 + $0x1150] sm:$0xff] }
 0x2bd   :  { %vm1722_vm3 = vcmp.gt.f32.partialorder %v8958_v59, 0.0  ;;  %v1729_v8 = vmul.f32 0.01, %v8958_v59  ;;  %v7615_v25 = vpack.c.bf16 %v2239_v49, %v2232_v48  ;;  %v7401_v48 = vpack.c.bf16 %v2280_v40, %v2273_v39  ;;  %v2279_v49 = vld [vmem:[#allocation8 + $0x10d8] sm:$0xff]  ;;  %v2314_v33 = vld [vmem:[#allocation8 + $0x11f0] sm:$0xff]  ;;  %v2321_v34 = vld [vmem:[#allocation8 + $0x1228] sm:$0xff] }
 0x2be   :  { %v9573_v17 = vsel %vm1721_vm2, %v8957_v56, %v1728_v1  ;;  %v2238_v56 = vld [vmem:[#allocation8 + $0xf90] sm:$0xff]  ;;  %v2261_v1 = vld [vmem:[#allocation8 + $0x1048] sm:$0xff]  ;;  %v2336_v40 = vld [vmem:[#allocation8 + $0x12a0] sm:$0xff] }
 0x2bf   :  { %7372 = vmatpush1.bf16.msra.mxu1 %v7371_v60  ;;  %v9569_v11 = vsel %vm1722_vm3, %v8958_v59, %v1729_v8  ;;  %v2246_v59 = vld [vmem:[#allocation8 + $0xfd0] sm:$0xff]  ;;  %v2253_v60 = vld [vmem:[#allocation8 + $0x1008] sm:$0xff]  ;;  %v7389_v10 = vpack.c.bf16 %v2238_v56, %v2231_v55 }
 0x2c0   :  { %2696 = vmatprep.mubr.f32.mxu1 %v9569_v11  ;;  %2980 = vmatprep.mubr.f32.mxu0 %v9569_v11  ;;  %v7619_v6 = vpack.c.bf16 %v2253_v60, %v2246_v59  ;;  %v2302_v59 = vld [vmem:[#allocation8 + $0x1190] sm:$0xff]  ;;  %v2309_v60 = vld [vmem:[#allocation8 + $0x11c8] sm:$0xff] }
 0x2c1   :  { %2981 = vmatmul.mubr.f32.vlgmr.msra.gmra.mrb[4].mxu0 %v9573_v17  ;;  %7374 = vmatprep.subr.bf16.mxu1 %v7373_v3  ;;  %v2268_v3 = vld [vmem:[#allocation8 + $0x1080] sm:$0xff]  ;;  %v2329_v39 = vld [vmem:[#allocation8 + $0x1268] sm:$0xff] }
 0x2c2   :  { %7604 = vmatpush1.bf16.msra.mxu0 %v7603_v20  ;;  %3051 = vmatprep.mubr.f32.mxu0 %v9577_v26  ;;  %v7621_v8 = vpack.c.bf16 %v2268_v3, %v2261_v1  ;;  %v2260_v20 = vld [vmem:[#allocation8 + $0x1040] sm:$0xff]  ;;  %v2317_v1 = vld [vmem:[#allocation8 + $0x1208] sm:$0xff] }
 0x2c3   :  { %7376 = vmatpush1.bf16.msra.mxu1 %v7375_v9  ;;  %7606 = vmatprep.subr.bf16.mxu0 %v7605_v12  ;;  %v2267_v9 = vld [vmem:[#allocation8 + $0x1078] sm:$0xff]  ;;  %v2244_v12 = vld [vmem:[#allocation8 + $0xfc0] sm:$0xff] }
 0x2c4   :  { %7378 = vmatprep.subr.bf16.mxu1 %v7377_v18  ;;  %v2275_v18 = vld [vmem:[#allocation8 + $0x10b8] sm:$0xff]  ;;  %v7623_v27 = vpack.c.bf16 %v2267_v9, %v2260_v20  ;;  %v7395_v29 = vpack.c.bf16 %v2251_v16, %v2244_v12  ;;  %v2324_v3 = vld [vmem:[#allocation8 + $0x1240] sm:$0xff] }
 0x2c5   :  { %v7625_v30 = vpack.c.bf16 %v2282_v19, %v2275_v18  ;;  %v2316_v20 = vld [vmem:[#allocation8 + $0x1200] sm:$0xff]  ;;  %v2323_v9 = vld [vmem:[#allocation8 + $0x1238] sm:$0xff]  ;;  %v2338_v19 = vld [vmem:[#allocation8 + $0x12b0] sm:$0xff] }
 0x2c6   :  { %7608 = vmatpush1.bf16.msra.mxu0 %v7607_v31  ;;  %2697 = vmatmul.mubr.f32.vlgmr.msra.gmra.mrb[10].mxu1 %v9573_v17  ;;  %v2274_v31 = vld [vmem:[#allocation8 + $0x10b0] sm:$0xff]  ;;  %v2300_v12 = vld [vmem:[#allocation8 + $0x1180] sm:$0xff]  ;;  %v2307_v16 = vld [vmem:[#allocation8 + $0x11b8] sm:$0xff] }
 0x2c7   :  { %7380 = vmatpush1.bf16.msra.mxu1 %v7379_v32  ;;  %2767 = vmatprep.mubr.f32.mxu1 %v9577_v26  ;;  %v2281_v32 = vld [vmem:[#allocation8 + $0x10e8] sm:$0xff]  ;;  %v2331_v18 = vld [vmem:[#allocation8 + $0x1278] sm:$0xff] }
 0x2c8   :  { %7610 = vmatprep.subr.bf16.mxu0 %v7609_v35  ;;  %7382 = vmatprep.subr.bf16.mxu1 %v7381_v28  ;;  %v2289_v35 = vld [vmem:[#allocation8 + $0x1128] sm:$0xff]  ;;  %v2296_v28 = vld [vmem:[#allocation8 + $0x1160] sm:$0xff]  ;;  %v7627_v42 = vpack.c.bf16 %v2281_v32, %v2274_v31  ;;  %v2330_v31 = vld [vmem:[#allocation8 + $0x1270] sm:$0xff] }
 0x2c9   :  { %v7629_v45 = vpack.c.bf16 %v2296_v28, %v2289_v35  ;;  %v2337_v32 = vld [vmem:[#allocation8 + $0x12a8] sm:$0xff]  ;;  %v2352_v28 = vld [vmem:[#allocation8 + $0x1320] sm:$0xff] }
 0x2ca   :  { %7612 = vmatpush1.bf16.msra.mxu0 %v7611_v46  ;;  %v2288_v46 = vld [vmem:[#allocation8 + $0x1120] sm:$0xff]  ;;  %v2345_v35 = vld [vmem:[#allocation8 + $0x12e8] sm:$0xff] }
 0x2cb   :  { %7384 = vmatpush1.bf16.msra.mxu1 %v7383_v47  ;;  %7614 = vmatprep.subr.bf16.mxu0 %v7613_v24  ;;  %v2295_v47 = vld [vmem:[#allocation8 + $0x1158] sm:$0xff]  ;;  %v2272_v24 = vld [vmem:[#allocation8 + $0x10a0] sm:$0xff] }
 0x2cc   :  { %7386 = vmatprep.subr.bf16.mxu1 %v7385_v51  ;;  %v2310_v51 = vld [vmem:[#allocation8 + $0x11d0] sm:$0xff]  ;;  %v7631_v56 = vpack.c.bf16 %v2295_v47, %v2288_v46  ;;  %v2344_v46 = vld [vmem:[#allocation8 + $0x12e0] sm:$0xff]  ;;  %v2351_v47 = vld [vmem:[#allocation8 + $0x1318] sm:$0xff] }
 0x2ce   :  { %7616 = vmatpush1.bf16.msra.mxu0 %v7615_v25 }
 0x2cf   :  { %7388 = vmatpush1.bf16.msra.mxu1 %v7387_v57  ;;  %7618 = vmatprep.subr.bf16.mxu0 %v7617_v58  ;;  %v7403_v57 = vpack.c.bf16 %v2279_v49, %v2272_v24  ;;  %v7633_v58 = vpack.c.bf16 %v2310_v51, %v2303_v50  ;;  %v2328_v24 = vld [vmem:[#allocation8 + $0x1260] sm:$0xff]  ;;  %v2335_v49 = vld [vmem:[#allocation8 + $0x1298] sm:$0xff]  ;;  %v2366_v51 = vld [vmem:[#allocation8 + $0x1390] sm:$0xff] }
 0x2d0   :  { %7390 = vmatprep.subr.bf16.mxu1 %v7389_v10  ;;  %v7405_v10 = vpack.c.bf16 %v2294_v54, %v2287_v53  ;;  %v2359_v50 = vld [vmem:[#allocation8 + $0x1358] sm:$0xff]  ;;  %v2350_v53 = vld [vmem:[#allocation8 + $0x1310] sm:$0xff]  ;;  %v7647_v54 = vpack.c.bf16 %v2351_v47, %v2344_v46 }
 0x2d2   :  { %7620 = vmatpush1.bf16.msra.mxu0 %v7619_v6  ;;  %v7635_v6 = vpack.c.bf16 %v2309_v60, %v2302_v59  ;;  %v2342_v59 = vld [vmem:[#allocation8 + $0x12d0] sm:$0xff] }
 0x2d3   :  { %7392 = vmatpush1.bf16.msra.mxu1 %v7391_v2  ;;  %7622 = vmatprep.subr.bf16.mxu0 %v7621_v8  ;;  %v7407_v2 = vpack.c.bf16 %v2293_v62, %v2286_v61  ;;  %v7637_v8 = vpack.c.bf16 %v2324_v3, %v2317_v1  ;;  %v2349_v61 = vld [vmem:[#allocation8 + $0x1308] sm:$0xff]  ;;  %v2380_v62 = vld [vmem:[#allocation8 + $0x1400] sm:$0xff] }
 0x2d4   :  { %7394 = vmatprep.subr.bf16.mxu1 %v7393_v15  ;;  %v7409_v15 = vpack.c.bf16 %v2308_v5, %v2301_v4  ;;  %v2357_v1 = vld [vmem:[#allocation8 + $0x1348] sm:$0xff]  ;;  %v2364_v3 = vld [vmem:[#allocation8 + $0x1380] sm:$0xff]  ;;  %v7423_v5 = vpack.c.bf16 %v2349_v61, %v2342_v59 }
 0x2d6   :  { %7624 = vmatpush1.bf16.msra.mxu0 %v7623_v27  ;;  %v7639_v27 = vpack.c.bf16 %v2323_v9, %v2316_v20  ;;  %v2356_v20 = vld [vmem:[#allocation8 + $0x1340] sm:$0xff]  ;;  %v9585_v9 = vsub.s32 4, %v9523_v7 }
 0x2d7   :  { %7396 = vmatpush1.bf16.msra.mxu1 %v7395_v29  ;;  %7626 = vmatprep.subr.bf16.mxu0 %v7625_v30  ;;  %v7411_v29 = vpack.c.bf16 %v2307_v16, %v2300_v12  ;;  %v7641_v30 = vpack.c.bf16 %v2338_v19, %v2331_v18  ;;  %v7425_v12 = vpack.c.bf16 %v2364_v3, %v2357_v1  ;;  %v2387_v16 = vld [vmem:[#allocation8 + $0x1438] sm:$0xff]  ;;  %v2394_v18 = vld [vmem:[#allocation8 + $0x1470] sm:$0xff]  ;;  %v2421_v1 = vld [vmem:[#allocation8 + $0x1548] sm:$0xff] }
 0x2d8   :  { %7398 = vmatprep.subr.bf16.mxu1 %v7397_v0  ;;  %v7413_v0 = vpack.c.bf16 %v2322_v23, %v2315_v21  ;;  %v2371_v19 = vld [vmem:[#allocation8 + $0x13b8] sm:$0xff]  ;;  %v2378_v21 = vld [vmem:[#allocation8 + $0x13f0] sm:$0xff] }
 0x2d9   :  { %v6138_v52 = vpop.f32.mrb[4].mxu1 }
 0x2da   :  { %7628 = vmatpush1.bf16.msra.mxu0 %v7627_v42  ;;  %v6139_v55 = vpop.f32.mrb[5].mxu1  ;;  %v7643_v42 = vpack.c.bf16 %v2337_v32, %v2330_v31  ;;  %v2386_v31 = vld [vmem:[#allocation8 + $0x1430] sm:$0xff]  ;;  %v2393_v32 = vld [vmem:[#allocation8 + $0x1468] sm:$0xff] }
 0x2db   :  { %v9582_v25 = vadd.f32 %v6139_v55, %v6138_v52  ;;  %7400 = vmatpush1.bf16.msra.mxu1 %v7399_v44  ;;  %7630 = vmatprep.subr.bf16.mxu0 %v7629_v45  ;;  %v7415_v44 = vpack.c.bf16 %v2321_v34, %v2314_v33  ;;  %v7645_v45 = vpack.c.bf16 %v2352_v28, %v2345_v35  ;;  %v2343_v52 = vld [vmem:[#allocation8 + $0x12d8] sm:$0xff]  ;;  %v2370_v33 = vld [vmem:[#allocation8 + $0x13b0] sm:$0xff]  ;;  %v2377_v35 = vld [vmem:[#allocation8 + $0x13e8] sm:$0xff] }
 0x2dc   :  { %7402 = vmatprep.subr.bf16.mxu1 %v7401_v48  ;;  %v7417_v48 = vpack.c.bf16 %v2336_v40, %v2329_v39  ;;  %v7419_v55 = vpack.c.bf16 %v2335_v49, %v2328_v24  ;;  %v7421_v60 = vpack.c.bf16 %v2350_v53, %v2343_v52  ;;  %v7429_v34 = vpack.c.bf16 %v2378_v21, %v2371_v19  ;;  %v2401_v28 = vld [vmem:[#allocation8 + $0x14a8] sm:$0xff]  ;;  %v2408_v39 = vld [vmem:[#allocation8 + $0x14e0] sm:$0xff]  ;;  %v2415_v53 = vld [vmem:[#allocation8 + $0x1518] sm:$0xff] }
 0x2dd   :  { %v2385_v40 = vld [vmem:[#allocation8 + $0x1428] sm:$0xff]  ;;  %v7431_v47 = vpack.c.bf16 %v2377_v35, %v2370_v33  ;;  %v7661_v24 = vpack.c.bf16 %v2408_v39, %v2401_v28  ;;  %v2384_v49 = vld [vmem:[#allocation8 + $0x1420] sm:$0xff]  ;;  %v2435_v19 = vld [vmem:[#allocation8 + $0x15b8] sm:$0xff]  ;;  %v9296_v35 = vmov 0.0  }
 0x2de   :  { %7632 = vmatpush1.bf16.msra.mxu0 %v7631_v56  ;;  %v7649_v56 = vpack.c.bf16 %v2366_v51, %v2359_v50  ;;  %v2391_v50 = vld [vmem:[#allocation8 + $0x1458] sm:$0xff]  ;;  %v2412_v21 = vld [vmem:[#allocation8 + $0x1500] sm:$0xff] }
 0x2df   :  { %7404 = vmatpush1.bf16.msra.mxu1 %v7403_v57  ;;  %7634 = vmatprep.subr.bf16.mxu0 %v7633_v58  ;;  %v2358_v57 = vld [vmem:[#allocation8 + $0x1350] sm:$0xff]  ;;  %v2365_v58 = vld [vmem:[#allocation8 + $0x1388] sm:$0xff]  ;;  %v2427_v33 = vld [vmem:[#allocation8 + $0x1578] sm:$0xff] }
 0x2e0   :  { %7406 = vmatprep.subr.bf16.mxu1 %v7405_v10  ;;  %v2373_v10 = vld [vmem:[#allocation8 + $0x13c8] sm:$0xff]  ;;  %v7651_v4 = vpack.c.bf16 %v2365_v58, %v2358_v57  ;;  %v2406_v57 = vld [vmem:[#allocation8 + $0x14d0] sm:$0xff] }
 0x2e2   :  { %7636 = vmatpush1.bf16.msra.mxu0 %v7635_v6  ;;  %v7653_v6 = vpack.c.bf16 %v2380_v62, %v2373_v10  ;;  %v2414_v62 = vld [vmem:[#allocation8 + $0x1510] sm:$0xff] }
 0x2e3   :  { %7408 = vmatpush1.bf16.msra.mxu1 %v7407_v2  ;;  %7638 = vmatprep.subr.bf16.mxu0 %v7637_v8  ;;  %v2372_v2 = vld [vmem:[#allocation8 + $0x13c0] sm:$0xff]  ;;  %v2379_v8 = vld [vmem:[#allocation8 + $0x13f8] sm:$0xff] }
 0x2e4   :  { %7410 = vmatprep.subr.bf16.mxu1 %v7409_v15  ;;  %v2363_v15 = vld [vmem:[#allocation8 + $0x1378] sm:$0xff]  ;;  %v7655_v23 = vpack.c.bf16 %v2379_v8, %v2372_v2  ;;  %v2436_v2 = vld [vmem:[#allocation8 + $0x15c0] sm:$0xff] }
 0x2e6   :  { %7640 = vmatpush1.bf16.msra.mxu0 %v7639_v27  ;;  %v852_v27 = vsub.s32 6, %v9523_v7 }
 0x2e7   :  { %7412 = vmatpush1.bf16.msra.mxu1 %v7411_v29  ;;  %7642 = vmatprep.subr.bf16.mxu0 %v7641_v30  ;;  %v7427_v29 = vpack.c.bf16 %v2363_v15, %v2356_v20  ;;  %v7657_v30 = vpack.c.bf16 %v2394_v18, %v2387_v16  ;;  %v2413_v20 = vld [vmem:[#allocation8 + $0x1508] sm:$0xff]  ;;  %v2428_v18 = vld [vmem:[#allocation8 + $0x1580] sm:$0xff] }
 0x2e8   :  { %7414 = vmatprep.subr.bf16.mxu1 %v7413_v0  ;;  %v845_v0 = vrot.slane %v9560_v43, %v9585_v9  ;;  %v853_v46 = vrot.slane %v9560_v43, %v852_v27  ;;  %v7435_v43 = vpack.c.bf16 %v2391_v50, %v2384_v49  ;;  %v2448_v49 = vld [vmem:[#allocation8 + $0x1620] sm:$0xff] }
 0x2ea   :  { %7644 = vmatpush1.bf16.msra.mxu0 %v7643_v42  ;;  %v2392_v42 = vld [vmem:[#allocation8 + $0x1460] sm:$0xff]  ;;  %v8959_v51 = vadd.f32 %v9546_v63, %v845_v0  ;;  %v2398_v63 = vld [vmem:[#allocation8 + $0x1490] sm:$0xff] }
 0x2eb   :  { %7416 = vmatpush1.bf16.msra.mxu1 %v7415_v44  ;;  %7646 = vmatprep.subr.bf16.mxu0 %v7645_v45  ;;  %v7659_v44 = vpack.c.bf16 %v2393_v32, %v2386_v31  ;;  %v2400_v45 = vld [vmem:[#allocation8 + $0x14a0] sm:$0xff]  ;;  %v7433_v52 = vpack.c.bf16 %v2392_v42, %v2385_v40  ;;  %v2443_v31 = vld [vmem:[#allocation8 + $0x15f8] sm:$0xff]  ;;  %v2450_v32 = vld [vmem:[#allocation8 + $0x1630] sm:$0xff] }
 0x2ec   :  { %7418 = vmatprep.subr.bf16.mxu1 %v7417_v48  ;;  %v2407_v48 = vld [vmem:[#allocation8 + $0x14d8] sm:$0xff]  ;;  %v1730_v3 = vmul.f32 0.01, %v8959_v51  ;;  %vm1723_vm5 = vcmp.gt.f32.partialorder %v8959_v51, 0.0  ;;  %v2434_v0 = vld [vmem:[#allocation8 + $0x15b0] sm:$0xff]  ;;  %v7673_v39 = vpack.c.bf16 %v2450_v32, %v2443_v31  ;;  %v2449_v42 = vld [vmem:[#allocation8 + $0x1628] sm:$0xff] }
 0x2ed   :  { %v7663_v59 = vpack.c.bf16 %v2407_v48, %v2400_v45  ;;  %v2442_v40 = vld [vmem:[#allocation8 + $0x15f0] sm:$0xff]  ;;  %v7445_v45 = vpack.c.bf16 %v2434_v0, %v2427_v33  ;;  %v2441_v48 = vld [vmem:[#allocation8 + $0x15e8] sm:$0xff]  ;;  %v2499_v31 = vld [vmem:[#allocation8 + $0x17b8] sm:$0xff] }
 0x2ee   :  { %7648 = vmatpush1.bf16.msra.mxu0 %v7647_v54  ;;  %v2422_v54 = vld [vmem:[#allocation8 + $0x1550] sm:$0xff]  ;;  %v7675_v50 = vpack.c.bf16 %v2449_v42, %v2442_v40  ;;  %v2483_v33 = vld [vmem:[#allocation8 + $0x1738] sm:$0xff]  ;;  %v2505_v42 = vld [vmem:[#allocation8 + $0x17e8] sm:$0xff] }
 0x2ef   :  { %7420 = vmatpush1.bf16.msra.mxu1 %v7419_v55  ;;  %7650 = vmatprep.subr.bf16.mxu0 %v7649_v56  ;;  %v2399_v56 = vld [vmem:[#allocation8 + $0x1498] sm:$0xff]  ;;  %v7665_v10 = vpack.c.bf16 %v2422_v54, %v2415_v53  ;;  %v2456_v53 = vld [vmem:[#allocation8 + $0x1660] sm:$0xff]  ;;  %v2506_v32 = vld [vmem:[#allocation8 + $0x17f0] sm:$0xff] }
 0x2f0   :  { %7422 = vmatprep.subr.bf16.mxu1 %v7421_v60  ;;  %v1576_v60 = vadd.f32 %v9582_v25, %v853_v46  ;;  %v7667_v25 = vpack.c.bf16 %v2421_v1, %v2414_v62  ;;  %v2433_v46 = vld [vmem:[#allocation8 + $0x15a8] sm:$0xff]  ;;  %v2463_v54 = vld [vmem:[#allocation8 + $0x1698] sm:$0xff]  ;;  %v2470_v1 = vld [vmem:[#allocation8 + $0x16d0] sm:$0xff] }
 0x2f1   :  { %v2490_v0 = vld [vmem:[#allocation8 + $0x1770] sm:$0xff] }
 0x2f2   :  { %7652 = vmatpush1.bf16.msra.mxu0 %v7651_v4  ;;  %v7437_v4 = vpack.c.bf16 %v2406_v57, %v2399_v56  ;;  %v7449_v56 = vpack.c.bf16 %v2448_v49, %v2441_v48  ;;  %v2447_v57 = vld [vmem:[#allocation8 + $0x1618] sm:$0xff]  ;;  %v2498_v40 = vld [vmem:[#allocation8 + $0x17b0] sm:$0xff]  ;;  %v2497_v48 = vld [vmem:[#allocation8 + $0x17a8] sm:$0xff] }
 0x2f3   :  { %7424 = vmatpush1.bf16.msra.mxu1 %v7423_v5  ;;  %7654 = vmatprep.subr.bf16.mxu0 %v7653_v6  ;;  %v2405_v5 = vld [vmem:[#allocation8 + $0x14c8] sm:$0xff]  ;;  %v2504_v49 = vld [vmem:[#allocation8 + $0x17e0] sm:$0xff] }
 0x2f4   :  { %7426 = vmatprep.subr.bf16.mxu1 %v7425_v12  ;;  %v2429_v6 = vld [vmem:[#allocation8 + $0x1588] sm:$0xff]  ;;  %v2420_v12 = vld [vmem:[#allocation8 + $0x1540] sm:$0xff]  ;;  %v7439_v15 = vpack.c.bf16 %v2405_v5, %v2398_v63 }
 0x2f5   :  { %v7669_v16 = vpack.c.bf16 %v2436_v2, %v2429_v6  ;;  %v2477_v63 = vld [vmem:[#allocation8 + $0x1708] sm:$0xff]  ;;  %v2492_v2 = vld [vmem:[#allocation8 + $0x1780] sm:$0xff] }
 0x2f6   :  { %7656 = vmatpush1.bf16.msra.mxu0 %v7655_v23  ;;  %v9597_v23 = vsel %vm1723_vm5, %v8959_v51, %v1730_v3  ;;  %v2454_v3 = vld [vmem:[#allocation8 + $0x1650] sm:$0xff]  ;;  %v2461_v5 = vld [vmem:[#allocation8 + $0x1688] sm:$0xff] }
 0x2f7   :  { %7428 = vmatpush1.bf16.msra.mxu1 %v7427_v29  ;;  %7658 = vmatprep.subr.bf16.mxu0 %v7657_v30  ;;  %v7441_v29 = vpack.c.bf16 %v2420_v12, %v2413_v20  ;;  %v2419_v30 = vld [vmem:[#allocation8 + $0x1538] sm:$0xff]  ;;  %v2485_v6 = vld [vmem:[#allocation8 + $0x1748] sm:$0xff]  ;;  %v2476_v12 = vld [vmem:[#allocation8 + $0x1700] sm:$0xff] }
 0x2f8   :  { %7430 = vmatprep.subr.bf16.mxu1 %v7429_v34  ;;  %v7671_v34 = vpack.c.bf16 %v2435_v19, %v2428_v18  ;;  %v7443_v28 = vpack.c.bf16 %v2419_v30, %v2412_v21  ;;  %v2469_v20 = vld [vmem:[#allocation8 + $0x16c8] sm:$0xff]  ;;  %v2484_v18 = vld [vmem:[#allocation8 + $0x1740] sm:$0xff]  ;;  %v2491_v19 = vld [vmem:[#allocation8 + $0x1778] sm:$0xff] }
 0x2f9   :  { %v6173_v55 = vpop.f32.mrb[6].mxu1  ;;  %v2468_v21 = vld [vmem:[#allocation8 + $0x16c0] sm:$0xff]  ;;  %v2475_v30 = vld [vmem:[#allocation8 + $0x16f8] sm:$0xff] }
 0x2fa   :  { %7660 = vmatpush1.bf16.msra.mxu0 %v7659_v44  ;;  %v6174_v58 = vpop.f32.mrb[7].mxu1  ;;  %v2426_v44 = vld [vmem:[#allocation8 + $0x1570] sm:$0xff] }
 0x2fb   :  { %v6175_v61 = vadd.f32 %v6174_v58, %v6173_v55  ;;  %7432 = vmatpush1.bf16.msra.mxu1 %v7431_v47  ;;  %7662 = vmatprep.subr.bf16.mxu0 %v7661_v24  ;;  %v2457_v47 = vld [vmem:[#allocation8 + $0x1668] sm:$0xff]  ;;  %v2464_v24 = vld [vmem:[#allocation8 + $0x16a0] sm:$0xff]  ;;  %v7447_v51 = vpack.c.bf16 %v2433_v46, %v2426_v44  ;;  %v2471_v58 = vld [vmem:[#allocation8 + $0x16d8] sm:$0xff] }
 0x2fc   :  { %7434 = vmatprep.subr.bf16.mxu1 %v7433_v52  ;;  %v7677_v52 = vpack.c.bf16 %v2464_v24, %v2457_v47  ;;  %v2440_v55 = vld [vmem:[#allocation8 + $0x15e0] sm:$0xff]  ;;  %v2482_v44 = vld [vmem:[#allocation8 + $0x1730] sm:$0xff]  ;;  %v2489_v46 = vld [vmem:[#allocation8 + $0x1768] sm:$0xff] }
 0x2fd   :  { %v9595_v8 = vadd.f32 %v6175_v61, %v1576_v60  ;;  %v2462_v60 = vld [vmem:[#allocation8 + $0x1690] sm:$0xff]  ;;  %v7679_v61 = vpack.c.bf16 %v2463_v54, %v2456_v53  ;;  %v2513_v47 = vld [vmem:[#allocation8 + $0x1828] sm:$0xff]  ;;  %v2520_v24 = vld [vmem:[#allocation8 + $0x1860] sm:$0xff] }
 0x2fe   :  { %7664 = vmatpush1.bf16.msra.mxu0 %v7663_v59  ;;  %v2478_v59 = vld [vmem:[#allocation8 + $0x1710] sm:$0xff]  ;;  %v2512_v53 = vld [vmem:[#allocation8 + $0x1820] sm:$0xff]  ;;  %v2519_v54 = vld [vmem:[#allocation8 + $0x1858] sm:$0xff] }
 0x2ff   :  { %7436 = vmatpush1.bf16.msra.mxu1 %v7435_v43  ;;  %7666 = vmatprep.subr.bf16.mxu0 %v7665_v10  ;;  %v2455_v43 = vld [vmem:[#allocation8 + $0x1658] sm:$0xff]  ;;  %v7451_v10 = vpack.c.bf16 %v2447_v57, %v2440_v55  ;;  %v7681_v62 = vpack.c.bf16 %v2478_v59, %v2471_v58  ;;  %v2496_v55 = vld [vmem:[#allocation8 + $0x17a0] sm:$0xff]  ;;  %v1858_v58 = vld [vmem:[#allocation8 + $0x3b0] sm:$0xff] }
 0x300   :  { %7438 = vmatprep.subr.bf16.mxu1 %v7437_v4  ;;  %v7453_v4 = vpack.c.bf16 %v2462_v60, %v2455_v43  ;;  %v2503_v57 = vld [vmem:[#allocation8 + $0x17d8] sm:$0xff]  ;;  %v1865_v59 = vld [vmem:[#allocation8 + $0x3e8] sm:$0xff] }
 0x301   :  { %3052 = vmatmul.mubr.f32.vlgmr.msra.gmra.mrb[4].mxu0 %v9597_v23  ;;  %v2511_v60 = vld [vmem:[#allocation8 + $0x1818] sm:$0xff] }
 0x302   :  { %7668 = vmatpush1.bf16.msra.mxu0 %v7667_v25  ;;  %3122 = vmatprep.mubr.f32.mxu0 %v9296_v35  ;;  %v7683_v25 = vpack.c.bf16 %v2477_v63, %v2470_v1  ;;  %v7467_v63 = vpack.c.bf16 %v2503_v57, %v2496_v55  ;;  %v1788_v57 = vld [vmem:[#allocation8 + $0x180] sm:$0xff] }
 0x303   :  { %7440 = vmatpush1.bf16.msra.mxu1 %v7439_v15  ;;  %7670 = vmatprep.subr.bf16.mxu0 %v7669_v16  ;;  %v7455_v15 = vpack.c.bf16 %v2461_v5, %v2454_v3  ;;  %v7685_v16 = vpack.c.bf16 %v2492_v2, %v2485_v6  ;;  %v7921_v3 = vpack.c.bf16 %v1865_v59, %v1858_v58  ;;  %v1753_v6 = vld [vmem:[#allocation8 + $0x68] sm:$0xff]  ;;  %v2510_v2 = vld [vmem:[#allocation8 + $0x1810] sm:$0xff]  ;;  %v1795_v58 = vld [vmem:[#allocation8 + $0x1b8] sm:$0xff] }
 0x304   :  { %7442 = vmatprep.subr.bf16.mxu1 %v7441_v29  ;;  %v7457_v29 = vpack.c.bf16 %v2476_v12, %v2469_v20  ;;  %v2517_v20 = vld [vmem:[#allocation8 + $0x1848] sm:$0xff] }
 0x306   :  { %2768 = vmatmul.mubr.f32.vlgmr.msra.gmra.mrb[10].mxu1 %v9597_v23  ;;  %7672 = vmatpush1.bf16.msra.mxu0 %v7671_v34  ;;  %v7687_v34 = vpack.c.bf16 %v2491_v19, %v2484_v18  ;;  %v1752_v18 = vld [vmem:[#allocation8 + $0x60] sm:$0xff] }
 0x307   :  { %7444 = vmatpush1.bf16.msra.mxu1 %v7443_v28  ;;  %7674 = vmatprep.subr.bf16.mxu0 %v7673_v39  ;;  %v7459_v28 = vpack.c.bf16 %v2475_v30, %v2468_v21  ;;  %v7689_v39 = vpack.c.bf16 %v2506_v32, %v2499_v31  ;;  %v1760_v30 = vld [vmem:[#allocation8 + $0xa0] sm:$0xff]  ;;  %v1767_v32 = vld [vmem:[#allocation8 + $0xd8] sm:$0xff] }
 0x308   :  { %7446 = vmatprep.subr.bf16.mxu1 %v7445_v45  ;;  %2838 = vmatprep.mubr.f32.mxu1 %v9296_v35  ;;  %v7461_v45 = vpack.c.bf16 %v2490_v0, %v2483_v33  ;;  %v1744_v33 = vld [vmem:[#allocation8 + $0x20] sm:$0xff]  ;;  %v1751_v0 = vld [vmem:[#allocation8 + $0x58] sm:$0xff] }
 0x30a   :  { %7676 = vmatpush1.bf16.msra.mxu0 %v7675_v50  ;;  %v7691_v50 = vpack.c.bf16 %v2505_v42, %v2498_v40  ;;  %v1759_v40 = vld [vmem:[#allocation8 + $0x98] sm:$0xff]  ;;  %v1766_v42 = vld [vmem:[#allocation8 + $0xd0] sm:$0xff] }
 0x30b   :  { %7448 = vmatpush1.bf16.msra.mxu1 %v7447_v51  ;;  %7678 = vmatprep.subr.bf16.mxu0 %v7677_v52  ;;  %v7463_v51 = vpack.c.bf16 %v2489_v46, %v2482_v44  ;;  %v7693_v52 = vpack.c.bf16 %v2520_v24, %v2513_v47  ;;  %v7927_v44 = vpack.c.bf16 %v1767_v32, %v1760_v30  ;;  %v1774_v46 = vld [vmem:[#allocation8 + $0x110] sm:$0xff]  ;;  %v1781_v47 = vld [vmem:[#allocation8 + $0x148] sm:$0xff]  ;;  %v1823_v30 = vld [vmem:[#allocation8 + $0x298] sm:$0xff] }
 0x30c   :  { %7450 = vmatprep.subr.bf16.mxu1 %v7449_v56  ;;  %v7465_v56 = vpack.c.bf16 %v2504_v49, %v2497_v48  ;;  %v1758_v48 = vld [vmem:[#allocation8 + $0x90] sm:$0xff]  ;;  %v1765_v49 = vld [vmem:[#allocation8 + $0xc8] sm:$0xff]  ;;  %v7931_v55 = vpack.c.bf16 %v1781_v47, %v1774_v46 }
 0x30d   :  { %v1837_v46 = vld [vmem:[#allocation8 + $0x308] sm:$0xff] }
 0x30e   :  { %7680 = vmatpush1.bf16.msra.mxu0 %v7679_v61  ;;  %v2518_v61 = vld [vmem:[#allocation8 + $0x1850] sm:$0xff] }
 0x30f   :  { %7452 = vmatpush1.bf16.msra.mxu1 %v7451_v10  ;;  %7682 = vmatprep.subr.bf16.mxu0 %v7681_v62  ;;  %v7695_v62 = vpack.c.bf16 %v2519_v54, %v2512_v53  ;;  %v7469_v5 = vpack.c.bf16 %v2518_v61, %v2511_v60  ;;  %v1773_v53 = vld [vmem:[#allocation8 + $0x108] sm:$0xff]  ;;  %v1780_v54 = vld [vmem:[#allocation8 + $0x140] sm:$0xff]  ;;  %v1779_v61 = vld [vmem:[#allocation8 + $0x138] sm:$0xff] }
 0x310   :  { %7454 = vmatprep.subr.bf16.mxu1 %v7453_v4  ;;  %v1746_v4 = vld [vmem:[#allocation8 + $0x30] sm:$0xff]  ;;  %v1772_v60 = vld [vmem:[#allocation8 + $0x100] sm:$0xff] }
 0x311   :  { %v7923_v21 = vpack.c.bf16 %v1753_v6, %v1746_v4  ;;  %v7707_v4 = vpack.c.bf16 %v1779_v61, %v1772_v60  ;;  %v1809_v6 = vld [vmem:[#allocation8 + $0x228] sm:$0xff]  ;;  %v1835_v60 = vld [vmem:[#allocation8 + $0x2f8] sm:$0xff]  ;;  %v2082_v61 = vld [vmem:[#allocation8 + $0xab0] sm:$0xff] }
 0x312   :  { %7684 = vmatpush1.bf16.msra.mxu0 %v7683_v25  ;;  %v1872_v25 = vld [vmem:[#allocation8 + $0x420] sm:$0xff] }
 0x313   :  { %7456 = vmatpush1.bf16.msra.mxu1 %v7455_v15  ;;  %7686 = vmatprep.subr.bf16.mxu0 %v7685_v16  ;;  %v1879_v15 = vld [vmem:[#allocation8 + $0x458] sm:$0xff]  ;;  %v1745_v16 = vld [vmem:[#allocation8 + $0x28] sm:$0xff] }
 0x314   :  { %7458 = vmatprep.subr.bf16.mxu1 %v7457_v29  ;;  %v7471_v29 = vpack.c.bf16 %v2517_v20, %v2510_v2  ;;  %v7925_v31 = vpack.c.bf16 %v1879_v15, %v1872_v25  ;;  %v1786_v20 = vld [vmem:[#allocation8 + $0x170] sm:$0xff]  ;;  %v1928_v25 = vld [vmem:[#allocation8 + $0x5e0] sm:$0xff]  ;;  %v1935_v15 = vld [vmem:[#allocation8 + $0x618] sm:$0xff] }
 0x316   :  { %7688 = vmatpush1.bf16.msra.mxu0 %v7687_v34 }
 0x317   :  { %7460 = vmatpush1.bf16.msra.mxu1 %v7459_v28  ;;  %7690 = vmatprep.subr.bf16.mxu0 %v7689_v39  ;;  %v1886_v28 = vld [vmem:[#allocation8 + $0x490] sm:$0xff]  ;;  %v1893_v39 = vld [vmem:[#allocation8 + $0x4c8] sm:$0xff] }
 0x318   :  { %7462 = vmatprep.subr.bf16.mxu1 %v7461_v45  ;;  %v7699_v45 = vpack.c.bf16 %v1751_v0, %v1744_v33  ;;  %v7929_v24 = vpack.c.bf16 %v1893_v39, %v1886_v28  ;;  %v1800_v33 = vld [vmem:[#allocation8 + $0x1e0] sm:$0xff]  ;;  %v1807_v0 = vld [vmem:[#allocation8 + $0x218] sm:$0xff]  ;;  %v1949_v28 = vld [vmem:[#allocation8 + $0x688] sm:$0xff] }
 0x319   :  { %v6208_v43 = vpop.f32.mrb[8].mxu1  ;;  %v1815_v39 = vld [vmem:[#allocation8 + $0x258] sm:$0xff] }
 0x31a   :  { %v6209_v10 = vpop.f32.mrb[9].mxu1  ;;  %7692 = vmatpush1.bf16.msra.mxu0 %v7691_v50  ;;  %v1900_v50 = vld [vmem:[#allocation8 + $0x500] sm:$0xff] }
 0x31b   :  { %v6210_v1 = vadd.f32 %v6209_v10, %v6208_v43  ;;  %7464 = vmatpush1.bf16.msra.mxu1 %v7463_v51  ;;  %7694 = vmatprep.subr.bf16.mxu0 %v7693_v52  ;;  %v7701_v51 = vpack.c.bf16 %v1766_v42, %v1759_v40  ;;  %v1907_v52 = vld [vmem:[#allocation8 + $0x538] sm:$0xff]  ;;  %v7705_v43 = vpack.c.bf16 %v1780_v54, %v1773_v53  ;;  %v1914_v10 = vld [vmem:[#allocation8 + $0x570] sm:$0xff]  ;;  %v1836_v53 = vld [vmem:[#allocation8 + $0x300] sm:$0xff] }
 0x31c   :  { %7466 = vmatprep.subr.bf16.mxu1 %v7465_v56  ;;  %v7703_v56 = vpack.c.bf16 %v1765_v49, %v1758_v48  ;;  %v7933_v59 = vpack.c.bf16 %v1907_v52, %v1900_v50  ;;  %v1822_v40 = vld [vmem:[#allocation8 + $0x290] sm:$0xff]  ;;  %v1821_v49 = vld [vmem:[#allocation8 + $0x288] sm:$0xff]  ;;  %v1956_v50 = vld [vmem:[#allocation8 + $0x6c0] sm:$0xff] }
 0x31d   :  { %v1716_v12 = vadd.f32 %v6210_v1, %v9595_v8  ;;  %v7697_v8 = vpack.c.bf16 %v1752_v18, %v1745_v16  ;;  %v1787_v1 = vld [vmem:[#allocation8 + $0x178] sm:$0xff]  ;;  %v1801_v16 = vld [vmem:[#allocation8 + $0x1e8] sm:$0xff]  ;;  %v1808_v18 = vld [vmem:[#allocation8 + $0x220] sm:$0xff] }
 0x31e   :  { %7696 = vmatpush1.bf16.msra.mxu0 %v7695_v62  ;;  %v1921_v62 = vld [vmem:[#allocation8 + $0x5a8] sm:$0xff]  ;;  %v7713_v32 = vpack.c.bf16 %v1808_v18, %v1801_v16  ;;  %v1814_v48 = vld [vmem:[#allocation8 + $0x250] sm:$0xff]  ;;  %v1864_v16 = vld [vmem:[#allocation8 + $0x3e0] sm:$0xff] }
 0x31f   :  { %v1732_v19 = vmul.f32 0.01, %v1716_v12  ;;  %7468 = vmatpush1.bf16.msra.mxu1 %v7467_v63  ;;  %7922 = vmatprep.subr.bf16.mxu0 %v7921_v3  ;;  %vm1725_vm6 = vcmp.gt.f32.partialorder %v1716_v12, 0.0  ;;  %v1794_v63 = vld [vmem:[#allocation8 + $0x1b0] sm:$0xff]  ;;  %v7935_v3 = vpack.c.bf16 %v1795_v58, %v1788_v57  ;;  %v7937_v2 = vpack.c.bf16 %v1921_v62, %v1914_v10  ;;  %v1829_v52 = vld [vmem:[#allocation8 + $0x2c8] sm:$0xff]  ;;  %v1851_v57 = vld [vmem:[#allocation8 + $0x378] sm:$0xff] }
 0x320   :  { %7470 = vmatprep.subr.bf16.mxu1 %v7469_v5  ;;  %v1802_v5 = vld [vmem:[#allocation8 + $0x1f0] sm:$0xff]  ;;  %v2089_v10 = vld [vmem:[#allocation8 + $0xae8] sm:$0xff]  ;;  %v1843_v62 = vld [vmem:[#allocation8 + $0x338] sm:$0xff] }
 0x321   :  { %v9604_v34 = vsel %vm1725_vm6, %v1716_v12, %v1732_v19  ;;  %v1793_v12 = vld [vmem:[#allocation8 + $0x1a8] sm:$0xff]  ;;  %v7939_v19 = vpack.c.bf16 %v1809_v6, %v1802_v5  ;;  %v1970_v6 = vld [vmem:[#allocation8 + $0x730] sm:$0xff] }
 0x322   :  { %3123 = vmatmul.mubr.f32.vlgmr.msra.gmra.mrb[4].mxu0 %v9604_v34 }
 0x323   :  { %7924 = vmatpush3.bf16.msra.mxu0 %v7923_v21  ;;  %7472 = vmatpush1.bf16.msra.mxu1 %v7471_v29  ;;  %v7711_v21 = vpack.c.bf16 %v1793_v12, %v1786_v20  ;;  %v1816_v29 = vld [vmem:[#allocation8 + $0x260] sm:$0xff]  ;;  %v1849_v20 = vld [vmem:[#allocation8 + $0x368] sm:$0xff] }
 0x324   :  { %3477 = vmatprep.mubr.f32.mxu0 %v9535_v13  ;;  %7926 = vmatprep.subr.bf16.mxu0 %v7925_v31  ;;  %v7941_v31 = vpack.c.bf16 %v1935_v15, %v1928_v25  ;;  %v7943_v42 = vpack.c.bf16 %v1823_v30, %v1816_v29  ;;  %v2096_v12 = vld [vmem:[#allocation8 + $0xb20] sm:$0xff]  ;;  %v2103_v25 = vld [vmem:[#allocation8 + $0xb58] sm:$0xff]  ;;  %v1857_v15 = vld [vmem:[#allocation8 + $0x3a8] sm:$0xff] }
 0x325   :  { %7698 = vmatprep.subr.bf16.mxu1 %v7697_v8  ;;  %v1942_v8 = vld [vmem:[#allocation8 + $0x650] sm:$0xff]  ;;  %v1984_v29 = vld [vmem:[#allocation8 + $0x7a0] sm:$0xff]  ;;  %v1991_v30 = vld [vmem:[#allocation8 + $0x7d8] sm:$0xff] }
 0x326   :  { %2839 = vmatmul.mubr.f32.vlgmr.msra.gmra.mrb[10].mxu1 %v9604_v34  ;;  %v7945_v47 = vpack.c.bf16 %v1949_v28, %v1942_v8  ;;  %v2117_v8 = vld [vmem:[#allocation8 + $0xbc8] sm:$0xff]  ;;  %v1871_v28 = vld [vmem:[#allocation8 + $0x418] sm:$0xff] }
 0x327   :  { %7928 = vmatpush3.bf16.msra.mxu0 %v7927_v44  ;;  %7700 = vmatpush1.bf16.msra.mxu1 %v7699_v45  ;;  %v7715_v44 = vpack.c.bf16 %v1807_v0, %v1800_v33  ;;  %v1830_v45 = vld [vmem:[#allocation8 + $0x2d0] sm:$0xff]  ;;  %v1863_v33 = vld [vmem:[#allocation8 + $0x3d8] sm:$0xff] }
 0x328   :  { %3193 = vmatprep.mubr.f32.mxu1 %v9535_v13  ;;  %7930 = vmatprep.subr.bf16.mxu0 %v7929_v24  ;;  %v7709_v13 = vpack.c.bf16 %v1794_v63, %v1787_v1  ;;  %v7717_v24 = vpack.c.bf16 %v1822_v40, %v1815_v39  ;;  %v7947_v54 = vpack.c.bf16 %v1837_v46, %v1830_v45  ;;  %v1850_v1 = vld [vmem:[#allocation8 + $0x370] sm:$0xff]  ;;  %v2005_v46 = vld [vmem:[#allocation8 + $0x848] sm:$0xff] }
 0x329   :  { %7702 = vmatprep.subr.bf16.mxu1 %v7701_v51  ;;  %v1963_v51 = vld [vmem:[#allocation8 + $0x6f8] sm:$0xff]  ;;  %v7725_v5 = vpack.c.bf16 %v1850_v1, %v1843_v62  ;;  %v2110_v0 = vld [vmem:[#allocation8 + $0xb90] sm:$0xff]  ;;  %v7959_v40 = vpack.c.bf16 %v1991_v30, %v1984_v29  ;;  %v1912_v30 = vld [vmem:[#allocation8 + $0x560] sm:$0xff] }
 0x32a   :  { %v7949_v58 = vpack.c.bf16 %v1963_v51, %v1956_v50  ;;  %v1878_v39 = vld [vmem:[#allocation8 + $0x450] sm:$0xff]  ;;  %v2131_v50 = vld [vmem:[#allocation8 + $0xc38] sm:$0xff]  ;;  %v1885_v51 = vld [vmem:[#allocation8 + $0x488] sm:$0xff] }
 0x32b   :  { %7932 = vmatpush3.bf16.msra.mxu0 %v7931_v55  ;;  %7704 = vmatpush1.bf16.msra.mxu1 %v7703_v56  ;;  %v7719_v55 = vpack.c.bf16 %v1821_v49, %v1814_v48  ;;  %v1844_v56 = vld [vmem:[#allocation8 + $0x340] sm:$0xff]  ;;  %v1998_v45 = vld [vmem:[#allocation8 + $0x810] sm:$0xff]  ;;  %v1877_v48 = vld [vmem:[#allocation8 + $0x448] sm:$0xff] }
 0x32c   :  { %7934 = vmatprep.subr.bf16.mxu0 %v7933_v59  ;;  %7706 = vmatprep.subr.bf16.mxu1 %v7705_v43  ;;  %v7721_v59 = vpack.c.bf16 %v1836_v53, %v1829_v52  ;;  %v1828_v43 = vld [vmem:[#allocation8 + $0x2c0] sm:$0xff]  ;;  %v7951_v63 = vpack.c.bf16 %v1851_v57, %v1844_v56  ;;  %v7963_v53 = vpack.c.bf16 %v2005_v46, %v1998_v45  ;;  %v2019_v57 = vld [vmem:[#allocation8 + $0x8b8] sm:$0xff]  ;;  %v1906_v62 = vld [vmem:[#allocation8 + $0x530] sm:$0xff] }
 0x32d   :  { %v2124_v49 = vld [vmem:[#allocation8 + $0xc00] sm:$0xff]  ;;  %v2047_v29 = vld [vmem:[#allocation8 + $0x998] sm:$0xff]  ;;  %v2061_v45 = vld [vmem:[#allocation8 + $0xa08] sm:$0xff] }
 0x32e   :  { %v1892_v52 = vld [vmem:[#allocation8 + $0x4c0] sm:$0xff]  ;;  %v1926_v46 = vld [vmem:[#allocation8 + $0x5d0] sm:$0xff] }
 0x32f   :  { %7936 = vmatpush3.bf16.msra.mxu0 %v7935_v3  ;;  %7708 = vmatpush1.bf16.msra.mxu1 %v7707_v4  ;;  %v7723_v3 = vpack.c.bf16 %v1835_v60, %v1828_v43  ;;  %v7953_v4 = vpack.c.bf16 %v2089_v10, %v2082_v61  ;;  %v2012_v56 = vld [vmem:[#allocation8 + $0x880] sm:$0xff]  ;;  %v1891_v43 = vld [vmem:[#allocation8 + $0x4b8] sm:$0xff]  ;;  %v2138_v60 = vld [vmem:[#allocation8 + $0xc70] sm:$0xff] }
 0x330   :  { %7938 = vmatprep.subr.bf16.mxu0 %v7937_v2  ;;  %7710 = vmatprep.subr.bf16.mxu1 %v7709_v13  ;;  %v1977_v2 = vld [vmem:[#allocation8 + $0x768] sm:$0xff]  ;;  %v1842_v13 = vld [vmem:[#allocation8 + $0x330] sm:$0xff]  ;;  %v1899_v10 = vld [vmem:[#allocation8 + $0x4f8] sm:$0xff]  ;;  %v7967_v1 = vpack.c.bf16 %v2019_v57, %v2012_v56 }
 0x331   :  { %v7955_v18 = vpack.c.bf16 %v1977_v2, %v1970_v6  ;;  %v2145_v61 = vld [vmem:[#allocation8 + $0xca8] sm:$0xff]  ;;  %v1898_v6 = vld [vmem:[#allocation8 + $0x4f0] sm:$0xff]  ;;  %v7741_v2 = vpack.c.bf16 %v1906_v62, %v1899_v10  ;;  %v2075_v56 = vld [vmem:[#allocation8 + $0xa78] sm:$0xff] }
 0x332   :  { %v1940_v57 = vld [vmem:[#allocation8 + $0x640] sm:$0xff]  ;;  %v1962_v10 = vld [vmem:[#allocation8 + $0x6f0] sm:$0xff] }
 0x333   :  { %7940 = vmatpush3.bf16.msra.mxu0 %v7939_v19  ;;  %7712 = vmatpush1.bf16.msra.mxu1 %v7711_v21  ;;  %v7727_v19 = vpack.c.bf16 %v1849_v20, %v1842_v13  ;;  %v7957_v21 = vpack.c.bf16 %v2103_v25, %v2096_v12  ;;  %v1905_v13 = vld [vmem:[#allocation8 + $0x528] sm:$0xff]  ;;  %v2152_v20 = vld [vmem:[#allocation8 + $0xce0] sm:$0xff]  ;;  %v2159_v12 = vld [vmem:[#allocation8 + $0xd18] sm:$0xff] }
 0x334   :  { %7942 = vmatprep.subr.bf16.mxu0 %v7941_v31  ;;  %7714 = vmatprep.subr.bf16.mxu1 %v7713_v32  ;;  %v1856_v31 = vld [vmem:[#allocation8 + $0x3a0] sm:$0xff]  ;;  %v7729_v32 = vpack.c.bf16 %v1864_v16, %v1857_v15  ;;  %v1913_v25 = vld [vmem:[#allocation8 + $0x568] sm:$0xff] }
 0x335   :  { %v1920_v15 = vld [vmem:[#allocation8 + $0x5a0] sm:$0xff] }
 0x337   :  { %7944 = vmatpush3.bf16.msra.mxu0 %v7943_v42  ;;  %7716 = vmatpush1.bf16.msra.mxu1 %v7715_v44  ;;  %v7731_v42 = vpack.c.bf16 %v1863_v33, %v1856_v31  ;;  %v7961_v44 = vpack.c.bf16 %v2117_v8, %v2110_v0  ;;  %v7745_v31 = vpack.c.bf16 %v1920_v15, %v1913_v25  ;;  %v2166_v33 = vld [vmem:[#allocation8 + $0xd50] sm:$0xff]  ;;  %v2173_v0 = vld [vmem:[#allocation8 + $0xd88] sm:$0xff]  ;;  %v1927_v8 = vld [vmem:[#allocation8 + $0x5d8] sm:$0xff] }
 0x338   :  { %7946 = vmatprep.subr.bf16.mxu0 %v7945_v47  ;;  %7718 = vmatprep.subr.bf16.mxu1 %v7717_v24  ;;  %v1870_v47 = vld [vmem:[#allocation8 + $0x410] sm:$0xff]  ;;  %v7733_v24 = vpack.c.bf16 %v1878_v39, %v1871_v28  ;;  %v1976_v25 = vld [vmem:[#allocation8 + $0x760] sm:$0xff] }
 0x339   :  { %v1934_v28 = vld [vmem:[#allocation8 + $0x610] sm:$0xff] }
 0x33b   :  { %7948 = vmatpush3.bf16.msra.mxu0 %v7947_v54  ;;  %7720 = vmatpush1.bf16.msra.mxu1 %v7719_v55  ;;  %v7735_v54 = vpack.c.bf16 %v1877_v48, %v1870_v47  ;;  %v7965_v55 = vpack.c.bf16 %v2131_v50, %v2124_v49  ;;  %v7749_v47 = vpack.c.bf16 %v1934_v28, %v1927_v8  ;;  %v2180_v48 = vld [vmem:[#allocation8 + $0xdc0] sm:$0xff]  ;;  %v2187_v49 = vld [vmem:[#allocation8 + $0xdf8] sm:$0xff]  ;;  %v1941_v50 = vld [vmem:[#allocation8 + $0x648] sm:$0xff] }
 0x33c   :  { %7950 = vmatprep.subr.bf16.mxu0 %v7949_v58  ;;  %7722 = vmatprep.subr.bf16.mxu1 %v7721_v59  ;;  %v1884_v58 = vld [vmem:[#allocation8 + $0x480] sm:$0xff]  ;;  %v7737_v59 = vpack.c.bf16 %v1892_v52, %v1885_v51  ;;  %v1990_v8 = vld [vmem:[#allocation8 + $0x7d0] sm:$0xff] }
 0x33d   :  { %v1948_v51 = vld [vmem:[#allocation8 + $0x680] sm:$0xff] }
 0x33f   :  { %7952 = vmatpush3.bf16.msra.mxu0 %v7951_v63  ;;  %7724 = vmatpush1.bf16.msra.mxu1 %v7723_v3  ;;  %v7739_v63 = vpack.c.bf16 %v1891_v43, %v1884_v58  ;;  %v7969_v3 = vpack.c.bf16 %v2145_v61, %v2138_v60  ;;  %v7753_v58 = vpack.c.bf16 %v1948_v51, %v1941_v50  ;;  %v2306_v43 = vld [vmem:[#allocation8 + $0x11b0] sm:$0xff]  ;;  %v2313_v60 = vld [vmem:[#allocation8 + $0x11e8] sm:$0xff]  ;;  %v1955_v61 = vld [vmem:[#allocation8 + $0x6b8] sm:$0xff] }
 0x340   :  { %7954 = vmatprep.subr.bf16.mxu0 %v7953_v4  ;;  %7726 = vmatprep.subr.bf16.mxu1 %v7725_v5  ;;  %v2026_v4 = vld [vmem:[#allocation8 + $0x8f0] sm:$0xff]  ;;  %v2033_v5 = vld [vmem:[#allocation8 + $0x928] sm:$0xff]  ;;  %v2004_v50 = vld [vmem:[#allocation8 + $0x840] sm:$0xff] }
 0x341   :  { %v7971_v16 = vpack.c.bf16 %v2033_v5, %v2026_v4  ;;  %v2201_v4 = vld [vmem:[#allocation8 + $0xe68] sm:$0xff]  ;;  %v1954_v5 = vld [vmem:[#allocation8 + $0x6b0] sm:$0xff] }
 0x342   :  { %3478 = vmatmul.mubr.f32.vlgmr.msra.gmra.mrb[6].mxu0 %v9539_v22 }
 0x343   :  { %7956 = vmatpush3.bf16.msra.mxu0 %v7955_v18  ;;  %3547 = vmatprep.mubr.f32.mxu0 %v9569_v11  ;;  %v7743_v18 = vpack.c.bf16 %v1905_v13, %v1898_v6  ;;  %v7757_v6 = vpack.c.bf16 %v1962_v10, %v1955_v61  ;;  %v2320_v13 = vld [vmem:[#allocation8 + $0x1220] sm:$0xff]  ;;  %v2018_v61 = vld [vmem:[#allocation8 + $0x8b0] sm:$0xff] }
 0x344   :  { %7728 = vmatpush1.bf16.msra.mxu1 %v7727_v19  ;;  %7958 = vmatprep.subr.bf16.mxu0 %v7957_v21  ;;  %v7973_v19 = vpack.c.bf16 %v2159_v12, %v2152_v20  ;;  %v2040_v21 = vld [vmem:[#allocation8 + $0x960] sm:$0xff]  ;;  %v2327_v20 = vld [vmem:[#allocation8 + $0x1258] sm:$0xff]  ;;  %v1969_v12 = vld [vmem:[#allocation8 + $0x728] sm:$0xff] }
 0x345   :  { %7730 = vmatprep.subr.bf16.mxu1 %v7729_v32  ;;  %v1919_v32 = vld [vmem:[#allocation8 + $0x598] sm:$0xff]  ;;  %v7975_v39 = vpack.c.bf16 %v2047_v29, %v2040_v21  ;;  %v7761_v29 = vpack.c.bf16 %v1976_v25, %v1969_v12 }
 0x346   :  { %v2215_v21 = vld [vmem:[#allocation8 + $0xed8] sm:$0xff] }
 0x347   :  { %7960 = vmatpush3.bf16.msra.mxu0 %v7959_v40  ;;  %v7747_v40 = vpack.c.bf16 %v1919_v32, %v1912_v30  ;;  %v1968_v30 = vld [vmem:[#allocation8 + $0x720] sm:$0xff]  ;;  %v2334_v32 = vld [vmem:[#allocation8 + $0x1290] sm:$0xff] }
 0x348   :  { %7732 = vmatpush1.bf16.msra.mxu1 %v7731_v42  ;;  %7962 = vmatprep.subr.bf16.mxu0 %v7961_v44  ;;  %v7977_v42 = vpack.c.bf16 %v2173_v0, %v2166_v33  ;;  %v2054_v44 = vld [vmem:[#allocation8 + $0x9d0] sm:$0xff]  ;;  %v2341_v33 = vld [vmem:[#allocation8 + $0x12c8] sm:$0xff]  ;;  %v1983_v0 = vld [vmem:[#allocation8 + $0x798] sm:$0xff] }
 0x349   :  { %7734 = vmatprep.subr.bf16.mxu1 %v7733_v24  ;;  %v1933_v24 = vld [vmem:[#allocation8 + $0x608] sm:$0xff]  ;;  %v7979_v52 = vpack.c.bf16 %v2061_v45, %v2054_v44  ;;  %v1982_v44 = vld [vmem:[#allocation8 + $0x790] sm:$0xff]  ;;  %v7993_v45 = vpack.c.bf16 %v2341_v33, %v2334_v32 }
 0x34a   :  { %v2046_v32 = vld [vmem:[#allocation8 + $0x990] sm:$0xff] }
 0x34b   :  { %7964 = vmatpush3.bf16.msra.mxu0 %v7963_v53  ;;  %v7751_v53 = vpack.c.bf16 %v1933_v24, %v1926_v46  ;;  %v7765_v46 = vpack.c.bf16 %v1990_v8, %v1983_v0  ;;  %v2348_v24 = vld [vmem:[#allocation8 + $0x1300] sm:$0xff] }
 0x34c   :  { %7736 = vmatpush1.bf16.msra.mxu1 %v7735_v54  ;;  %7966 = vmatprep.subr.bf16.mxu0 %v7965_v55  ;;  %v7981_v54 = vpack.c.bf16 %v2187_v49, %v2180_v48  ;;  %v2068_v55 = vld [vmem:[#allocation8 + $0xa40] sm:$0xff]  ;;  %v2355_v48 = vld [vmem:[#allocation8 + $0x1338] sm:$0xff]  ;;  %v1997_v49 = vld [vmem:[#allocation8 + $0x808] sm:$0xff] }
 0x34d   :  { %7738 = vmatprep.subr.bf16.mxu1 %v7737_v59  ;;  %v1947_v59 = vld [vmem:[#allocation8 + $0x678] sm:$0xff]  ;;  %v7983_v62 = vpack.c.bf16 %v2075_v56, %v2068_v55  ;;  %v1996_v56 = vld [vmem:[#allocation8 + $0x800] sm:$0xff] }
 0x34e   :  { %v2243_v55 = vld [vmem:[#allocation8 + $0xfb8] sm:$0xff] }
 0x34f   :  { %7968 = vmatpush3.bf16.msra.mxu0 %v7967_v1  ;;  %v7755_v1 = vpack.c.bf16 %v1947_v59, %v1940_v57  ;;  %v7769_v57 = vpack.c.bf16 %v2004_v50, %v1997_v49  ;;  %v2362_v59 = vld [vmem:[#allocation8 + $0x1370] sm:$0xff] }
 0x350   :  { %7740 = vmatpush1.bf16.msra.mxu1 %v7739_v63  ;;  %7970 = vmatprep.subr.bf16.mxu0 %v7969_v3  ;;  %v7985_v63 = vpack.c.bf16 %v2313_v60, %v2306_v43  ;;  %v2194_v3 = vld [vmem:[#allocation8 + $0xe30] sm:$0xff]  ;;  %v2369_v43 = vld [vmem:[#allocation8 + $0x13a8] sm:$0xff]  ;;  %v2011_v60 = vld [vmem:[#allocation8 + $0x878] sm:$0xff] }
 0x351   :  { %7742 = vmatprep.subr.bf16.mxu1 %v7741_v2  ;;  %v1961_v2 = vld [vmem:[#allocation8 + $0x6e8] sm:$0xff]  ;;  %v7987_v15 = vpack.c.bf16 %v2201_v4, %v2194_v3  ;;  %v7773_v3 = vpack.c.bf16 %v2018_v61, %v2011_v60 }
 0x352   :  { %v2017_v4 = vld [vmem:[#allocation8 + $0x8a8] sm:$0xff] }
 0x353   :  { %7972 = vmatpush3.bf16.msra.mxu0 %v7971_v16  ;;  %v7759_v16 = vpack.c.bf16 %v1961_v2, %v1954_v5  ;;  %v2376_v5 = vld [vmem:[#allocation8 + $0x13e0] sm:$0xff]  ;;  %v2025_v2 = vld [vmem:[#allocation8 + $0x8e8] sm:$0xff] }
 0x354   :  { %7744 = vmatpush1.bf16.msra.mxu1 %v7743_v18  ;;  %7974 = vmatprep.subr.bf16.mxu0 %v7973_v19  ;;  %v7989_v18 = vpack.c.bf16 %v2327_v20, %v2320_v13  ;;  %v2208_v19 = vld [vmem:[#allocation8 + $0xea0] sm:$0xff]  ;;  %v2425_v60 = vld [vmem:[#allocation8 + $0x1568] sm:$0xff] }
 0x355   :  { %7746 = vmatprep.subr.bf16.mxu1 %v7745_v31  ;;  %v1975_v31 = vld [vmem:[#allocation8 + $0x758] sm:$0xff]  ;;  %v7991_v28 = vpack.c.bf16 %v2215_v21, %v2208_v19  ;;  %v2032_v13 = vld [vmem:[#allocation8 + $0x920] sm:$0xff] }
 0x356   :  { %v7777_v19 = vpack.c.bf16 %v2032_v13, %v2025_v2  ;;  %v2031_v21 = vld [vmem:[#allocation8 + $0x918] sm:$0xff]  ;;  %v2080_v2 = vld [vmem:[#allocation8 + $0xaa0] sm:$0xff] }
 0x357   :  { %7976 = vmatpush3.bf16.msra.mxu0 %v7975_v39  ;;  %v7763_v39 = vpack.c.bf16 %v1975_v31, %v1968_v30  ;;  %v2397_v30 = vld [vmem:[#allocation8 + $0x1488] sm:$0xff]  ;;  %v2039_v31 = vld [vmem:[#allocation8 + $0x958] sm:$0xff] }
 0x358   :  { %7748 = vmatpush1.bf16.msra.mxu1 %v7747_v40  ;;  %7978 = vmatprep.subr.bf16.mxu0 %v7977_v42  ;;  %v2222_v40 = vld [vmem:[#allocation8 + $0xf10] sm:$0xff]  ;;  %v2229_v42 = vld [vmem:[#allocation8 + $0xf48] sm:$0xff]  ;;  %v2087_v13 = vld [vmem:[#allocation8 + $0xad8] sm:$0xff] }
 0x359   :  { %7750 = vmatprep.subr.bf16.mxu1 %v7749_v47  ;;  %v1989_v47 = vld [vmem:[#allocation8 + $0x7c8] sm:$0xff]  ;;  %v7995_v51 = vpack.c.bf16 %v2229_v42, %v2222_v40  ;;  %v2038_v40 = vld [vmem:[#allocation8 + $0x950] sm:$0xff]  ;;  %v7781_v42 = vpack.c.bf16 %v2046_v32, %v2039_v31  ;;  %v2116_v31 = vld [vmem:[#allocation8 + $0xbc0] sm:$0xff] }
 0x35b   :  { %7980 = vmatpush3.bf16.msra.mxu0 %v7979_v52  ;;  %v7767_v52 = vpack.c.bf16 %v1989_v47, %v1982_v44  ;;  %v2045_v44 = vld [vmem:[#allocation8 + $0x988] sm:$0xff] }
 0x35c   :  { %7752 = vmatpush1.bf16.msra.mxu1 %v7751_v53  ;;  %7982 = vmatprep.subr.bf16.mxu0 %v7981_v54  ;;  %v7997_v53 = vpack.c.bf16 %v2355_v48, %v2348_v24  ;;  %v2236_v54 = vld [vmem:[#allocation8 + $0xf80] sm:$0xff]  ;;  %v2053_v47 = vld [vmem:[#allocation8 + $0x9c8] sm:$0xff]  ;;  %v7783_v49 = vpack.c.bf16 %v2045_v44, %v2038_v40  ;;  %v2115_v40 = vld [vmem:[#allocation8 + $0xbb8] sm:$0xff] }
 0x35d   :  { %7754 = vmatprep.subr.bf16.mxu1 %v7753_v58  ;;  %v2003_v58 = vld [vmem:[#allocation8 + $0x838] sm:$0xff]  ;;  %v2060_v24 = vld [vmem:[#allocation8 + $0xa00] sm:$0xff]  ;;  %v2130_v44 = vld [vmem:[#allocation8 + $0xc30] sm:$0xff] }
 0x35e   :  { %v7771_v10 = vpack.c.bf16 %v2003_v58, %v1996_v56  ;;  %v2067_v56 = vld [vmem:[#allocation8 + $0xa38] sm:$0xff] }
 0x35f   :  { %7984 = vmatpush3.bf16.msra.mxu0 %v7983_v62  ;;  %v8001_v62 = vpack.c.bf16 %v2369_v43, %v2362_v59  ;;  %v2418_v43 = vld [vmem:[#allocation8 + $0x1530] sm:$0xff] }
 0x360   :  { %7756 = vmatpush1.bf16.msra.mxu1 %v7755_v1  ;;  %7986 = vmatprep.subr.bf16.mxu0 %v7985_v63  ;;  %v2257_v1 = vld [vmem:[#allocation8 + $0x1028] sm:$0xff]  ;;  %v2010_v63 = vld [vmem:[#allocation8 + $0x870] sm:$0xff] }
 0x361   :  { %7758 = vmatprep.subr.bf16.mxu1 %v7757_v6  ;;  %v2383_v6 = vld [vmem:[#allocation8 + $0x1418] sm:$0xff]  ;;  %v7775_v12 = vpack.c.bf16 %v2017_v4, %v2010_v63  ;;  %v9297_v63 = vmov 0.0|0.0   ;;  %v2432_v4 = vld [vmem:[#allocation8 + $0x15a0] sm:$0xff] }
 0x362   :  { %3548 = vmatmul.mubr.f32.vlgmr.msra.gmra.mrb[8].mxu0 %v9573_v17  ;;  %v8005_v25 = vpack.c.bf16 %v2383_v6, %v2376_v5  ;;  %v2439_v5 = vld [vmem:[#allocation8 + $0x15d8] sm:$0xff] }
 0x363   :  { %7988 = vmatpush3.bf16.msra.mxu0 %v7987_v15  ;;  %3617 = vmatprep.mubr.f32.mxu0 %v9577_v26  ;;  %v2264_v15 = vld [vmem:[#allocation8 + $0x1060] sm:$0xff] }
 0x364   :  { %7760 = vmatpush1.bf16.msra.mxu1 %v7759_v16  ;;  %7990 = vmatprep.subr.bf16.mxu0 %v7989_v18  ;;  %v2271_v16 = vld [vmem:[#allocation8 + $0x1098] sm:$0xff]  ;;  %v2024_v18 = vld [vmem:[#allocation8 + $0x8e0] sm:$0xff] }
 0x365   :  { %7762 = vmatprep.subr.bf16.mxu1 %v7761_v29  ;;  %v2390_v29 = vld [vmem:[#allocation8 + $0x1450] sm:$0xff]  ;;  %v8007_v33 = vpack.c.bf16 %v2271_v16, %v2264_v15  ;;  %v7779_v0 = vpack.c.bf16 %v2031_v21, %v2024_v18  ;;  %v7795_v15 = vpack.c.bf16 %v2087_v13, %v2080_v2  ;;  %v2453_v18 = vld [vmem:[#allocation8 + $0x1648] sm:$0xff]  ;;  %v2516_v13 = vld [vmem:[#allocation8 + $0x1840] sm:$0xff] }
 0x366   :  { %v8009_v8 = vpack.c.bf16 %v2397_v30, %v2390_v29  ;;  %v2446_v16 = vld [vmem:[#allocation8 + $0x1610] sm:$0xff]  ;;  %v2101_v29 = vld [vmem:[#allocation8 + $0xb48] sm:$0xff] }
 0x367   :  { %3194 = vmatmul.mubr.f32.vlgmr.msra.gmra.mrb[12].mxu1 %v9539_v22  ;;  %7992 = vmatpush3.bf16.msra.mxu0 %v7991_v28  ;;  %v7999_v22 = vpack.c.bf16 %v2243_v55, %v2236_v54  ;;  %v2278_v28 = vld [vmem:[#allocation8 + $0x10d0] sm:$0xff]  ;;  %v2052_v54 = vld [vmem:[#allocation8 + $0x9c0] sm:$0xff]  ;;  %v2059_v55 = vld [vmem:[#allocation8 + $0x9f8] sm:$0xff]  ;;  %v8024_v32 = vpack.c.bf16 %v2453_v18, %v2446_v16 }
 0x368   :  { %7764 = vmatpush1.bf16.msra.mxu1 %v7763_v39  ;;  %3264 = vmatprep.mubr.f32.mxu1 %v9569_v11  ;;  %v2250_v11 = vld [vmem:[#allocation8 + $0xff0] sm:$0xff]  ;;  %v2285_v39 = vld [vmem:[#allocation8 + $0x1108] sm:$0xff]  ;;  %v7787_v59 = vpack.c.bf16 %v2059_v55, %v2052_v54  ;;  %v2488_v55 = vld [vmem:[#allocation8 + $0x1760] sm:$0xff] }
 0x369   :  { %7994 = vmatprep.subr.bf16.mxu0 %v7993_v45  ;;  %7766 = vmatprep.subr.bf16.mxu1 %v7765_v46  ;;  %v8003_v20 = vpack.c.bf16 %v2257_v1, %v2250_v11  ;;  %v2404_v45 = vld [vmem:[#allocation8 + $0x14c0] sm:$0xff]  ;;  %v2411_v46 = vld [vmem:[#allocation8 + $0x14f8] sm:$0xff]  ;;  %v8011_v48 = vpack.c.bf16 %v2285_v39, %v2278_v28  ;;  %v8018_v1 = vpack.c.bf16 %v2425_v60, %v2418_v43  ;;  %v2094_v21 = vld [vmem:[#allocation8 + $0xb10] sm:$0xff] }
 0x36a   :  { %v8013_v50 = vpack.c.bf16 %v2411_v46, %v2404_v45  ;;  %v2088_v11 = vld [vmem:[#allocation8 + $0xae0] sm:$0xff]  ;;  %v2109_v30 = vld [vmem:[#allocation8 + $0xb88] sm:$0xff]  ;;  %v2151_v43 = vld [vmem:[#allocation8 + $0xcd8] sm:$0xff] }
 0x36b   :  { %7996 = vmatpush3.bf16.msra.mxu0 %v7995_v51  ;;  %v2292_v51 = vld [vmem:[#allocation8 + $0x1140] sm:$0xff]  ;;  %v7801_v28 = vpack.c.bf16 %v2116_v31, %v2109_v30  ;;  %v2158_v60 = vld [vmem:[#allocation8 + $0xd10] sm:$0xff]  ;;  %v3716_v16 = vld [vmem:[#allocation11 + $0x80] sm:$0xff] }
 0x36c   :  { %7768 = vmatpush1.bf16.msra.mxu1 %v7767_v52  ;;  %7998 = vmatprep.subr.bf16.mxu0 %v7997_v53  ;;  %v2299_v52 = vld [vmem:[#allocation8 + $0x1178] sm:$0xff]  ;;  %v7785_v53 = vpack.c.bf16 %v2060_v24, %v2053_v47  ;;  %v2108_v39 = vld [vmem:[#allocation8 + $0xb80] sm:$0xff]  ;;  %v2474_v47 = vld [vmem:[#allocation8 + $0x16f0] sm:$0xff] }
 0x36d   :  { %7770 = vmatprep.subr.bf16.mxu1 %v7769_v57  ;;  %v2074_v57 = vld [vmem:[#allocation8 + $0xa70] sm:$0xff]  ;;  %v8015_v58 = vpack.c.bf16 %v2299_v52, %v2292_v51  ;;  %v7803_v46 = vpack.c.bf16 %v2115_v40, %v2108_v39  ;;  %v2481_v24 = vld [vmem:[#allocation8 + $0x1728] sm:$0xff]  ;;  %v2144_v52 = vld [vmem:[#allocation8 + $0xca0] sm:$0xff] }
 0x36e   :  { %v7789_v61 = vpack.c.bf16 %v2074_v57, %v2067_v56  ;;  %v2137_v51 = vld [vmem:[#allocation8 + $0xc68] sm:$0xff]  ;;  %v2495_v56 = vld [vmem:[#allocation8 + $0x1798] sm:$0xff]  ;;  %v3717_v18 = vld [vmem:[#allocation11 + $0x88] sm:$0xff] }
 0x36f   :  { %8000 = vmatpush3.bf16.msra.mxu0 %v7999_v22  ;;  %v2066_v22 = vld [vmem:[#allocation8 + $0xa30] sm:$0xff]  ;;  %v7809_v57 = vpack.c.bf16 %v2144_v52, %v2137_v51  ;;  %v3718_v39 = vld [vmem:[#allocation11 + $0x90] sm:$0xff]  ;;  %v3719_v40 = vld [vmem:[#allocation11 + $0x98] sm:$0xff] }
 0x370   :  { %7772 = vmatpush1.bf16.msra.mxu1 %v7771_v10  ;;  %8002 = vmatprep.subr.bf16.mxu0 %v8001_v62  ;;  %v2073_v10 = vld [vmem:[#allocation8 + $0xa68] sm:$0xff]  ;;  %v2178_v31 = vld [vmem:[#allocation8 + $0xdb0] sm:$0xff]  ;;  %v2199_v51 = vld [vmem:[#allocation8 + $0xe58] sm:$0xff] }
 0x371   :  { %7774 = vmatprep.subr.bf16.mxu1 %v7773_v3  ;;  %v2081_v62 = vld [vmem:[#allocation8 + $0xaa8] sm:$0xff]  ;;  %v7791_v3 = vpack.c.bf16 %v2073_v10, %v2066_v22  ;;  %v2502_v10 = vld [vmem:[#allocation8 + $0x17d0] sm:$0xff]  ;;  %v2207_v52 = vld [vmem:[#allocation8 + $0xe98] sm:$0xff] }
 0x372   :  { %v7793_v6 = vpack.c.bf16 %v2088_v11, %v2081_v62  ;;  %v2509_v62 = vld [vmem:[#allocation8 + $0x1808] sm:$0xff]  ;;  %v7813_v11 = vpack.c.bf16 %v2158_v60, %v2151_v43  ;;  %v3705_v43 = vld [vmem:[#allocation11 + $0x28] sm:$0xff] }
 0x373   :  { %8004 = vmatpush3.bf16.msra.mxu0 %v8003_v20  ;;  %v2095_v20 = vld [vmem:[#allocation8 + $0xb18] sm:$0xff] }
 0x374   :  { %7776 = vmatpush1.bf16.msra.mxu1 %v7775_v12  ;;  %8006 = vmatprep.subr.bf16.mxu0 %v8005_v25  ;;  %v2102_v12 = vld [vmem:[#allocation8 + $0xb50] sm:$0xff]  ;;  %v8021_v25 = vpack.c.bf16 %v2439_v5, %v2432_v4  ;;  %v2165_v4 = vld [vmem:[#allocation8 + $0xd48] sm:$0xff]  ;;  %v2172_v5 = vld [vmem:[#allocation8 + $0xd80] sm:$0xff] }
 0x375   :  { %7778 = vmatprep.subr.bf16.mxu1 %v7777_v19  ;;  %v7797_v19 = vpack.c.bf16 %v2102_v12, %v2095_v20  ;;  %v2523_v20 = vld [vmem:[#allocation8 + $0x1878] sm:$0xff]  ;;  %v2164_v12 = vld [vmem:[#allocation8 + $0xd40] sm:$0xff] }
 0x377   :  { %8008 = vmatpush3.bf16.msra.mxu0 %v8007_v33  ;;  %v7799_v33 = vpack.c.bf16 %v2101_v29, %v2094_v21  ;;  %v2186_v21 = vld [vmem:[#allocation8 + $0xdf0] sm:$0xff]  ;;  %v8039_v29 = vpack.c.bf16 %v2523_v20, %v2516_v13  ;;  %v3707_v13 = vld [vmem:[#allocation11 + $0x38] sm:$0xff] }
 0x378   :  { %7780 = vmatpush1.bf16.msra.mxu1 %v7779_v0  ;;  %8010 = vmatprep.subr.bf16.mxu0 %v8009_v8  ;;  %v2460_v0 = vld [vmem:[#allocation8 + $0x1680] sm:$0xff]  ;;  %v2467_v8 = vld [vmem:[#allocation8 + $0x16b8] sm:$0xff] }
 0x379   :  { %7782 = vmatprep.subr.bf16.mxu1 %v7781_v42  ;;  %v2123_v42 = vld [vmem:[#allocation8 + $0xbf8] sm:$0xff]  ;;  %v8027_v45 = vpack.c.bf16 %v2467_v8, %v2460_v0  ;;  %v3701_v0 = vld [vmem:[#allocation11 + $0x8] sm:$0xff] }
 0x37b   :  { %8012 = vmatpush3.bf16.msra.mxu0 %v8011_v48  ;;  %v7805_v48 = vpack.c.bf16 %v2130_v44, %v2123_v42  ;;  %v2193_v42 = vld [vmem:[#allocation8 + $0xe28] sm:$0xff]  ;;  %v2200_v44 = vld [vmem:[#allocation8 + $0xe60] sm:$0xff] }
 0x37c   :  { %7784 = vmatpush1.bf16.msra.mxu1 %v7783_v49  ;;  %8014 = vmatprep.subr.bf16.mxu0 %v8013_v50  ;;  %v2122_v49 = vld [vmem:[#allocation8 + $0xbf0] sm:$0xff]  ;;  %v2129_v50 = vld [vmem:[#allocation8 + $0xc28] sm:$0xff] }
 0x37d   :  { %7786 = vmatprep.subr.bf16.mxu1 %v7785_v53  ;;  %v8030_v53 = vpack.c.bf16 %v2481_v24, %v2474_v47  ;;  %v7807_v54 = vpack.c.bf16 %v2129_v50, %v2122_v49  ;;  %v8045_v47 = vpack.c.bf16 %v3719_v40, %v3718_v39  ;;  %v3702_v24 = vld [vmem:[#allocation11 + $0x10] sm:$0xff]  ;;  %v7825_v49 = vpack.c.bf16 %v2200_v44, %v2193_v42  ;;  %v2192_v50 = vld [vmem:[#allocation8 + $0xe20] sm:$0xff] }
 0x37e   :  { %v2248_v42 = vld [vmem:[#allocation8 + $0xfe0] sm:$0xff] }
 0x37f   :  { %8016 = vmatpush3.bf16.msra.mxu0 %v8015_v58  ;;  %v2136_v58 = vld [vmem:[#allocation8 + $0xc60] sm:$0xff] }
 0x380   :  { %7788 = vmatpush1.bf16.msra.mxu1 %v7787_v59  ;;  %8017 = vmatprep.subr.bf16.mxu0 %v9297_v63  ;;  %v2143_v59 = vld [vmem:[#allocation8 + $0xc98] sm:$0xff] }
 0x381   :  { %7790 = vmatprep.subr.bf16.mxu1 %v7789_v61  ;;  %v8033_v61 = vpack.c.bf16 %v2495_v56, %v2488_v55  ;;  %v7811_v22 = vpack.c.bf16 %v2143_v59, %v2136_v58  ;;  %v3721_v55 = vld [vmem:[#allocation11 + $0xa8] sm:$0xff]  ;;  %v3704_v59 = vld [vmem:[#allocation11 + $0x20] sm:$0xff] }
 0x382   :  { %3618 = vmatmul.mubr.f32.vlgmr.msra.gmra.mrb[10].mxu0 %v9597_v23  ;;  %v2206_v58 = vld [vmem:[#allocation8 + $0xe90] sm:$0xff] }
 0x383   :  { %8019 = vmatpush3.bf16.msra.mxu0 %v8018_v1  ;;  %6504 = vmatprep.mubr.msk.f32.mxu0 %vm9298_vm7, %v9296_v35  ;;  %v2150_v1 = vld [vmem:[#allocation8 + $0xcd0] sm:$0xff] }
 0x384   :  { %7792 = vmatpush1.bf16.msra.mxu1 %v7791_v3  ;;  %8020 = vmatprep.subr.bf16.mxu0 %v9297_v63  ;;  %v2157_v3 = vld [vmem:[#allocation8 + $0xd08] sm:$0xff] }
 0x385   :  { %7794 = vmatprep.subr.bf16.mxu1 %v7793_v6  ;;  %v8036_v6 = vpack.c.bf16 %v2509_v62, %v2502_v10  ;;  %v7815_v2 = vpack.c.bf16 %v2157_v3, %v2150_v1  ;;  %v3722_v10 = vld [vmem:[#allocation11 + $0xb0] sm:$0xff]  ;;  %v3723_v62 = vld [vmem:[#allocation11 + $0xb8] sm:$0xff]  ;;  %v8051_v3 = vpack.c.bf16 %v3705_v43, %v3704_v59  ;;  %v2269_v59 = vld [vmem:[#allocation8 + $0x1088] sm:$0xff] }
 0x386   :  { %v2228_v1 = vld [vmem:[#allocation8 + $0xf40] sm:$0xff]  ;;  %v3730_v43 = vld [vmem:[#allocation11 + $0xf0] sm:$0xff] }
 0x387   :  { %8022 = vmatpush3.bf16.msra.mxu0 %v8021_v25  ;;  %v7817_v25 = vpack.c.bf16 %v2172_v5, %v2165_v4  ;;  %v2220_v5 = vld [vmem:[#allocation8 + $0xf00] sm:$0xff] }
 0x388   :  { %7796 = vmatpush1.bf16.msra.mxu1 %v7795_v15  ;;  %8023 = vmatprep.subr.bf16.mxu0 %v9297_v63  ;;  %v2171_v15 = vld [vmem:[#allocation8 + $0xd78] sm:$0xff] }
 0x389   :  { %7798 = vmatprep.subr.bf16.mxu1 %v7797_v19  ;;  %v2179_v19 = vld [vmem:[#allocation8 + $0xdb8] sm:$0xff]  ;;  %v7819_v30 = vpack.c.bf16 %v2171_v15, %v2164_v12  ;;  %v3725_v15 = vld [vmem:[#allocation11 + $0xc8] sm:$0xff] }
 0x38a   :  { %v7821_v8 = vpack.c.bf16 %v2186_v21, %v2179_v19  ;;  %v2227_v12 = vld [vmem:[#allocation8 + $0xf38] sm:$0xff]  ;;  %v2234_v21 = vld [vmem:[#allocation8 + $0xf70] sm:$0xff] }
 0x38b   :  { %8025 = vmatpush3.bf16.msra.mxu0 %v8024_v32  ;;  %v8041_v32 = vpack.c.bf16 %v3717_v18, %v3716_v16  ;;  %v2235_v16 = vld [vmem:[#allocation8 + $0xf78] sm:$0xff]  ;;  %v2242_v18 = vld [vmem:[#allocation8 + $0xfb0] sm:$0xff]  ;;  %v7835_v19 = vpack.c.bf16 %v2227_v12, %v2220_v5  ;;  %v2276_v5 = vld [vmem:[#allocation8 + $0x10c0] sm:$0xff] }
 0x38c   :  { %7800 = vmatpush1.bf16.msra.mxu1 %v7799_v33  ;;  %8026 = vmatprep.subr.bf16.mxu0 %v9297_v63  ;;  %v3700_v33 = vld [vmem:[#allocation11] sm:$0xff] }
 0x38d   :  { %7802 = vmatprep.subr.bf16.mxu1 %v7801_v28  ;;  %v2185_v28 = vld [vmem:[#allocation8 + $0xde8] sm:$0xff] }
 0x38f   :  { %8028 = vmatpush3.bf16.msra.mxu0 %v8027_v45  ;;  %v8043_v45 = vpack.c.bf16 %v3701_v0, %v3700_v33  ;;  %v3726_v33 = vld [vmem:[#allocation11 + $0xd0] sm:$0xff]  ;;  %v3727_v0 = vld [vmem:[#allocation11 + $0xd8] sm:$0xff] }
 0x390   :  { %7804 = vmatpush1.bf16.msra.mxu1 %v7803_v46  ;;  %8029 = vmatprep.subr.bf16.mxu0 %v9297_v63  ;;  %v7823_v46 = vpack.c.bf16 %v2185_v28, %v2178_v31  ;;  %v7837_v31 = vpack.c.bf16 %v2242_v18, %v2235_v16  ;;  %v2256_v28 = vld [vmem:[#allocation8 + $0x1020] sm:$0xff]  ;;  %v8061_v44 = vpack.c.bf16 %v3727_v0, %v3726_v33  ;;  %v2297_v16 = vld [vmem:[#allocation8 + $0x1168] sm:$0xff]  ;;  %v2318_v0 = vld [vmem:[#allocation8 + $0x1210] sm:$0xff] }
 0x391   :  { %7806 = vmatprep.subr.bf16.mxu1 %v7805_v48  ;;  %v3703_v48 = vld [vmem:[#allocation11 + $0x18] sm:$0xff]  ;;  %v2305_v18 = vld [vmem:[#allocation8 + $0x11a8] sm:$0xff] }
 0x392   :  { %v8047_v56 = vpack.c.bf16 %v3703_v48, %v3702_v24  ;;  %v2255_v24 = vld [vmem:[#allocation8 + $0x1018] sm:$0xff]  ;;  %v3728_v48 = vld [vmem:[#allocation11 + $0xe0] sm:$0xff] }
 0x393   :  { %8031 = vmatpush3.bf16.msra.mxu0 %v8030_v53  ;;  %v2214_v53 = vld [vmem:[#allocation8 + $0xed0] sm:$0xff] }
 0x394   :  { %7808 = vmatpush1.bf16.msra.mxu1 %v7807_v54  ;;  %8032 = vmatprep.subr.bf16.mxu0 %v9297_v63  ;;  %v3720_v54 = vld [vmem:[#allocation11 + $0xa0] sm:$0xff]  ;;  %v7829_v60 = vpack.c.bf16 %v2214_v53, %v2207_v52  ;;  %v7843_v53 = vpack.c.bf16 %v2255_v24, %v2248_v42 }
 0x395   :  { %7810 = vmatprep.subr.bf16.mxu1 %v7809_v57  ;;  %v7827_v57 = vpack.c.bf16 %v2199_v51, %v2192_v50  ;;  %v2263_v50 = vld [vmem:[#allocation8 + $0x1058] sm:$0xff]  ;;  %v2270_v51 = vld [vmem:[#allocation8 + $0x1090] sm:$0xff] }
 0x397   :  { %8034 = vmatpush3.bf16.msra.mxu0 %v8033_v61  ;;  %v2213_v61 = vld [vmem:[#allocation8 + $0xec8] sm:$0xff] }
 0x398   :  { %7812 = vmatpush1.bf16.msra.mxu1 %v7811_v22  ;;  %8035 = vmatprep.subr.bf16.mxu0 %v9297_v63  ;;  %v8049_v22 = vpack.c.bf16 %v3721_v55, %v3720_v54  ;;  %v7831_v4 = vpack.c.bf16 %v2213_v61, %v2206_v58  ;;  %v2262_v54 = vld [vmem:[#allocation8 + $0x1050] sm:$0xff]  ;;  %v7845_v58 = vpack.c.bf16 %v2270_v51, %v2263_v50  ;;  %v2277_v61 = vld [vmem:[#allocation8 + $0x10c8] sm:$0xff] }
 0x399   :  { %7814 = vmatprep.subr.bf16.mxu1 %v7813_v11  ;;  %v2221_v11 = vld [vmem:[#allocation8 + $0xf08] sm:$0xff] }
 0x39a   :  { %v7833_v20 = vpack.c.bf16 %v2228_v1, %v2221_v11  ;;  %v3714_v1 = vld [vmem:[#allocation11 + $0x70] sm:$0xff]  ;;  %v2353_v50 = vld [vmem:[#allocation8 + $0x1328] sm:$0xff] }
 0x39b   :  { %8037 = vmatpush3.bf16.msra.mxu0 %v8036_v6  ;;  %v8053_v6 = vpack.c.bf16 %v3723_v62, %v3722_v10  ;;  %v7847_v62 = vpack.c.bf16 %v2269_v59, %v2262_v54  ;;  %v2361_v51 = vld [vmem:[#allocation8 + $0x1368] sm:$0xff] }
 0x39c   :  { %7816 = vmatpush1.bf16.msra.mxu1 %v7815_v2  ;;  %8038 = vmatprep.subr.bf16.mxu0 %v9297_v63  ;;  %v3706_v2 = vld [vmem:[#allocation11 + $0x30] sm:$0xff] }
 0x39d   :  { %7818 = vmatprep.subr.bf16.mxu1 %v7817_v25  ;;  %v3724_v25 = vld [vmem:[#allocation11 + $0xc0] sm:$0xff] }
 0x39f   :  { %8040 = vmatpush3.bf16.msra.mxu0 %v8039_v29  ;;  %v3708_v29 = vld [vmem:[#allocation11 + $0x40] sm:$0xff] }
 0x3a0   :  { %7820 = vmatpush1.bf16.msra.mxu1 %v7819_v30  ;;  %8042 = vmatprep.subr.bf16.mxu0 %v8041_v32  ;;  %v3709_v30 = vld [vmem:[#allocation11 + $0x48] sm:$0xff]  ;;  %v2241_v32 = vld [vmem:[#allocation8 + $0xfa8] sm:$0xff] }
 0x3a1   :  { %7822 = vmatprep.subr.bf16.mxu1 %v7821_v8  ;;  %v2249_v8 = vld [vmem:[#allocation8 + $0xfe8] sm:$0xff]  ;;  %v8059_v39 = vpack.c.bf16 %v3709_v30, %v3708_v29  ;;  %v7839_v40 = vpack.c.bf16 %v2241_v32, %v2234_v21  ;;  %v2311_v29 = vld [vmem:[#allocation8 + $0x11d8] sm:$0xff] }
 0x3a2   :  { %6505 = vmatmul.mubr.f32.vlgmr.msra.gmra.mrb[12].mxu0 %v9604_v34  ;;  %v2319_v30 = vld [vmem:[#allocation8 + $0x1218] sm:$0xff] }
 0x3a3   :  { %8044 = vmatpush3.bf16.msra.mxu0 %v8043_v45  ;;  %v3710_v45 = vld [vmem:[#allocation11 + $0x50] sm:$0xff] }
 0x3a4   :  { %7824 = vmatpush1.bf16.msra.mxu1 %v7823_v46  ;;  %8046 = vmatprep.subr.bf16.mxu0 %v8045_v47  ;;  %v3711_v46 = vld [vmem:[#allocation11 + $0x58] sm:$0xff]  ;;  %v7841_v47 = vpack.c.bf16 %v2256_v28, %v2249_v8  ;;  %v2325_v8 = vld [vmem:[#allocation8 + $0x1248] sm:$0xff] }
 0x3a5   :  { %7826 = vmatprep.subr.bf16.mxu1 %v7825_v49  ;;  %v3729_v49 = vld [vmem:[#allocation11 + $0xe8] sm:$0xff]  ;;  %v8063_v52 = vpack.c.bf16 %v3711_v46, %v3710_v45  ;;  %v2333_v28 = vld [vmem:[#allocation8 + $0x1288] sm:$0xff]  ;;  %v2339_v45 = vld [vmem:[#allocation8 + $0x12b8] sm:$0xff] }
 0x3a6   :  { %v8065_v55 = vpack.c.bf16 %v3729_v49, %v3728_v48  ;;  %v2347_v46 = vld [vmem:[#allocation8 + $0x12f8] sm:$0xff]  ;;  %v2346_v49 = vld [vmem:[#allocation8 + $0x12f0] sm:$0xff] }
 0x3a7   :  { %3265 = vmatmul.mubr.f32.vlgmr.msra.gmra.mrb[12].mxu1 %v9573_v17  ;;  %8048 = vmatpush3.bf16.msra.mxu0 %v8047_v56  ;;  %v8055_v17 = vpack.c.bf16 %v3707_v13, %v3706_v2  ;;  %v3712_v56 = vld [vmem:[#allocation11 + $0x60] sm:$0xff]  ;;  %v2291_v2 = vld [vmem:[#allocation8 + $0x1138] sm:$0xff]  ;;  %v2298_v13 = vld [vmem:[#allocation8 + $0x1170] sm:$0xff] }
 0x3a8   :  { %7828 = vmatpush1.bf16.msra.mxu1 %v7827_v57  ;;  %3335 = vmatprep.mubr.f32.mxu1 %v9577_v26  ;;  %v8057_v26 = vpack.c.bf16 %v3725_v15, %v3724_v25  ;;  %v3713_v57 = vld [vmem:[#allocation11 + $0x68] sm:$0xff]  ;;  %v7853_v25 = vpack.c.bf16 %v2298_v13, %v2291_v2 }
 0x3a9   :  { %7830 = vmatprep.subr.bf16.mxu1 %v7829_v60  ;;  %8050 = vmatprep.subr.bf16.mxu0 %v8049_v22  ;;  %v3731_v60 = vld [vmem:[#allocation11 + $0xf8] sm:$0xff]  ;;  %v8067_v10 = vpack.c.bf16 %v3713_v57, %v3712_v56  ;;  %v2290_v15 = vld [vmem:[#allocation8 + $0x1130] sm:$0xff]  ;;  %v2367_v56 = vld [vmem:[#allocation8 + $0x1398] sm:$0xff] }
 0x3aa   :  { %v2284_v22 = vld [vmem:[#allocation8 + $0x1100] sm:$0xff]  ;;  %v8069_v11 = vpack.c.bf16 %v3731_v60, %v3730_v43  ;;  %v2375_v57 = vld [vmem:[#allocation8 + $0x13d8] sm:$0xff]  ;;  %v2374_v60 = vld [vmem:[#allocation8 + $0x13d0] sm:$0xff] }
 0x3ab   :  { %8052 = vmatpush3.bf16.msra.mxu0 %v8051_v3  ;;  %v3715_v3 = vld [vmem:[#allocation11 + $0x78] sm:$0xff]  ;;  %v2402_v13 = vld [vmem:[#allocation8 + $0x14b0] sm:$0xff] }
 0x3ac   :  { %7832 = vmatpush1.bf16.msra.mxu1 %v7831_v4  ;;  %8054 = vmatprep.subr.bf16.mxu0 %v8053_v6  ;;  %v7849_v4 = vpack.c.bf16 %v2284_v22, %v2277_v61  ;;  %v2283_v6 = vld [vmem:[#allocation8 + $0x10f8] sm:$0xff]  ;;  %v2381_v61 = vld [vmem:[#allocation8 + $0x1408] sm:$0xff] }
 0x3ad   :  { %7834 = vmatprep.subr.bf16.mxu1 %v7833_v20  ;;  %v8071_v20 = vpack.c.bf16 %v3715_v3, %v3714_v1  ;;  %v7851_v12 = vpack.c.bf16 %v2283_v6, %v2276_v5  ;;  %v2389_v22 = vld [vmem:[#allocation8 + $0x1448] sm:$0xff]  ;;  %v2388_v1 = vld [vmem:[#allocation8 + $0x1440] sm:$0xff]  ;;  %v2395_v3 = vld [vmem:[#allocation8 + $0x1478] sm:$0xff] }
 0x3ae   :  { %v2410_v5 = vld [vmem:[#allocation8 + $0x14f0] sm:$0xff]  ;;  %v7883_v6 = vpack.c.bf16 %v2395_v3, %v2388_v1 }
 0x3af   :  { %8056 = vmatpush3.bf16.msra.mxu0 %v8055_v17  ;;  %v2312_v17 = vld [vmem:[#allocation8 + $0x11e0] sm:$0xff] }
 0x3b0   :  { %7836 = vmatpush1.bf16.msra.mxu1 %v7835_v19  ;;  %8058 = vmatprep.subr.bf16.mxu0 %v8057_v26  ;;  %v7855_v19 = vpack.c.bf16 %v2297_v16, %v2290_v15  ;;  %v7857_v21 = vpack.c.bf16 %v2312_v17, %v2305_v18  ;;  %v2304_v26 = vld [vmem:[#allocation8 + $0x11a0] sm:$0xff]  ;;  %v2423_v17 = vld [vmem:[#allocation8 + $0x1558] sm:$0xff] }
 0x3b1   :  { %7838 = vmatprep.subr.bf16.mxu1 %v7837_v31  ;;  %v2326_v31 = vld [vmem:[#allocation8 + $0x1250] sm:$0xff]  ;;  %v7859_v32 = vpack.c.bf16 %v2311_v29, %v2304_v26  ;;  %v2416_v18 = vld [vmem:[#allocation8 + $0x1520] sm:$0xff] }
 0x3b2   :  { %v7861_v33 = vpack.c.bf16 %v2326_v31, %v2319_v30  ;;  %v7891_v26 = vpack.c.bf16 %v2423_v17, %v2416_v18  ;;  %v2430_v30 = vld [vmem:[#allocation8 + $0x1590] sm:$0xff]  ;;  %v2437_v31 = vld [vmem:[#allocation8 + $0x15c8] sm:$0xff]  ;;  %v3782_v17 = vld [vmem:[#allocation11 + $0x290] sm:$0xff] }
 0x3b3   :  { %8060 = vmatpush3.bf16.msra.mxu0 %v8059_v39  ;;  %v2340_v39 = vld [vmem:[#allocation8 + $0x12c0] sm:$0xff]  ;;  %v3765_v18 = vld [vmem:[#allocation11 + $0x208] sm:$0xff] }
 0x3b4   :  { %7840 = vmatpush1.bf16.msra.mxu1 %v7839_v40  ;;  %8062 = vmatprep.subr.bf16.mxu0 %v8061_v44  ;;  %v7863_v40 = vpack.c.bf16 %v2325_v8, %v2318_v0  ;;  %v7865_v42 = vpack.c.bf16 %v2340_v39, %v2333_v28  ;;  %v2332_v44 = vld [vmem:[#allocation8 + $0x1280] sm:$0xff]  ;;  %v7895_v0 = vpack.c.bf16 %v2437_v31, %v2430_v30  ;;  %v2451_v39 = vld [vmem:[#allocation8 + $0x1638] sm:$0xff]  ;;  %v2514_v30 = vld [vmem:[#allocation8 + $0x1830] sm:$0xff] }
 0x3b5   :  { %7842 = vmatprep.subr.bf16.mxu1 %v7841_v47  ;;  %v2354_v47 = vld [vmem:[#allocation8 + $0x1330] sm:$0xff]  ;;  %v7867_v24 = vpack.c.bf16 %v2339_v45, %v2332_v44  ;;  %v2444_v28 = vld [vmem:[#allocation8 + $0x1600] sm:$0xff]  ;;  %v2521_v31 = vld [vmem:[#allocation8 + $0x1868] sm:$0xff] }
 0x3b6   :  { %v7869_v48 = vpack.c.bf16 %v2354_v47, %v2347_v46  ;;  %v7899_v44 = vpack.c.bf16 %v2451_v39, %v2444_v28  ;;  %v2458_v46 = vld [vmem:[#allocation8 + $0x1670] sm:$0xff]  ;;  %v2465_v47 = vld [vmem:[#allocation8 + $0x16a8] sm:$0xff] }
 0x3b7   :  { %8064 = vmatpush3.bf16.msra.mxu0 %v8063_v52  ;;  %v2368_v52 = vld [vmem:[#allocation8 + $0x13a0] sm:$0xff]  ;;  %v3749_v28 = vld [vmem:[#allocation11 + $0x188] sm:$0xff] }
 0x3b8   :  { %7844 = vmatpush1.bf16.msra.mxu1 %v7843_v53  ;;  %8066 = vmatprep.subr.bf16.mxu0 %v8065_v55  ;;  %v7871_v53 = vpack.c.bf16 %v2353_v50, %v2346_v49  ;;  %v7873_v54 = vpack.c.bf16 %v2368_v52, %v2361_v51  ;;  %v2360_v55 = vld [vmem:[#allocation8 + $0x1360] sm:$0xff]  ;;  %v2479_v51 = vld [vmem:[#allocation8 + $0x1718] sm:$0xff] }
 0x3b9   :  { %7846 = vmatprep.subr.bf16.mxu1 %v7845_v58  ;;  %v2382_v58 = vld [vmem:[#allocation8 + $0x1410] sm:$0xff]  ;;  %v7875_v59 = vpack.c.bf16 %v2367_v56, %v2360_v55  ;;  %v2472_v50 = vld [vmem:[#allocation8 + $0x16e0] sm:$0xff]  ;;  %v2487_v52 = vld [vmem:[#allocation8 + $0x1758] sm:$0xff] }
 0x3ba   :  { %v7877_v43 = vpack.c.bf16 %v2382_v58, %v2375_v57  ;;  %v9632_v55 = vld [vmem:[#allocation10] sm:$0xff]  ;;  %v2486_v58 = vld [vmem:[#allocation8 + $0x1750] sm:$0xff] }
 0x3bb   :  { %8068 = vmatpush3.bf16.msra.mxu0 %v8067_v10  ;;  %v2396_v10 = vld [vmem:[#allocation8 + $0x1480] sm:$0xff] }
 0x3bc   :  { %7848 = vmatpush1.bf16.msra.mxu1 %v7847_v62  ;;  %8070 = vmatprep.subr.bf16.mxu0 %v8069_v11  ;;  %v7879_v62 = vpack.c.bf16 %v2381_v61, %v2374_v60  ;;  %v7881_v11 = vpack.c.bf16 %v2396_v10, %v2389_v22  ;;  %v2529_v60 = vrot.slane %v9632_v55, %v9526_v38  ;;  %v2501_v61 = vld [vmem:[#allocation8 + $0x17c8] sm:$0xff]  ;;  %v2508_v22 = vld [vmem:[#allocation8 + $0x1800] sm:$0xff] }
 0x3bd   :  { %7850 = vmatprep.subr.bf16.mxu1 %v7849_v4  ;;  %v2403_v4 = vld [vmem:[#allocation8 + $0x14b8] sm:$0xff]  ;;  %v2533_v10 = vrot.slane %v9632_v55, %v9529_v41  ;;  %v7913_v3 = vpack.c.bf16 %v2508_v22, %v2501_v61  ;;  %v3735_v22 = vld [vmem:[#allocation11 + $0x118] sm:$0xff] }
 0x3be   :  { %v7885_v2 = vpack.c.bf16 %v2410_v5, %v2403_v4  ;;  %v2507_v4 = vld [vmem:[#allocation8 + $0x17f8] sm:$0xff] }
 0x3bf   :  { %8072 = vmatpush3.bf16.msra.mxu0 %v8071_v20  ;;  %v2409_v20 = vld [vmem:[#allocation8 + $0x14e8] sm:$0xff]  ;;  %v2515_v5 = vld [vmem:[#allocation8 + $0x1838] sm:$0xff] }
 0x3c0   :  { %7852 = vmatpush1.bf16.msra.mxu1 %v7851_v12  ;;  %v2417_v12 = vld [vmem:[#allocation8 + $0x1528] sm:$0xff]  ;;  %v7887_v15 = vpack.c.bf16 %v2409_v20, %v2402_v13  ;;  %v3734_v61 = vld [vmem:[#allocation11 + $0x110] sm:$0xff] }
 0x3c1   :  { %7854 = vmatprep.subr.bf16.mxu1 %v7853_v25  ;;  %v2424_v25 = vld [vmem:[#allocation8 + $0x1560] sm:$0xff]  ;;  %v3780_v20 = vld [vmem:[#allocation11 + $0x280] sm:$0xff] }
 0x3c2   :  { %v7889_v16 = vpack.c.bf16 %v2424_v25, %v2417_v12  ;;  %v3781_v12 = vld [vmem:[#allocation11 + $0x288] sm:$0xff]  ;;  %v3764_v25 = vld [vmem:[#allocation11 + $0x200] sm:$0xff] }
 0x3c4   :  { %7856 = vmatpush1.bf16.msra.mxu1 %v7855_v19  ;;  %v2431_v19 = vld [vmem:[#allocation8 + $0x1598] sm:$0xff] }
 0x3c5   :  { %7858 = vmatprep.subr.bf16.mxu1 %v7857_v21  ;;  %v2438_v21 = vld [vmem:[#allocation8 + $0x15d0] sm:$0xff] }
 0x3c6   :  { %v7893_v29 = vpack.c.bf16 %v2438_v21, %v2431_v19  ;;  %v3783_v19 = vld [vmem:[#allocation11 + $0x298] sm:$0xff] }
 0x3c7   :  { %v8109_v39 = vpack.c.bf16 %v3783_v19, %v3782_v17  ;;  %v3755_v17 = vld [vmem:[#allocation11 + $0x1b8] sm:$0xff] }
 0x3c8   :  { %7860 = vmatpush1.bf16.msra.mxu1 %v7859_v32  ;;  %v2445_v32 = vld [vmem:[#allocation8 + $0x1608] sm:$0xff] }
 0x3c9   :  { %7862 = vmatprep.subr.bf16.mxu1 %v7861_v33  ;;  %v2452_v33 = vld [vmem:[#allocation8 + $0x1640] sm:$0xff] }
 0x3ca   :  { %v7897_v8 = vpack.c.bf16 %v2452_v33, %v2445_v32  ;;  %v3748_v32 = vld [vmem:[#allocation11 + $0x180] sm:$0xff]  ;;  %v8107_v33 = vpack.c.bf16 %v3765_v18, %v3764_v25  ;;  %v3737_v25 = vld [vmem:[#allocation11 + $0x128] sm:$0xff] }
 0x3cc   :  { %7864 = vmatpush1.bf16.msra.mxu1 %v7863_v40  ;;  %v2459_v40 = vld [vmem:[#allocation8 + $0x1678] sm:$0xff] }
 0x3cd   :  { %7866 = vmatprep.subr.bf16.mxu1 %v7865_v42  ;;  %v2466_v42 = vld [vmem:[#allocation8 + $0x16b0] sm:$0xff] }
 0x3ce   :  { %v7901_v45 = vpack.c.bf16 %v2466_v42, %v2459_v40  ;;  %v3766_v40 = vld [vmem:[#allocation11 + $0x210] sm:$0xff]  ;;  %v3767_v42 = vld [vmem:[#allocation11 + $0x218] sm:$0xff] }
 0x3d0   :  { %7868 = vmatpush1.bf16.msra.mxu1 %v7867_v24  ;;  %v2473_v24 = vld [vmem:[#allocation8 + $0x16e8] sm:$0xff] }
 0x3d1   :  { %7870 = vmatprep.subr.bf16.mxu1 %v7869_v48  ;;  %v2480_v48 = vld [vmem:[#allocation8 + $0x1720] sm:$0xff] }
 0x3d2   :  { %v7905_v49 = vpack.c.bf16 %v2480_v48, %v2473_v24  ;;  %v3732_v24 = vld [vmem:[#allocation11 + $0x100] sm:$0xff]  ;;  %v3733_v48 = vld [vmem:[#allocation11 + $0x108] sm:$0xff] }
 0x3d4   :  { %7872 = vmatpush1.bf16.msra.mxu1 %v7871_v53  ;;  %v2494_v53 = vld [vmem:[#allocation8 + $0x1790] sm:$0xff] }
 0x3d5   :  { %7874 = vmatprep.subr.bf16.mxu1 %v7873_v54  ;;  %v7907_v54 = vpack.c.bf16 %v2479_v51, %v2472_v50  ;;  %v7909_v57 = vpack.c.bf16 %v2494_v53, %v2487_v52  ;;  %v3751_v51 = vld [vmem:[#allocation11 + $0x198] sm:$0xff]  ;;  %v3768_v53 = vld [vmem:[#allocation11 + $0x220] sm:$0xff] }
 0x3d8   :  { %7876 = vmatpush1.bf16.msra.mxu1 %v7875_v59  ;;  %v2493_v59 = vld [vmem:[#allocation8 + $0x1788] sm:$0xff] }
 0x3d9   :  { %7878 = vmatprep.subr.bf16.mxu1 %v7877_v43 }
 0x3dc   :  { %7880 = vmatpush1.bf16.msra.mxu1 %v7879_v62  ;;  %v7911_v62 = vpack.c.bf16 %v2493_v59, %v2486_v58  ;;  %v3787_v58 = vld [vmem:[#allocation11 + $0x2b8] sm:$0xff]  ;;  %v8075_v59 = vpack.c.bf16 %v3733_v48, %v3732_v24  ;;  %v3742_v24 = vld [vmem:[#allocation11 + $0x150] sm:$0xff] }
 0x3dd   :  { %7882 = vmatprep.subr.bf16.mxu1 %v7881_v11  ;;  %v2500_v11 = vld [vmem:[#allocation8 + $0x17c0] sm:$0xff] }
 0x3de   :  { %v7915_v21 = vpack.c.bf16 %v2507_v4, %v2500_v11  ;;  %v3753_v11 = vld [vmem:[#allocation11 + $0x1a8] sm:$0xff]  ;;  %v3771_v4 = vld [vmem:[#allocation11 + $0x238] sm:$0xff] }
 0x3df   :  { %v3743_v48 = vld [vmem:[#allocation11 + $0x158] sm:$0xff] }
 0x3e0   :  { %7884 = vmatpush1.bf16.msra.mxu1 %v7883_v6  ;;  %v2522_v6 = vld [vmem:[#allocation8 + $0x1870] sm:$0xff] }
 0x3e1   :  { %7886 = vmatprep.subr.bf16.mxu1 %v7885_v2 }
 0x3e4   :  { %7888 = vmatpush1.bf16.msra.mxu1 %v7887_v15 }
 0x3e5   :  { %7890 = vmatprep.subr.bf16.mxu1 %v7889_v16  ;;  %v8105_v16 = vpack.c.bf16 %v3781_v12, %v3780_v20  ;;  %v3736_v12 = vld [vmem:[#allocation11 + $0x120] sm:$0xff] }
 0x3e7   :  { %3336 = vmatmul.mubr.f32.vlgmr.msra.gmra.mrb[12].mxu1 %v9597_v23  ;;  %v7903_v23 = vpack.c.bf16 %v2465_v47, %v2458_v46  ;;  %8106 = vmatprep.subr.bf16.mxu0 %v8105_v16  ;;  %v7919_v46 = vpack.c.bf16 %v2521_v31, %v2514_v30  ;;  %v8073_v47 = vpack.c.bf16 %v3749_v28, %v3748_v32  ;;  %v3754_v16 = vld [vmem:[#allocation11 + $0x1b0] sm:$0xff]  ;;  %v3739_v31 = vld [vmem:[#allocation11 + $0x138] sm:$0xff] }
 0x3e8   :  { %7892 = vmatpush1.bf16.msra.mxu1 %v7891_v26  ;;  %3406 = vmatprep.mubr.f32.mxu1 %v9296_v35  ;;  %v3738_v30 = vld [vmem:[#allocation11 + $0x130] sm:$0xff] }
 0x3e9   :  { %7894 = vmatprep.subr.bf16.mxu1 %v7893_v29  ;;  %v7917_v29 = vpack.c.bf16 %v2522_v6, %v2515_v5  ;;  %v3788_v5 = vld [vmem:[#allocation11 + $0x2c0] sm:$0xff]  ;;  %v3789_v6 = vld [vmem:[#allocation11 + $0x2c8] sm:$0xff] }
 0x3ea   :  { %v8121_v19 = vpack.c.bf16 %v3789_v6, %v3788_v5 }
 0x3ec   :  { %7896 = vmatpush1.bf16.msra.mxu1 %v7895_v0  ;;  %v2541_v0 = vrot.slane %v9632_v55, %v9558_v37 }
 0x3ed   :  { %7898 = vmatprep.subr.bf16.mxu1 %v7897_v8 }
 0x3f0   :  { %7900 = vmatpush1.bf16.msra.mxu1 %v7899_v44  ;;  %v3784_v44 = vld [vmem:[#allocation11 + $0x2a0] sm:$0xff] }
 0x3f1   :  { %7902 = vmatprep.subr.bf16.mxu1 %v7901_v45  ;;  %v3785_v45 = vld [vmem:[#allocation11 + $0x2a8] sm:$0xff] }
 0x3f2   :  { %v8113_v52 = vpack.c.bf16 %v3785_v45, %v3784_v44  ;;  %v3759_v44 = vld [vmem:[#allocation11 + $0x1d8] sm:$0xff] }
 0x3f4   :  { %7904 = vmatpush1.bf16.msra.mxu1 %v7903_v23  ;;  %v3750_v23 = vld [vmem:[#allocation11 + $0x190] sm:$0xff] }
 0x3f5   :  { %v9634_v56 = vpop.f32.mrb[4].mxu0  ;;  %7906 = vmatprep.subr.bf16.mxu1 %v7905_v49  ;;  %v8111_v49 = vpack.c.bf16 %v3767_v42, %v3766_v40  ;;  %v3741_v40 = vld [vmem:[#allocation11 + $0x148] sm:$0xff]  ;;  %v3758_v42 = vld [vmem:[#allocation11 + $0x1d0] sm:$0xff] }
 0x3f6   :  { %v3126_v43 = vpop.f32.mrb[5].mxu0 }
 0x3f7   :  { %v9650_v50 = vadd.f32 %v3126_v43, %v2541_v0  ;;  %v3757_v0 = vld [vmem:[#allocation11 + $0x1c8] sm:$0xff] }
 0x3f8   :  { %7908 = vmatpush1.bf16.msra.mxu1 %v7907_v54  ;;  %v3769_v54 = vld [vmem:[#allocation11 + $0x228] sm:$0xff] }
 0x3f9   :  { %v2840_v1 = vpop.f32.mrb[10].mxu1  ;;  %7910 = vmatprep.subr.bf16.mxu1 %v7909_v57  ;;  %v3786_v57 = vld [vmem:[#allocation11 + $0x2b0] sm:$0xff]  ;;  %v3696_v43 = vmul.f32 %v9650_v50, %v9650_v50 }
 0x3fa   :  { %v9640_v2 = vadd.f32 %v2840_v1, %v2529_v60  ;;  %v2842_v13 = vpop.f32.mrb[11].mxu1  ;;  %v8077_v60 = vpack.c.bf16 %v3751_v51, %v3750_v23  ;;  %v8117_v1 = vpack.c.bf16 %v3787_v58, %v3786_v57  ;;  %v3761_v51 = vld [vmem:[#allocation11 + $0x1e8] sm:$0xff]  ;;  %v3744_v57 = vld [vmem:[#allocation11 + $0x160] sm:$0xff] }
 0x3fb   :  { %v9642_v15 = vadd.f32 %v2842_v13, %v2533_v10  ;;  %v3752_v10 = vld [vmem:[#allocation11 + $0x1a0] sm:$0xff]  ;;  %v8079_v13 = vpack.c.bf16 %v3735_v22, %v3734_v61  ;;  %v3745_v58 = vld [vmem:[#allocation11 + $0x168] sm:$0xff]  ;;  %v2537_v22 = vrot.slane %v9632_v55, %v9555_v36 }
 0x3fc   :  { %7912 = vmatpush1.bf16.msra.mxu1 %v7911_v62  ;;  %v3693_v8 = vmul.f32 %v9640_v2, %v9640_v2  ;;  %v8115_v62 = vpack.c.bf16 %v3769_v54, %v3768_v53  ;;  %v8081_v20 = vpack.c.bf16 %v3753_v11, %v3752_v10  ;;  %v8095_v53 = vpack.c.bf16 %v3743_v48, %v3742_v24  ;;  %v3774_v48 = vld [vmem:[#allocation11 + $0x250] sm:$0xff] }
 0x3fd   :  { %v3694_v26 = vmul.f32 %v9642_v15, %v9642_v15  ;;  %7914 = vmatprep.subr.bf16.mxu1 %v7913_v3  ;;  %v3770_v3 = vld [vmem:[#allocation11 + $0x230] sm:$0xff]  ;;  %v8099_v61 = vpack.c.bf16 %v3745_v58, %v3744_v57 }
 0x3fe   :  { %v8119_v18 = vpack.c.bf16 %v3771_v4, %v3770_v3  ;;  %v3796_v3 = vld [vmem:[#allocation11 + $0x300] sm:$0xff]  ;;  %v3797_v4 = vld [vmem:[#allocation11 + $0x308] sm:$0xff] }
 0x3ff   :  { %3876 = vmatprep.mubr.f32.mxu0 %v3694_v26  ;;  %v3773_v26 = vld [vmem:[#allocation11 + $0x248] sm:$0xff]  ;;  %v8138_v5 = vpack.c.bf16 %v3797_v4, %v3796_v3  ;;  %v3779_v3 = vld [vmem:[#allocation11 + $0x278] sm:$0xff] }
 0x400   :  { %7916 = vmatpush1.bf16.msra.mxu1 %v7915_v21  ;;  %3877 = vmatmul.mubr.f32.vlgmr.msra.gmra.mrb[14].mxu0 %v3693_v8  ;;  %v3772_v21 = vld [vmem:[#allocation11 + $0x240] sm:$0xff]  ;;  %v8087_v8 = vpack.c.bf16 %v3739_v31, %v3738_v30  ;;  %v3806_v31 = vld [vmem:[#allocation11 + $0x350] sm:$0xff] }
 0x401   :  { %7918 = vmatprep.subr.bf16.mxu1 %v7917_v29  ;;  %8108 = vmatpush3.bf16.msra.mxu0 %v8107_v33  ;;  %v8083_v29 = vpack.c.bf16 %v3737_v25, %v3736_v12  ;;  %v8123_v32 = vpack.c.bf16 %v3773_v26, %v3772_v21  ;;  %v3756_v33 = vld [vmem:[#allocation11 + $0x1c0] sm:$0xff]  ;;  %v3801_v25 = vld [vmem:[#allocation11 + $0x328] sm:$0xff] }
 0x402   :  { %8110 = vmatprep.subr.bf16.mxu0 %v8109_v39  ;;  %v8089_v28 = vpack.c.bf16 %v3757_v0, %v3756_v33  ;;  %v3740_v39 = vld [vmem:[#allocation11 + $0x140] sm:$0xff]  ;;  %v3805_v26 = vld [vmem:[#allocation11 + $0x348] sm:$0xff] }
 0x403   :  { %v8091_v45 = vpack.c.bf16 %v3741_v40, %v3740_v39  ;;  %v3804_v21 = vld [vmem:[#allocation11 + $0x340] sm:$0xff] }
 0x404   :  { %7920 = vmatpush1.bf16.msra.mxu1 %v7919_v46  ;;  %v3808_v40 = vld [vmem:[#allocation11 + $0x360] sm:$0xff] }
 0x405   :  { %8074 = vmatprep.subr.bf16.mxu1 %v8073_v47  ;;  %8112 = vmatpush3.bf16.msra.mxu0 %v8111_v49  ;;  %v8093_v47 = vpack.c.bf16 %v3759_v44, %v3758_v42  ;;  %v3760_v49 = vld [vmem:[#allocation11 + $0x1e0] sm:$0xff]  ;;  %v3809_v42 = vld [vmem:[#allocation11 + $0x368] sm:$0xff]  ;;  %v3811_v44 = vld [vmem:[#allocation11 + $0x378] sm:$0xff] }
 0x406   :  { %8114 = vmatprep.subr.bf16.mxu0 %v8113_v52  ;;  %v8097_v54 = vpack.c.bf16 %v3761_v51, %v3760_v49  ;;  %v8156_v7 = vpack.c.bf16 %v3809_v42, %v3808_v40 }
 0x407   :  { %3407 = vmatmul.mubr.f32.vlgmr.msra.gmra.mrb[12].mxu1 %v9604_v34  ;;  %v8085_v34 = vpack.c.bf16 %v3755_v17, %v3754_v16  ;;  %v3803_v17 = vld [vmem:[#allocation11 + $0x338] sm:$0xff] }
 0x408   :  { %8076 = vmatpush3.bf16.msra.mxu1 %v8075_v59  ;;  %3946 = vmatprep.mubr.f32.mxu1 %v3696_v43  ;;  %v3762_v59 = vld [vmem:[#allocation11 + $0x1f0] sm:$0xff]  ;;  %v3747_v43 = vld [vmem:[#allocation11 + $0x178] sm:$0xff] }
 0x409   :  { %8078 = vmatprep.subr.bf16.mxu1 %v8077_v60  ;;  %8116 = vmatpush3.bf16.msra.mxu0 %v8115_v62  ;;  %v3763_v60 = vld [vmem:[#allocation11 + $0x1f8] sm:$0xff]  ;;  %v3746_v62 = vld [vmem:[#allocation11 + $0x170] sm:$0xff] }
 0x40a   :  { %8118 = vmatprep.subr.bf16.mxu0 %v8117_v1  ;;  %v8101_v10 = vpack.c.bf16 %v3763_v60, %v3762_v59  ;;  %v8103_v11 = vpack.c.bf16 %v3747_v43, %v3746_v62  ;;  %v9658_v1 = vadd.f32 %v9634_v56, %v2537_v22  ;;  %v3800_v56 = vld [vmem:[#allocation11 + $0x320] sm:$0xff]  ;;  %v3777_v60 = vld [vmem:[#allocation11 + $0x268] sm:$0xff]  ;;  %v3795_v62 = vld [vmem:[#allocation11 + $0x2f8] sm:$0xff] }
 0x40b   :  { %v8144_v16 = vpack.c.bf16 %v3801_v25, %v3800_v56  ;;  %v3776_v59 = vld [vmem:[#allocation11 + $0x260] sm:$0xff]  ;;  %v4097_v25 = vld [vmem:[#allocation13 + $0x18] sm:$0xff] }
 0x40c   :  { %8080 = vmatpush3.bf16.msra.mxu1 %v8079_v13  ;;  %v3695_v6 = vmul.f32 %v9658_v1, %v9658_v1  ;;  %v3798_v13 = vld [vmem:[#allocation11 + $0x310] sm:$0xff]  ;;  %v4102_v56 = vld [vmem:[#allocation13 + $0x40] sm:$0xff] }
 0x40d   :  { %8082 = vmatprep.subr.bf16.mxu1 %v8081_v20  ;;  %8120 = vmatpush3.bf16.msra.mxu0 %v8119_v18  ;;  %v3799_v20 = vld [vmem:[#allocation11 + $0x318] sm:$0xff]  ;;  %v3802_v18 = vld [vmem:[#allocation11 + $0x330] sm:$0xff] }
 0x40e   :  { %8122 = vmatprep.subr.bf16.mxu0 %v8121_v19  ;;  %v8141_v12 = vpack.c.bf16 %v3799_v20, %v3798_v13  ;;  %v8147_v19 = vpack.c.bf16 %v3803_v17, %v3802_v18  ;;  %v4104_v18 = vld [vmem:[#allocation13 + $0x50] sm:$0xff] }
 0x40f   :  { %v8193_v17 = vpack.c.bf16 %v4104_v18, %v4097_v25  ;;  %v4139_v25 = vld [vmem:[#allocation13 + $0x168] sm:$0xff]  ;;  %v4146_v18 = vld [vmem:[#allocation13 + $0x1a0] sm:$0xff] }
 0x410   :  { %8084 = vmatpush3.bf16.msra.mxu1 %v8083_v29  ;;  %v2553_v29 = vrot.slane %v9632_v55, %v852_v27  ;;  %v3810_v27 = vld [vmem:[#allocation11 + $0x370] sm:$0xff] }
 0x411   :  { %8086 = vmatprep.subr.bf16.mxu1 %v8085_v34  ;;  %8124 = vmatpush3.bf16.msra.mxu0 %v8123_v32  ;;  %v8150_v34 = vpack.c.bf16 %v3805_v26, %v3804_v21  ;;  %v3807_v32 = vld [vmem:[#allocation11 + $0x358] sm:$0xff]  ;;  %v4103_v21 = vld [vmem:[#allocation13 + $0x48] sm:$0xff] }
 0x414   :  { %8088 = vmatpush3.bf16.msra.mxu1 %v8087_v8 }
 0x415   :  { %v6243_v46 = vpop.f32.mrb[6].mxu0  ;;  %8090 = vmatprep.subr.bf16.mxu1 %v8089_v28  ;;  %v8153_v28 = vpack.c.bf16 %v3807_v32, %v3806_v31  ;;  %v4110_v31 = vld [vmem:[#allocation13 + $0x80] sm:$0xff] }
 0x416   :  { %v6244_v23 = vpop.f32.mrb[7].mxu0 }
 0x417   :  { %v6245_v52 = vadd.f32 %v6244_v23, %v6243_v46  ;;  %v3790_v46 = vld [vmem:[#allocation11 + $0x2d0] sm:$0xff]  ;;  %v3775_v23 = vld [vmem:[#allocation11 + $0x258] sm:$0xff] }
 0x418   :  { %8092 = vmatpush3.bf16.msra.mxu1 %v8091_v45  ;;  %v8159_v45 = vpack.c.bf16 %v3811_v44, %v3810_v27  ;;  %v8127_v49 = vpack.c.bf16 %v3775_v23, %v3774_v48  ;;  %v4131_v27 = vld [vmem:[#allocation13 + $0x128] sm:$0xff]  ;;  %v2545_v44 = vrot.slane %v9632_v55, %v9585_v9  ;;  %v4094_v23 = vld [vmem:[#allocation13] sm:$0xff] }
 0x419   :  { %8094 = vmatprep.subr.bf16.mxu1 %v8093_v47  ;;  %v3480_v0 = vadd.f32 %v6245_v52, %v2553_v29  ;;  %v3791_v47 = vld [vmem:[#allocation11 + $0x2d8] sm:$0xff]  ;;  %v3792_v52 = vld [vmem:[#allocation11 + $0x2e0] sm:$0xff]  ;;  %v4111_v29 = vld [vmem:[#allocation13 + $0x88] sm:$0xff] }
 0x41a   :  { %v8125_v24 = vpack.c.bf16 %v3791_v47, %v3790_v46  ;;  %v2549_v46 = vrot.slane %v9632_v55, %v9552_v14 }
 0x41c   :  { %8096 = vmatpush3.bf16.msra.mxu1 %v8095_v53  ;;  %8126 = vmatprep.subr.bf16.mxu0 %v8125_v24  ;;  %v3793_v53 = vld [vmem:[#allocation11 + $0x2e8] sm:$0xff] }
 0x41d   :  { %8098 = vmatprep.subr.bf16.mxu1 %v8097_v54  ;;  %8128 = vmatpush3.bf16.msra.mxu0 %v8127_v49  ;;  %v8129_v57 = vpack.c.bf16 %v3793_v53, %v3792_v52  ;;  %v4101_v49 = vld [vmem:[#allocation13 + $0x38] sm:$0xff]  ;;  %v4116_v53 = vld [vmem:[#allocation13 + $0xb0] sm:$0xff] }
 0x41e   :  { %v4109_v52 = vld [vmem:[#allocation13 + $0x78] sm:$0xff] }
 0x41f   :  { %8130 = vmatprep.subr.bf16.mxu0 %v8129_v57  ;;  %v8163_v57 = vpack.c.bf16 %v4101_v49, %v4094_v23  ;;  %v8165_v55 = vpack.c.bf16 %v4116_v53, %v4109_v52  ;;  %v4174_v23 = vld [vmem:[#allocation13 + $0x280] sm:$0xff]  ;;  %v4164_v49 = vld [vmem:[#allocation13 + $0x230] sm:$0xff]  ;;  %v4171_v52 = vld [vmem:[#allocation13 + $0x268] sm:$0xff] }
 0x420   :  { %8100 = vmatpush3.bf16.msra.mxu1 %v8099_v61  ;;  %v8131_v61 = vpack.c.bf16 %v3777_v60, %v3776_v59  ;;  %v4108_v59 = vld [vmem:[#allocation13 + $0x70] sm:$0xff]  ;;  %v4115_v60 = vld [vmem:[#allocation13 + $0xa8] sm:$0xff] }
 0x421   :  { %8102 = vmatprep.subr.bf16.mxu1 %v8101_v10  ;;  %v3794_v10 = vld [vmem:[#allocation11 + $0x2f0] sm:$0xff] }
 0x422   :  { %8132 = vmatpush3.bf16.msra.mxu0 %v8131_v61  ;;  %v8133_v43 = vpack.c.bf16 %v3795_v62, %v3794_v10  ;;  %v4123_v61 = vld [vmem:[#allocation13 + $0xe8] sm:$0xff]  ;;  %v8167_v10 = vpack.c.bf16 %v4115_v60, %v4108_v59  ;;  %v4186_v60 = vld [vmem:[#allocation13 + $0x2e0] sm:$0xff] }
 0x423   :  { %v4179_v59 = vld [vmem:[#allocation13 + $0x2a8] sm:$0xff] }
 0x424   :  { %8104 = vmatpush3.bf16.msra.mxu1 %v8103_v11  ;;  %v3778_v11 = vld [vmem:[#allocation11 + $0x270] sm:$0xff]  ;;  %8134 = vmatprep.subr.bf16.mxu0 %v8133_v43  ;;  %v4122_v43 = vld [vmem:[#allocation13 + $0xe0] sm:$0xff] }
 0x425   :  { %8137 = vmatprep.subr.bf16.mxu1 %v9297_v63  ;;  %v8135_v4 = vpack.c.bf16 %v3779_v3, %v3778_v11  ;;  %v4129_v11 = vld [vmem:[#allocation13 + $0x118] sm:$0xff] }
 0x426   :  { %v8171_v3 = vpack.c.bf16 %v4129_v11, %v4122_v43  ;;  %v4185_v43 = vld [vmem:[#allocation13 + $0x2d8] sm:$0xff] }
 0x427   :  { %3947 = vmatmul.mubr.f32.vlgmr.msra.gmra.mrb[14].mxu1 %v3695_v6  ;;  %8136 = vmatpush3.bf16.msra.mxu0 %v8135_v4 }
 0x428   :  { %8139 = vmatpush3.bf16.msra.mxu1 %v8138_v5  ;;  %6539 = vmatprep.mubr.msk.f32.mxu1 %vm9298_vm7, %v9296_v35 }
 0x429   :  { %8140 = vmatprep.subr.bf16.mxu1 %v9297_v63 }
 0x42c   :  { %8142 = vmatpush3.bf16.msra.mxu1 %v8141_v12  ;;  %v4095_v12 = vld [vmem:[#allocation13 + $0x8] sm:$0xff] }
 0x42d   :  { %8143 = vmatprep.subr.bf16.mxu1 %v9297_v63 }
 0x430   :  { %8145 = vmatpush3.bf16.msra.mxu1 %v8144_v16  ;;  %v8161_v16 = vpack.c.bf16 %v4102_v56, %v4095_v12  ;;  %v4137_v12 = vld [vmem:[#allocation13 + $0x158] sm:$0xff]  ;;  %v4144_v56 = vld [vmem:[#allocation13 + $0x190] sm:$0xff] }
 0x431   :  { %8146 = vmatprep.subr.bf16.mxu1 %v9297_v63 }
 0x432   :  { %8162 = vmatprep.subr.bf16.mxu0 %v8161_v16  ;;  %v8173_v16 = vpack.c.bf16 %v4144_v56, %v4137_v12  ;;  %v4200_v56 = vld [vmem:[#allocation13 + $0x350] sm:$0xff] }
 0x434   :  { %8148 = vmatpush3.bf16.msra.mxu1 %v8147_v19  ;;  %v4096_v19 = vld [vmem:[#allocation13 + $0x10] sm:$0xff] }
 0x435   :  { %v6278_v30 = vpop.f32.mrb[8].mxu0  ;;  %8149 = vmatprep.subr.bf16.mxu1 %v9297_v63  ;;  %v8195_v26 = vpack.c.bf16 %v4103_v21, %v4096_v19  ;;  %v4143_v19 = vld [vmem:[#allocation13 + $0x188] sm:$0xff]  ;;  %v8205_v21 = vpack.c.bf16 %v4146_v18, %v4139_v25 }
 0x436   :  { %v6279_v33 = vpop.f32.mrb[9].mxu0  ;;  %v4195_v25 = vld [vmem:[#allocation13 + $0x328] sm:$0xff] }
 0x437   :  { %v6280_v8 = vadd.f32 %v6279_v33, %v6278_v30  ;;  %v4117_v33 = vld [vmem:[#allocation13 + $0xb8] sm:$0xff] }
 0x438   :  { %8151 = vmatpush3.bf16.msra.mxu1 %v8150_v34  ;;  %v4118_v34 = vld [vmem:[#allocation13 + $0xc0] sm:$0xff] }
 0x439   :  { %v3550_v39 = vadd.f32 %v6280_v8, %v3480_v0  ;;  %8152 = vmatprep.subr.bf16.mxu1 %v9297_v63  ;;  %v8197_v30 = vpack.c.bf16 %v4118_v34, %v4111_v29  ;;  %v8199_v8 = vpack.c.bf16 %v4117_v33, %v4110_v31  ;;  %v4138_v29 = vld [vmem:[#allocation13 + $0x160] sm:$0xff]  ;;  %v4145_v34 = vld [vmem:[#allocation13 + $0x198] sm:$0xff]  ;;  %v4151_v31 = vld [vmem:[#allocation13 + $0x1c8] sm:$0xff] }
 0x43a   :  { %v4153_v33 = vld [vmem:[#allocation13 + $0x1d8] sm:$0xff] }
 0x43c   :  { %8154 = vmatpush3.bf16.msra.mxu1 %v8153_v28  ;;  %v4125_v28 = vld [vmem:[#allocation13 + $0xf8] sm:$0xff] }
 0x43d   :  { %8155 = vmatprep.subr.bf16.mxu1 %v9297_v63 }
 0x440   :  { %8157 = vmatpush3.bf16.msra.mxu1 %v8156_v7  ;;  %v4124_v7 = vld [vmem:[#allocation13 + $0xf0] sm:$0xff] }
 0x441   :  { %8158 = vmatprep.subr.bf16.mxu1 %v9297_v63 }
 0x444   :  { %8160 = vmatpush3.bf16.msra.mxu1 %v8159_v45  ;;  %v8203_v45 = vpack.c.bf16 %v4131_v27, %v4124_v7  ;;  %v4152_v7 = vld [vmem:[#allocation13 + $0x1d0] sm:$0xff]  ;;  %v4159_v27 = vld [vmem:[#allocation13 + $0x208] sm:$0xff] }
 0x445   :  { %8194 = vmatprep.subr.bf16.mxu1 %v8193_v17  ;;  %v4136_v17 = vld [vmem:[#allocation13 + $0x150] sm:$0xff] }
 0x455   :  { %v6313_v51 = vpop.f32.mrb[10].mxu0 }
 0x456   :  { %v6314_v54 = vpop.f32.mrb[11].mxu0 }
 0x457   :  { %v6315_v58 = vadd.f32 %v6314_v54, %v6313_v51 }
 0x459   :  { %v3620_v22 = vadd.f32 %v6315_v58, %v3550_v39  ;;  %v4132_v39 = vld [vmem:[#allocation13 + $0x130] sm:$0xff] }
 0x45a   :  { %v8201_v42 = vpack.c.bf16 %v4132_v39, %v4125_v28  ;;  %v4150_v28 = vld [vmem:[#allocation13 + $0x1c0] sm:$0xff]  ;;  %v4157_v39 = vld [vmem:[#allocation13 + $0x1f8] sm:$0xff] }
 0x475   :  { %v3689_v5 = vpop.f32.mrb[12].mxu0 }
 0x476   :  { %v9675_v6 = vadd.f32 %v3689_v5, %v3620_v22  ;;  %v6506_v13 = vpop.f32.mrb[13].mxu0  ;;  %v4130_v22 = vld [vmem:[#allocation13 + $0x120] sm:$0xff] }
 0x477   :  { %v8169_v62 = vpack.c.bf16 %v4130_v22, %v4123_v61  ;;  %v4181_v61 = vld [vmem:[#allocation13 + $0x2b8] sm:$0xff]  ;;  %v8185_v22 = vpack.c.bf16 %v4186_v60, %v4179_v59  ;;  %v4127_v60 = vld [vmem:[#allocation13 + $0x108] sm:$0xff] }
 0x478   :  { %v3699_v20 = vmul.f32 %v9675_v6, %v9675_v6 }
 0x47a   :  { %6540 = vmatmul.mubr.f32.vlgmr.msra.gmra.mrb[16].mxu1 %v3699_v20 }
 0x47b   :  { %4341 = vmatprep.mubr.f32.mxu1 %v9296_v35  ;;  %8196 = vmatpush1.bf16.msra.mxu1 %v8195_v26  ;;  %v8175_v26 = vpack.c.bf16 %v4143_v19, %v4136_v17  ;;  %v4192_v19 = vld [vmem:[#allocation13 + $0x310] sm:$0xff] }
 0x47c   :  { %8198 = vmatprep.subr.bf16.mxu1 %v8197_v30  ;;  %v8207_v30 = vpack.c.bf16 %v4145_v34, %v4138_v29  ;;  %v4201_v34 = vld [vmem:[#allocation13 + $0x358] sm:$0xff] }
 0x47f   :  { %8200 = vmatpush1.bf16.msra.mxu1 %v8199_v8  ;;  %v4160_v8 = vld [vmem:[#allocation13 + $0x210] sm:$0xff] }
 0x480   :  { %8202 = vmatprep.subr.bf16.mxu1 %v8201_v42  ;;  %v8179_v42 = vpack.c.bf16 %v4157_v39, %v4150_v28 }
 0x483   :  { %8204 = vmatpush1.bf16.msra.mxu1 %v8203_v45  ;;  %v4165_v45 = vld [vmem:[#allocation13 + $0x238] sm:$0xff] }
 0x484   :  { %8206 = vmatprep.subr.bf16.mxu1 %v8205_v21  ;;  %v4199_v21 = vld [vmem:[#allocation13 + $0x348] sm:$0xff] }
 0x485   :  { %v8191_v29 = vpack.c.bf16 %v4199_v21, %v4192_v19  ;;  %v4155_v19 = vld [vmem:[#allocation13 + $0x1e8] sm:$0xff]  ;;  %v4162_v21 = vld [vmem:[#allocation13 + $0x220] sm:$0xff] }
 0x487   :  { %8208 = vmatpush1.bf16.msra.mxu1 %v8207_v30  ;;  %v4099_v30 = vld [vmem:[#allocation13 + $0x28] sm:$0xff] }
 0x4d3   :  { %v6365_v32 = vpop.f32.mrb[14].mxu0 }
 0x4d4   :  { %v6366_v0 = vpop.f32.mrb[15].mxu0 }
 0x4d5   :  { %v6367_v40 = vadd.f32 %v6366_v0, %v6365_v32  ;;  %v4158_v32 = vld [vmem:[#allocation13 + $0x200] sm:$0xff] }
 0x4d6   :  { %v8177_v0 = vpack.c.bf16 %v4158_v32, %v4151_v31  ;;  %v4106_v31 = vld [vmem:[#allocation13 + $0x60] sm:$0xff] }
 0x4da   :  { %v3408_v47 = vpop.f32.mrb[12].mxu1 }
 0x4db   :  { %v9684_v24 = vadd.f32 %v3408_v47, %v2545_v44  ;;  %v3410_v48 = vpop.f32.mrb[13].mxu1  ;;  %v8211_v44 = vpack.c.bf16 %v4159_v27, %v4152_v7  ;;  %v4167_v47 = vld [vmem:[#allocation13 + $0x248] sm:$0xff] }
 0x4dc   :  { %v9686_v51 = vadd.f32 %v3410_v48, %v2549_v46  ;;  %v4172_v46 = vld [vmem:[#allocation13 + $0x270] sm:$0xff]  ;;  %v8213_v53 = vpack.c.bf16 %v4174_v23, %v4167_v47  ;;  %v4107_v47 = vld [vmem:[#allocation13 + $0x68] sm:$0xff] }
 0x4dd   :  { %v3697_v58 = vmul.f32 %v9684_v24, %v9684_v24  ;;  %v8181_v48 = vpack.c.bf16 %v4172_v46, %v4165_v45  ;;  %v4105_v45 = vld [vmem:[#allocation13 + $0x58] sm:$0xff]  ;;  %v4100_v46 = vld [vmem:[#allocation13 + $0x30] sm:$0xff] }
 0x4de   :  { %v3698_v54 = vmul.f32 %v9686_v51, %v9686_v51  ;;  %v4120_v23 = vld [vmem:[#allocation13 + $0xd0] sm:$0xff] }
 0x4e0   :  { %4016 = vmatprep.mubr.f32.mxu0 %v3698_v54  ;;  %v8183_v54 = vpack.c.bf16 %v4171_v52, %v4164_v49  ;;  %v8258_v52 = vpack.c.bf16 %v4107_v47, %v4100_v46  ;;  %v4190_v46 = vld [vmem:[#allocation13 + $0x300] sm:$0xff] }
 0x4e1   :  { %4017 = vmatmul.mubr.f32.vlgmr.msra.gmra.mrb[16].mxu0 %v3697_v58  ;;  %v4173_v58 = vld [vmem:[#allocation13 + $0x278] sm:$0xff] }
 0x4e2   :  { %8164 = vmatpush1.bf16.msra.mxu0 %v8163_v57  ;;  %4270 = vmatprep.mubr.f32.mxu0 %v9296_v35  ;;  %v4166_v57 = vld [vmem:[#allocation13 + $0x240] sm:$0xff] }
 0x4e3   :  { %8166 = vmatprep.subr.bf16.mxu0 %v8165_v55  ;;  %v8215_v55 = vpack.c.bf16 %v4173_v58, %v4166_v57  ;;  %v4119_v57 = vld [vmem:[#allocation13 + $0xc8] sm:$0xff]  ;;  %v4114_v58 = vld [vmem:[#allocation13 + $0xa0] sm:$0xff] }
 0x4e6   :  { %8168 = vmatpush1.bf16.msra.mxu0 %v8167_v10  ;;  %v4188_v10 = vld [vmem:[#allocation13 + $0x2f0] sm:$0xff] }
 0x4e7   :  { %8170 = vmatprep.subr.bf16.mxu0 %v8169_v62  ;;  %v4178_v62 = vld [vmem:[#allocation13 + $0x2a0] sm:$0xff]  ;;  %v8217_v11 = vpack.c.bf16 %v4188_v10, %v4181_v61 }
 0x4e8   :  { %v4126_v10 = vld [vmem:[#allocation13 + $0x100] sm:$0xff] }
 0x4ea   :  { %8172 = vmatpush1.bf16.msra.mxu0 %v8171_v3  ;;  %v8187_v3 = vpack.c.bf16 %v4185_v43, %v4178_v62  ;;  %v4133_v43 = vld [vmem:[#allocation13 + $0x138] sm:$0xff] }
 0x4eb   :  { %8174 = vmatprep.subr.bf16.mxu0 %v8173_v16  ;;  %v4202_v16 = vld [vmem:[#allocation13 + $0x360] sm:$0xff] }
 0x4ec   :  { %v8221_v17 = vpack.c.bf16 %v4202_v16, %v4195_v25  ;;  %v4147_v16 = vld [vmem:[#allocation13 + $0x1a8] sm:$0xff] }
 0x4ee   :  { %8176 = vmatpush1.bf16.msra.mxu0 %v8175_v26  ;;  %v4194_v26 = vld [vmem:[#allocation13 + $0x320] sm:$0xff] }
 0x4ef   :  { %8178 = vmatprep.subr.bf16.mxu0 %v8177_v0  ;;  %v8223_v32 = vpack.c.bf16 %v4201_v34, %v4194_v26  ;;  %v4154_v34 = vld [vmem:[#allocation13 + $0x1e0] sm:$0xff] }
 0x4f2   :  { %8180 = vmatpush1.bf16.msra.mxu0 %v8179_v42 }
 0x4f3   :  { %8182 = vmatprep.subr.bf16.mxu0 %v8181_v48  ;;  %v4113_v48 = vld [vmem:[#allocation13 + $0x98] sm:$0xff] }
 0x4f6   :  { %8184 = vmatpush1.bf16.msra.mxu0 %v8183_v54  ;;  %v8229_v54 = vpack.c.bf16 %v4120_v23, %v4113_v48  ;;  %v4182_v23 = vld [vmem:[#allocation13 + $0x2c0] sm:$0xff] }
 0x4f7   :  { %8186 = vmatprep.subr.bf16.mxu0 %v8185_v22 }
 0x4fa   :  { %v6400_v4 = vpop.f32.mrb[14].mxu1  ;;  %8188 = vmatpush1.bf16.msra.mxu0 %v8187_v3  ;;  %v4135_v3 = vld [vmem:[#allocation13 + $0x148] sm:$0xff] }
 0x4fb   :  { %v6401_v5 = vpop.f32.mrb[15].mxu1 }
 0x4fc   :  { %v6402_v13 = vadd.f32 %v6401_v5, %v6400_v4  ;;  %v4180_v4 = vld [vmem:[#allocation13 + $0x2b0] sm:$0xff]  ;;  %v4187_v5 = vld [vmem:[#allocation13 + $0x2e8] sm:$0xff] }
 0x4fd   :  { %v8219_v12 = vpack.c.bf16 %v4187_v5, %v4180_v4  ;;  %v4141_v4 = vld [vmem:[#allocation13 + $0x178] sm:$0xff]  ;;  %v4148_v5 = vld [vmem:[#allocation13 + $0x1b0] sm:$0xff] }
 0x4fe   :  { %v9693_v20 = vadd.f32 %v6402_v13, %v6367_v40  ;;  %v8209_v40 = vpack.c.bf16 %v4160_v8, %v4153_v33  ;;  %v4193_v13 = vld [vmem:[#allocation13 + $0x318] sm:$0xff]  ;;  %v8225_v33 = vpack.c.bf16 %v4106_v31, %v4099_v30  ;;  %v8237_v25 = vpack.c.bf16 %v4148_v5, %v4141_v4  ;;  %v4521_v4 = vld [vmem:[#allocation14 + $0x48] sm:$0xff] }
 0x4ff   :  { %v8189_v18 = vpack.c.bf16 %v4200_v56, %v4193_v13  ;;  %v8235_v13 = vpack.c.bf16 %v4133_v43, %v4126_v10  ;;  %v4140_v56 = vld [vmem:[#allocation13 + $0x170] sm:$0xff]  ;;  %v8241_v30 = vpack.c.bf16 %v4162_v21, %v4155_v19  ;;  %v4161_v31 = vld [vmem:[#allocation13 + $0x218] sm:$0xff]  ;;  %v4198_v10 = vld [vmem:[#allocation13 + $0x340] sm:$0xff] }
 0x500   :  { %8210 = vmatprep.subr.bf16.mxu1 %v8209_v40  ;;  %v8239_v26 = vpack.c.bf16 %v4147_v16, %v4140_v56  ;;  %v4513_v43 = vld [vmem:[#allocation14 + $0x8] sm:$0xff]  ;;  %v4518_v56 = vld [vmem:[#allocation14 + $0x30] sm:$0xff]  ;;  %v4531_v21 = vld [vmem:[#allocation14 + $0x98] sm:$0xff] }
 0x501   :  { %8212 = vmatpush1.bf16.msra.mxu1 %v8211_v44  ;;  %8190 = vmatprep.subr.bf16.mxu0 %v8189_v18  ;;  %v4098_v44 = vld [vmem:[#allocation13 + $0x20] sm:$0xff]  ;;  %v4525_v19 = vld [vmem:[#allocation14 + $0x68] sm:$0xff] }
 0x502   :  { %8214 = vmatprep.subr.bf16.mxu1 %v8213_v53  ;;  %8192 = vmatpush1.bf16.msra.mxu0 %v8191_v29  ;;  %v8227_v49 = vpack.c.bf16 %v4105_v45, %v4098_v44  ;;  %v4112_v53 = vld [vmem:[#allocation13 + $0x90] sm:$0xff]  ;;  %v4142_v18 = vld [vmem:[#allocation13 + $0x180] sm:$0xff]  ;;  %v4177_v44 = vld [vmem:[#allocation13 + $0x298] sm:$0xff] }
 0x503   :  { %8226 = vmatprep.subr.bf16.mxu0 %v8225_v33  ;;  %v8231_v61 = vpack.c.bf16 %v4119_v57, %v4112_v53  ;;  %v4163_v33 = vld [vmem:[#allocation13 + $0x228] sm:$0xff]  ;;  %v4184_v53 = vld [vmem:[#allocation13 + $0x2d0] sm:$0xff]  ;;  %v4197_v57 = vld [vmem:[#allocation13 + $0x338] sm:$0xff] }
 0x504   :  { %v4183_v45 = vld [vmem:[#allocation13 + $0x2c8] sm:$0xff] }
 0x505   :  { %8216 = vmatpush1.bf16.msra.mxu1 %v8215_v55  ;;  %v4121_v55 = vld [vmem:[#allocation13 + $0xd8] sm:$0xff] }
 0x506   :  { %8218 = vmatprep.subr.bf16.mxu1 %v8217_v11  ;;  %v8261_v22 = vpack.c.bf16 %v4121_v55, %v4114_v58  ;;  %v4128_v11 = vld [vmem:[#allocation13 + $0x110] sm:$0xff] }
 0x507   :  { %v4204_v58 = vld [vmem:[#allocation13 + $0x370] sm:$0xff] }
 0x509   :  { %8220 = vmatpush1.bf16.msra.mxu1 %v8219_v12  ;;  %v8264_v12 = vpack.c.bf16 %v4135_v3, %v4128_v11  ;;  %v4519_v11 = vld [vmem:[#allocation14 + $0x38] sm:$0xff] }
 0x50a   :  { %8222 = vmatprep.subr.bf16.mxu1 %v8221_v17  ;;  %v4149_v17 = vld [vmem:[#allocation13 + $0x1b8] sm:$0xff] }
 0x50b   :  { %v8267_v29 = vpack.c.bf16 %v4149_v17, %v4142_v18  ;;  %v4515_v3 = vld [vmem:[#allocation14 + $0x18] sm:$0xff]  ;;  %v4514_v18 = vld [vmem:[#allocation14 + $0x10] sm:$0xff]  ;;  %v4520_v17 = vld [vmem:[#allocation14 + $0x40] sm:$0xff] }
 0x50c   :  { %v8505_v16 = vpack.c.bf16 %v4521_v4, %v4515_v3 }
 0x50d   :  { %8224 = vmatpush1.bf16.msra.mxu1 %v8223_v32  ;;  %v4156_v32 = vld [vmem:[#allocation13 + $0x1f0] sm:$0xff] }
 0x50e   :  { %8257 = vmatprep.subr.bf16.mxu1 %v9297_v63 }
 0x54d   :  { %v4088_v0 = vpop.f32.mrb[16].mxu1 }
 0x54e   :  { %v6541_v8 = vpop.f32.mrb[17].mxu1 }
 0x54f   :  { %v4176_v8 = vld [vmem:[#allocation13 + $0x290] sm:$0xff] }
 0x5b4   :  { %v6435_v28 = vpop.f32.mrb[16].mxu0 }
 0x5b5   :  { %v6436_v39 = vpop.f32.mrb[17].mxu0 }
 0x5b6   :  { %v6437_v40 = vadd.f32 %v6436_v39, %v6435_v28  ;;  %v8243_v28 = vpack.c.bf16 %v4161_v31, %v4154_v34  ;;  %v8270_v39 = vpack.c.bf16 %v4163_v33, %v4156_v32  ;;  %v4524_v31 = vld [vmem:[#allocation14 + $0x60] sm:$0xff]  ;;  %v4530_v32 = vld [vmem:[#allocation14 + $0x90] sm:$0xff]  ;;  %v8285_v33 = vpack.c.bf16 %v4531_v21, %v4525_v19  ;;  %v4575_v19 = vld [vmem:[#allocation14 + $0x1f8] sm:$0xff] }
 0x5b7   :  { %v4581_v21 = vld [vmem:[#allocation14 + $0x228] sm:$0xff] }
 0x5b8   :  { %v4019_v42 = vadd.f32 %v6437_v40, %v9693_v20  ;;  %v4134_v20 = vld [vmem:[#allocation13 + $0x140] sm:$0xff]  ;;  %v4168_v40 = vld [vmem:[#allocation13 + $0x250] sm:$0xff] }
 0x5b9   :  { %v8233_v62 = vpack.c.bf16 %v4134_v20, %v4127_v60  ;;  %v4196_v20 = vld [vmem:[#allocation13 + $0x330] sm:$0xff] }
 0x5ba   :  { %v4089_v7 = vadd.f32 %v4088_v0, %v4019_v42  ;;  %v4169_v0 = vld [vmem:[#allocation13 + $0x258] sm:$0xff] }
 0x5bb   :  { %v8245_v42 = vpack.c.bf16 %v4176_v8, %v4169_v0  ;;  %v4526_v8 = vld [vmem:[#allocation14 + $0x70] sm:$0xff] }
 0x5bc   :  { %v4092_v27 = vmax.f32 %v4089_v7, 1e-24  ;;  %v4175_v7 = vld [vmem:[#allocation13 + $0x288] sm:$0xff] }
 0x5bd   :  { %v8247_v47 = vpack.c.bf16 %v4175_v7, %v4168_v40  ;;  %v4539_v40 = vld [vmem:[#allocation14 + $0xd8] sm:$0xff]  ;;  %v8287_v7 = vpack.c.bf16 %v4530_v32, %v4524_v31  ;;  %v8525_v32 = vpack.c.bf16 %v4581_v21, %v4575_v19 }
 0x5be   :  { %9041 = vrsqrt.f32 %v4092_v27  ;;  %v4170_v27 = vld [vmem:[#allocation13 + $0x260] sm:$0xff] }
 0x5bf   :  { %v8273_v48 = vpack.c.bf16 %v4177_v44, %v4170_v27  ;;  %v4536_v44 = vld [vmem:[#allocation14 + $0xc0] sm:$0xff] }
 0x5c8   :  { %v9697_v59 = vpop.eup %9041 }
 0x5c9   :  { %4271 = vmatmul.mubr.f32.vlgmr.msra.gmra.mrb[18].mxu0 %v9697_v59  ;;  %4342 = vmatmul.mubr.f32.vlgmr.msra.gmra.mrb[18].mxu1 %v9697_v59 }
 0x5ca   :  { %8228 = vmatpush1.bf16.msra.mxu0 %v8227_v49  ;;  %8259 = vmatpush3.bf16.msra.mxu1 %v8258_v52  ;;  %v8249_v49 = vpack.c.bf16 %v4190_v46, %v4183_v45  ;;  %v4189_v52 = vld [vmem:[#allocation13 + $0x2f8] sm:$0xff]  ;;  %v4542_v45 = vld [vmem:[#allocation14 + $0xf0] sm:$0xff] }
 0x5cb   :  { %8230 = vmatprep.subr.bf16.mxu0 %v8229_v54  ;;  %8260 = vmatprep.subr.bf16.mxu1 %v9297_v63  ;;  %v4191_v54 = vld [vmem:[#allocation13 + $0x308] sm:$0xff]  ;;  %v8251_v55 = vpack.c.bf16 %v4189_v52, %v4182_v23  ;;  %v4544_v23 = vld [vmem:[#allocation14 + $0x100] sm:$0xff]  ;;  %v4555_v52 = vld [vmem:[#allocation14 + $0x158] sm:$0xff] }
 0x5cc   :  { %4412 = vmatprep.mubr.f32.mxu0 %v9296_v35  ;;  %6574 = vmatprep.mubr.msk.f32.mxu1 %vm9298_vm7, %v9296_v35  ;;  %v8276_v60 = vpack.c.bf16 %v4191_v54, %v4184_v53  ;;  %v4551_v53 = vld [vmem:[#allocation14 + $0x138] sm:$0xff]  ;;  %v4557_v54 = vld [vmem:[#allocation14 + $0x168] sm:$0xff] }
 0x5ce   :  { %8232 = vmatpush1.bf16.msra.mxu0 %v8231_v61  ;;  %8262 = vmatpush3.bf16.msra.mxu1 %v8261_v22  ;;  %v4203_v61 = vld [vmem:[#allocation13 + $0x368] sm:$0xff]  ;;  %v8253_v22 = vpack.c.bf16 %v4204_v58, %v4197_v57  ;;  %v8291_v57 = vpack.c.bf16 %v4542_v45, %v4536_v44  ;;  %v4548_v58 = vld [vmem:[#allocation14 + $0x120] sm:$0xff] }
 0x5cf   :  { %8234 = vmatprep.subr.bf16.mxu0 %v8233_v62  ;;  %8263 = vmatprep.subr.bf16.mxu1 %v9297_v63  ;;  %v4205_v62 = vld [vmem:[#allocation13 + $0x378] sm:$0xff]  ;;  %v8255_v5 = vpack.c.bf16 %v4203_v61, %v4196_v20  ;;  %v8517_v20 = vpack.c.bf16 %v4557_v54, %v4551_v53  ;;  %v4550_v61 = vld [vmem:[#allocation14 + $0x130] sm:$0xff] }
 0x5d2   :  { %8236 = vmatpush1.bf16.msra.mxu0 %v8235_v13  ;;  %8265 = vmatpush3.bf16.msra.mxu1 %v8264_v12  ;;  %v8279_v13 = vpack.c.bf16 %v4205_v62, %v4198_v10  ;;  %v4512_v12 = vld [vmem:[#allocation14] sm:$0xff]  ;;  %v4561_v10 = vld [vmem:[#allocation14 + $0x188] sm:$0xff]  ;;  %v4567_v62 = vld [vmem:[#allocation14 + $0x1b8] sm:$0xff] }
 0x5d3   :  { %8238 = vmatprep.subr.bf16.mxu0 %v8237_v25  ;;  %8266 = vmatprep.subr.bf16.mxu1 %v9297_v63  ;;  %v8281_v25 = vpack.c.bf16 %v4519_v11, %v4513_v43  ;;  %v8283_v34 = vpack.c.bf16 %v4518_v56, %v4512_v12  ;;  %v4563_v43 = vld [vmem:[#allocation14 + $0x198] sm:$0xff]  ;;  %v4569_v11 = vld [vmem:[#allocation14 + $0x1c8] sm:$0xff]  ;;  %v8297_v12 = vpack.c.bf16 %v4567_v62, %v4561_v10 }
 0x5d4   :  { %v8521_v56 = vpack.c.bf16 %v4569_v11, %v4563_v43  ;;  %v4611_v10 = vld [vmem:[#allocation14 + $0x318] sm:$0xff]  ;;  %v4617_v62 = vld [vmem:[#allocation14 + $0x348] sm:$0xff] }
 0x5d6   :  { %8240 = vmatpush1.bf16.msra.mxu0 %v8239_v26  ;;  %8268 = vmatpush3.bf16.msra.mxu1 %v8267_v29  ;;  %v4527_v26 = vld [vmem:[#allocation14 + $0x78] sm:$0xff]  ;;  %v4533_v29 = vld [vmem:[#allocation14 + $0xa8] sm:$0xff] }
 0x5d7   :  { %8242 = vmatprep.subr.bf16.mxu0 %v8241_v30  ;;  %8269 = vmatprep.subr.bf16.mxu1 %v9297_v63  ;;  %v8507_v30 = vpack.c.bf16 %v4520_v17, %v4514_v18  ;;  %v8509_v0 = vpack.c.bf16 %v4533_v29, %v4527_v26  ;;  %v4573_v18 = vld [vmem:[#allocation14 + $0x1e8] sm:$0xff]  ;;  %v4579_v17 = vld [vmem:[#allocation14 + $0x218] sm:$0xff] }
 0x5d8   :  { %v8301_v31 = vpack.c.bf16 %v4579_v17, %v4573_v18  ;;  %v4623_v18 = vld [vmem:[#allocation14 + $0x378] sm:$0xff]  ;;  %v4629_v17 = vld [vmem:[#allocation14 + $0x3a8] sm:$0xff] }
 0x5da   :  { %8244 = vmatpush1.bf16.msra.mxu0 %v8243_v28  ;;  %8271 = vmatpush3.bf16.msra.mxu1 %v8270_v39  ;;  %v4537_v28 = vld [vmem:[#allocation14 + $0xc8] sm:$0xff]  ;;  %v4543_v39 = vld [vmem:[#allocation14 + $0xf8] sm:$0xff] }
 0x5db   :  { %8246 = vmatprep.subr.bf16.mxu0 %v8245_v42  ;;  %8272 = vmatprep.subr.bf16.mxu1 %v9297_v63  ;;  %v4545_v42 = vld [vmem:[#allocation14 + $0x108] sm:$0xff]  ;;  %v8289_v46 = vpack.c.bf16 %v4543_v39, %v4537_v28  ;;  %v4587_v28 = vld [vmem:[#allocation14 + $0x258] sm:$0xff] }
 0x5dc   :  { %v4593_v39 = vld [vmem:[#allocation14 + $0x288] sm:$0xff] }
 0x5dd   :  { %v8529_v45 = vpack.c.bf16 %v4593_v39, %v4587_v28 }
 0x5de   :  { %8248 = vmatpush1.bf16.msra.mxu0 %v8247_v47  ;;  %8274 = vmatpush3.bf16.msra.mxu1 %v8273_v48  ;;  %v8513_v47 = vpack.c.bf16 %v4545_v42, %v4539_v40  ;;  %v4538_v48 = vld [vmem:[#allocation14 + $0xd0] sm:$0xff] }
 0x5df   :  { %8250 = vmatprep.subr.bf16.mxu0 %v8249_v49  ;;  %8275 = vmatprep.subr.bf16.mxu1 %v9297_v63  ;;  %v4549_v49 = vld [vmem:[#allocation14 + $0x128] sm:$0xff] }
 0x5e2   :  { %8252 = vmatpush1.bf16.msra.mxu0 %v8251_v55  ;;  %8277 = vmatpush3.bf16.msra.mxu1 %v8276_v60  ;;  %v4554_v55 = vld [vmem:[#allocation14 + $0x150] sm:$0xff]  ;;  %v8293_v60 = vpack.c.bf16 %v4555_v52, %v4549_v49  ;;  %v4599_v49 = vld [vmem:[#allocation14 + $0x2b8] sm:$0xff]  ;;  %v4605_v52 = vld [vmem:[#allocation14 + $0x2e8] sm:$0xff] }
 0x5e3   :  { %8254 = vmatprep.subr.bf16.mxu0 %v8253_v22  ;;  %8278 = vmatprep.subr.bf16.mxu1 %v9297_v63  ;;  %v4532_v63 = vld [vmem:[#allocation14 + $0xa0] sm:$0xff]  ;;  %v8295_v3 = vpack.c.bf16 %v4554_v55, %v4548_v58  ;;  %v8533_v55 = vpack.c.bf16 %v4605_v52, %v4599_v49 }
 0x5e4   :  { %v8511_v27 = vpack.c.bf16 %v4532_v63, %v4526_v8  ;;  %v4556_v22 = vld [vmem:[#allocation14 + $0x160] sm:$0xff]  ;;  %v4585_v8 = vld [vmem:[#allocation14 + $0x248] sm:$0xff]  ;;  %v4591_v63 = vld [vmem:[#allocation14 + $0x278] sm:$0xff] }
 0x5e5   :  { %v8519_v4 = vpack.c.bf16 %v4556_v22, %v4550_v61  ;;  %v8305_v44 = vpack.c.bf16 %v4591_v63, %v4585_v8  ;;  %v4609_v61 = vld [vmem:[#allocation14 + $0x308] sm:$0xff]  ;;  %v4615_v22 = vld [vmem:[#allocation14 + $0x338] sm:$0xff] }
 0x5e6   :  { %8256 = vmatpush1.bf16.msra.mxu0 %v8255_v5  ;;  %8280 = vmatpush3.bf16.msra.mxu1 %v8279_v13  ;;  %v4560_v5 = vld [vmem:[#allocation14 + $0x180] sm:$0xff]  ;;  %v4566_v13 = vld [vmem:[#allocation14 + $0x1b0] sm:$0xff]  ;;  %v4635_v8 = vld [vmem:[#allocation14 + $0x3d8] sm:$0xff] }
 0x5e7   :  { %8282 = vmatprep.subr.bf16.mxu0 %v8281_v25  ;;  %8506 = vmatprep.subr.bf16.mxu1 %v8505_v16  ;;  %v4562_v25 = vld [vmem:[#allocation14 + $0x190] sm:$0xff]  ;;  %v4568_v16 = vld [vmem:[#allocation14 + $0x1c0] sm:$0xff]  ;;  %v8299_v26 = vpack.c.bf16 %v4566_v13, %v4560_v5  ;;  %v8313_v5 = vpack.c.bf16 %v4615_v22, %v4609_v61  ;;  %v8537_v13 = vpack.c.bf16 %v4617_v62, %v4611_v10  ;;  %v4641_v63 = vld [vmem:[#allocation14 + $0x408] sm:$0xff] }
 0x5e8   :  { %v8523_v29 = vpack.c.bf16 %v4568_v16, %v4562_v25  ;;  %v4621_v25 = vld [vmem:[#allocation14 + $0x368] sm:$0xff]  ;;  %v4627_v16 = vld [vmem:[#allocation14 + $0x398] sm:$0xff] }
 0x5e9   :  { %4413 = vmatmul.mubr.f32.vlgmr.msra.gmra.mrb[20].mxu0 %v9697_v59  ;;  %6575 = vmatmul.mubr.f32.vlgmr.msra.gmra.mrb[20].mxu1 %v9697_v59  ;;  %v8515_v59 = vpack.c.bf16 %v4544_v23, %v4538_v48  ;;  %v4597_v48 = vld [vmem:[#allocation14 + $0x2a8] sm:$0xff]  ;;  %v4603_v23 = vld [vmem:[#allocation14 + $0x2d8] sm:$0xff] }
 0x5ea   :  { %8284 = vmatpush1.bf16.msra.mxu0 %v8283_v34  ;;  %8508 = vmatpush1.bf16.msra.mxu1 %v8507_v30  ;;  %v4572_v34 = vld [vmem:[#allocation14 + $0x1e0] sm:$0xff]  ;;  %v4578_v30 = vld [vmem:[#allocation14 + $0x210] sm:$0xff]  ;;  %v8309_v58 = vpack.c.bf16 %v4603_v23, %v4597_v48  ;;  %v4647_v48 = vld [vmem:[#allocation14 + $0x438] sm:$0xff] }
 0x5eb   :  { %8286 = vmatprep.subr.bf16.mxu0 %v8285_v33  ;;  %8510 = vmatprep.subr.bf16.mxu1 %v8509_v0  ;;  %v4574_v33 = vld [vmem:[#allocation14 + $0x1f0] sm:$0xff]  ;;  %v4580_v0 = vld [vmem:[#allocation14 + $0x220] sm:$0xff]  ;;  %v8303_v40 = vpack.c.bf16 %v4578_v30, %v4572_v34  ;;  %v8317_v34 = vpack.c.bf16 %v4627_v16, %v4621_v25  ;;  %v8541_v30 = vpack.c.bf16 %v4629_v17, %v4623_v18  ;;  %v4653_v23 = vld [vmem:[#allocation14 + $0x468] sm:$0xff] }
 0x5ec   :  { %v8527_v42 = vpack.c.bf16 %v4580_v0, %v4574_v33  ;;  %v4633_v33 = vld [vmem:[#allocation14 + $0x3c8] sm:$0xff]  ;;  %v4639_v0 = vld [vmem:[#allocation14 + $0x3f8] sm:$0xff] }
 0x5ed   :  { %v4659_v61 = vld [vmem:[#allocation14 + $0x498] sm:$0xff]  ;;  %v4665_v22 = vld [vmem:[#allocation14 + $0x4c8] sm:$0xff] }
 0x5ee   :  { %8288 = vmatpush1.bf16.msra.mxu0 %v8287_v7  ;;  %8512 = vmatpush1.bf16.msra.mxu1 %v8511_v27  ;;  %v4584_v7 = vld [vmem:[#allocation14 + $0x240] sm:$0xff]  ;;  %v4590_v27 = vld [vmem:[#allocation14 + $0x270] sm:$0xff]  ;;  %v4671_v25 = vld [vmem:[#allocation14 + $0x4f8] sm:$0xff] }
 0x5ef   :  { %8290 = vmatprep.subr.bf16.mxu0 %v8289_v46  ;;  %8514 = vmatprep.subr.bf16.mxu1 %v8513_v47  ;;  %v4586_v46 = vld [vmem:[#allocation14 + $0x250] sm:$0xff]  ;;  %v4592_v47 = vld [vmem:[#allocation14 + $0x280] sm:$0xff]  ;;  %v8307_v53 = vpack.c.bf16 %v4590_v27, %v4584_v7  ;;  %v8321_v7 = vpack.c.bf16 %v4639_v0, %v4633_v33  ;;  %v8545_v27 = vpack.c.bf16 %v4641_v63, %v4635_v8  ;;  %v4677_v16 = vld [vmem:[#allocation14 + $0x528] sm:$0xff] }
 0x5f0   :  { %v8531_v54 = vpack.c.bf16 %v4592_v47, %v4586_v46  ;;  %v4645_v46 = vld [vmem:[#allocation14 + $0x428] sm:$0xff]  ;;  %v4651_v47 = vld [vmem:[#allocation14 + $0x458] sm:$0xff] }
 0x5f1   :  { %v4683_v33 = vld [vmem:[#allocation14 + $0x558] sm:$0xff]  ;;  %v4689_v0 = vld [vmem:[#allocation14 + $0x588] sm:$0xff] }
 0x5f2   :  { %8292 = vmatpush1.bf16.msra.mxu0 %v8291_v57  ;;  %8516 = vmatpush1.bf16.msra.mxu1 %v8515_v59  ;;  %v4596_v57 = vld [vmem:[#allocation14 + $0x2a0] sm:$0xff]  ;;  %v4602_v59 = vld [vmem:[#allocation14 + $0x2d0] sm:$0xff] }
 0x5f3   :  { %8294 = vmatprep.subr.bf16.mxu0 %v8293_v60  ;;  %8518 = vmatprep.subr.bf16.mxu1 %v8517_v20  ;;  %v4598_v60 = vld [vmem:[#allocation14 + $0x2b0] sm:$0xff]  ;;  %v4604_v20 = vld [vmem:[#allocation14 + $0x2e0] sm:$0xff]  ;;  %v8311_v43 = vpack.c.bf16 %v4602_v59, %v4596_v57  ;;  %v8325_v57 = vpack.c.bf16 %v4651_v47, %v4645_v46  ;;  %v8549_v59 = vpack.c.bf16 %v4653_v23, %v4647_v48  ;;  %v4695_v46 = vld [vmem:[#allocation14 + $0x5b8] sm:$0xff] }
 0x5f4   :  { %v8535_v11 = vpack.c.bf16 %v4604_v20, %v4598_v60  ;;  %v4657_v60 = vld [vmem:[#allocation14 + $0x488] sm:$0xff]  ;;  %v4663_v20 = vld [vmem:[#allocation14 + $0x4b8] sm:$0xff] }
 0x5f5   :  { %v4701_v47 = vld [vmem:[#allocation14 + $0x5e8] sm:$0xff] }
 0x5f6   :  { %8296 = vmatpush1.bf16.msra.mxu0 %v8295_v3  ;;  %8520 = vmatpush1.bf16.msra.mxu1 %v8519_v4  ;;  %v4608_v3 = vld [vmem:[#allocation14 + $0x300] sm:$0xff]  ;;  %v4614_v4 = vld [vmem:[#allocation14 + $0x330] sm:$0xff] }
 0x5f7   :  { %8298 = vmatprep.subr.bf16.mxu0 %v8297_v12  ;;  %8522 = vmatprep.subr.bf16.mxu1 %v8521_v56  ;;  %v4610_v12 = vld [vmem:[#allocation14 + $0x310] sm:$0xff]  ;;  %v4616_v56 = vld [vmem:[#allocation14 + $0x340] sm:$0xff]  ;;  %v8315_v19 = vpack.c.bf16 %v4614_v4, %v4608_v3  ;;  %v8329_v3 = vpack.c.bf16 %v4663_v20, %v4657_v60  ;;  %v8553_v4 = vpack.c.bf16 %v4665_v22, %v4659_v61  ;;  %v4707_v60 = vld [vmem:[#allocation14 + $0x618] sm:$0xff] }
 0x5f8   :  { %v8539_v21 = vpack.c.bf16 %v4616_v56, %v4610_v12  ;;  %v4669_v12 = vld [vmem:[#allocation14 + $0x4e8] sm:$0xff]  ;;  %v4675_v56 = vld [vmem:[#allocation14 + $0x518] sm:$0xff] }
 0x5f9   :  { %v4713_v20 = vld [vmem:[#allocation14 + $0x648] sm:$0xff] }
 0x5fa   :  { %8300 = vmatpush1.bf16.msra.mxu0 %v8299_v26  ;;  %8524 = vmatpush1.bf16.msra.mxu1 %v8523_v29  ;;  %v4620_v26 = vld [vmem:[#allocation14 + $0x360] sm:$0xff]  ;;  %v4626_v29 = vld [vmem:[#allocation14 + $0x390] sm:$0xff] }
 0x5fb   :  { %8302 = vmatprep.subr.bf16.mxu0 %v8301_v31  ;;  %8526 = vmatprep.subr.bf16.mxu1 %v8525_v32  ;;  %v4622_v31 = vld [vmem:[#allocation14 + $0x370] sm:$0xff]  ;;  %v4628_v32 = vld [vmem:[#allocation14 + $0x3a0] sm:$0xff]  ;;  %v8319_v28 = vpack.c.bf16 %v4626_v29, %v4620_v26  ;;  %v8333_v26 = vpack.c.bf16 %v4675_v56, %v4669_v12  ;;  %v8557_v29 = vpack.c.bf16 %v4677_v16, %v4671_v25  ;;  %v4717_v12 = vld [vmem:[#allocation14 + $0x668] sm:$0xff] }
 0x5fc   :  { %v8543_v39 = vpack.c.bf16 %v4628_v32, %v4622_v31  ;;  %v4681_v31 = vld [vmem:[#allocation14 + $0x548] sm:$0xff]  ;;  %v4687_v32 = vld [vmem:[#allocation14 + $0x578] sm:$0xff] }
 0x5fd   :  { %v4723_v56 = vld [vmem:[#allocation14 + $0x698] sm:$0xff] }
 0x5fe   :  { %8304 = vmatpush1.bf16.msra.mxu0 %v8303_v40  ;;  %8528 = vmatpush1.bf16.msra.mxu1 %v8527_v42  ;;  %v4632_v40 = vld [vmem:[#allocation14 + $0x3c0] sm:$0xff]  ;;  %v4638_v42 = vld [vmem:[#allocation14 + $0x3f0] sm:$0xff] }
 0x5ff   :  { %8306 = vmatprep.subr.bf16.mxu0 %v8305_v44  ;;  %8530 = vmatprep.subr.bf16.mxu1 %v8529_v45  ;;  %v4634_v44 = vld [vmem:[#allocation14 + $0x3d0] sm:$0xff]  ;;  %v4640_v45 = vld [vmem:[#allocation14 + $0x400] sm:$0xff]  ;;  %v8323_v49 = vpack.c.bf16 %v4638_v42, %v4632_v40  ;;  %v8337_v40 = vpack.c.bf16 %v4687_v32, %v4681_v31  ;;  %v8561_v42 = vpack.c.bf16 %v4689_v0, %v4683_v33 }
 0x600   :  { %v8547_v52 = vpack.c.bf16 %v4640_v45, %v4634_v44  ;;  %v4693_v44 = vld [vmem:[#allocation14 + $0x5a8] sm:$0xff]  ;;  %v4699_v45 = vld [vmem:[#allocation14 + $0x5d8] sm:$0xff]  ;;  %v4716_v31 = vld [vmem:[#allocation14 + $0x660] sm:$0xff]  ;;  %v8349_v33 = vpack.c.bf16 %v4723_v56, %v4717_v12 }
 0x601   :  { %v4722_v32 = vld [vmem:[#allocation14 + $0x690] sm:$0xff]  ;;  %v4724_v0 = vld [vmem:[#allocation14 + $0x6a0] sm:$0xff] }
 0x602   :  { %8308 = vmatpush1.bf16.msra.mxu0 %v8307_v53  ;;  %8532 = vmatpush1.bf16.msra.mxu1 %v8531_v54  ;;  %v4644_v53 = vld [vmem:[#allocation14 + $0x420] sm:$0xff]  ;;  %v4650_v54 = vld [vmem:[#allocation14 + $0x450] sm:$0xff] }
 0x603   :  { %8310 = vmatprep.subr.bf16.mxu0 %v8309_v58  ;;  %8534 = vmatprep.subr.bf16.mxu1 %v8533_v55  ;;  %v4646_v58 = vld [vmem:[#allocation14 + $0x430] sm:$0xff]  ;;  %v4652_v55 = vld [vmem:[#allocation14 + $0x460] sm:$0xff]  ;;  %v8327_v10 = vpack.c.bf16 %v4650_v54, %v4644_v53  ;;  %v8341_v53 = vpack.c.bf16 %v4699_v45, %v4693_v44  ;;  %v8565_v54 = vpack.c.bf16 %v4701_v47, %v4695_v46 }
 0x604   :  { %v8551_v62 = vpack.c.bf16 %v4652_v55, %v4646_v58  ;;  %v4705_v58 = vld [vmem:[#allocation14 + $0x608] sm:$0xff]  ;;  %v4711_v55 = vld [vmem:[#allocation14 + $0x638] sm:$0xff]  ;;  %v4730_v46 = vld [vmem:[#allocation14 + $0x6d0] sm:$0xff] }
 0x605   :  { %v4736_v47 = vld [vmem:[#allocation14 + $0x700] sm:$0xff]  ;;  %v4754_v12 = vld [vmem:[#allocation14 + $0x790] sm:$0xff] }
 0x606   :  { %8312 = vmatpush1.bf16.msra.mxu0 %v8311_v43  ;;  %8536 = vmatpush1.bf16.msra.mxu1 %v8535_v11  ;;  %v4656_v43 = vld [vmem:[#allocation14 + $0x480] sm:$0xff]  ;;  %v4662_v11 = vld [vmem:[#allocation14 + $0x4b0] sm:$0xff] }
 0x607   :  { %8314 = vmatprep.subr.bf16.mxu0 %v8313_v5  ;;  %8538 = vmatprep.subr.bf16.mxu1 %v8537_v13  ;;  %v4658_v5 = vld [vmem:[#allocation14 + $0x490] sm:$0xff]  ;;  %v4664_v13 = vld [vmem:[#allocation14 + $0x4c0] sm:$0xff]  ;;  %v8331_v18 = vpack.c.bf16 %v4662_v11, %v4656_v43 }
 0x608   :  { %v8555_v17 = vpack.c.bf16 %v4664_v13, %v4658_v5  ;;  %v4704_v43 = vld [vmem:[#allocation14 + $0x600] sm:$0xff]  ;;  %v4710_v11 = vld [vmem:[#allocation14 + $0x630] sm:$0xff] }
 0x609   :  { %v4760_v56 = vld [vmem:[#allocation14 + $0x7c0] sm:$0xff] }
 0x60a   :  { %8316 = vmatpush1.bf16.msra.mxu0 %v8315_v19  ;;  %8540 = vmatpush1.bf16.msra.mxu1 %v8539_v21  ;;  %v4668_v19 = vld [vmem:[#allocation14 + $0x4e0] sm:$0xff]  ;;  %v4674_v21 = vld [vmem:[#allocation14 + $0x510] sm:$0xff] }
 0x60b   :  { %8318 = vmatprep.subr.bf16.mxu0 %v8317_v34  ;;  %8542 = vmatprep.subr.bf16.mxu1 %v8541_v30  ;;  %v4670_v34 = vld [vmem:[#allocation14 + $0x4f0] sm:$0xff]  ;;  %v4676_v30 = vld [vmem:[#allocation14 + $0x520] sm:$0xff]  ;;  %v8335_v8 = vpack.c.bf16 %v4674_v21, %v4668_v19  ;;  %v4719_v19 = vld [vmem:[#allocation14 + $0x678] sm:$0xff] }
 0x60c   :  { %v8559_v63 = vpack.c.bf16 %v4676_v30, %v4670_v34  ;;  %v4725_v21 = vld [vmem:[#allocation14 + $0x6a8] sm:$0xff]  ;;  %v8347_v34 = vpack.c.bf16 %v4710_v11, %v4704_v43 }
 0x60e   :  { %8320 = vmatpush1.bf16.msra.mxu0 %v8319_v28  ;;  %8544 = vmatpush1.bf16.msra.mxu1 %v8543_v39  ;;  %v4680_v28 = vld [vmem:[#allocation14 + $0x540] sm:$0xff]  ;;  %v4686_v39 = vld [vmem:[#allocation14 + $0x570] sm:$0xff] }
 0x60f   :  { %8322 = vmatprep.subr.bf16.mxu0 %v8321_v7  ;;  %8546 = vmatprep.subr.bf16.mxu1 %v8545_v27  ;;  %v4682_v7 = vld [vmem:[#allocation14 + $0x550] sm:$0xff]  ;;  %v4688_v27 = vld [vmem:[#allocation14 + $0x580] sm:$0xff]  ;;  %v8339_v48 = vpack.c.bf16 %v4686_v39, %v4680_v28  ;;  %v4731_v28 = vld [vmem:[#allocation14 + $0x6d8] sm:$0xff] }
 0x610   :  { %v8563_v23 = vpack.c.bf16 %v4688_v27, %v4682_v7  ;;  %v4737_v39 = vld [vmem:[#allocation14 + $0x708] sm:$0xff]  ;;  %v4728_v7 = vld [vmem:[#allocation14 + $0x6c0] sm:$0xff]  ;;  %v4734_v27 = vld [vmem:[#allocation14 + $0x6f0] sm:$0xff] }
 0x611   :  { %v8577_v45 = vpack.c.bf16 %v4737_v39, %v4731_v28 }
 0x612   :  { %8324 = vmatpush1.bf16.msra.mxu0 %v8323_v49  ;;  %8548 = vmatpush1.bf16.msra.mxu1 %v8547_v52  ;;  %v4692_v49 = vld [vmem:[#allocation14 + $0x5a0] sm:$0xff]  ;;  %v4698_v52 = vld [vmem:[#allocation14 + $0x5d0] sm:$0xff] }
 0x613   :  { %8326 = vmatprep.subr.bf16.mxu0 %v8325_v57  ;;  %8550 = vmatprep.subr.bf16.mxu1 %v8549_v59  ;;  %v4694_v57 = vld [vmem:[#allocation14 + $0x5b0] sm:$0xff]  ;;  %v4700_v59 = vld [vmem:[#allocation14 + $0x5e0] sm:$0xff]  ;;  %v8343_v61 = vpack.c.bf16 %v4698_v52, %v4692_v49  ;;  %v4743_v49 = vld [vmem:[#allocation14 + $0x738] sm:$0xff] }
 0x614   :  { %v8567_v22 = vpack.c.bf16 %v4700_v59, %v4694_v57  ;;  %v4749_v52 = vld [vmem:[#allocation14 + $0x768] sm:$0xff]  ;;  %v4740_v57 = vld [vmem:[#allocation14 + $0x720] sm:$0xff]  ;;  %v4746_v59 = vld [vmem:[#allocation14 + $0x750] sm:$0xff] }
 0x615   :  { %v8359_v43 = vpack.c.bf16 %v4746_v59, %v4740_v57 }
 0x616   :  { %8328 = vmatpush1.bf16.msra.mxu0 %v8327_v10  ;;  %8552 = vmatpush1.bf16.msra.mxu1 %v8551_v62  ;;  %v8345_v10 = vpack.c.bf16 %v4711_v55, %v4705_v58  ;;  %v8569_v62 = vpack.c.bf16 %v4713_v20, %v4707_v60  ;;  %v8581_v55 = vpack.c.bf16 %v4749_v52, %v4743_v49  ;;  %v4742_v60 = vld [vmem:[#allocation14 + $0x730] sm:$0xff]  ;;  %v4748_v20 = vld [vmem:[#allocation14 + $0x760] sm:$0xff] }
 0x617   :  { %8330 = vmatprep.subr.bf16.mxu0 %v8329_v3  ;;  %8554 = vmatprep.subr.bf16.mxu1 %v8553_v4  ;;  %v4706_v3 = vld [vmem:[#allocation14 + $0x610] sm:$0xff]  ;;  %v4712_v4 = vld [vmem:[#allocation14 + $0x640] sm:$0xff]  ;;  %v8583_v11 = vpack.c.bf16 %v4748_v20, %v4742_v60  ;;  %v4801_v60 = vld [vmem:[#allocation14 + $0x908] sm:$0xff] }
 0x618   :  { %v8571_v30 = vpack.c.bf16 %v4712_v4, %v4706_v3  ;;  %v4752_v3 = vld [vmem:[#allocation14 + $0x780] sm:$0xff]  ;;  %v4758_v4 = vld [vmem:[#allocation14 + $0x7b0] sm:$0xff]  ;;  %v4807_v20 = vld [vmem:[#allocation14 + $0x938] sm:$0xff] }
 0x61a   :  { %8332 = vmatpush1.bf16.msra.mxu0 %v8331_v18  ;;  %8556 = vmatpush1.bf16.msra.mxu1 %v8555_v17 }
 0x61b   :  { %8334 = vmatprep.subr.bf16.mxu0 %v8333_v26  ;;  %8558 = vmatprep.subr.bf16.mxu1 %v8557_v29 }
 0x61e   :  { %8336 = vmatpush1.bf16.msra.mxu0 %v8335_v8  ;;  %8560 = vmatpush1.bf16.msra.mxu1 %v8559_v63  ;;  %v4729_v8 = vld [vmem:[#allocation14 + $0x6c8] sm:$0xff] }
 0x61f   :  { %8338 = vmatprep.subr.bf16.mxu0 %v8337_v40  ;;  %8562 = vmatprep.subr.bf16.mxu1 %v8561_v42  ;;  %v8351_v40 = vpack.c.bf16 %v4722_v32, %v4716_v31  ;;  %v4764_v31 = vld [vmem:[#allocation14 + $0x7e0] sm:$0xff]  ;;  %v4770_v32 = vld [vmem:[#allocation14 + $0x810] sm:$0xff] }
 0x620   :  { %v8367_v28 = vpack.c.bf16 %v4770_v32, %v4764_v31 }
 0x622   :  { %8340 = vmatpush1.bf16.msra.mxu0 %v8339_v48  ;;  %8564 = vmatpush1.bf16.msra.mxu1 %v8563_v23  ;;  %v4741_v48 = vld [vmem:[#allocation14 + $0x728] sm:$0xff]  ;;  %v4747_v23 = vld [vmem:[#allocation14 + $0x758] sm:$0xff] }
 0x623   :  { %8342 = vmatprep.subr.bf16.mxu0 %v8341_v53  ;;  %8566 = vmatprep.subr.bf16.mxu1 %v8565_v54  ;;  %v8355_v53 = vpack.c.bf16 %v4734_v27, %v4728_v7  ;;  %v8579_v54 = vpack.c.bf16 %v4736_v47, %v4730_v46  ;;  %v8357_v58 = vpack.c.bf16 %v4747_v23, %v4741_v48  ;;  %v4789_v46 = vld [vmem:[#allocation14 + $0x8a8] sm:$0xff]  ;;  %v4795_v47 = vld [vmem:[#allocation14 + $0x8d8] sm:$0xff] }
 0x624   :  { %v4791_v48 = vld [vmem:[#allocation14 + $0x8b8] sm:$0xff]  ;;  %v4797_v23 = vld [vmem:[#allocation14 + $0x8e8] sm:$0xff]  ;;  %v8373_v57 = vpack.c.bf16 %v4795_v47, %v4789_v46  ;;  %v4826_v47 = vld [vmem:[#allocation14 + $0x9d0] sm:$0xff] }
 0x625   :  { %v8597_v59 = vpack.c.bf16 %v4797_v23, %v4791_v48  ;;  %v4832_v48 = vld [vmem:[#allocation14 + $0xa00] sm:$0xff]  ;;  %v4837_v23 = vld [vmem:[#allocation14 + $0xa28] sm:$0xff] }
 0x626   :  { %8344 = vmatpush1.bf16.msra.mxu0 %v8343_v61  ;;  %8568 = vmatpush1.bf16.msra.mxu1 %v8567_v22  ;;  %v4753_v61 = vld [vmem:[#allocation14 + $0x788] sm:$0xff]  ;;  %v4759_v22 = vld [vmem:[#allocation14 + $0x7b8] sm:$0xff] }
 0x627   :  { %8346 = vmatprep.subr.bf16.mxu0 %v8345_v10  ;;  %8570 = vmatprep.subr.bf16.mxu1 %v8569_v62  ;;  %v4755_v10 = vld [vmem:[#allocation14 + $0x798] sm:$0xff]  ;;  %v4761_v62 = vld [vmem:[#allocation14 + $0x7c8] sm:$0xff] }
 0x69c   :  { %v4272_v5 = vpop.f32.mrb[18].mxu0  ;;  %v4343_v13 = vpop.f32.mrb[18].mxu1 }
 0x69d   :  { %v9714_v25 = vmul.f32 %v9640_v2, %v4272_v5  ;;  %v9717_v16 = vmul.f32 %v9658_v1, %v4343_v13  ;;  %v4274_v18 = vpop.f32.mrb[19].mxu0  ;;  %v4345_v17 = vpop.f32.mrb[19].mxu1  ;;  %v4718_v2 = vld [vmem:[#allocation14 + $0x670] sm:$0xff]  ;;  %v8361_v5 = vpack.c.bf16 %v4759_v22, %v4753_v61  ;;  %v8585_v13 = vpack.c.bf16 %v4761_v62, %v4755_v10  ;;  %v4803_v61 = vld [vmem:[#allocation14 + $0x918] sm:$0xff]  ;;  %v4809_v22 = vld [vmem:[#allocation14 + $0x948] sm:$0xff] }
 0x69e   :  { %v9720_v26 = vmul.f32 %v9642_v15, %v4274_v18  ;;  %v9723_v29 = vmul.f32 %v9650_v50, %v4345_v17  ;;  %v8573_v15 = vpack.c.bf16 %v4725_v21, %v4719_v19  ;;  %v4735_v50 = vld [vmem:[#allocation14 + $0x6f8] sm:$0xff]  ;;  %v8575_v42 = vpack.c.bf16 %v4724_v0, %v4718_v2  ;;  %v4765_v18 = vld [vmem:[#allocation14 + $0x7e8] sm:$0xff]  ;;  %v4766_v0 = vld [vmem:[#allocation14 + $0x7f0] sm:$0xff] }
 0x69f   :  { %v8353_v44 = vpack.c.bf16 %v4735_v50, %v4729_v8  ;;  %v4771_v17 = vld [vmem:[#allocation14 + $0x818] sm:$0xff]  ;;  %v4773_v21 = vld [vmem:[#allocation14 + $0x828] sm:$0xff]  ;;  %v4772_v8 = vld [vmem:[#allocation14 + $0x820] sm:$0xff] }
 0x6a0   :  { %v4502_v1 = vcombine.low %v9714_v25, %v9720_v26  ;;  %v4503_v63 = vcombine.low %v9717_v16, %v9723_v29  ;;  %5280 = vmatprep.mubr.f32.mxu0 %v9720_v26  ;;  %5564 = vmatprep.mubr.f32.mxu1 %v9720_v26  ;;  %v4767_v19 = vld [vmem:[#allocation14 + $0x7f8] sm:$0xff]  ;;  %v4785_v50 = vld [vmem:[#allocation14 + $0x888] sm:$0xff]  ;;  %v8591_v39 = vpack.c.bf16 %v4772_v8, %v4766_v0  ;;  %v4812_v8 = vld [vmem:[#allocation14 + $0x960] sm:$0xff] }
 0x6a1   :  { %5281 = vmatmul.mubr.f32.vlgmr.msra.gmra.mrb[22].mxu0 %v9714_v25  ;;  %5565 = vmatmul.mubr.f32.vlgmr.msra.gmra.mrb[22].mxu1 %v9714_v25  ;;  %v8589_v2 = vpack.c.bf16 %v4773_v21, %v4767_v19  ;;  %v4815_v19 = vld [vmem:[#allocation14 + $0x978] sm:$0xff]  ;;  %v4821_v21 = vld [vmem:[#allocation14 + $0x9a8] sm:$0xff] }
 0x6a2   :  { %4508 = vst [vmem:[%s9804_s9] sm:$0xff] %v4502_v1  ;;  %4509 = vst [vmem:[%s9804_s9 + $0x8] sm:$0xff] %v4503_v63  ;;  %8348 = vmatpush1.bf16.msra.mxu0 %v8347_v34  ;;  %8572 = vmatpush1.bf16.msra.mxu1 %v8571_v30  ;;  %v8363_v34 = vpack.c.bf16 %v4758_v4, %v4752_v3  ;;  %v8587_v30 = vpack.c.bf16 %v4760_v56, %v4754_v12  ;;  %v4777_v1 = vld [vmem:[#allocation14 + $0x848] sm:$0xff]  ;;  %v4783_v63 = vld [vmem:[#allocation14 + $0x878] sm:$0xff] }
 0x6a3   :  { %5351 = vmatprep.mubr.f32.mxu0 %v9723_v29  ;;  %5635 = vmatprep.mubr.f32.mxu1 %v9723_v29  ;;  %v8369_v7 = vpack.c.bf16 %v4783_v63, %v4777_v1  ;;  %v8377_v3 = vpack.c.bf16 %v4807_v20, %v4801_v60  ;;  %v8601_v4 = vpack.c.bf16 %v4809_v22, %v4803_v61  ;;  %v4813_v12 = vld [vmem:[#allocation14 + $0x968] sm:$0xff]  ;;  %v4818_v1 = vld [vmem:[#allocation14 + $0x990] sm:$0xff]  ;;  %v4844_v61 = vld [vmem:[#allocation14 + $0xa60] sm:$0xff] }
 0x6a4   :  { %8350 = vmatprep.subr.bf16.mxu0 %v8349_v33  ;;  %8574 = vmatprep.subr.bf16.mxu1 %v8573_v15  ;;  %v8365_v33 = vpack.c.bf16 %v4771_v17, %v4765_v18  ;;  %v4779_v15 = vld [vmem:[#allocation14 + $0x858] sm:$0xff]  ;;  %v4814_v63 = vld [vmem:[#allocation14 + $0x970] sm:$0xff]  ;;  %v4849_v22 = vld [vmem:[#allocation14 + $0xa88] sm:$0xff] }
 0x6a5   :  { %v8593_v27 = vpack.c.bf16 %v4785_v50, %v4779_v15  ;;  %v4819_v17 = vld [vmem:[#allocation14 + $0x998] sm:$0xff]  ;;  %v4820_v15 = vld [vmem:[#allocation14 + $0x9a0] sm:$0xff]  ;;  %v4825_v50 = vld [vmem:[#allocation14 + $0x9c8] sm:$0xff] }
 0x6a6   :  { %8352 = vmatpush1.bf16.msra.mxu0 %v8351_v40  ;;  %8576 = vmatpush1.bf16.msra.mxu1 %v8575_v42  ;;  %v4776_v40 = vld [vmem:[#allocation14 + $0x840] sm:$0xff]  ;;  %v4782_v42 = vld [vmem:[#allocation14 + $0x870] sm:$0xff] }
 0x6a7   :  { %8354 = vmatprep.subr.bf16.mxu0 %v8353_v44  ;;  %8578 = vmatprep.subr.bf16.mxu1 %v8577_v45  ;;  %v4778_v44 = vld [vmem:[#allocation14 + $0x850] sm:$0xff]  ;;  %v4784_v45 = vld [vmem:[#allocation14 + $0x880] sm:$0xff]  ;;  %v8371_v49 = vpack.c.bf16 %v4782_v42, %v4776_v40  ;;  %v4833_v40 = vld [vmem:[#allocation14 + $0xa08] sm:$0xff]  ;;  %v8383_v42 = vpack.c.bf16 %v4818_v1, %v4812_v8 }
 0x6a8   :  { %v8595_v52 = vpack.c.bf16 %v4784_v45, %v4778_v44  ;;  %v4830_v44 = vld [vmem:[#allocation14 + $0x9f0] sm:$0xff] }
 0x6a9   :  { %v4838_v20 = vld [vmem:[#allocation14 + $0xa30] sm:$0xff] }
 0x6aa   :  { %8356 = vmatpush1.bf16.msra.mxu0 %v8355_v53  ;;  %8580 = vmatpush1.bf16.msra.mxu1 %v8579_v54  ;;  %v4788_v53 = vld [vmem:[#allocation14 + $0x8a0] sm:$0xff]  ;;  %v4794_v54 = vld [vmem:[#allocation14 + $0x8d0] sm:$0xff] }
 0x6ab   :  { %8358 = vmatprep.subr.bf16.mxu0 %v8357_v58  ;;  %8582 = vmatprep.subr.bf16.mxu1 %v8581_v55  ;;  %v4790_v58 = vld [vmem:[#allocation14 + $0x8b0] sm:$0xff]  ;;  %v4796_v55 = vld [vmem:[#allocation14 + $0x8e0] sm:$0xff]  ;;  %v8375_v10 = vpack.c.bf16 %v4794_v54, %v4788_v53  ;;  %v4845_v53 = vld [vmem:[#allocation14 + $0xa68] sm:$0xff] }
 0x6ac   :  { %v8599_v62 = vpack.c.bf16 %v4796_v55, %v4790_v58  ;;  %v4842_v58 = vld [vmem:[#allocation14 + $0xa50] sm:$0xff] }
 0x6ad   :  { %v4866_v8 = vld [vmem:[#allocation14 + $0xb10] sm:$0xff] }
 0x6ae   :  { %8360 = vmatpush1.bf16.msra.mxu0 %v8359_v43  ;;  %8584 = vmatpush1.bf16.msra.mxu1 %v8583_v11  ;;  %v4800_v43 = vld [vmem:[#allocation14 + $0x900] sm:$0xff]  ;;  %v4806_v11 = vld [vmem:[#allocation14 + $0x930] sm:$0xff] }
 0x6af   :  { %8362 = vmatprep.subr.bf16.mxu0 %v8361_v5  ;;  %8586 = vmatprep.subr.bf16.mxu1 %v8585_v13  ;;  %v4802_v5 = vld [vmem:[#allocation14 + $0x910] sm:$0xff]  ;;  %v4808_v13 = vld [vmem:[#allocation14 + $0x940] sm:$0xff] }
 0x6b0   :  { %v8603_v0 = vpack.c.bf16 %v4808_v13, %v4802_v5  ;;  %v4854_v5 = vld [vmem:[#allocation14 + $0xab0] sm:$0xff] }
 0x6b2   :  { %8364 = vmatpush1.bf16.msra.mxu0 %v8363_v34  ;;  %8588 = vmatpush1.bf16.msra.mxu1 %v8587_v30 }
 0x6b3   :  { %8366 = vmatprep.subr.bf16.mxu0 %v8365_v33  ;;  %8590 = vmatprep.subr.bf16.mxu1 %v8589_v2  ;;  %v8379_v2 = vpack.c.bf16 %v4806_v11, %v4800_v43  ;;  %v4857_v43 = vld [vmem:[#allocation14 + $0xac8] sm:$0xff] }
 0x6b6   :  { %8368 = vmatpush1.bf16.msra.mxu0 %v8367_v28  ;;  %8592 = vmatpush1.bf16.msra.mxu1 %v8591_v39  ;;  %v4831_v28 = vld [vmem:[#allocation14 + $0x9f8] sm:$0xff] }
 0x6b7   :  { %8370 = vmatprep.subr.bf16.mxu0 %v8369_v7  ;;  %8594 = vmatprep.subr.bf16.mxu1 %v8593_v27  ;;  %v4827_v39 = vld [vmem:[#allocation14 + $0x9d8] sm:$0xff]  ;;  %v8607_v7 = vpack.c.bf16 %v4820_v15, %v4814_v63  ;;  %v4824_v27 = vld [vmem:[#allocation14 + $0x9c0] sm:$0xff]  ;;  %v8385_v45 = vpack.c.bf16 %v4831_v28, %v4825_v50  ;;  %v4873_v15 = vld [vmem:[#allocation14 + $0xb48] sm:$0xff] }
 0x6b8   :  { %v8609_v46 = vpack.c.bf16 %v4833_v40, %v4827_v39  ;;  %v8387_v54 = vpack.c.bf16 %v4830_v44, %v4824_v27  ;;  %v4868_v63 = vld [vmem:[#allocation14 + $0xb20] sm:$0xff]  ;;  %v4879_v50 = vld [vmem:[#allocation14 + $0xb78] sm:$0xff]  ;;  %v4881_v28 = vld [vmem:[#allocation14 + $0xb88] sm:$0xff] }
 0x6b9   :  { %v8401_v27 = vpack.c.bf16 %v4879_v50, %v4873_v15  ;;  %v4923_v15 = vld [vmem:[#allocation14 + $0xcd8] sm:$0xff]  ;;  %v4929_v50 = vld [vmem:[#allocation14 + $0xd08] sm:$0xff] }
 0x6ba   :  { %8372 = vmatpush1.bf16.msra.mxu0 %v8371_v49  ;;  %8596 = vmatpush1.bf16.msra.mxu1 %v8595_v52  ;;  %v4843_v49 = vld [vmem:[#allocation14 + $0xa58] sm:$0xff] }
 0x6bb   :  { %8374 = vmatprep.subr.bf16.mxu0 %v8373_v57  ;;  %8598 = vmatprep.subr.bf16.mxu1 %v8597_v59  ;;  %v4839_v52 = vld [vmem:[#allocation14 + $0xa38] sm:$0xff]  ;;  %v8611_v57 = vpack.c.bf16 %v4832_v48, %v4826_v47  ;;  %v4836_v59 = vld [vmem:[#allocation14 + $0xa20] sm:$0xff]  ;;  %v8389_v55 = vpack.c.bf16 %v4843_v49, %v4837_v23  ;;  %v4885_v47 = vld [vmem:[#allocation14 + $0xba8] sm:$0xff] }
 0x6bc   :  { %v4414_v56 = vpop.f32.mrb[20].mxu0  ;;  %v4485_v18 = vpop.f32.mrb[20].mxu1  ;;  %v8613_v60 = vpack.c.bf16 %v4845_v53, %v4839_v52  ;;  %v8391_v11 = vpack.c.bf16 %v4842_v58, %v4836_v59  ;;  %v4891_v48 = vld [vmem:[#allocation14 + $0xbd8] sm:$0xff]  ;;  %v4893_v49 = vld [vmem:[#allocation14 + $0xbe8] sm:$0xff] }
 0x6bd   :  { %v9742_v34 = vmul.f32 %v9684_v24, %v4414_v56  ;;  %v9745_v30 = vmul.f32 %v4485_v18, %v9675_v6  ;;  %v4416_v31 = vpop.f32.mrb[21].mxu0  ;;  %v6576_v32 = vpop.f32.mrb[21].mxu1  ;;  %v8381_v6 = vpack.c.bf16 %v4819_v17, %v4813_v12  ;;  %v8605_v24 = vpack.c.bf16 %v4821_v21, %v4815_v19  ;;  %v4850_v56 = vld [vmem:[#allocation14 + $0xa90] sm:$0xff]  ;;  %v4856_v18 = vld [vmem:[#allocation14 + $0xac0] sm:$0xff]  ;;  %v4861_v17 = vld [vmem:[#allocation14 + $0xae8] sm:$0xff] }
 0x6be   :  { %v9748_v33 = vmul.f32 %v9686_v51, %v4416_v31  ;;  %8376 = vmatpush1.bf16.msra.mxu0 %v8375_v10  ;;  %8600 = vmatpush1.bf16.msra.mxu1 %v8599_v62  ;;  %v4855_v10 = vld [vmem:[#allocation14 + $0xab8] sm:$0xff]  ;;  %v4869_v31 = vld [vmem:[#allocation14 + $0xb28] sm:$0xff]  ;;  %v8405_v59 = vpack.c.bf16 %v4891_v48, %v4885_v47 }
 0x6bf   :  { %4511 = vst [vmem:[%s9804_s9 + $0x18] sm:$0xf] %v9745_v30  ;;  %8378 = vmatprep.subr.bf16.mxu0 %v8377_v3  ;;  %8602 = vmatprep.subr.bf16.mxu1 %v8601_v4  ;;  %v4851_v62 = vld [vmem:[#allocation14 + $0xa98] sm:$0xff]  ;;  %v8615_v3 = vpack.c.bf16 %v4844_v61, %v4838_v20  ;;  %v4848_v4 = vld [vmem:[#allocation14 + $0xa80] sm:$0xff]  ;;  %v8393_v13 = vpack.c.bf16 %v4855_v10, %v4849_v22  ;;  %v4897_v20 = vld [vmem:[#allocation14 + $0xc08] sm:$0xff] }
 0x6c0   :  { %v4504_v51 = vcombine.low %v9742_v34, %v9748_v33  ;;  %v8617_v12 = vpack.c.bf16 %v4857_v43, %v4851_v62  ;;  %v4867_v19 = vld [vmem:[#allocation14 + $0xb18] sm:$0xff]  ;;  %v8395_v32 = vpack.c.bf16 %v4854_v5, %v4848_v4  ;;  %v4905_v10 = vld [vmem:[#allocation14 + $0xc48] sm:$0xff]  ;;  %v4896_v4 = vld [vmem:[#allocation14 + $0xc00] sm:$0xff] }
 0x6c1   :  { %v4863_v21 = vld [vmem:[#allocation14 + $0xaf8] sm:$0xff]  ;;  %v8397_v1 = vpack.c.bf16 %v4867_v19, %v4861_v17  ;;  %v4902_v5 = vld [vmem:[#allocation14 + $0xc30] sm:$0xff]  ;;  %v4917_v19 = vld [vmem:[#allocation14 + $0xca8] sm:$0xff] }
 0x6c2   :  { %4510 = vst [vmem:[%s9804_s9 + $0x10] sm:$0xff] %v4504_v51  ;;  %8380 = vmatpush1.bf16.msra.mxu0 %v8379_v2  ;;  %8604 = vmatpush1.bf16.msra.mxu1 %v8603_v0  ;;  %v8619_v2 = vpack.c.bf16 %v4856_v18, %v4850_v56  ;;  %v4860_v0 = vld [vmem:[#allocation14 + $0xae0] sm:$0xff]  ;;  %v4875_v51 = vld [vmem:[#allocation14 + $0xb58] sm:$0xff]  ;;  %v4909_v56 = vld [vmem:[#allocation14 + $0xc68] sm:$0xff]  ;;  %s9299_s9 = smov [#allocation17]  }
 0x6c3   :  { %8382 = vmatprep.subr.bf16.mxu0 %v8381_v6  ;;  %8606 = vmatprep.subr.bf16.mxu1 %v8605_v24  ;;  %v8621_v6 = vpack.c.bf16 %v4869_v31, %v4863_v21  ;;  %v4862_v24 = vld [vmem:[#allocation14 + $0xaf0] sm:$0xff]  ;;  %v8399_v39 = vpack.c.bf16 %v4866_v8, %v4860_v0  ;;  %v8625_v44 = vpack.c.bf16 %v4881_v28, %v4875_v51  ;;  %v4887_v23 = vld [vmem:[#allocation14 + $0xbb8] sm:$0xff]  ;;  %v4941_v48 = vld [vmem:[#allocation14 + $0xd68] sm:$0xff]  ;;  %s6091_s22 = sshll.u32 %s9299_s9, 4  ;;  %s6092_s22 = int_to_ptr.vmem [resolvable:$true] %s6091_s22 }
 0x6c4   :  { %v8623_v40 = vpack.c.bf16 %v4868_v63, %v4862_v24  ;;  %v8629_v58 = vpack.c.bf16 %v4893_v49, %v4887_v23  ;;  %v4903_v61 = vld [vmem:[#allocation14 + $0xc38] sm:$0xff]  ;;  %v8411_v21 = vpack.c.bf16 %v4902_v5, %v4896_v4  ;;  %v4910_v0 = vld [vmem:[#allocation14 + $0xc70] sm:$0xff]  ;;  %v4921_v24 = vld [vmem:[#allocation14 + $0xcc8] sm:$0xff]  ;;  %s9247_s5 = scalar_lea.vmem %s6092_s22, 384  ;;  %p9252_p3 = scmp.lt.s32.totalorder %s6092_s22, %s6092_s22 }
 0x6c5   :  { %v4899_v22 = vld [vmem:[#allocation14 + $0xc18] sm:$0xff]  ;;  %v4952_v5 = vld [vmem:[#allocation14 + $0xdc0] sm:$0xff]  ;;  %p9248_p2 = scmp.ne.s32.totalorder %s6092_s22, %s9247_s5  ;;  %p9253_p4 = scmp.lt.s32.totalorder %s9247_s5, %s9247_s5 }
 0x6c6   :  { %8384 = vmatpush1.bf16.msra.mxu0 %v8383_v42  ;;  %8608 = vmatpush1.bf16.msra.mxu1 %v8607_v7  ;;  %v4872_v42 = vld [vmem:[#allocation14 + $0xb40] sm:$0xff]  ;;  %v4878_v7 = vld [vmem:[#allocation14 + $0xb70] sm:$0xff]  ;;  %v4915_v18 = vld [vmem:[#allocation14 + $0xc98] sm:$0xff] }
 0x6c7   :  { %8386 = vmatprep.subr.bf16.mxu0 %v8385_v45  ;;  %8610 = vmatprep.subr.bf16.mxu1 %v8609_v46  ;;  %v4874_v45 = vld [vmem:[#allocation14 + $0xb50] sm:$0xff]  ;;  %v4880_v46 = vld [vmem:[#allocation14 + $0xb80] sm:$0xff]  ;;  %v8403_v52 = vpack.c.bf16 %v4878_v7, %v4872_v42  ;;  %v4911_v17 = vld [vmem:[#allocation14 + $0xc78] sm:$0xff]  ;;  %v8413_v8 = vpack.c.bf16 %v4915_v18, %v4909_v56  ;;  %p9254_p5 = por %p9253_p4, %p9252_p3 }
 0x6c8   :  { %v8627_v53 = vpack.c.bf16 %v4880_v46, %v4874_v45  ;;  %v4927_v63 = vld [vmem:[#allocation14 + $0xcf8] sm:$0xff]  ;;  %v4926_v42 = vld [vmem:[#allocation14 + $0xcf0] sm:$0xff]  ;;  %v4933_v45 = vld [vmem:[#allocation14 + $0xd28] sm:$0xff] }
 0x6c9   :  { %v4922_v7 = vld [vmem:[#allocation14 + $0xcd0] sm:$0xff]  ;;  %v4939_v46 = vld [vmem:[#allocation14 + $0xd58] sm:$0xff]  ;;  %v4965_v18 = vld [vmem:[#allocation14 + $0xe28] sm:$0xff]  ;;  %p9255_p6 = pnand %p9254_p5, %p9248_p2 }
 0x6ca   :  { %8388 = vmatpush1.bf16.msra.mxu0 %v8387_v54  ;;  %8612 = vmatpush1.bf16.msra.mxu1 %v8611_v57  ;;  %v4884_v54 = vld [vmem:[#allocation14 + $0xba0] sm:$0xff]  ;;  %v4890_v57 = vld [vmem:[#allocation14 + $0xbd0] sm:$0xff]  ;;  %v4935_v47 = vld [vmem:[#allocation14 + $0xd38] sm:$0xff] }
 0x6cb   :  { %8390 = vmatprep.subr.bf16.mxu0 %v8389_v55  ;;  %8614 = vmatprep.subr.bf16.mxu1 %v8613_v60  ;;  %v4886_v55 = vld [vmem:[#allocation14 + $0xbb0] sm:$0xff]  ;;  %v4892_v60 = vld [vmem:[#allocation14 + $0xbe0] sm:$0xff]  ;;  %v8407_v62 = vpack.c.bf16 %v4890_v57, %v4884_v54  ;;  %v4959_v56 = vld [vmem:[#allocation14 + $0xdf8] sm:$0xff] }
 0x6cc   :  { %v8631_v43 = vpack.c.bf16 %v4892_v60, %v4886_v55  ;;  %v4938_v54 = vld [vmem:[#allocation14 + $0xd50] sm:$0xff]  ;;  %v4945_v55 = vld [vmem:[#allocation14 + $0xd88] sm:$0xff]  ;;  %v4951_v60 = vld [vmem:[#allocation14 + $0xdb8] sm:$0xff] }
 0x6cd   :  { %v4934_v57 = vld [vmem:[#allocation14 + $0xd30] sm:$0xff] }
 0x6ce   :  { %8392 = vmatpush1.bf16.msra.mxu0 %v8391_v11  ;;  %8616 = vmatpush1.bf16.msra.mxu1 %v8615_v3  ;;  %v8409_v11 = vpack.c.bf16 %v4903_v61, %v4897_v20  ;;  %v8633_v3 = vpack.c.bf16 %v4905_v10, %v4899_v22  ;;  %v4947_v20 = vld [vmem:[#allocation14 + $0xd98] sm:$0xff]  ;;  %v4953_v61 = vld [vmem:[#allocation14 + $0xdc8] sm:$0xff] }
 0x6cf   :  { %8394 = vmatprep.subr.bf16.mxu0 %v8393_v13  ;;  %8618 = vmatprep.subr.bf16.mxu1 %v8617_v12  ;;  %v4898_v13 = vld [vmem:[#allocation14 + $0xc10] sm:$0xff]  ;;  %v4904_v12 = vld [vmem:[#allocation14 + $0xc40] sm:$0xff]  ;;  %v8649_v4 = vpack.c.bf16 %v4953_v61, %v4947_v20 }
 0x6d0   :  { %v8635_v31 = vpack.c.bf16 %v4904_v12, %v4898_v13  ;;  %v4957_v13 = vld [vmem:[#allocation14 + $0xde8] sm:$0xff]  ;;  %v4963_v12 = vld [vmem:[#allocation14 + $0xe18] sm:$0xff] }
 0x6d2   :  { %8396 = vmatpush1.bf16.msra.mxu0 %v8395_v32  ;;  %8620 = vmatpush1.bf16.msra.mxu1 %v8619_v2  ;;  %v4908_v32 = vld [vmem:[#allocation14 + $0xc60] sm:$0xff]  ;;  %v4914_v2 = vld [vmem:[#allocation14 + $0xc90] sm:$0xff] }
 0x6d3   :  { %8398 = vmatprep.subr.bf16.mxu0 %v8397_v1  ;;  %8622 = vmatprep.subr.bf16.mxu1 %v8621_v6  ;;  %v8637_v1 = vpack.c.bf16 %v4917_v19, %v4911_v17  ;;  %v4916_v6 = vld [vmem:[#allocation14 + $0xca0] sm:$0xff]  ;;  %v8415_v51 = vpack.c.bf16 %v4914_v2, %v4908_v32  ;;  %v4962_v32 = vld [vmem:[#allocation14 + $0xe10] sm:$0xff] }
 0x6d4   :  { %v8639_v28 = vpack.c.bf16 %v4916_v6, %v4910_v0  ;;  %v4958_v2 = vld [vmem:[#allocation14 + $0xdf0] sm:$0xff]  ;;  %v8653_v0 = vpack.c.bf16 %v4965_v18, %v4959_v56  ;;  %v4975_v6 = vld [vmem:[#allocation14 + $0xe78] sm:$0xff] }
 0x6d6   :  { %8400 = vmatpush1.bf16.msra.mxu0 %v8399_v39  ;;  %8624 = vmatpush1.bf16.msra.mxu1 %v8623_v40  ;;  %v8417_v39 = vpack.c.bf16 %v4927_v63, %v4921_v24  ;;  %v4920_v40 = vld [vmem:[#allocation14 + $0xcc0] sm:$0xff]  ;;  %v4971_v24 = vld [vmem:[#allocation14 + $0xe58] sm:$0xff]  ;;  %v4977_v63 = vld [vmem:[#allocation14 + $0xe88] sm:$0xff] }
 0x6d7   :  { %8402 = vmatprep.subr.bf16.mxu0 %v8401_v27  ;;  %8626 = vmatprep.subr.bf16.mxu1 %v8625_v44  ;;  %v8641_v27 = vpack.c.bf16 %v4929_v50, %v4923_v15  ;;  %v4928_v44 = vld [vmem:[#allocation14 + $0xd00] sm:$0xff]  ;;  %v8419_v23 = vpack.c.bf16 %v4926_v42, %v4920_v40  ;;  %v4970_v40 = vld [vmem:[#allocation14 + $0xe50] sm:$0xff]  ;;  %v8657_v42 = vpack.c.bf16 %v4977_v63, %v4971_v24 }
 0x6d8   :  { %v8643_v49 = vpack.c.bf16 %v4928_v44, %v4922_v7  ;;  %v4976_v7 = vld [vmem:[#allocation14 + $0xe80] sm:$0xff]  ;;  %v4987_v44 = vld [vmem:[#allocation14 + $0xed8] sm:$0xff] }
 0x6da   :  { %8404 = vmatpush1.bf16.msra.mxu0 %v8403_v52  ;;  %8628 = vmatpush1.bf16.msra.mxu1 %v8627_v53  ;;  %v8421_v52 = vpack.c.bf16 %v4939_v46, %v4933_v45  ;;  %v4932_v53 = vld [vmem:[#allocation14 + $0xd20] sm:$0xff]  ;;  %v4983_v45 = vld [vmem:[#allocation14 + $0xeb8] sm:$0xff]  ;;  %v4989_v46 = vld [vmem:[#allocation14 + $0xee8] sm:$0xff] }
 0x6db   :  { %8406 = vmatprep.subr.bf16.mxu0 %v8405_v59  ;;  %8630 = vmatprep.subr.bf16.mxu1 %v8629_v58  ;;  %v8645_v59 = vpack.c.bf16 %v4941_v48, %v4935_v47  ;;  %v4940_v58 = vld [vmem:[#allocation14 + $0xd60] sm:$0xff]  ;;  %v8423_v22 = vpack.c.bf16 %v4938_v54, %v4932_v53  ;;  %v8659_v48 = vpack.c.bf16 %v4976_v7, %v4970_v40  ;;  %v4982_v53 = vld [vmem:[#allocation14 + $0xeb0] sm:$0xff]  ;;  %v5035_v7 = vld [vmem:[#allocation14 + $0x1058] sm:$0xff] }
 0x6dc   :  { %v8647_v10 = vpack.c.bf16 %v4940_v58, %v4934_v57  ;;  %v8661_v54 = vpack.c.bf16 %v4989_v46, %v4983_v45  ;;  %v4988_v57 = vld [vmem:[#allocation14 + $0xee0] sm:$0xff]  ;;  %v4999_v58 = vld [vmem:[#allocation14 + $0xf38] sm:$0xff] }
 0x6dd   :  { %v8663_v61 = vpack.c.bf16 %v4988_v57, %v4982_v53  ;;  %v5024_v40 = vld [vmem:[#allocation14 + $0x1000] sm:$0xff]  ;;  %v5047_v57 = vld [vmem:[#allocation14 + $0x10b8] sm:$0xff] }
 0x6de   :  { %8408 = vmatpush1.bf16.msra.mxu0 %v8407_v62  ;;  %8632 = vmatpush1.bf16.msra.mxu1 %v8631_v43  ;;  %v8425_v62 = vpack.c.bf16 %v4951_v60, %v4945_v55  ;;  %v4944_v43 = vld [vmem:[#allocation14 + $0xd80] sm:$0xff]  ;;  %v4995_v55 = vld [vmem:[#allocation14 + $0xf18] sm:$0xff]  ;;  %v5001_v60 = vld [vmem:[#allocation14 + $0xf48] sm:$0xff] }
 0x6df   :  { %8410 = vmatprep.subr.bf16.mxu0 %v8409_v11  ;;  %8634 = vmatprep.subr.bf16.mxu1 %v8633_v3  ;;  %v4950_v11 = vld [vmem:[#allocation14 + $0xdb0] sm:$0xff]  ;;  %v5036_v53 = vld [vmem:[#allocation14 + $0x1060] sm:$0xff] }
 0x6e0   :  { %v4946_v3 = vld [vmem:[#allocation14 + $0xd90] sm:$0xff]  ;;  %v8427_v17 = vpack.c.bf16 %v4950_v11, %v4944_v43  ;;  %v8665_v11 = vpack.c.bf16 %v5001_v60, %v4995_v55 }
 0x6e1   :  { %5352 = vmatmul.mubr.f32.vlgmr.msra.gmra.mrb[22].mxu0 %v9717_v16  ;;  %5636 = vmatmul.mubr.f32.vlgmr.msra.gmra.mrb[22].mxu1 %v9717_v16  ;;  %v8651_v19 = vpack.c.bf16 %v4952_v5, %v4946_v3  ;;  %v4994_v43 = vld [vmem:[#allocation14 + $0xf10] sm:$0xff]  ;;  %v5000_v3 = vld [vmem:[#allocation14 + $0xf40] sm:$0xff]  ;;  %v5011_v5 = vld [vmem:[#allocation14 + $0xf98] sm:$0xff] }
 0x6e2   :  { %8412 = vmatpush1.bf16.msra.mxu0 %v8411_v21  ;;  %5422 = vmatprep.mubr.f32.mxu0 %v9748_v33  ;;  %v8429_v21 = vpack.c.bf16 %v4963_v12, %v4957_v13  ;;  %v5007_v13 = vld [vmem:[#allocation14 + $0xf78] sm:$0xff]  ;;  %v5013_v12 = vld [vmem:[#allocation14 + $0xfa8] sm:$0xff]  ;;  %v8667_v18 = vpack.c.bf16 %v5000_v3, %v4994_v43  ;;  %v5048_v43 = vld [vmem:[#allocation14 + $0x10c0] sm:$0xff] }
 0x6e3   :  { %8636 = vmatpush1.bf16.msra.mxu1 %v8635_v31  ;;  %5706 = vmatprep.mubr.f32.mxu1 %v9748_v33  ;;  %v4956_v31 = vld [vmem:[#allocation14 + $0xde0] sm:$0xff]  ;;  %v5059_v3 = vld [vmem:[#allocation14 + $0x1118] sm:$0xff] }
 0x6e4   :  { %8414 = vmatprep.subr.bf16.mxu0 %v8413_v8  ;;  %8638 = vmatprep.subr.bf16.mxu1 %v8637_v1  ;;  %v4964_v8 = vld [vmem:[#allocation14 + $0xe20] sm:$0xff]  ;;  %v4969_v1 = vld [vmem:[#allocation14 + $0xe48] sm:$0xff]  ;;  %v8431_v15 = vpack.c.bf16 %v4962_v32, %v4956_v31  ;;  %v5006_v31 = vld [vmem:[#allocation14 + $0xf70] sm:$0xff]  ;;  %v8669_v32 = vpack.c.bf16 %v5013_v12, %v5007_v13 }
 0x6e5   :  { %v8655_v50 = vpack.c.bf16 %v4964_v8, %v4958_v2  ;;  %v5012_v2 = vld [vmem:[#allocation14 + $0xfa0] sm:$0xff]  ;;  %v5023_v8 = vld [vmem:[#allocation14 + $0xff8] sm:$0xff] }
 0x6e6   :  { %8416 = vmatpush1.bf16.msra.mxu0 %v8415_v51  ;;  %v8433_v51 = vpack.c.bf16 %v4975_v6, %v4969_v1  ;;  %v5019_v1 = vld [vmem:[#allocation14 + $0xfd8] sm:$0xff]  ;;  %v5025_v6 = vld [vmem:[#allocation14 + $0x1008] sm:$0xff]  ;;  %v8671_v63 = vpack.c.bf16 %v5012_v2, %v5006_v31  ;;  %v5060_v31 = vld [vmem:[#allocation14 + $0x1120] sm:$0xff] }
 0x6e7   :  { %8640 = vmatpush1.bf16.msra.mxu1 %v8639_v28  ;;  %8418 = vmatprep.subr.bf16.mxu0 %v8417_v39  ;;  %v4968_v28 = vld [vmem:[#allocation14 + $0xe40] sm:$0xff]  ;;  %v4974_v39 = vld [vmem:[#allocation14 + $0xe70] sm:$0xff]  ;;  %v5071_v2 = vld [vmem:[#allocation14 + $0x1178] sm:$0xff] }
 0x6e8   :  { %8642 = vmatprep.subr.bf16.mxu1 %v8641_v27  ;;  %v4981_v27 = vld [vmem:[#allocation14 + $0xea8] sm:$0xff]  ;;  %v8435_v47 = vpack.c.bf16 %v4974_v39, %v4968_v28  ;;  %v5018_v28 = vld [vmem:[#allocation14 + $0xfd0] sm:$0xff]  ;;  %v8673_v39 = vpack.c.bf16 %v5025_v6, %v5019_v1 }
 0x6e9   :  { %v8675_v46 = vpack.c.bf16 %v5024_v40, %v5018_v28  ;;  %v5072_v28 = vld [vmem:[#allocation14 + $0x1180] sm:$0xff]  ;;  %v5083_v40 = vld [vmem:[#allocation14 + $0x11d8] sm:$0xff] }
 0x6ea   :  { %8420 = vmatpush1.bf16.msra.mxu0 %v8419_v23  ;;  %v8437_v23 = vpack.c.bf16 %v4987_v44, %v4981_v27  ;;  %v5031_v27 = vld [vmem:[#allocation14 + $0x1038] sm:$0xff]  ;;  %v5037_v44 = vld [vmem:[#allocation14 + $0x1068] sm:$0xff] }
 0x6eb   :  { %8644 = vmatpush1.bf16.msra.mxu1 %v8643_v49  ;;  %8422 = vmatprep.subr.bf16.mxu0 %v8421_v52  ;;  %v4980_v49 = vld [vmem:[#allocation14 + $0xea0] sm:$0xff]  ;;  %v4986_v52 = vld [vmem:[#allocation14 + $0xed0] sm:$0xff] }
 0x6ec   :  { %8646 = vmatprep.subr.bf16.mxu1 %v8645_v59  ;;  %v4993_v59 = vld [vmem:[#allocation14 + $0xf08] sm:$0xff]  ;;  %v8439_v20 = vpack.c.bf16 %v4986_v52, %v4980_v49  ;;  %v5030_v49 = vld [vmem:[#allocation14 + $0x1030] sm:$0xff]  ;;  %v8677_v52 = vpack.c.bf16 %v5037_v44, %v5031_v27 }
 0x6ed   :  { %v8679_v60 = vpack.c.bf16 %v5036_v53, %v5030_v49  ;;  %v5084_v49 = vld [vmem:[#allocation14 + $0x11e0] sm:$0xff]  ;;  %v5095_v53 = vld [vmem:[#allocation14 + $0x1238] sm:$0xff] }
 0x6ee   :  { %8424 = vmatpush1.bf16.msra.mxu0 %v8423_v22  ;;  %v8441_v22 = vpack.c.bf16 %v4999_v58, %v4993_v59  ;;  %v5043_v59 = vld [vmem:[#allocation14 + $0x1098] sm:$0xff]  ;;  %v5049_v58 = vld [vmem:[#allocation14 + $0x10c8] sm:$0xff] }
 0x6ef   :  { %8648 = vmatpush1.bf16.msra.mxu1 %v8647_v10  ;;  %8426 = vmatprep.subr.bf16.mxu0 %v8425_v62  ;;  %v4992_v10 = vld [vmem:[#allocation14 + $0xf00] sm:$0xff]  ;;  %v4998_v62 = vld [vmem:[#allocation14 + $0xf30] sm:$0xff] }
 0x6f0   :  { %8650 = vmatprep.subr.bf16.mxu1 %v8649_v4  ;;  %v5005_v4 = vld [vmem:[#allocation14 + $0xf68] sm:$0xff]  ;;  %v8443_v56 = vpack.c.bf16 %v4998_v62, %v4992_v10  ;;  %v5042_v10 = vld [vmem:[#allocation14 + $0x1090] sm:$0xff]  ;;  %v8681_v62 = vpack.c.bf16 %v5049_v58, %v5043_v59 }
 0x6f1   :  { %v8683_v12 = vpack.c.bf16 %v5048_v43, %v5042_v10  ;;  %v5096_v10 = vld [vmem:[#allocation14 + $0x1240] sm:$0xff]  ;;  %v5107_v43 = vld [vmem:[#allocation14 + $0x1298] sm:$0xff] }
 0x6f2   :  { %8428 = vmatpush1.bf16.msra.mxu0 %v8427_v17  ;;  %v8445_v17 = vpack.c.bf16 %v5011_v5, %v5005_v4  ;;  %v5055_v4 = vld [vmem:[#allocation14 + $0x10f8] sm:$0xff]  ;;  %v5061_v5 = vld [vmem:[#allocation14 + $0x1128] sm:$0xff] }
 0x6f3   :  { %8652 = vmatpush1.bf16.msra.mxu1 %v8651_v19  ;;  %8430 = vmatprep.subr.bf16.mxu0 %v8429_v21  ;;  %v5004_v19 = vld [vmem:[#allocation14 + $0xf60] sm:$0xff]  ;;  %v5010_v21 = vld [vmem:[#allocation14 + $0xf90] sm:$0xff] }
 0x6f4   :  { %8654 = vmatprep.subr.bf16.mxu1 %v8653_v0  ;;  %v5017_v0 = vld [vmem:[#allocation14 + $0xfc8] sm:$0xff]  ;;  %v8447_v24 = vpack.c.bf16 %v5010_v21, %v5004_v19  ;;  %v5054_v19 = vld [vmem:[#allocation14 + $0x10f0] sm:$0xff]  ;;  %v8685_v21 = vpack.c.bf16 %v5061_v5, %v5055_v4 }
 0x6f5   :  { %v8687_v6 = vpack.c.bf16 %v5060_v31, %v5054_v19  ;;  %v5108_v19 = vld [vmem:[#allocation14 + $0x12a0] sm:$0xff]  ;;  %v5119_v31 = vld [vmem:[#allocation14 + $0x12f8] sm:$0xff] }
 0x6f6   :  { %8432 = vmatpush1.bf16.msra.mxu0 %v8431_v15  ;;  %v8449_v15 = vpack.c.bf16 %v5023_v8, %v5017_v0  ;;  %v5067_v0 = vld [vmem:[#allocation14 + $0x1158] sm:$0xff]  ;;  %v5073_v8 = vld [vmem:[#allocation14 + $0x1188] sm:$0xff] }
 0x6f7   :  { %8656 = vmatpush1.bf16.msra.mxu1 %v8655_v50  ;;  %8434 = vmatprep.subr.bf16.mxu0 %v8433_v51  ;;  %v5016_v50 = vld [vmem:[#allocation14 + $0xfc0] sm:$0xff]  ;;  %v5022_v51 = vld [vmem:[#allocation14 + $0xff0] sm:$0xff] }
 0x6f8   :  { %8658 = vmatprep.subr.bf16.mxu1 %v8657_v42  ;;  %v5029_v42 = vld [vmem:[#allocation14 + $0x1028] sm:$0xff]  ;;  %v8451_v45 = vpack.c.bf16 %v5022_v51, %v5016_v50  ;;  %v5066_v50 = vld [vmem:[#allocation14 + $0x1150] sm:$0xff]  ;;  %v8689_v51 = vpack.c.bf16 %v5073_v8, %v5067_v0 }
 0x6f9   :  { %v8691_v44 = vpack.c.bf16 %v5072_v28, %v5066_v50  ;;  %v5120_v50 = vld [vmem:[#allocation14 + $0x1300] sm:$0xff]  ;;  %v5131_v28 = vld [vmem:[#allocation14 + $0x1358] sm:$0xff] }
 0x6fa   :  { %8436 = vmatpush1.bf16.msra.mxu0 %v8435_v47  ;;  %v8453_v47 = vpack.c.bf16 %v5035_v7, %v5029_v42  ;;  %v5079_v42 = vld [vmem:[#allocation14 + $0x11b8] sm:$0xff]  ;;  %v5085_v7 = vld [vmem:[#allocation14 + $0x11e8] sm:$0xff] }
 0x6fb   :  { %8660 = vmatpush1.bf16.msra.mxu1 %v8659_v48  ;;  %8438 = vmatprep.subr.bf16.mxu0 %v8437_v23  ;;  %v5028_v48 = vld [vmem:[#allocation14 + $0x1020] sm:$0xff]  ;;  %v5034_v23 = vld [vmem:[#allocation14 + $0x1050] sm:$0xff] }
 0x6fc   :  { %8662 = vmatprep.subr.bf16.mxu1 %v8661_v54  ;;  %v5041_v54 = vld [vmem:[#allocation14 + $0x1088] sm:$0xff]  ;;  %v8455_v55 = vpack.c.bf16 %v5034_v23, %v5028_v48  ;;  %v5078_v48 = vld [vmem:[#allocation14 + $0x11b0] sm:$0xff]  ;;  %v8693_v23 = vpack.c.bf16 %v5085_v7, %v5079_v42 }
 0x6fd   :  { %v8695_v58 = vpack.c.bf16 %v5084_v49, %v5078_v48  ;;  %v5132_v48 = vld [vmem:[#allocation14 + $0x1360] sm:$0xff]  ;;  %v5143_v49 = vld [vmem:[#allocation14 + $0x13b8] sm:$0xff] }
 0x6fe   :  { %8440 = vmatpush1.bf16.msra.mxu0 %v8439_v20  ;;  %v8457_v20 = vpack.c.bf16 %v5047_v57, %v5041_v54  ;;  %v5091_v54 = vld [vmem:[#allocation14 + $0x1218] sm:$0xff]  ;;  %v5097_v57 = vld [vmem:[#allocation14 + $0x1248] sm:$0xff] }
 0x6ff   :  { %8664 = vmatpush1.bf16.msra.mxu1 %v8663_v61  ;;  %8442 = vmatprep.subr.bf16.mxu0 %v8441_v22  ;;  %v5040_v61 = vld [vmem:[#allocation14 + $0x1080] sm:$0xff]  ;;  %v5046_v22 = vld [vmem:[#allocation14 + $0x10b0] sm:$0xff] }
 0x700   :  { %8666 = vmatprep.subr.bf16.mxu1 %v8665_v11  ;;  %v5053_v11 = vld [vmem:[#allocation14 + $0x10e8] sm:$0xff]  ;;  %v8459_v13 = vpack.c.bf16 %v5046_v22, %v5040_v61  ;;  %v5090_v61 = vld [vmem:[#allocation14 + $0x1210] sm:$0xff]  ;;  %v8697_v22 = vpack.c.bf16 %v5097_v57, %v5091_v54 }
 0x701   :  { %v8699_v5 = vpack.c.bf16 %v5096_v10, %v5090_v61  ;;  %v5144_v61 = vld [vmem:[#allocation14 + $0x13c0] sm:$0xff]  ;;  %v5155_v10 = vld [vmem:[#allocation14 + $0x1418] sm:$0xff] }
 0x702   :  { %8444 = vmatpush1.bf16.msra.mxu0 %v8443_v56  ;;  %v8461_v56 = vpack.c.bf16 %v5059_v3, %v5053_v11  ;;  %v5103_v11 = vld [vmem:[#allocation14 + $0x1278] sm:$0xff]  ;;  %v5109_v3 = vld [vmem:[#allocation14 + $0x12a8] sm:$0xff] }
 0x703   :  { %8668 = vmatpush1.bf16.msra.mxu1 %v8667_v18  ;;  %8446 = vmatprep.subr.bf16.mxu0 %v8445_v17  ;;  %v5052_v18 = vld [vmem:[#allocation14 + $0x10e0] sm:$0xff]  ;;  %v5058_v17 = vld [vmem:[#allocation14 + $0x1110] sm:$0xff] }
 0x704   :  { %8670 = vmatprep.subr.bf16.mxu1 %v8669_v32  ;;  %v5065_v32 = vld [vmem:[#allocation14 + $0x1148] sm:$0xff]  ;;  %v8463_v1 = vpack.c.bf16 %v5058_v17, %v5052_v18  ;;  %v5102_v18 = vld [vmem:[#allocation14 + $0x1270] sm:$0xff]  ;;  %v8701_v17 = vpack.c.bf16 %v5109_v3, %v5103_v11 }
 0x705   :  { %v8703_v8 = vpack.c.bf16 %v5108_v19, %v5102_v18  ;;  %v5156_v18 = vld [vmem:[#allocation14 + $0x1420] sm:$0xff]  ;;  %v5167_v19 = vld [vmem:[#allocation14 + $0x1478] sm:$0xff] }
 0x706   :  { %8448 = vmatpush1.bf16.msra.mxu0 %v8447_v24  ;;  %v8465_v24 = vpack.c.bf16 %v5071_v2, %v5065_v32  ;;  %v5115_v32 = vld [vmem:[#allocation14 + $0x12d8] sm:$0xff]  ;;  %v5121_v2 = vld [vmem:[#allocation14 + $0x1308] sm:$0xff] }
 0x707   :  { %8672 = vmatpush1.bf16.msra.mxu1 %v8671_v63  ;;  %8450 = vmatprep.subr.bf16.mxu0 %v8449_v15  ;;  %v5064_v63 = vld [vmem:[#allocation14 + $0x1140] sm:$0xff]  ;;  %v5070_v15 = vld [vmem:[#allocation14 + $0x1170] sm:$0xff] }
 0x708   :  { %8674 = vmatprep.subr.bf16.mxu1 %v8673_v39  ;;  %v5077_v39 = vld [vmem:[#allocation14 + $0x11a8] sm:$0xff]  ;;  %v8467_v27 = vpack.c.bf16 %v5070_v15, %v5064_v63  ;;  %v5114_v63 = vld [vmem:[#allocation14 + $0x12d0] sm:$0xff]  ;;  %v8705_v15 = vpack.c.bf16 %v5121_v2, %v5115_v32 }
 0x709   :  { %v8707_v7 = vpack.c.bf16 %v5120_v50, %v5114_v63  ;;  %v5168_v63 = vld [vmem:[#allocation14 + $0x1480] sm:$0xff]  ;;  %v5179_v50 = vld [vmem:[#allocation14 + $0x14d8] sm:$0xff] }
 0x70a   :  { %8452 = vmatpush1.bf16.msra.mxu0 %v8451_v45  ;;  %v8469_v45 = vpack.c.bf16 %v5083_v40, %v5077_v39  ;;  %v5127_v39 = vld [vmem:[#allocation14 + $0x1338] sm:$0xff]  ;;  %v5133_v40 = vld [vmem:[#allocation14 + $0x1368] sm:$0xff] }
 0x70b   :  { %8676 = vmatpush1.bf16.msra.mxu1 %v8675_v46  ;;  %8454 = vmatprep.subr.bf16.mxu0 %v8453_v47  ;;  %v5076_v46 = vld [vmem:[#allocation14 + $0x11a0] sm:$0xff]  ;;  %v5082_v47 = vld [vmem:[#allocation14 + $0x11d0] sm:$0xff] }
 0x70c   :  { %8678 = vmatprep.subr.bf16.mxu1 %v8677_v52  ;;  %v5089_v52 = vld [vmem:[#allocation14 + $0x1208] sm:$0xff]  ;;  %v8471_v59 = vpack.c.bf16 %v5082_v47, %v5076_v46  ;;  %v5126_v46 = vld [vmem:[#allocation14 + $0x1330] sm:$0xff]  ;;  %v8709_v47 = vpack.c.bf16 %v5133_v40, %v5127_v39 }
 0x70d   :  { %v8711_v57 = vpack.c.bf16 %v5132_v48, %v5126_v46  ;;  %v5180_v46 = vld [vmem:[#allocation14 + $0x14e0] sm:$0xff]  ;;  %v4523_v48 = vld [vmem:[#allocation14 + $0x58] sm:$0xff] }
 0x70e   :  { %8456 = vmatpush1.bf16.msra.mxu0 %v8455_v55  ;;  %v8473_v55 = vpack.c.bf16 %v5095_v53, %v5089_v52  ;;  %v5139_v52 = vld [vmem:[#allocation14 + $0x1398] sm:$0xff]  ;;  %v5145_v53 = vld [vmem:[#allocation14 + $0x13c8] sm:$0xff] }
 0x70f   :  { %8680 = vmatpush1.bf16.msra.mxu1 %v8679_v60  ;;  %8458 = vmatprep.subr.bf16.mxu0 %v8457_v20  ;;  %v5088_v60 = vld [vmem:[#allocation14 + $0x1200] sm:$0xff]  ;;  %v5094_v20 = vld [vmem:[#allocation14 + $0x1230] sm:$0xff] }
 0x710   :  { %8682 = vmatprep.subr.bf16.mxu1 %v8681_v62  ;;  %v5101_v62 = vld [vmem:[#allocation14 + $0x1268] sm:$0xff]  ;;  %v8475_v4 = vpack.c.bf16 %v5094_v20, %v5088_v60  ;;  %v5138_v60 = vld [vmem:[#allocation14 + $0x1390] sm:$0xff]  ;;  %v8713_v20 = vpack.c.bf16 %v5145_v53, %v5139_v52  ;;  %v4516_v53 = vld [vmem:[#allocation14 + $0x20] sm:$0xff] }
 0x711   :  { %v8715_v3 = vpack.c.bf16 %v5144_v61, %v5138_v60  ;;  %v4528_v60 = vld [vmem:[#allocation14 + $0x80] sm:$0xff]  ;;  %v4541_v61 = vld [vmem:[#allocation14 + $0xe8] sm:$0xff] }
 0x712   :  { %8460 = vmatpush1.bf16.msra.mxu0 %v8459_v13  ;;  %v8477_v13 = vpack.c.bf16 %v5107_v43, %v5101_v62  ;;  %v5151_v62 = vld [vmem:[#allocation14 + $0x13f8] sm:$0xff]  ;;  %v5157_v43 = vld [vmem:[#allocation14 + $0x1428] sm:$0xff] }
 0x713   :  { %8684 = vmatpush1.bf16.msra.mxu1 %v8683_v12  ;;  %8462 = vmatprep.subr.bf16.mxu0 %v8461_v56  ;;  %v5100_v12 = vld [vmem:[#allocation14 + $0x1260] sm:$0xff]  ;;  %v5106_v56 = vld [vmem:[#allocation14 + $0x1290] sm:$0xff] }
 0x714   :  { %8686 = vmatprep.subr.bf16.mxu1 %v8685_v21  ;;  %v5113_v21 = vld [vmem:[#allocation14 + $0x12c8] sm:$0xff]  ;;  %v8479_v0 = vpack.c.bf16 %v5106_v56, %v5100_v12  ;;  %v5150_v12 = vld [vmem:[#allocation14 + $0x13f0] sm:$0xff]  ;;  %v8717_v56 = vpack.c.bf16 %v5157_v43, %v5151_v62  ;;  %v4540_v43 = vld [vmem:[#allocation14 + $0xe0] sm:$0xff] }
 0x715   :  { %v8719_v2 = vpack.c.bf16 %v5156_v18, %v5150_v12  ;;  %v4552_v12 = vld [vmem:[#allocation14 + $0x140] sm:$0xff]  ;;  %v4565_v18 = vld [vmem:[#allocation14 + $0x1a8] sm:$0xff] }
 0x716   :  { %8464 = vmatpush1.bf16.msra.mxu0 %v8463_v1  ;;  %v8481_v1 = vpack.c.bf16 %v5119_v31, %v5113_v21  ;;  %v5163_v21 = vld [vmem:[#allocation14 + $0x1458] sm:$0xff]  ;;  %v5169_v31 = vld [vmem:[#allocation14 + $0x1488] sm:$0xff] }
 0x717   :  { %8688 = vmatpush1.bf16.msra.mxu1 %v8687_v6  ;;  %8466 = vmatprep.subr.bf16.mxu0 %v8465_v24  ;;  %v5112_v6 = vld [vmem:[#allocation14 + $0x12c0] sm:$0xff]  ;;  %v5118_v24 = vld [vmem:[#allocation14 + $0x12f0] sm:$0xff] }
 0x718   :  { %8690 = vmatprep.subr.bf16.mxu1 %v8689_v51  ;;  %v5125_v51 = vld [vmem:[#allocation14 + $0x1328] sm:$0xff]  ;;  %v8483_v42 = vpack.c.bf16 %v5118_v24, %v5112_v6  ;;  %v5162_v6 = vld [vmem:[#allocation14 + $0x1450] sm:$0xff]  ;;  %v8721_v24 = vpack.c.bf16 %v5169_v31, %v5163_v21  ;;  %v4564_v31 = vld [vmem:[#allocation14 + $0x1a0] sm:$0xff] }
 0x719   :  { %v8723_v40 = vpack.c.bf16 %v5168_v63, %v5162_v6  ;;  %v4582_v6 = vld [vmem:[#allocation14 + $0x230] sm:$0xff]  ;;  %v4595_v63 = vld [vmem:[#allocation14 + $0x298] sm:$0xff] }
 0x71a   :  { %8468 = vmatpush1.bf16.msra.mxu0 %v8467_v27  ;;  %v8485_v27 = vpack.c.bf16 %v5131_v28, %v5125_v51  ;;  %v5175_v51 = vld [vmem:[#allocation14 + $0x14b8] sm:$0xff]  ;;  %v5181_v28 = vld [vmem:[#allocation14 + $0x14e8] sm:$0xff] }
 0x71b   :  { %8692 = vmatpush1.bf16.msra.mxu1 %v8691_v44  ;;  %8470 = vmatprep.subr.bf16.mxu0 %v8469_v45  ;;  %v5124_v44 = vld [vmem:[#allocation14 + $0x1320] sm:$0xff]  ;;  %v5130_v45 = vld [vmem:[#allocation14 + $0x1350] sm:$0xff] }
 0x71c   :  { %8694 = vmatprep.subr.bf16.mxu1 %v8693_v23  ;;  %v5137_v23 = vld [vmem:[#allocation14 + $0x1388] sm:$0xff]  ;;  %v8487_v54 = vpack.c.bf16 %v5130_v45, %v5124_v44  ;;  %v5174_v44 = vld [vmem:[#allocation14 + $0x14b0] sm:$0xff]  ;;  %v8725_v45 = vpack.c.bf16 %v5181_v28, %v5175_v51  ;;  %v4588_v51 = vld [vmem:[#allocation14 + $0x260] sm:$0xff] }
 0x71d   :  { %v4594_v28 = vld [vmem:[#allocation14 + $0x290] sm:$0xff] }
 0x71e   :  { %8472 = vmatpush1.bf16.msra.mxu0 %v8471_v59  ;;  %v8489_v59 = vpack.c.bf16 %v5143_v49, %v5137_v23  ;;  %v8727_v49 = vpack.c.bf16 %v5180_v46, %v5174_v44  ;;  %v4606_v44 = vld [vmem:[#allocation14 + $0x2f0] sm:$0xff]  ;;  %v4619_v46 = vld [vmem:[#allocation14 + $0x358] sm:$0xff] }
 0x71f   :  { %8696 = vmatpush1.bf16.msra.mxu1 %v8695_v58  ;;  %8474 = vmatprep.subr.bf16.mxu0 %v8473_v55  ;;  %v5136_v58 = vld [vmem:[#allocation14 + $0x1380] sm:$0xff]  ;;  %v5142_v55 = vld [vmem:[#allocation14 + $0x13b0] sm:$0xff] }
 0x720   :  { %8698 = vmatprep.subr.bf16.mxu1 %v8697_v22  ;;  %v5149_v22 = vld [vmem:[#allocation14 + $0x13e8] sm:$0xff]  ;;  %v8491_v11 = vpack.c.bf16 %v5142_v55, %v5136_v58 }
 0x721   :  { %5423 = vmatmul.mubr.f32.vlgmr.msra.gmra.mrb[22].mxu0 %v9742_v34 }
 0x722   :  { %5707 = vmatmul.mubr.f32.vlgmr.msra.gmra.mrb[22].mxu1 %v9742_v34  ;;  %8476 = vmatpush1.bf16.msra.mxu0 %v8475_v4  ;;  %v8493_v4 = vpack.c.bf16 %v5155_v10, %v5149_v22  ;;  %v4547_v22 = vld [vmem:[#allocation14 + $0x118] sm:$0xff] }
 0x723   :  { %8700 = vmatpush1.bf16.msra.mxu1 %v8699_v5  ;;  %8478 = vmatprep.subr.bf16.mxu0 %v8477_v13  ;;  %v5148_v5 = vld [vmem:[#allocation14 + $0x13e0] sm:$0xff]  ;;  %v5154_v13 = vld [vmem:[#allocation14 + $0x1410] sm:$0xff]  ;;  %v8737_v62 = vpack.c.bf16 %v4547_v22, %v4541_v61 }
 0x724   :  { %8702 = vmatprep.subr.bf16.mxu1 %v8701_v17  ;;  %5493 = vmatprep.mubr.f32.mxu0 %v9296_v35  ;;  %v5161_v17 = vld [vmem:[#allocation14 + $0x1448] sm:$0xff]  ;;  %v8495_v32 = vpack.c.bf16 %v5154_v13, %v5148_v5  ;;  %v4636_v22 = vld [vmem:[#allocation14 + $0x3e0] sm:$0xff] }
 0x725   :  { %5777 = vmatprep.mubr.f32.mxu1 %v9296_v35 }
 0x726   :  { %8480 = vmatpush1.bf16.msra.mxu0 %v8479_v0  ;;  %v8497_v0 = vpack.c.bf16 %v5167_v19, %v5161_v17  ;;  %v4571_v17 = vld [vmem:[#allocation14 + $0x1d8] sm:$0xff] }
 0x727   :  { %8704 = vmatpush1.bf16.msra.mxu1 %v8703_v8  ;;  %8482 = vmatprep.subr.bf16.mxu0 %v8481_v1  ;;  %v5160_v8 = vld [vmem:[#allocation14 + $0x1440] sm:$0xff]  ;;  %v5166_v1 = vld [vmem:[#allocation14 + $0x1470] sm:$0xff]  ;;  %v8745_v21 = vpack.c.bf16 %v4571_v17, %v4565_v18 }
 0x728   :  { %8706 = vmatprep.subr.bf16.mxu1 %v8705_v15  ;;  %v5173_v15 = vld [vmem:[#allocation14 + $0x14a8] sm:$0xff]  ;;  %v8499_v39 = vpack.c.bf16 %v5166_v1, %v5160_v8  ;;  %v4576_v1 = vld [vmem:[#allocation14 + $0x200] sm:$0xff] }
 0x729   :  { %v4660_v17 = vld [vmem:[#allocation14 + $0x4a0] sm:$0xff] }
 0x72a   :  { %8484 = vmatpush1.bf16.msra.mxu0 %v8483_v42  ;;  %v8501_v42 = vpack.c.bf16 %v5179_v50, %v5173_v15  ;;  %v8751_v15 = vpack.c.bf16 %v4582_v6, %v4576_v1  ;;  %v4691_v1 = vld [vmem:[#allocation14 + $0x598] sm:$0xff] }
 0x72b   :  { %8708 = vmatpush1.bf16.msra.mxu1 %v8707_v7  ;;  %8486 = vmatprep.subr.bf16.mxu0 %v8485_v27  ;;  %v5172_v7 = vld [vmem:[#allocation14 + $0x14a0] sm:$0xff]  ;;  %v5178_v27 = vld [vmem:[#allocation14 + $0x14d0] sm:$0xff] }
 0x72c   :  { %8710 = vmatprep.subr.bf16.mxu1 %v8709_v47  ;;  %v4517_v47 = vld [vmem:[#allocation14 + $0x28] sm:$0xff]  ;;  %v8503_v23 = vpack.c.bf16 %v5178_v27, %v5172_v7  ;;  %v4600_v27 = vld [vmem:[#allocation14 + $0x2c0] sm:$0xff] }
 0x72d   :  { %v8729_v52 = vpack.c.bf16 %v4523_v48, %v4517_v47  ;;  %v8759_v47 = vpack.c.bf16 %v4606_v44, %v4600_v27  ;;  %v4715_v27 = vld [vmem:[#allocation14 + $0x658] sm:$0xff] }
 0x72e   :  { %8488 = vmatpush1.bf16.msra.mxu0 %v8487_v54  ;;  %v4522_v54 = vld [vmem:[#allocation14 + $0x50] sm:$0xff] }
 0x72f   :  { %8712 = vmatpush1.bf16.msra.mxu1 %v8711_v57  ;;  %8490 = vmatprep.subr.bf16.mxu0 %v8489_v59  ;;  %v4529_v57 = vld [vmem:[#allocation14 + $0x88] sm:$0xff]  ;;  %v4535_v59 = vld [vmem:[#allocation14 + $0xb8] sm:$0xff]  ;;  %v8731_v58 = vpack.c.bf16 %v4522_v54, %v4516_v53 }
 0x730   :  { %8714 = vmatprep.subr.bf16.mxu1 %v8713_v20  ;;  %v8733_v55 = vpack.c.bf16 %v4535_v59, %v4529_v57  ;;  %v4534_v20 = vld [vmem:[#allocation14 + $0xb0] sm:$0xff]  ;;  %v4631_v53 = vld [vmem:[#allocation14 + $0x3b8] sm:$0xff]  ;;  %v4624_v59 = vld [vmem:[#allocation14 + $0x380] sm:$0xff] }
 0x731   :  { %v8735_v10 = vpack.c.bf16 %v4534_v20, %v4528_v60  ;;  %v4643_v60 = vld [vmem:[#allocation14 + $0x418] sm:$0xff] }
 0x732   :  { %8492 = vmatpush1.bf16.msra.mxu0 %v8491_v11  ;;  %v4546_v11 = vld [vmem:[#allocation14 + $0x110] sm:$0xff] }
 0x733   :  { %8716 = vmatpush1.bf16.msra.mxu1 %v8715_v3  ;;  %8494 = vmatprep.subr.bf16.mxu0 %v8493_v4  ;;  %v4553_v3 = vld [vmem:[#allocation14 + $0x148] sm:$0xff]  ;;  %v4559_v4 = vld [vmem:[#allocation14 + $0x178] sm:$0xff]  ;;  %v8739_v5 = vpack.c.bf16 %v4546_v11, %v4540_v43 }
 0x734   :  { %8718 = vmatprep.subr.bf16.mxu1 %v8717_v56  ;;  %v8741_v13 = vpack.c.bf16 %v4559_v4, %v4553_v3  ;;  %v4558_v56 = vld [vmem:[#allocation14 + $0x170] sm:$0xff]  ;;  %v4655_v43 = vld [vmem:[#allocation14 + $0x478] sm:$0xff]  ;;  %v4648_v4 = vld [vmem:[#allocation14 + $0x440] sm:$0xff] }
 0x735   :  { %v8743_v19 = vpack.c.bf16 %v4558_v56, %v4552_v12  ;;  %v4667_v12 = vld [vmem:[#allocation14 + $0x4d8] sm:$0xff] }
 0x736   :  { %8496 = vmatpush1.bf16.msra.mxu0 %v8495_v32  ;;  %v4577_v32 = vld [vmem:[#allocation14 + $0x208] sm:$0xff] }
 0x737   :  { %8720 = vmatpush1.bf16.msra.mxu1 %v8719_v2  ;;  %8498 = vmatprep.subr.bf16.mxu0 %v8497_v0  ;;  %v4583_v2 = vld [vmem:[#allocation14 + $0x238] sm:$0xff] }
 0x738   :  { %8722 = vmatprep.subr.bf16.mxu1 %v8721_v24  ;;  %v8749_v8 = vpack.c.bf16 %v4583_v2, %v4577_v32  ;;  %v4589_v24 = vld [vmem:[#allocation14 + $0x268] sm:$0xff]  ;;  %v4672_v2 = vld [vmem:[#allocation14 + $0x500] sm:$0xff] }
 0x739   :  { %v8753_v50 = vpack.c.bf16 %v4595_v63, %v4589_v24  ;;  %v4684_v63 = vld [vmem:[#allocation14 + $0x560] sm:$0xff] }
 0x73a   :  { %8500 = vmatpush1.bf16.msra.mxu0 %v8499_v39  ;;  %v4601_v39 = vld [vmem:[#allocation14 + $0x2c8] sm:$0xff] }
 0x73b   :  { %8724 = vmatpush1.bf16.msra.mxu1 %v8723_v40  ;;  %8502 = vmatprep.subr.bf16.mxu0 %v8501_v42  ;;  %v4607_v40 = vld [vmem:[#allocation14 + $0x2f8] sm:$0xff]  ;;  %v8755_v42 = vpack.c.bf16 %v4594_v28, %v4588_v51 }
 0x73c   :  { %8726 = vmatprep.subr.bf16.mxu1 %v8725_v45  ;;  %v8757_v7 = vpack.c.bf16 %v4607_v40, %v4601_v39  ;;  %v4613_v45 = vld [vmem:[#allocation14 + $0x328] sm:$0xff]  ;;  %v4703_v51 = vld [vmem:[#allocation14 + $0x5f8] sm:$0xff]  ;;  %v4696_v40 = vld [vmem:[#allocation14 + $0x5c0] sm:$0xff] }
 0x73d   :  { %v8761_v48 = vpack.c.bf16 %v4619_v46, %v4613_v45  ;;  %v4708_v46 = vld [vmem:[#allocation14 + $0x620] sm:$0xff] }
 0x73e   :  { %8504 = vmatpush1.bf16.msra.mxu0 %v8503_v23  ;;  %v4612_v23 = vld [vmem:[#allocation14 + $0x320] sm:$0xff] }
 0x73f   :  { %8728 = vmatpush1.bf16.msra.mxu1 %v8727_v49  ;;  %8730 = vmatprep.subr.bf16.mxu0 %v8729_v52  ;;  %v4618_v49 = vld [vmem:[#allocation14 + $0x350] sm:$0xff]  ;;  %v4625_v52 = vld [vmem:[#allocation14 + $0x388] sm:$0xff] }
 0x740   :  { %v8763_v54 = vpack.c.bf16 %v4618_v49, %v4612_v23  ;;  %v8765_v57 = vpack.c.bf16 %v4631_v53, %v4625_v52  ;;  %v4727_v23 = vld [vmem:[#allocation14 + $0x6b8] sm:$0xff]  ;;  %v4720_v53 = vld [vmem:[#allocation14 + $0x680] sm:$0xff] }
 0x741   :  { %5494 = vmatmul.mubr.f32.vlgmr.msra.gmra.mrb[22].mxu0 %v9745_v30 }
 0x742   :  { %5778 = vmatmul.mubr.f32.vlgmr.msra.gmra.mrb[22].mxu1 %v9745_v30  ;;  %8732 = vmatpush1.bf16.msra.mxu0 %v8731_v58  ;;  %v4630_v58 = vld [vmem:[#allocation14 + $0x3b0] sm:$0xff] }
 0x743   :  { %5848 = vmatprep.mubr.f32.mxu0 %v9720_v26  ;;  %8734 = vmatprep.subr.bf16.mxu0 %v8733_v55  ;;  %v4570_v26 = vld [vmem:[#allocation14 + $0x1d0] sm:$0xff]  ;;  %v4637_v55 = vld [vmem:[#allocation14 + $0x3e8] sm:$0xff]  ;;  %v8767_v20 = vpack.c.bf16 %v4630_v58, %v4624_v59  ;;  %v4739_v59 = vld [vmem:[#allocation14 + $0x718] sm:$0xff] }
 0x744   :  { %v8747_v0 = vpack.c.bf16 %v4570_v26, %v4564_v31  ;;  %v8769_v61 = vpack.c.bf16 %v4643_v60, %v4637_v55  ;;  %v4679_v31 = vld [vmem:[#allocation14 + $0x538] sm:$0xff]  ;;  %v4732_v60 = vld [vmem:[#allocation14 + $0x6e0] sm:$0xff] }
 0x746   :  { %8736 = vmatpush1.bf16.msra.mxu0 %v8735_v10  ;;  %v4642_v10 = vld [vmem:[#allocation14 + $0x410] sm:$0xff] }
 0x747   :  { %8738 = vmatprep.subr.bf16.mxu0 %v8737_v62  ;;  %v4649_v62 = vld [vmem:[#allocation14 + $0x448] sm:$0xff]  ;;  %v8771_v11 = vpack.c.bf16 %v4642_v10, %v4636_v22  ;;  %v4751_v22 = vld [vmem:[#allocation14 + $0x778] sm:$0xff] }
 0x748   :  { %v8773_v3 = vpack.c.bf16 %v4655_v43, %v4649_v62  ;;  %v4744_v43 = vld [vmem:[#allocation14 + $0x740] sm:$0xff] }
 0x74a   :  { %8740 = vmatpush1.bf16.msra.mxu0 %v8739_v5  ;;  %v4654_v5 = vld [vmem:[#allocation14 + $0x470] sm:$0xff] }
 0x74b   :  { %8742 = vmatprep.subr.bf16.mxu0 %v8741_v13  ;;  %v4661_v13 = vld [vmem:[#allocation14 + $0x4a8] sm:$0xff]  ;;  %v8775_v56 = vpack.c.bf16 %v4654_v5, %v4648_v4  ;;  %v4763_v4 = vld [vmem:[#allocation14 + $0x7d8] sm:$0xff] }
 0x74c   :  { %v8777_v18 = vpack.c.bf16 %v4667_v12, %v4661_v13  ;;  %v4762_v13 = vld [vmem:[#allocation14 + $0x7d0] sm:$0xff]  ;;  %v4769_v12 = vld [vmem:[#allocation14 + $0x808] sm:$0xff] }
 0x74e   :  { %8744 = vmatpush1.bf16.msra.mxu0 %v8743_v19  ;;  %v4666_v19 = vld [vmem:[#allocation14 + $0x4d0] sm:$0xff] }
 0x74f   :  { %8746 = vmatprep.subr.bf16.mxu0 %v8745_v21  ;;  %v4673_v21 = vld [vmem:[#allocation14 + $0x508] sm:$0xff]  ;;  %v8779_v26 = vpack.c.bf16 %v4666_v19, %v4660_v17  ;;  %v4768_v19 = vld [vmem:[#allocation14 + $0x800] sm:$0xff] }
 0x750   :  { %v8781_v32 = vpack.c.bf16 %v4679_v31, %v4673_v21  ;;  %v4774_v21 = vld [vmem:[#allocation14 + $0x830] sm:$0xff]  ;;  %v4781_v31 = vld [vmem:[#allocation14 + $0x868] sm:$0xff] }
 0x752   :  { %8748 = vmatpush1.bf16.msra.mxu0 %v8747_v0  ;;  %v4678_v0 = vld [vmem:[#allocation14 + $0x530] sm:$0xff] }
 0x753   :  { %8750 = vmatprep.subr.bf16.mxu0 %v8749_v8  ;;  %v4685_v8 = vld [vmem:[#allocation14 + $0x568] sm:$0xff]  ;;  %v8783_v6 = vpack.c.bf16 %v4678_v0, %v4672_v2  ;;  %v4780_v0 = vld [vmem:[#allocation14 + $0x860] sm:$0xff] }
 0x754   :  { %v8785_v24 = vpack.c.bf16 %v4691_v1, %v4685_v8  ;;  %v4786_v8 = vld [vmem:[#allocation14 + $0x890] sm:$0xff]  ;;  %v4793_v1 = vld [vmem:[#allocation14 + $0x8c8] sm:$0xff] }
 0x756   :  { %8752 = vmatpush1.bf16.msra.mxu0 %v8751_v15  ;;  %v4690_v15 = vld [vmem:[#allocation14 + $0x590] sm:$0xff] }
 0x757   :  { %8754 = vmatprep.subr.bf16.mxu0 %v8753_v50  ;;  %v4697_v50 = vld [vmem:[#allocation14 + $0x5c8] sm:$0xff]  ;;  %v8787_v28 = vpack.c.bf16 %v4690_v15, %v4684_v63  ;;  %v4792_v15 = vld [vmem:[#allocation14 + $0x8c0] sm:$0xff] }
 0x758   :  { %v8789_v39 = vpack.c.bf16 %v4703_v51, %v4697_v50  ;;  %v4798_v50 = vld [vmem:[#allocation14 + $0x8f0] sm:$0xff]  ;;  %v4805_v51 = vld [vmem:[#allocation14 + $0x928] sm:$0xff] }
 0x75a   :  { %8756 = vmatpush1.bf16.msra.mxu0 %v8755_v42  ;;  %v4702_v42 = vld [vmem:[#allocation14 + $0x5f0] sm:$0xff] }
 0x75b   :  { %8758 = vmatprep.subr.bf16.mxu0 %v8757_v7  ;;  %v4709_v7 = vld [vmem:[#allocation14 + $0x628] sm:$0xff]  ;;  %v8791_v44 = vpack.c.bf16 %v4702_v42, %v4696_v40  ;;  %v4804_v42 = vld [vmem:[#allocation14 + $0x920] sm:$0xff] }
 0x75c   :  { %v8793_v45 = vpack.c.bf16 %v4715_v27, %v4709_v7  ;;  %v4810_v7 = vld [vmem:[#allocation14 + $0x950] sm:$0xff]  ;;  %v4817_v27 = vld [vmem:[#allocation14 + $0x988] sm:$0xff] }
 0x75e   :  { %8760 = vmatpush1.bf16.msra.mxu0 %v8759_v47  ;;  %v4714_v47 = vld [vmem:[#allocation14 + $0x650] sm:$0xff] }
 0x75f   :  { %8762 = vmatprep.subr.bf16.mxu0 %v8761_v48  ;;  %v4721_v48 = vld [vmem:[#allocation14 + $0x688] sm:$0xff]  ;;  %v8795_v49 = vpack.c.bf16 %v4714_v47, %v4708_v46  ;;  %v4816_v47 = vld [vmem:[#allocation14 + $0x980] sm:$0xff] }
 0x760   :  { %v8797_v52 = vpack.c.bf16 %v4727_v23, %v4721_v48  ;;  %v4822_v48 = vld [vmem:[#allocation14 + $0x9b0] sm:$0xff]  ;;  %v4829_v23 = vld [vmem:[#allocation14 + $0x9e8] sm:$0xff] }
 0x762   :  { %8764 = vmatpush1.bf16.msra.mxu0 %v8763_v54  ;;  %v4726_v54 = vld [vmem:[#allocation14 + $0x6b0] sm:$0xff] }
 0x763   :  { %8766 = vmatprep.subr.bf16.mxu0 %v8765_v57  ;;  %v4733_v57 = vld [vmem:[#allocation14 + $0x6e8] sm:$0xff]  ;;  %v8799_v58 = vpack.c.bf16 %v4726_v54, %v4720_v53  ;;  %v4828_v54 = vld [vmem:[#allocation14 + $0x9e0] sm:$0xff] }
 0x764   :  { %v8801_v55 = vpack.c.bf16 %v4739_v59, %v4733_v57  ;;  %v4834_v57 = vld [vmem:[#allocation14 + $0xa10] sm:$0xff]  ;;  %v4841_v59 = vld [vmem:[#allocation14 + $0xa48] sm:$0xff] }
 0x766   :  { %8768 = vmatpush1.bf16.msra.mxu0 %v8767_v20  ;;  %v4738_v20 = vld [vmem:[#allocation14 + $0x710] sm:$0xff] }
 0x767   :  { %8770 = vmatprep.subr.bf16.mxu0 %v8769_v61  ;;  %v4745_v61 = vld [vmem:[#allocation14 + $0x748] sm:$0xff]  ;;  %v8803_v10 = vpack.c.bf16 %v4738_v20, %v4732_v60  ;;  %v4840_v20 = vld [vmem:[#allocation14 + $0xa40] sm:$0xff] }
 0x768   :  { %v8805_v62 = vpack.c.bf16 %v4751_v22, %v4745_v61  ;;  %v4846_v61 = vld [vmem:[#allocation14 + $0xa70] sm:$0xff]  ;;  %v4853_v22 = vld [vmem:[#allocation14 + $0xaa8] sm:$0xff] }
 0x76a   :  { %8772 = vmatpush1.bf16.msra.mxu0 %v8771_v11  ;;  %v4750_v11 = vld [vmem:[#allocation14 + $0x770] sm:$0xff] }
 0x76b   :  { %8774 = vmatprep.subr.bf16.mxu0 %v8773_v3  ;;  %v4757_v3 = vld [vmem:[#allocation14 + $0x7a8] sm:$0xff] }
 0x76c   :  { %v8809_v5 = vpack.c.bf16 %v4763_v4, %v4757_v3  ;;  %v4858_v3 = vld [vmem:[#allocation14 + $0xad0] sm:$0xff]  ;;  %v4865_v4 = vld [vmem:[#allocation14 + $0xb08] sm:$0xff] }
 0x76e   :  { %8776 = vmatpush1.bf16.msra.mxu0 %v8775_v56  ;;  %v4775_v56 = vld [vmem:[#allocation14 + $0x838] sm:$0xff] }
 0x76f   :  { %8778 = vmatprep.subr.bf16.mxu0 %v8777_v18  ;;  %v8813_v17 = vpack.c.bf16 %v4775_v56, %v4769_v12  ;;  %v4870_v12 = vld [vmem:[#allocation14 + $0xb30] sm:$0xff]  ;;  %v4877_v56 = vld [vmem:[#allocation14 + $0xb68] sm:$0xff] }
 0x772   :  { %8780 = vmatpush1.bf16.msra.mxu0 %v8779_v26  ;;  %v4787_v26 = vld [vmem:[#allocation14 + $0x898] sm:$0xff] }
 0x773   :  { %8782 = vmatprep.subr.bf16.mxu0 %v8781_v32  ;;  %v8815_v32 = vpack.c.bf16 %v4774_v21, %v4768_v19  ;;  %v8817_v2 = vpack.c.bf16 %v4787_v26, %v4781_v31  ;;  %v4876_v21 = vld [vmem:[#allocation14 + $0xb60] sm:$0xff]  ;;  %v4882_v31 = vld [vmem:[#allocation14 + $0xb90] sm:$0xff]  ;;  %v4889_v26 = vld [vmem:[#allocation14 + $0xbc8] sm:$0xff] }
 0x776   :  { %8784 = vmatpush1.bf16.msra.mxu0 %v8783_v6  ;;  %v4799_v6 = vld [vmem:[#allocation14 + $0x8f8] sm:$0xff] }
 0x777   :  { %8786 = vmatprep.subr.bf16.mxu0 %v8785_v24  ;;  %v8819_v24 = vpack.c.bf16 %v4786_v8, %v4780_v0  ;;  %v8821_v63 = vpack.c.bf16 %v4799_v6, %v4793_v1  ;;  %v4888_v8 = vld [vmem:[#allocation14 + $0xbc0] sm:$0xff]  ;;  %v4894_v1 = vld [vmem:[#allocation14 + $0xbf0] sm:$0xff]  ;;  %v4901_v6 = vld [vmem:[#allocation14 + $0xc28] sm:$0xff] }
 0x77a   :  { %8788 = vmatpush1.bf16.msra.mxu0 %v8787_v28  ;;  %v4811_v28 = vld [vmem:[#allocation14 + $0x958] sm:$0xff] }
 0x77b   :  { %8790 = vmatprep.subr.bf16.mxu0 %v8789_v39  ;;  %v8823_v39 = vpack.c.bf16 %v4798_v50, %v4792_v15  ;;  %v8825_v40 = vpack.c.bf16 %v4811_v28, %v4805_v51  ;;  %v4900_v50 = vld [vmem:[#allocation14 + $0xc20] sm:$0xff]  ;;  %v4906_v51 = vld [vmem:[#allocation14 + $0xc50] sm:$0xff]  ;;  %v4913_v28 = vld [vmem:[#allocation14 + $0xc88] sm:$0xff] }
 0x77e   :  { %8792 = vmatpush1.bf16.msra.mxu0 %v8791_v44  ;;  %v4823_v44 = vld [vmem:[#allocation14 + $0x9b8] sm:$0xff] }
 0x77f   :  { %8794 = vmatprep.subr.bf16.mxu0 %v8793_v45  ;;  %v8827_v45 = vpack.c.bf16 %v4810_v7, %v4804_v42  ;;  %v8829_v46 = vpack.c.bf16 %v4823_v44, %v4817_v27  ;;  %v4912_v7 = vld [vmem:[#allocation14 + $0xc80] sm:$0xff]  ;;  %v4918_v27 = vld [vmem:[#allocation14 + $0xcb0] sm:$0xff]  ;;  %v4925_v44 = vld [vmem:[#allocation14 + $0xce8] sm:$0xff] }
 0x781   :  { %5849 = vmatmul.mubr.f32.vlgmr.msra.gmra.mrb[24].mxu0 %v9714_v25  ;;  %v8807_v25 = vpack.c.bf16 %v4750_v11, %v4744_v43  ;;  %v4852_v11 = vld [vmem:[#allocation14 + $0xaa0] sm:$0xff] }
 0x782   :  { %8796 = vmatpush1.bf16.msra.mxu0 %v8795_v49  ;;  %5919 = vmatprep.mubr.f32.mxu0 %v9723_v29  ;;  %v4756_v29 = vld [vmem:[#allocation14 + $0x7a0] sm:$0xff]  ;;  %v4835_v49 = vld [vmem:[#allocation14 + $0xa18] sm:$0xff] }
 0x783   :  { %8798 = vmatprep.subr.bf16.mxu0 %v8797_v52  ;;  %v8811_v18 = vpack.c.bf16 %v4762_v13, %v4756_v29  ;;  %v8831_v52 = vpack.c.bf16 %v4822_v48, %v4816_v47  ;;  %v8833_v53 = vpack.c.bf16 %v4835_v49, %v4829_v23  ;;  %v4864_v13 = vld [vmem:[#allocation14 + $0xb00] sm:$0xff]  ;;  %v4930_v23 = vld [vmem:[#allocation14 + $0xd10] sm:$0xff]  ;;  %v4937_v49 = vld [vmem:[#allocation14 + $0xd48] sm:$0xff] }
 0x784   :  { %v4924_v48 = vld [vmem:[#allocation14 + $0xce0] sm:$0xff] }
 0x786   :  { %8800 = vmatpush1.bf16.msra.mxu0 %v8799_v58  ;;  %v4847_v58 = vld [vmem:[#allocation14 + $0xa78] sm:$0xff] }
 0x787   :  { %8802 = vmatprep.subr.bf16.mxu0 %v8801_v55  ;;  %v8835_v55 = vpack.c.bf16 %v4834_v57, %v4828_v54  ;;  %v8837_v60 = vpack.c.bf16 %v4847_v58, %v4841_v59  ;;  %v4936_v57 = vld [vmem:[#allocation14 + $0xd40] sm:$0xff]  ;;  %v4942_v59 = vld [vmem:[#allocation14 + $0xd70] sm:$0xff]  ;;  %v4949_v58 = vld [vmem:[#allocation14 + $0xda8] sm:$0xff] }
 0x78a   :  { %8804 = vmatpush1.bf16.msra.mxu0 %v8803_v10  ;;  %v4859_v10 = vld [vmem:[#allocation14 + $0xad8] sm:$0xff] }
 0x78b   :  { %8806 = vmatprep.subr.bf16.mxu0 %v8805_v62  ;;  %v8839_v62 = vpack.c.bf16 %v4846_v61, %v4840_v20  ;;  %v8841_v43 = vpack.c.bf16 %v4859_v10, %v4853_v22  ;;  %v4954_v20 = vld [vmem:[#allocation14 + $0xdd0] sm:$0xff]  ;;  %v4961_v61 = vld [vmem:[#allocation14 + $0xe08] sm:$0xff]  ;;  %v4967_v22 = vld [vmem:[#allocation14 + $0xe38] sm:$0xff] }
 0x78e   :  { %8808 = vmatpush1.bf16.msra.mxu0 %v8807_v25  ;;  %v4871_v25 = vld [vmem:[#allocation14 + $0xb38] sm:$0xff] }
 0x78f   :  { %8810 = vmatprep.subr.bf16.mxu0 %v8809_v5  ;;  %v8843_v5 = vpack.c.bf16 %v4858_v3, %v4852_v11  ;;  %v8845_v29 = vpack.c.bf16 %v4871_v25, %v4865_v4  ;;  %v4966_v11 = vld [vmem:[#allocation14 + $0xe30] sm:$0xff]  ;;  %v4973_v3 = vld [vmem:[#allocation14 + $0xe68] sm:$0xff]  ;;  %v4979_v4 = vld [vmem:[#allocation14 + $0xe98] sm:$0xff] }
 0x792   :  { %8812 = vmatpush1.bf16.msra.mxu0 %v8811_v18  ;;  %v4883_v18 = vld [vmem:[#allocation14 + $0xb98] sm:$0xff] }
 0x793   :  { %8814 = vmatprep.subr.bf16.mxu0 %v8813_v17  ;;  %v8847_v17 = vpack.c.bf16 %v4870_v12, %v4864_v13  ;;  %v8849_v19 = vpack.c.bf16 %v4883_v18, %v4877_v56  ;;  %v4978_v13 = vld [vmem:[#allocation14 + $0xe90] sm:$0xff]  ;;  %v4985_v12 = vld [vmem:[#allocation14 + $0xec8] sm:$0xff]  ;;  %v4991_v56 = vld [vmem:[#allocation14 + $0xef8] sm:$0xff] }
 0x796   :  { %8816 = vmatpush1.bf16.msra.mxu0 %v8815_v32  ;;  %v4895_v32 = vld [vmem:[#allocation14 + $0xbf8] sm:$0xff] }
 0x797   :  { %8818 = vmatprep.subr.bf16.mxu0 %v8817_v2  ;;  %v8851_v2 = vpack.c.bf16 %v4882_v31, %v4876_v21  ;;  %v8853_v0 = vpack.c.bf16 %v4895_v32, %v4889_v26  ;;  %v4990_v21 = vld [vmem:[#allocation14 + $0xef0] sm:$0xff]  ;;  %v4997_v31 = vld [vmem:[#allocation14 + $0xf28] sm:$0xff]  ;;  %v5003_v26 = vld [vmem:[#allocation14 + $0xf58] sm:$0xff] }
 0x79a   :  { %8820 = vmatpush1.bf16.msra.mxu0 %v8819_v24  ;;  %v4907_v24 = vld [vmem:[#allocation14 + $0xc58] sm:$0xff] }
 0x79b   :  { %8822 = vmatprep.subr.bf16.mxu0 %v8821_v63  ;;  %v8855_v63 = vpack.c.bf16 %v4894_v1, %v4888_v8  ;;  %v8857_v15 = vpack.c.bf16 %v4907_v24, %v4901_v6  ;;  %v5002_v8 = vld [vmem:[#allocation14 + $0xf50] sm:$0xff]  ;;  %v5009_v1 = vld [vmem:[#allocation14 + $0xf88] sm:$0xff]  ;;  %v5015_v6 = vld [vmem:[#allocation14 + $0xfb8] sm:$0xff] }
 0x79e   :  { %8824 = vmatpush1.bf16.msra.mxu0 %v8823_v39  ;;  %v4919_v39 = vld [vmem:[#allocation14 + $0xcb8] sm:$0xff] }
 0x79f   :  { %8826 = vmatprep.subr.bf16.mxu0 %v8825_v40  ;;  %v8859_v40 = vpack.c.bf16 %v4906_v51, %v4900_v50  ;;  %v8861_v42 = vpack.c.bf16 %v4919_v39, %v4913_v28  ;;  %v5014_v50 = vld [vmem:[#allocation14 + $0xfb0] sm:$0xff]  ;;  %v5021_v51 = vld [vmem:[#allocation14 + $0xfe8] sm:$0xff]  ;;  %v5027_v28 = vld [vmem:[#allocation14 + $0x1018] sm:$0xff] }
 0x7a2   :  { %8828 = vmatpush1.bf16.msra.mxu0 %v8827_v45  ;;  %v4931_v45 = vld [vmem:[#allocation14 + $0xd18] sm:$0xff] }
 0x7a3   :  { %8830 = vmatprep.subr.bf16.mxu0 %v8829_v46  ;;  %v8863_v46 = vpack.c.bf16 %v4918_v27, %v4912_v7  ;;  %v8865_v47 = vpack.c.bf16 %v4931_v45, %v4925_v44  ;;  %v5026_v7 = vld [vmem:[#allocation14 + $0x1010] sm:$0xff]  ;;  %v5033_v27 = vld [vmem:[#allocation14 + $0x1048] sm:$0xff]  ;;  %v5039_v44 = vld [vmem:[#allocation14 + $0x1078] sm:$0xff] }
 0x7a6   :  { %8832 = vmatpush1.bf16.msra.mxu0 %v8831_v52  ;;  %v4943_v52 = vld [vmem:[#allocation14 + $0xd78] sm:$0xff] }
 0x7a7   :  { %8834 = vmatprep.subr.bf16.mxu0 %v8833_v53  ;;  %v8867_v53 = vpack.c.bf16 %v4930_v23, %v4924_v48  ;;  %v8869_v54 = vpack.c.bf16 %v4943_v52, %v4937_v49  ;;  %v5038_v48 = vld [vmem:[#allocation14 + $0x1070] sm:$0xff]  ;;  %v5045_v23 = vld [vmem:[#allocation14 + $0x10a8] sm:$0xff]  ;;  %v5051_v49 = vld [vmem:[#allocation14 + $0x10d8] sm:$0xff] }
 0x7aa   :  { %8836 = vmatpush1.bf16.msra.mxu0 %v8835_v55  ;;  %v4955_v55 = vld [vmem:[#allocation14 + $0xdd8] sm:$0xff] }
 0x7ab   :  { %8838 = vmatprep.subr.bf16.mxu0 %v8837_v60  ;;  %v8873_v60 = vpack.c.bf16 %v4955_v55, %v4949_v58  ;;  %v5063_v58 = vld [vmem:[#allocation14 + $0x1138] sm:$0xff] }
 0x7ae   :  { %8840 = vmatpush1.bf16.msra.mxu0 %v8839_v62  ;;  %v8877_v62 = vpack.c.bf16 %v4967_v22, %v4961_v61  ;;  %v5075_v61 = vld [vmem:[#allocation14 + $0x1198] sm:$0xff] }
 0x7af   :  { %8842 = vmatprep.subr.bf16.mxu0 %v8841_v43  ;;  %v4960_v43 = vld [vmem:[#allocation14 + $0xe00] sm:$0xff] }
 0x7b0   :  { %v8879_v25 = vpack.c.bf16 %v4966_v11, %v4960_v43  ;;  %v5074_v43 = vld [vmem:[#allocation14 + $0x1190] sm:$0xff]  ;;  %v5081_v11 = vld [vmem:[#allocation14 + $0x11c8] sm:$0xff] }
 0x7b2   :  { %8844 = vmatpush1.bf16.msra.mxu0 %v8843_v5  ;;  %v8881_v5 = vpack.c.bf16 %v4979_v4, %v4973_v3  ;;  %v5087_v3 = vld [vmem:[#allocation14 + $0x11f8] sm:$0xff] }
 0x7b3   :  { %8846 = vmatprep.subr.bf16.mxu0 %v8845_v29  ;;  %v4972_v29 = vld [vmem:[#allocation14 + $0xe60] sm:$0xff] }
 0x7b4   :  { %v8883_v18 = vpack.c.bf16 %v4978_v13, %v4972_v29  ;;  %v5086_v29 = vld [vmem:[#allocation14 + $0x11f0] sm:$0xff]  ;;  %v5093_v13 = vld [vmem:[#allocation14 + $0x1228] sm:$0xff] }
 0x7b6   :  { %8848 = vmatpush1.bf16.msra.mxu0 %v8847_v17  ;;  %v8885_v17 = vpack.c.bf16 %v4991_v56, %v4985_v12  ;;  %v5099_v12 = vld [vmem:[#allocation14 + $0x1258] sm:$0xff] }
 0x7b7   :  { %8850 = vmatprep.subr.bf16.mxu0 %v8849_v19  ;;  %v4984_v19 = vld [vmem:[#allocation14 + $0xec0] sm:$0xff] }
 0x7b8   :  { %v8887_v32 = vpack.c.bf16 %v4990_v21, %v4984_v19  ;;  %v5098_v19 = vld [vmem:[#allocation14 + $0x1250] sm:$0xff]  ;;  %v5105_v21 = vld [vmem:[#allocation14 + $0x1288] sm:$0xff] }
 0x7ba   :  { %8852 = vmatpush1.bf16.msra.mxu0 %v8851_v2  ;;  %v8889_v2 = vpack.c.bf16 %v5003_v26, %v4997_v31  ;;  %v5111_v31 = vld [vmem:[#allocation14 + $0x12b8] sm:$0xff] }
 0x7bb   :  { %8854 = vmatprep.subr.bf16.mxu0 %v8853_v0  ;;  %v4996_v0 = vld [vmem:[#allocation14 + $0xf20] sm:$0xff] }
 0x7bc   :  { %v8891_v24 = vpack.c.bf16 %v5002_v8, %v4996_v0  ;;  %v5110_v0 = vld [vmem:[#allocation14 + $0x12b0] sm:$0xff]  ;;  %v5117_v8 = vld [vmem:[#allocation14 + $0x12e8] sm:$0xff] }
 0x7be   :  { %8856 = vmatpush1.bf16.msra.mxu0 %v8855_v63  ;;  %v8893_v63 = vpack.c.bf16 %v5015_v6, %v5009_v1  ;;  %v5123_v1 = vld [vmem:[#allocation14 + $0x1318] sm:$0xff] }
 0x7bf   :  { %8858 = vmatprep.subr.bf16.mxu0 %v8857_v15  ;;  %v5008_v15 = vld [vmem:[#allocation14 + $0xf80] sm:$0xff] }
 0x7c0   :  { %v8895_v39 = vpack.c.bf16 %v5014_v50, %v5008_v15  ;;  %v5122_v15 = vld [vmem:[#allocation14 + $0x1310] sm:$0xff]  ;;  %v5129_v50 = vld [vmem:[#allocation14 + $0x1348] sm:$0xff] }
 0x7c1   :  { %5920 = vmatmul.mubr.f32.vlgmr.msra.gmra.mrb[24].mxu0 %v9717_v16  ;;  %v8871_v16 = vpack.c.bf16 %v4942_v59, %v4936_v57  ;;  %v5050_v57 = vld [vmem:[#allocation14 + $0x10d0] sm:$0xff]  ;;  %v5057_v59 = vld [vmem:[#allocation14 + $0x1108] sm:$0xff] }
 0x7c2   :  { %8860 = vmatpush1.bf16.msra.mxu0 %v8859_v40  ;;  %5990 = vmatprep.mubr.f32.mxu0 %v9748_v33  ;;  %v4948_v33 = vld [vmem:[#allocation14 + $0xda0] sm:$0xff]  ;;  %v8897_v40 = vpack.c.bf16 %v5027_v28, %v5021_v51  ;;  %v5135_v51 = vld [vmem:[#allocation14 + $0x1378] sm:$0xff] }
 0x7c3   :  { %8862 = vmatprep.subr.bf16.mxu0 %v8861_v42  ;;  %v8875_v10 = vpack.c.bf16 %v4954_v20, %v4948_v33  ;;  %v5020_v42 = vld [vmem:[#allocation14 + $0xfe0] sm:$0xff]  ;;  %v5062_v33 = vld [vmem:[#allocation14 + $0x1130] sm:$0xff]  ;;  %v5069_v20 = vld [vmem:[#allocation14 + $0x1168] sm:$0xff] }
 0x7c4   :  { %v8899_v45 = vpack.c.bf16 %v5026_v7, %v5020_v42  ;;  %v5134_v42 = vld [vmem:[#allocation14 + $0x1370] sm:$0xff]  ;;  %v5141_v7 = vld [vmem:[#allocation14 + $0x13a8] sm:$0xff] }
 0x7c6   :  { %8864 = vmatpush1.bf16.msra.mxu0 %v8863_v46  ;;  %v8901_v46 = vpack.c.bf16 %v5039_v44, %v5033_v27  ;;  %v5147_v27 = vld [vmem:[#allocation14 + $0x13d8] sm:$0xff] }
 0x7c7   :  { %8866 = vmatprep.subr.bf16.mxu0 %v8865_v47  ;;  %v5032_v47 = vld [vmem:[#allocation14 + $0x1040] sm:$0xff]  ;;  %v8937_v44 = vpack.c.bf16 %v5147_v27, %v5141_v7 }
 0x7c8   :  { %v8903_v52 = vpack.c.bf16 %v5038_v48, %v5032_v47  ;;  %v5159_v47 = vld [vmem:[#allocation14 + $0x1438] sm:$0xff] }
 0x7ca   :  { %8868 = vmatpush1.bf16.msra.mxu0 %v8867_v53  ;;  %v8905_v53 = vpack.c.bf16 %v5051_v49, %v5045_v23  ;;  %v5184_v23 = vld [vmem:[#allocation16] sm:$0x3f] }
 0x7cb   :  { %8870 = vmatprep.subr.bf16.mxu0 %v8869_v54  ;;  %v5044_v54 = vld [vmem:[#allocation14 + $0x10a0] sm:$0xff] }
 0x7cc   :  { %v8907_v55 = vpack.c.bf16 %v5050_v57, %v5044_v54  ;;  %v5165_v54 = vld [vmem:[#allocation14 + $0x1468] sm:$0xff]  ;;  %v5171_v57 = vld [vmem:[#allocation14 + $0x1498] sm:$0xff] }
 0x7ce   :  { %8872 = vmatpush1.bf16.msra.mxu0 %v8871_v16  ;;  %v8909_v16 = vpack.c.bf16 %v5063_v58, %v5057_v59  ;;  %v5189_v59 = vrot.slane %v5184_v23, %v9526_v38  ;;  %v5197_v58 = vrot.slane %v5184_v23, %v9555_v36 }
 0x7cf   :  { %8874 = vmatprep.subr.bf16.mxu0 %v8873_v60  ;;  %v5056_v60 = vld [vmem:[#allocation14 + $0x1100] sm:$0xff] }
 0x7d0   :  { %v8911_v22 = vpack.c.bf16 %v5062_v33, %v5056_v60  ;;  %v5201_v60 = vrot.slane %v5184_v23, %v9558_v37  ;;  %v8945_v33 = vpack.c.bf16 %v5171_v57, %v5165_v54  ;;  %v5182_v37 = vld [vmem:[#allocation14 + $0x14f0] sm:$0xff] }
 0x7d2   :  { %8876 = vmatpush1.bf16.msra.mxu0 %v8875_v10  ;;  %v8913_v10 = vpack.c.bf16 %v5075_v61, %v5069_v20  ;;  %v5164_v20 = vld [vmem:[#allocation14 + $0x1460] sm:$0xff]  ;;  %v5170_v61 = vld [vmem:[#allocation14 + $0x1490] sm:$0xff] }
 0x7d3   :  { %8878 = vmatprep.subr.bf16.mxu0 %v8877_v62  ;;  %v5068_v62 = vld [vmem:[#allocation14 + $0x1160] sm:$0xff]  ;;  %v8947_v36 = vpack.c.bf16 %v5170_v61, %v5164_v20 }
 0x7d4   :  { %v8915_v4 = vpack.c.bf16 %v5074_v43, %v5068_v62  ;;  %v5183_v62 = vld [vmem:[#allocation14 + $0x14f8] sm:$0xff] }
 0x7d6   :  { %8880 = vmatpush1.bf16.msra.mxu0 %v8879_v25  ;;  %v8917_v25 = vpack.c.bf16 %v5087_v3, %v5081_v11 }
 0x7d7   :  { %8882 = vmatprep.subr.bf16.mxu0 %v8881_v5  ;;  %v5080_v5 = vld [vmem:[#allocation14 + $0x11c0] sm:$0xff] }
 0x7d8   :  { %v8919_v56 = vpack.c.bf16 %v5086_v29, %v5080_v5  ;;  %v5176_v29 = vld [vmem:[#allocation14 + $0x14c0] sm:$0xff] }
 0x7da   :  { %8884 = vmatpush1.bf16.msra.mxu0 %v8883_v18  ;;  %v8921_v18 = vpack.c.bf16 %v5099_v12, %v5093_v13 }
 0x7db   :  { %8886 = vmatprep.subr.bf16.mxu0 %v8885_v17  ;;  %v5092_v17 = vld [vmem:[#allocation14 + $0x1220] sm:$0xff] }
 0x7dc   :  { %v8923_v26 = vpack.c.bf16 %v5098_v19, %v5092_v17  ;;  %v5209_v17 = vrot.slane %v5184_v23, %v9552_v14 }
 0x7de   :  { %8888 = vmatpush1.bf16.msra.mxu0 %v8887_v32  ;;  %v8925_v32 = vpack.c.bf16 %v5111_v31, %v5105_v21 }
 0x7df   :  { %8890 = vmatprep.subr.bf16.mxu0 %v8889_v2  ;;  %v5104_v2 = vld [vmem:[#allocation14 + $0x1280] sm:$0xff] }
 0x7e0   :  { %v8927_v6 = vpack.c.bf16 %v5110_v0, %v5104_v2 }
 0x7e2   :  { %8892 = vmatpush1.bf16.msra.mxu0 %v8891_v24  ;;  %v8929_v24 = vpack.c.bf16 %v5123_v1, %v5117_v8 }
 0x7e3   :  { %8894 = vmatprep.subr.bf16.mxu0 %v8893_v63  ;;  %v5116_v63 = vld [vmem:[#allocation14 + $0x12e0] sm:$0xff] }
 0x7e4   :  { %v8931_v28 = vpack.c.bf16 %v5122_v15, %v5116_v63 }
 0x7e6   :  { %8896 = vmatpush1.bf16.msra.mxu0 %v8895_v39  ;;  %v8933_v39 = vpack.c.bf16 %v5135_v51, %v5129_v50 }
 0x7e7   :  { %8898 = vmatprep.subr.bf16.mxu0 %v8897_v40  ;;  %v5128_v40 = vld [vmem:[#allocation14 + $0x1340] sm:$0xff] }
 0x7ea   :  { %8900 = vmatpush1.bf16.msra.mxu0 %v8899_v45  ;;  %v5140_v45 = vld [vmem:[#allocation14 + $0x13a0] sm:$0xff] }
 0x7eb   :  { %8902 = vmatprep.subr.bf16.mxu0 %v8901_v46  ;;  %v5153_v46 = vld [vmem:[#allocation14 + $0x1408] sm:$0xff] }
 0x7ec   :  { %v8941_v49 = vpack.c.bf16 %v5159_v47, %v5153_v46 }
 0x7ee   :  { %8904 = vmatpush1.bf16.msra.mxu0 %v8903_v52  ;;  %v5152_v52 = vld [vmem:[#allocation14 + $0x1400] sm:$0xff] }
 0x7ef   :  { %8906 = vmatprep.subr.bf16.mxu0 %v8905_v53  ;;  %v5158_v53 = vld [vmem:[#allocation14 + $0x1430] sm:$0xff] }
 0x7f2   :  { %8908 = vmatpush1.bf16.msra.mxu0 %v8907_v55  ;;  %v5193_v55 = vrot.slane %v5184_v23, %v9529_v41 }
 0x7f3   :  { %8910 = vmatprep.subr.bf16.mxu0 %v8909_v16  ;;  %v8943_v16 = vpack.c.bf16 %v5158_v53, %v5152_v52 }
 0x7f6   :  { %8912 = vmatpush1.bf16.msra.mxu0 %v8911_v22 }
 0x7f7   :  { %8914 = vmatprep.subr.bf16.mxu0 %v8913_v10  ;;  %v5177_v10 = vld [vmem:[#allocation14 + $0x14c8] sm:$0xff] }
 0x7f8   :  { %v8949_v41 = vpack.c.bf16 %v5183_v62, %v5177_v10 }
 0x7fa   :  { %8916 = vmatpush1.bf16.msra.mxu0 %v8915_v4 }
 0x7fb   :  { %8918 = vmatprep.subr.bf16.mxu0 %v8917_v25 }
 0x7fe   :  { %8920 = vmatpush1.bf16.msra.mxu0 %v8919_v56  ;;  %v8951_v56 = vpack.c.bf16 %v5182_v37, %v5176_v29 }
 0x7ff   :  { %8922 = vmatprep.subr.bf16.mxu0 %v8921_v18  ;;  %v5205_v18 = vrot.slane %v5184_v23, %v9585_v9 }
 0x801   :  { %5991 = vmatmul.mubr.f32.vlgmr.msra.gmra.mrb[24].mxu0 %v9742_v34  ;;  %v8935_v34 = vpack.c.bf16 %v5134_v42, %v5128_v40 }
 0x802   :  { %8924 = vmatpush1.bf16.msra.mxu0 %v8923_v26  ;;  %6061 = vmatprep.mubr.f32.mxu0 %v9296_v35  ;;  %v5146_v35 = vld [vmem:[#allocation14 + $0x13d0] sm:$0xff] }
 0x803   :  { %8926 = vmatprep.subr.bf16.mxu0 %v8925_v32  ;;  %v8939_v48 = vpack.c.bf16 %v5146_v35, %v5140_v45 }
 0x806   :  { %8928 = vmatpush1.bf16.msra.mxu0 %v8927_v6 }
 0x807   :  { %8930 = vmatprep.subr.bf16.mxu0 %v8929_v24 }
 0x80a   :  { %8932 = vmatpush1.bf16.msra.mxu0 %v8931_v28 }
 0x80b   :  { %8934 = vmatprep.subr.bf16.mxu0 %v8933_v39 }
 0x80e   :  { %8936 = vmatpush1.bf16.msra.mxu0 %v8935_v34 }
 0x80f   :  { %8938 = vmatprep.subr.bf16.mxu0 %v8937_v44 }
 0x812   :  { %8940 = vmatpush1.bf16.msra.mxu0 %v8939_v48 }
 0x813   :  { %8942 = vmatprep.subr.bf16.mxu0 %v8941_v49 }
 0x814   :  { %v5495_v22 = vpop.f32.mrb[22].mxu0 }
 0x815   :  { %v8967_v43 = vadd.f32 %v5495_v22, %v5189_v59  ;;  %v5779_v11 = vpop.f32.mrb[22].mxu1  ;;  %v5497_v3 = vpop.f32.mrb[23].mxu0 }
 0x816   :  { %v8969_v4 = vadd.f32 %v5779_v11, %v5197_v58  ;;  %v8968_v38 = vadd.f32 %v5497_v3, %v5193_v55  ;;  %v5781_v25 = vpop.f32.mrb[23].mxu1  ;;  %8944 = vmatpush1.bf16.msra.mxu0 %v8943_v16 }
 0x817   :  { %v8970_v5 = vadd.f32 %v5781_v25, %v5201_v60  ;;  %8946 = vmatprep.subr.bf16.mxu0 %v8945_v33 }
 0x818   :  { %v6074_v13 = vcombine.low %v8967_v43, %v8968_v38 }
 0x819   :  { %v6075_v12 = vcombine.low %v8969_v4, %v8970_v5 }
 0x81a   :  { %6080 = vst [vmem:[#allocation17] sm:$0xff] %v6074_v13  ;;  %8948 = vmatpush1.bf16.msra.mxu0 %v8947_v36 }
 0x81b   :  { %6081 = vst [vmem:[#allocation17 + $0x8] sm:$0xff] %v6075_v12  ;;  %8950 = vmatprep.subr.bf16.mxu0 %v8949_v41 }
 0x81e   :  { %8952 = vmatpush1.bf16.msra.mxu0 %v8951_v56 }
 0x821   :  { %6062 = vmatmul.mubr.f32.vlgmr.msra.gmra.mrb[24].mxu0 %v9745_v30 }
 0x8f4   :  { %v6063_v19 = vpop.f32.mrb[24].mxu0 }
 0x8f5   :  { %v8971_v21 = vadd.f32 %v6063_v19, %v5205_v18  ;;  %v6065_v31 = vpop.f32.mrb[25].mxu0 }
 0x8f6   :  { %v8972_v26 = vadd.f32 %v6065_v31, %v5209_v17 }
 0x8f8   :  { %v6076_v32 = vcombine.low %v8971_v21, %v8972_v26 }
 0x8fa   :  { %6082 = vst [vmem:[#allocation17 + $0x10] sm:$0xff] %v6076_v32 }
 0x8fb   :  { %9258 = shalt.err (!%p9255_p6)
}
 0x8fc   :  { %s9259_s26 = scalar_lea.hbm %s9805_s10, 384 }
 0x8fd   :  { %p9260_p7 = scmp.ne.s32.totalorder %s9805_s10, %s9259_s26  ;;  %p9263_p8 = scmp.lt.u32.totalorder %s9259_s26, %s9805_s10 }
 0x8ff   :  { %p9265_p9 = pnand %p9263_p8, %p9260_p7 }
 0x901   :  { %9268 = shalt.err (!%p9265_p9)
}
 0x902   :  { %6094 = dma.vmem_to_hbm [thread:$0]  %s6092_s22, 384, %s9805_s10, [#allocation4]  }
 0x903   :  { %9279 = dma.done.wait [#allocation4], 384  }
 0x904   :  { %9280 = vsyncadd [#allocation4], 4294966912 }
 0x905   :  { %6100 = vsyncpa [#allocation3], 1 }
 0x906   :  { %6101 = vsyncpa [#allocation6], 1 }
 0x907   :  { %6102 = vsyncpa [#allocation9], 1 }
 0x908   :  { %6103 = vsyncpa [#allocation12], 1 }
 0x909   :  { %6104 = vsyncpa [#allocation15], 1 }
 0x90a   :  { %6105 = vsyncpa [#allocation4], 1 }

</bundles_post_ra>
